<compile_context>
chip_gen: v7x
topology: tpu7x:2x2x1
jax: 0.10.0
libtpu: 0.0.40
codegen_flags: <defaults>
</compile_context>

<pallas_src>
import numpy as np
import jax
import jax.numpy as jnp
from jax.experimental import pallas as pl
from jax.experimental.pallas import tpu as pltpu

# ---------------------------------------------------------------- configuration
B, S = 2, 64                    # rays x samples-per-ray
N = B * S                       # 128 shading points
P = 128                         # physical particles
TILE_N = 128                    # rows per grid step (== N -> single step)

D_IN = 3
D_OUT = 3
FEATURE_VECTOR_SIZE = 16
NORMAL_SIZE = 3
HIDDEN = [64, 64]

N_FREQ_XYZ = 10                 # Embedding(3, 10) -> 63 dims
N_FREQ_DENS = 4                 # Embedding(1, 4)  -> 9 dims
N_FREQ_DIR = 4                  # Embedding(3, 4)  -> 27 dims

POS_ENC = 2 * 3 * (1 + 2 * N_FREQ_XYZ) + 1 * (1 + 2 * N_FREQ_DENS) - D_IN    # 132
DIR_ENC = 2 * 3 * (1 + 2 * N_FREQ_DIR)                                        # 54
DIMS = [D_IN + FEATURE_VECTOR_SIZE + POS_ENC + DIR_ENC + NORMAL_SIZE] + HIDDEN + [D_OUT]
NUM_LAYERS = len(DIMS)          # 4  -> MLP dims [208, 64, 64, 3]

NN_SEARCH = dict(search_radius_scale=2.0, particle_radius=0.25,
                 fix_radius=True, N_neighbor=P)
RADIUS = NN_SEARCH['search_radius_scale'] * NN_SEARCH['particle_radius']      # 0.5
BIAS = 1.0


# ---------------------------------------------------------------- layer-0 split metadata
def _build_layer0_metadata():
    """Column bookkeeping for splitting W0 into raw / sin / cos slabs.

    Reference (torch) rendering_input column order (208):
      [xyz_emb(hit_pos)=63 | dens_emb=9 | xyz_emb(smoothed)=63 |
       dir_emb(hit_dir)=27 | dir_emb(smoothed_dir)=27 | normals=3 | feature_vectors=16]
    each Embedding block is [v, sin(2^0 v), cos(2^0 v), ..., sin(2^(F-1) v), cos(2^(F-1) v)].
    """
    specs = [(3, N_FREQ_XYZ),    # hit position
             (1, N_FREQ_DENS),   # density
             (3, N_FREQ_XYZ),    # smoothed position
             (3, N_FREQ_DIR),    # hit (ray) direction
             (3, N_FREQ_DIR)]    # smoothed direction
    raw_cols, sin_cols, cos_cols, freqs = [], [], [], []
    offset = 0
    for (c, nf) in specs:
        raw_cols += list(range(offset, offset + c))
        for i in range(nf):
            base = offset + c + 2 * c * i
            sin_cols += list(range(base, base + c))
            cos_cols += list(range(base + c, base + 2 * c))
            freqs += [2.0 ** i] * c
        offset += c * (1 + 2 * nf)
    raw_cols += list(range(offset, offset + NORMAL_SIZE)); offset += NORMAL_SIZE
    raw_cols += list(range(offset, offset + FEATURE_VECTOR_SIZE)); offset += FEATURE_VECTOR_SIZE
    assert offset == DIMS[0]
    return (np.array(raw_cols), np.array(sin_cols), np.array(cos_cols),
            np.array(freqs, np.float32))


RAW_COLS, SIN_COLS, COS_COLS, FREQS = _build_layer0_metadata()
RAW_DIM = len(RAW_COLS)          # 32
ANG_DIM = len(SIN_COLS)          # 88


# ---------------------------------------------------------------- the Pallas kernel
def rendering_kernel(x_ref, hdir_ref, nrm_ref, fv_ref, pT_ref, paug_ref, ro_ref, freq_ref,
                     w0r_ref, w0s_ref, w0c_ref, b0_ref, w1_ref, b1_ref, w2_ref, b2_ref,
                     out_ref):
    x = x_ref[...]                                  # (T, 3)   ray sample (hit) positions
    pT = pT_ref[...]                                # (3, P)   particles, transposed
    paug = paug_ref[...]                            # (P, 4)   [px, py, pz, 1]

    x0, x1, x2 = x[:, 0:1], x[:, 1:2], x[:, 2:3]
    dx = x0 - pT[0:1, :]
    dy = x1 - pT[1:2, :]
    dz = x2 - pT[2:3, :]
    d2 = dx * dx + dy * dy + dz * dz                # (T, P) squared distances

    inv_r = jnp.float32(1.0 / RADIUS)
    d = jnp.sqrt(d2)
    dr = d * inv_r
    # clamp(1 - (d/r)^3, 0) is already 0 outside the radius -> no extra `within` mask.
    w = jnp.maximum(1.0 - dr * dr * dr, 0.0)                       # (T, P) smoothing weights
    within = (d2 < jnp.float32(RADIUS * RADIUS)).astype(jnp.float32)

    # One MXU matmul each replaces five XLU lane reductions:
    #   red_w = [sum(w*px), sum(w*py), sum(w*pz), sum(w)],  red_m[:, 3] = #in-radius particles
    red_w = jnp.dot(w, paug, preferred_element_type=jnp.float32)       # (T, 4)
    red_m = jnp.dot(within, paug, preferred_element_type=jnp.float32)  # (T, 4)
    wsum_in = red_w[:, 3:4]
    cnt = red_m[:, 3:4]

    # ball_query pads the (P - cnt) empty neighbour slots with zero positions: each padded
    # slot sits at distance |x| (weight w_pad) and contributes nothing to the numerator.
    n_pad = jnp.float32(P) - cnt
    x_norm = jnp.sqrt(x0 * x0 + x1 * x1 + x2 * x2)
    xr = x_norm * inv_r
    w_pad = jnp.maximum(1.0 - xr * xr * xr, 0.0)
    density = wsum_in + n_pad * w_pad                                  # weights.sum(-1, keepdim)
    smoothed = red_w[:, 0:3] / (density + 1e-12)                       # (T, 3) weighted_nn

    # get_particles_direction(smoothed, ro)
    ro = ro_ref[...]                                                   # (1, 3)
    sd = smoothed - ro
    sd_n2 = (sd[:, 0:1] * sd[:, 0:1] + sd[:, 1:2] * sd[:, 1:2] + sd[:, 2:3] * sd[:, 2:3])
    sd = sd / jnp.sqrt(sd_n2)

    hd = hdir_ref[...]                                                 # (T, 3) hit (ray) dirs
    nrm = nrm_ref[...]                                                 # (T, 3) normals
    fv = fv_ref[...]                                                   # (T, 16) feature vectors

    # ---- layer 0 on three lane-dense slabs instead of a 208-wide concatenated input
    raw = jnp.concatenate([x, density, smoothed, hd, sd, nrm, fv], axis=-1)     # (T, 32)
    ang = jnp.concatenate([x] * N_FREQ_XYZ + [density] * N_FREQ_DENS +
                          [smoothed] * N_FREQ_XYZ + [hd] * N_FREQ_DIR +
                          [sd] * N_FREQ_DIR, axis=-1)                           # (T, 88)
    ang = ang * freq_ref[...]                       # exact power-of-two frequency scaling
    sin_s = jnp.sin(ang)                            # one EUP slab instead of 24 tiny calls
    cos_s = jnp.cos(ang)

    h = (jnp.dot(raw, w0r_ref[...], preferred_element_type=jnp.float32)
         + jnp.dot(sin_s, w0s_ref[...], preferred_element_type=jnp.float32)
         + jnp.dot(cos_s, w0c_ref[...], preferred_element_type=jnp.float32)
         + b0_ref[...])
    h = jnp.maximum(h, 0.0)
    h = jnp.dot(h, w1_ref[...], preferred_element_type=jnp.float32) + b1_ref[...]
    h = jnp.maximum(h, 0.0)
    h = jnp.dot(h, w2_ref[...], preferred_element_type=jnp.float32) + b2_ref[...]
    out_ref[...] = 1.0 / (1.0 + jnp.exp(-h))        # sigmoid


# ---------------------------------------------------------------- wrapper
def rendering_forward_pallas(x_flat, hdir_flat, normals, feature_vectors, particles, ro,
                             kparams):
    assert N % TILE_N == 0
    pT = particles.T                                                   # (3, P)
    paug = jnp.concatenate([particles, jnp.ones((P, 1), jnp.float32)], axis=1)  # (P, 4)
    (w0r, w0s, w0c, b0, w1, b1, w2, b2, freq_row) = kparams

    row = lambda i: (i, 0)
    const = lambda i: (0, 0)
    in_specs = [
        pl.BlockSpec((TILE_N, 3), row),                        # x
        pl.BlockSpec((TILE_N, 3), row),                        # hit dirs (expanded)
        pl.BlockSpec((TILE_N, NORMAL_SIZE), row),              # normals
        pl.BlockSpec((TILE_N, FEATURE_VECTOR_SIZE), row),      # feature vectors
        pl.BlockSpec((3, P), const),                           # particles^T
        pl.BlockSpec((P, 4), const),                           # [particles | 1]
        pl.BlockSpec((1, 3), const),                           # ro
        pl.BlockSpec((1, ANG_DIM), const),                     # frequency row
        pl.BlockSpec(w0r.shape, const), pl.BlockSpec(w0s.shape, const),
        pl.BlockSpec(w0c.shape, const), pl.BlockSpec(b0.shape, const),
        pl.BlockSpec(w1.shape, const), pl.BlockSpec(b1.shape, const),
        pl.BlockSpec(w2.shape, const), pl.BlockSpec(b2.shape, const),
    ]
    return pl.pallas_call(
        rendering_kernel,
        out_shape=jax.ShapeDtypeStruct((N, D_OUT), jnp.float32),
        grid=(N // TILE_N,),                                   # single step at N=128
        in_specs=in_specs,
        out_specs=pl.BlockSpec((TILE_N, D_OUT), row),
        compiler_params=pltpu.CompilerParams(dimension_semantics=("parallel",)),
    )(x_flat, hdir_flat, normals, feature_vectors, pT, paug, ro, freq_row,
      w0r, w0s, w0c, b0, w1, b1, w2, b2)


# ---------------------------------------------------------------- parameters
def init_params(key):
    """geometric_init=True, bias=1.0; weight_norm is an identity reparam at init.
    Weights stored as (in_dim, out_dim); torch uses (out, in) with y = x W^T + b."""
    params = []
    keys = jax.random.split(key, NUM_LAYERS - 1)
    for l in range(NUM_LAYERS - 1):
        in_dim, out_dim = DIMS[l], DIMS[l + 1]
        if l == NUM_LAYERS - 2:
            w = 1e-4 * jax.random.normal(keys[l], (in_dim, out_dim), jnp.float32)
            b = jnp.full((1, out_dim), -BIAS, jnp.float32)
        else:
            std = np.sqrt(2.0) / np.sqrt(out_dim)
            w = std * jax.random.normal(keys[l], (in_dim, out_dim), jnp.float32)
            b = jnp.zeros((1, out_dim), jnp.float32)
        params.append((w, b))
    return params


def prepare_kernel_params(params):
    """Split W0 (208, 64) into raw / sin / cos blocks matching the kernel's slab layouts."""
    (w0, b0), (w1, b1), (w2, b2) = params
    w0r = w0[np.asarray(RAW_COLS), :]          # (32, 64)
    w0s = w0[np.asarray(SIN_COLS), :]          # (88, 64)
    w0c = w0[np.asarray(COS_COLS), :]          # (88, 64)
    freq_row = jnp.asarray(FREQS)[None, :]     # (1, 88)
    return (w0r, w0s, w0c, b0, w1, b1, w2, b2, freq_row)


# ---------------------------------------------------------------- pure-JAX reference
def reference_forward(points, normals, view_dirs, feature_vectors, particles, rays, ro, params):
    # view_dirs is accepted for signature fidelity; the 'idr' path never concatenates it.
    del view_dirs
    B_, S_, _ = points.shape
    x = points.reshape(-1, 3)

    # ball_query with K == P: every in-radius particle kept, remaining slots padded with zeros
    diff = x[:, None, :] - particles[None, :, :]
    d2 = jnp.sum(diff * diff, -1)
    within = d2 < RADIUS ** 2
    neighbors = jnp.where(within[..., None], particles[None, :, :], 0.0)       # (N, P, 3)

    # smoothing_position (exclude_ray=True)
    dists = jnp.linalg.norm(neighbors - x[:, None, :], axis=-1)                # (N, P)
    weights = jnp.maximum(1.0 - (dists / RADIUS) ** 3, 0.0)
    w_sum = weights.sum(-1, keepdims=True)
    smoothed = (weights[..., None] * neighbors).sum(1) / (w_sum + 1e-12)
    density = w_sum

    hit_dir = jnp.repeat(rays[:, 3:], S_, axis=0)                              # repeat_interleave
    dirs = smoothed - ro
    smoothed_dir = dirs / jnp.linalg.norm(dirs, axis=-1, keepdims=True)

    def emb(v, nf):
        outs = [v]
        for i in range(nf):
            f = 2.0 ** i
            outs += [jnp.sin(f * v), jnp.cos(f * v)]
        return jnp.concatenate(outs, -1)

    rendering_input = jnp.concatenate(
        [emb(x, N_FREQ_XYZ), emb(density, N_FREQ_DENS), emb(smoothed, N_FREQ_XYZ),
         emb(hit_dir, N_FREQ_DIR), emb(smoothed_dir, N_FREQ_DIR),
         normals, feature_vectors], axis=-1)                                   # (N, 208)

    h = rendering_input
    for l, (w, b) in enumerate(params):
        h = jnp.dot(h, w, precision=jax.lax.Precision.HIGHEST) + b
        if l < len(params) - 1:
            h = jnp.maximum(h, 0.0)
    return 1.0 / (1.0 + jnp.exp(-h))


# ---------------------------------------------------------------- main
if __name__ == "__main__":
    key = jax.random.PRNGKey(0)
    k_pts, k_nrm, k_vd, k_fv, k_part, k_rays, k_mlp = jax.random.split(key, 7)

    points = jax.random.uniform(k_pts, (B, S, 3), jnp.float32, -1.0, 1.0)      # ray samples
    normals = jax.random.uniform(k_nrm, (N, NORMAL_SIZE), jnp.float32, -1.0, 1.0)
    view_dirs = jax.random.uniform(k_vd, (N, 3), jnp.float32, -1.0, 1.0)       # unused in 'idr'
    feature_vectors = jax.random.uniform(k_fv, (N, FEATURE_VECTOR_SIZE), jnp.float32, -1.0, 1.0)
    particles = jax.random.uniform(k_part, (P, 3), jnp.float32, -1.0, 1.0)     # physical_particles
    ray_dirs = jax.random.uniform(k_rays, (B, 3), jnp.float32, -1.0, 1.0)
    ray_dirs = ray_dirs / jnp.linalg.norm(ray_dirs, axis=-1, keepdims=True)
    rays = jnp.concatenate([jnp.zeros((B, 3), jnp.float32), ray_dirs], axis=-1)  # (B, 6)
    ro = jnp.array([[0.5, -0.25, 1.5]], jnp.float32)                           # camera origin
    # `indices` is only used when per_image_code=True -> not needed here.

    params = init_params(k_mlp)
    kparams = prepare_kernel_params(params)

    x_flat = points.reshape(-1, 3)
    hdir_flat = jnp.repeat(rays[:, 3:], S, axis=0)                             # (N, 3)

    out = rendering_forward_pallas(x_flat, hdir_flat, normals, feature_vectors,
                                   particles, ro, kparams)
    out = jax.block_until_ready(out)

    ref = reference_forward(points, normals, view_dirs, feature_vectors,
                            particles, rays, ro, params)
    assert out.shape == (N, D_OUT)
    np.testing.assert_allclose(np.asarray(out), np.asarray(ref), rtol=2e-3, atol=2e-3)

    print("KERNEL_OK")
</pallas_src>

<mosaic_0001>
module attributes {stable_mosaic.version = 11 : i64} {
  func.func @rendering_kernel(%arg0: i32, %arg1: memref<128x3xf32, #tpu.memory_space<vmem>>, %arg2: memref<128x3xf32, #tpu.memory_space<vmem>>, %arg3: memref<128x3xf32, #tpu.memory_space<vmem>>, %arg4: memref<128x16xf32, #tpu.memory_space<vmem>>, %arg5: memref<3x128xf32, #tpu.memory_space<vmem>>, %arg6: memref<128x4xf32, #tpu.memory_space<vmem>>, %arg7: memref<1x3xf32, #tpu.memory_space<vmem>>, %arg8: memref<1x88xf32, #tpu.memory_space<vmem>>, %arg9: memref<32x64xf32, #tpu.memory_space<vmem>>, %arg10: memref<88x64xf32, #tpu.memory_space<vmem>>, %arg11: memref<88x64xf32, #tpu.memory_space<vmem>>, %arg12: memref<1x64xf32, #tpu.memory_space<vmem>>, %arg13: memref<64x64xf32, #tpu.memory_space<vmem>>, %arg14: memref<1x64xf32, #tpu.memory_space<vmem>>, %arg15: memref<64x3xf32, #tpu.memory_space<vmem>>, %arg16: memref<1x3xf32, #tpu.memory_space<vmem>>, %arg17: memref<128x3xf32, #tpu.memory_space<vmem>>) attributes {dimension_semantics = [#tpu.dimension_semantics<parallel>], iteration_bounds = array<i64: 1>, scalar_prefetch = 0 : i64, scratch_operands = 0 : i64, tpu.core_type = #tpu.core_type<tc>, window_params = [{transform_indices = @transform_0, window_bounds = array<i64: 128, 3>}, {transform_indices = @transform_1, window_bounds = array<i64: 128, 3>}, {transform_indices = @transform_2, window_bounds = array<i64: 128, 3>}, {transform_indices = @transform_3, window_bounds = array<i64: 128, 16>}, {pipeline_mode = #tpu.pipeline_mode<synchronous>, transform_indices = @transform_4, window_bounds = array<i64: 3, 128>}, {pipeline_mode = #tpu.pipeline_mode<synchronous>, transform_indices = @transform_5, window_bounds = array<i64: 128, 4>}, {pipeline_mode = #tpu.pipeline_mode<synchronous>, transform_indices = @transform_6, window_bounds = array<i64: 1, 3>}, {pipeline_mode = #tpu.pipeline_mode<synchronous>, transform_indices = @transform_7, window_bounds = array<i64: 1, 88>}, {pipeline_mode = #tpu.pipeline_mode<synchronous>, transform_indices = @transform_8, window_bounds = array<i64: 32, 64>}, {pipeline_mode = #tpu.pipeline_mode<synchronous>, transform_indices = @transform_9, window_bounds = array<i64: 88, 64>}, {pipeline_mode = #tpu.pipeline_mode<synchronous>, transform_indices = @transform_10, window_bounds = array<i64: 88, 64>}, {pipeline_mode = #tpu.pipeline_mode<synchronous>, transform_indices = @transform_11, window_bounds = array<i64: 1, 64>}, {pipeline_mode = #tpu.pipeline_mode<synchronous>, transform_indices = @transform_12, window_bounds = array<i64: 64, 64>}, {pipeline_mode = #tpu.pipeline_mode<synchronous>, transform_indices = @transform_13, window_bounds = array<i64: 1, 64>}, {pipeline_mode = #tpu.pipeline_mode<synchronous>, transform_indices = @transform_14, window_bounds = array<i64: 64, 3>}, {pipeline_mode = #tpu.pipeline_mode<synchronous>, transform_indices = @transform_15, window_bounds = array<i64: 1, 3>}, {transform_indices = @transform_16, window_bounds = array<i64: 128, 3>}]} {
    %c0 = arith.constant 0 : index
    %c0_0 = arith.constant 0 : index
    %0 = vector.load %arg1[%c0, %c0_0] : memref<128x3xf32, #tpu.memory_space<vmem>>, vector<128x3xf32>
    %c0_1 = arith.constant 0 : index
    %c0_2 = arith.constant 0 : index
    %1 = vector.load %arg5[%c0_1, %c0_2] : memref<3x128xf32, #tpu.memory_space<vmem>>, vector<3x128xf32>
    %c0_3 = arith.constant 0 : index
    %c0_4 = arith.constant 0 : index
    %2 = vector.load %arg6[%c0_3, %c0_4] : memref<128x4xf32, #tpu.memory_space<vmem>>, vector<128x4xf32>
    %3 = vector.extract_strided_slice %0 {offsets = [0, 0], sizes = [128, 1], strides = [1, 1]} : vector<128x3xf32> to vector<128x1xf32>
    %4 = vector.extract_strided_slice %0 {offsets = [0, 1], sizes = [128, 1], strides = [1, 1]} : vector<128x3xf32> to vector<128x1xf32>
    %5 = vector.extract_strided_slice %0 {offsets = [0, 2], sizes = [128, 1], strides = [1, 1]} : vector<128x3xf32> to vector<128x1xf32>
    %6 = vector.extract_strided_slice %1 {offsets = [0, 0], sizes = [1, 128], strides = [1, 1]} : vector<3x128xf32> to vector<1x128xf32>
    %7 = vector.broadcast %3 : vector<128x1xf32> to vector<128x128xf32>
    %8 = vector.broadcast %6 : vector<1x128xf32> to vector<128x128xf32>
    %9 = arith.subf %7, %8 : vector<128x128xf32>
    %10 = vector.extract_strided_slice %1 {offsets = [1, 0], sizes = [1, 128], strides = [1, 1]} : vector<3x128xf32> to vector<1x128xf32>
    %11 = vector.broadcast %4 : vector<128x1xf32> to vector<128x128xf32>
    %12 = vector.broadcast %10 : vector<1x128xf32> to vector<128x128xf32>
    %13 = arith.subf %11, %12 : vector<128x128xf32>
    %14 = vector.extract_strided_slice %1 {offsets = [2, 0], sizes = [1, 128], strides = [1, 1]} : vector<3x128xf32> to vector<1x128xf32>
    %15 = vector.broadcast %5 : vector<128x1xf32> to vector<128x128xf32>
    %16 = vector.broadcast %14 : vector<1x128xf32> to vector<128x128xf32>
    %17 = arith.subf %15, %16 : vector<128x128xf32>
    %18 = arith.mulf %9, %9 : vector<128x128xf32>
    %19 = arith.mulf %13, %13 : vector<128x128xf32>
    %20 = arith.addf %18, %19 : vector<128x128xf32>
    %21 = arith.mulf %17, %17 : vector<128x128xf32>
    %22 = arith.addf %20, %21 : vector<128x128xf32>
    %23 = math.sqrt %22 : vector<128x128xf32>
    %cst = arith.constant 2.000000e+00 : f32
    %24 = vector.broadcast %cst : f32 to vector<128x128xf32>
    %25 = arith.mulf %23, %24 : vector<128x128xf32>
    %26 = arith.mulf %25, %25 : vector<128x128xf32>
    %27 = arith.mulf %26, %25 : vector<128x128xf32>
    %cst_5 = arith.constant 1.000000e+00 : f32
    %28 = vector.broadcast %cst_5 : f32 to vector<128x128xf32>
    %29 = arith.subf %28, %27 : vector<128x128xf32>
    %cst_6 = arith.constant 0.000000e+00 : f32
    %30 = vector.broadcast %cst_6 : f32 to vector<128x128xf32>
    %31 = arith.maximumf %29, %30 : vector<128x128xf32>
    %cst_7 = arith.constant 2.500000e-01 : f32
    %32 = vector.broadcast %cst_7 : f32 to vector<128x128xf32>
    %33 = arith.cmpf olt, %22, %32 : vector<128x128xf32>
    %34 = arith.extui %33 : vector<128x128xi1> to vector<128x128xi32>
    %35 = arith.sitofp %34 : vector<128x128xi32> to vector<128x128xf32>
    %cst_8 = arith.constant dense<0.000000e+00> : vector<128x4xf32>
    %36 = tpu.matmul %31, %2, %cst_8 {dimension_numbers = #tpu.dot_dimension_numbers<[1], [0], [0], [1], [0, 0, 1, 1], [], []>} : vector<128x128xf32>, vector<128x4xf32>, vector<128x4xf32> -> vector<128x4xf32>
    %cst_9 = arith.constant dense<0.000000e+00> : vector<128x4xf32>
    %37 = tpu.matmul %35, %2, %cst_9 {dimension_numbers = #tpu.dot_dimension_numbers<[1], [0], [0], [1], [0, 0, 1, 1], [], []>} : vector<128x128xf32>, vector<128x4xf32>, vector<128x4xf32> -> vector<128x4xf32>
    %38 = vector.extract_strided_slice %36 {offsets = [0, 3], sizes = [128, 1], strides = [1, 1]} : vector<128x4xf32> to vector<128x1xf32>
    %39 = vector.extract_strided_slice %37 {offsets = [0, 3], sizes = [128, 1], strides = [1, 1]} : vector<128x4xf32> to vector<128x1xf32>
    %cst_10 = arith.constant 1.280000e+02 : f32
    %40 = vector.broadcast %cst_10 : f32 to vector<128x1xf32>
    %41 = arith.subf %40, %39 : vector<128x1xf32>
    %42 = arith.mulf %3, %3 : vector<128x1xf32>
    %43 = arith.mulf %4, %4 : vector<128x1xf32>
    %44 = arith.addf %42, %43 : vector<128x1xf32>
    %45 = arith.mulf %5, %5 : vector<128x1xf32>
    %46 = arith.addf %44, %45 : vector<128x1xf32>
    %47 = math.sqrt %46 : vector<128x1xf32>
    %cst_11 = arith.constant 2.000000e+00 : f32
    %48 = vector.broadcast %cst_11 : f32 to vector<128x1xf32>
    %49 = arith.mulf %47, %48 : vector<128x1xf32>
    %50 = arith.mulf %49, %49 : vector<128x1xf32>
    %51 = arith.mulf %50, %49 : vector<128x1xf32>
    %cst_12 = arith.constant 1.000000e+00 : f32
    %52 = vector.broadcast %cst_12 : f32 to vector<128x1xf32>
    %53 = arith.subf %52, %51 : vector<128x1xf32>
    %cst_13 = arith.constant 0.000000e+00 : f32
    %54 = vector.broadcast %cst_13 : f32 to vector<128x1xf32>
    %55 = arith.maximumf %53, %54 : vector<128x1xf32>
    %56 = arith.mulf %41, %55 : vector<128x1xf32>
    %57 = arith.addf %38, %56 : vector<128x1xf32>
    %58 = vector.extract_strided_slice %36 {offsets = [0, 0], sizes = [128, 3], strides = [1, 1]} : vector<128x4xf32> to vector<128x3xf32>
    %cst_14 = arith.constant 9.99999996E-13 : f32
    %59 = vector.broadcast %cst_14 : f32 to vector<128x1xf32>
    %60 = arith.addf %57, %59 : vector<128x1xf32>
    %61 = vector.broadcast %60 : vector<128x1xf32> to vector<128x3xf32>
    %62 = arith.divf %58, %61 : vector<128x3xf32>
    %c0_15 = arith.constant 0 : index
    %c0_16 = arith.constant 0 : index
    %63 = vector.load %arg7[%c0_15, %c0_16] : memref<1x3xf32, #tpu.memory_space<vmem>>, vector<1x3xf32>
    %64 = vector.broadcast %63 : vector<1x3xf32> to vector<128x3xf32>
    %65 = arith.subf %62, %64 : vector<128x3xf32>
    %66 = vector.extract_strided_slice %65 {offsets = [0, 0], sizes = [128, 1], strides = [1, 1]} : vector<128x3xf32> to vector<128x1xf32>
    %67 = vector.extract_strided_slice %65 {offsets = [0, 0], sizes = [128, 1], strides = [1, 1]} : vector<128x3xf32> to vector<128x1xf32>
    %68 = arith.mulf %66, %67 : vector<128x1xf32>
    %69 = vector.extract_strided_slice %65 {offsets = [0, 1], sizes = [128, 1], strides = [1, 1]} : vector<128x3xf32> to vector<128x1xf32>
    %70 = vector.extract_strided_slice %65 {offsets = [0, 1], sizes = [128, 1], strides = [1, 1]} : vector<128x3xf32> to vector<128x1xf32>
    %71 = arith.mulf %69, %70 : vector<128x1xf32>
    %72 = arith.addf %68, %71 : vector<128x1xf32>
    %73 = vector.extract_strided_slice %65 {offsets = [0, 2], sizes = [128, 1], strides = [1, 1]} : vector<128x3xf32> to vector<128x1xf32>
    %74 = vector.extract_strided_slice %65 {offsets = [0, 2], sizes = [128, 1], strides = [1, 1]} : vector<128x3xf32> to vector<128x1xf32>
    %75 = arith.mulf %73, %74 : vector<128x1xf32>
    %76 = arith.addf %72, %75 : vector<128x1xf32>
    %77 = math.sqrt %76 : vector<128x1xf32>
    %78 = vector.broadcast %77 : vector<128x1xf32> to vector<128x3xf32>
    %79 = arith.divf %65, %78 : vector<128x3xf32>
    %c0_17 = arith.constant 0 : index
    %c0_18 = arith.constant 0 : index
    %80 = vector.load %arg2[%c0_17, %c0_18] : memref<128x3xf32, #tpu.memory_space<vmem>>, vector<128x3xf32>
    %c0_19 = arith.constant 0 : index
    %c0_20 = arith.constant 0 : index
    %81 = vector.load %arg3[%c0_19, %c0_20] : memref<128x3xf32, #tpu.memory_space<vmem>>, vector<128x3xf32>
    %c0_21 = arith.constant 0 : index
    %c0_22 = arith.constant 0 : index
    %82 = vector.load %arg4[%c0_21, %c0_22] : memref<128x16xf32, #tpu.memory_space<vmem>>, vector<128x16xf32>
    %83 = tpu.concatenate %0, %57, %62, %80, %79, %81, %82 in 1 : vector<128x3xf32>, vector<128x1xf32>, vector<128x3xf32>, vector<128x3xf32>, vector<128x3xf32>, vector<128x3xf32>, vector<128x16xf32> -> vector<128x32xf32>
    %84 = tpu.concatenate %0, %0, %0, %0, %0, %0, %0, %0, %0, %0, %57, %57, %57, %57, %62, %62 in 1 : vector<128x3xf32>, vector<128x3xf32>, vector<128x3xf32>, vector<128x3xf32>, vector<128x3xf32>, vector<128x3xf32>, vector<128x3xf32>, vector<128x3xf32>, vector<128x3xf32>, vector<128x3xf32>, vector<128x1xf32>, vector<128x1xf32>, vector<128x1xf32>, vector<128x1xf32>, vector<128x3xf32>, vector<128x3xf32> -> vector<128x40xf32>
    %85 = tpu.concatenate %62, %62, %62, %62, %62, %62, %62, %62, %80, %80, %80, %80, %79, %79, %79, %79 in 1 : vector<128x3xf32>, vector<128x3xf32>, vector<128x3xf32>, vector<128x3xf32>, vector<128x3xf32>, vector<128x3xf32>, vector<128x3xf32>, vector<128x3xf32>, vector<128x3xf32>, vector<128x3xf32>, vector<128x3xf32>, vector<128x3xf32>, vector<128x3xf32>, vector<128x3xf32>, vector<128x3xf32>, vector<128x3xf32> -> vector<128x48xf32>
    %86 = tpu.concatenate %84, %85 in 1 : vector<128x40xf32>, vector<128x48xf32> -> vector<128x88xf32>
    %c0_23 = arith.constant 0 : index
    %c0_24 = arith.constant 0 : index
    %87 = vector.load %arg8[%c0_23, %c0_24] : memref<1x88xf32, #tpu.memory_space<vmem>>, vector<1x88xf32>
    %88 = vector.broadcast %87 : vector<1x88xf32> to vector<128x88xf32>
    %89 = arith.mulf %86, %88 : vector<128x88xf32>
    %90 = math.sin %89 : vector<128x88xf32>
    %91 = math.cos %89 : vector<128x88xf32>
    %c0_25 = arith.constant 0 : index
    %c0_26 = arith.constant 0 : index
    %92 = vector.load %arg9[%c0_25, %c0_26] : memref<32x64xf32, #tpu.memory_space<vmem>>, vector<32x64xf32>
    %cst_27 = arith.constant dense<0.000000e+00> : vector<128x64xf32>
    %93 = tpu.matmul %83, %92, %cst_27 {dimension_numbers = #tpu.dot_dimension_numbers<[1], [0], [0], [1], [0, 0, 1, 1], [], []>} : vector<128x32xf32>, vector<32x64xf32>, vector<128x64xf32> -> vector<128x64xf32>
    %c0_28 = arith.constant 0 : index
    %c0_29 = arith.constant 0 : index
    %94 = vector.load %arg10[%c0_28, %c0_29] : memref<88x64xf32, #tpu.memory_space<vmem>>, vector<88x64xf32>
    %cst_30 = arith.constant dense<0.000000e+00> : vector<128x64xf32>
    %95 = tpu.matmul %90, %94, %cst_30 {dimension_numbers = #tpu.dot_dimension_numbers<[1], [0], [0], [1], [0, 0, 1, 1], [], []>} : vector<128x88xf32>, vector<88x64xf32>, vector<128x64xf32> -> vector<128x64xf32>
    %96 = arith.addf %93, %95 : vector<128x64xf32>
    %c0_31 = arith.constant 0 : index
    %c0_32 = arith.constant 0 : index
    %97 = vector.load %arg11[%c0_31, %c0_32] : memref<88x64xf32, #tpu.memory_space<vmem>>, vector<88x64xf32>
    %cst_33 = arith.constant dense<0.000000e+00> : vector<128x64xf32>
    %98 = tpu.matmul %91, %97, %cst_33 {dimension_numbers = #tpu.dot_dimension_numbers<[1], [0], [0], [1], [0, 0, 1, 1], [], []>} : vector<128x88xf32>, vector<88x64xf32>, vector<128x64xf32> -> vector<128x64xf32>
    %99 = arith.addf %96, %98 : vector<128x64xf32>
    %c0_34 = arith.constant 0 : index
    %c0_35 = arith.constant 0 : index
    %100 = vector.load %arg12[%c0_34, %c0_35] : memref<1x64xf32, #tpu.memory_space<vmem>>, vector<1x64xf32>
    %101 = vector.broadcast %100 : vector<1x64xf32> to vector<128x64xf32>
    %102 = arith.addf %99, %101 : vector<128x64xf32>
    %cst_36 = arith.constant 0.000000e+00 : f32
    %103 = vector.broadcast %cst_36 : f32 to vector<128x64xf32>
    %104 = arith.maximumf %102, %103 : vector<128x64xf32>
    %c0_37 = arith.constant 0 : index
    %c0_38 = arith.constant 0 : index
    %105 = vector.load %arg13[%c0_37, %c0_38] : memref<64x64xf32, #tpu.memory_space<vmem>>, vector<64x64xf32>
    %cst_39 = arith.constant dense<0.000000e+00> : vector<128x64xf32>
    %106 = tpu.matmul %104, %105, %cst_39 {dimension_numbers = #tpu.dot_dimension_numbers<[1], [0], [0], [1], [0, 0, 1, 1], [], []>} : vector<128x64xf32>, vector<64x64xf32>, vector<128x64xf32> -> vector<128x64xf32>
    %c0_40 = arith.constant 0 : index
    %c0_41 = arith.constant 0 : index
    %107 = vector.load %arg14[%c0_40, %c0_41] : memref<1x64xf32, #tpu.memory_space<vmem>>, vector<1x64xf32>
    %108 = vector.broadcast %107 : vector<1x64xf32> to vector<128x64xf32>
    %109 = arith.addf %106, %108 : vector<128x64xf32>
    %cst_42 = arith.constant 0.000000e+00 : f32
    %110 = vector.broadcast %cst_42 : f32 to vector<128x64xf32>
    %111 = arith.maximumf %109, %110 : vector<128x64xf32>
    %c0_43 = arith.constant 0 : index
    %c0_44 = arith.constant 0 : index
    %112 = vector.load %arg15[%c0_43, %c0_44] : memref<64x3xf32, #tpu.memory_space<vmem>>, vector<64x3xf32>
    %cst_45 = arith.constant dense<0.000000e+00> : vector<128x3xf32>
    %113 = tpu.matmul %111, %112, %cst_45 {dimension_numbers = #tpu.dot_dimension_numbers<[1], [0], [0], [1], [0, 0, 1, 1], [], []>} : vector<128x64xf32>, vector<64x3xf32>, vector<128x3xf32> -> vector<128x3xf32>
    %c0_46 = arith.constant 0 : index
    %c0_47 = arith.constant 0 : index
    %114 = vector.load %arg16[%c0_46, %c0_47] : memref<1x3xf32, #tpu.memory_space<vmem>>, vector<1x3xf32>
    %115 = vector.broadcast %114 : vector<1x3xf32> to vector<128x3xf32>
    %116 = arith.addf %113, %115 : vector<128x3xf32>
    %cst_48 = arith.constant 0.000000e+00 : f32
    %117 = vector.broadcast %cst_48 : f32 to vector<128x3xf32>
    %118 = arith.subf %117, %116 : vector<128x3xf32>
    %119 = math.exp %118 : vector<128x3xf32>
    %cst_49 = arith.constant 1.000000e+00 : f32
    %120 = vector.broadcast %cst_49 : f32 to vector<128x3xf32>
    %121 = arith.addf %120, %119 : vector<128x3xf32>
    %cst_50 = arith.constant 1.000000e+00 : f32
    %122 = vector.broadcast %cst_50 : f32 to vector<128x3xf32>
    %123 = arith.divf %122, %121 : vector<128x3xf32>
    %c0_51 = arith.constant 0 : index
    %c0_52 = arith.constant 0 : index
    %124 = vector.load %arg17[%c0_51, %c0_52] : memref<128x3xf32, #tpu.memory_space<vmem>>, vector<128x3xf32>
    tpu.vector_store %arg17[%c0_51, %c0_52], %123 {strides = array<i32>} : memref<128x3xf32, #tpu.memory_space<vmem>>, vector<128x3xf32>,
    return
  }
  func.func @transform_0(%arg0: i32) -> (i32, i32) {
    %c0_i32 = arith.constant 0 : i32
    %c0_i32_0 = arith.constant 0 : i32
    return %arg0, %c0_i32 : i32, i32
  }
  func.func @transform_1(%arg0: i32) -> (i32, i32) {
    %c0_i32 = arith.constant 0 : i32
    %c0_i32_0 = arith.constant 0 : i32
    return %arg0, %c0_i32 : i32, i32
  }
  func.func @transform_2(%arg0: i32) -> (i32, i32) {
    %c0_i32 = arith.constant 0 : i32
    %c0_i32_0 = arith.constant 0 : i32
    return %arg0, %c0_i32 : i32, i32
  }
  func.func @transform_3(%arg0: i32) -> (i32, i32) {
    %c0_i32 = arith.constant 0 : i32
    %c0_i32_0 = arith.constant 0 : i32
    return %arg0, %c0_i32 : i32, i32
  }
  func.func @transform_4(%arg0: i32) -> (i32, i32) {
    %c0_i32 = arith.constant 0 : i32
    %c0_i32_0 = arith.constant 0 : i32
    %c0_i32_1 = arith.constant 0 : i32
    return %c0_i32, %c0_i32_0 : i32, i32
  }
  func.func @transform_5(%arg0: i32) -> (i32, i32) {
    %c0_i32 = arith.constant 0 : i32
    %c0_i32_0 = arith.constant 0 : i32
    %c0_i32_1 = arith.constant 0 : i32
    return %c0_i32, %c0_i32_0 : i32, i32
  }
  func.func @transform_6(%arg0: i32) -> (i32, i32) {
    %c0_i32 = arith.constant 0 : i32
    %c0_i32_0 = arith.constant 0 : i32
    %c0_i32_1 = arith.constant 0 : i32
    return %c0_i32, %c0_i32_0 : i32, i32
  }
  func.func @transform_7(%arg0: i32) -> (i32, i32) {
    %c0_i32 = arith.constant 0 : i32
    %c0_i32_0 = arith.constant 0 : i32
    %c0_i32_1 = arith.constant 0 : i32
    return %c0_i32, %c0_i32_0 : i32, i32
  }
  func.func @transform_8(%arg0: i32) -> (i32, i32) {
    %c0_i32 = arith.constant 0 : i32
    %c0_i32_0 = arith.constant 0 : i32
    %c0_i32_1 = arith.constant 0 : i32
    return %c0_i32, %c0_i32_0 : i32, i32
  }
  func.func @transform_9(%arg0: i32) -> (i32, i32) {
    %c0_i32 = arith.constant 0 : i32
    %c0_i32_0 = arith.constant 0 : i32
    %c0_i32_1 = arith.constant 0 : i32
    return %c0_i32, %c0_i32_0 : i32, i32
  }
  func.func @transform_10(%arg0: i32) -> (i32, i32) {
    %c0_i32 = arith.constant 0 : i32
    %c0_i32_0 = arith.constant 0 : i32
    %c0_i32_1 = arith.constant 0 : i32
    return %c0_i32, %c0_i32_0 : i32, i32
  }
  func.func @transform_11(%arg0: i32) -> (i32, i32) {
    %c0_i32 = arith.constant 0 : i32
    %c0_i32_0 = arith.constant 0 : i32
    %c0_i32_1 = arith.constant 0 : i32
    return %c0_i32, %c0_i32_0 : i32, i32
  }
  func.func @transform_12(%arg0: i32) -> (i32, i32) {
    %c0_i32 = arith.constant 0 : i32
    %c0_i32_0 = arith.constant 0 : i32
    %c0_i32_1 = arith.constant 0 : i32
    return %c0_i32, %c0_i32_0 : i32, i32
  }
  func.func @transform_13(%arg0: i32) -> (i32, i32) {
    %c0_i32 = arith.constant 0 : i32
    %c0_i32_0 = arith.constant 0 : i32
    %c0_i32_1 = arith.constant 0 : i32
    return %c0_i32, %c0_i32_0 : i32, i32
  }
  func.func @transform_14(%arg0: i32) -> (i32, i32) {
    %c0_i32 = arith.constant 0 : i32
    %c0_i32_0 = arith.constant 0 : i32
    %c0_i32_1 = arith.constant 0 : i32
    return %c0_i32, %c0_i32_0 : i32, i32
  }
  func.func @transform_15(%arg0: i32) -> (i32, i32) {
    %c0_i32 = arith.constant 0 : i32
    %c0_i32_0 = arith.constant 0 : i32
    %c0_i32_1 = arith.constant 0 : i32
    return %c0_i32, %c0_i32_0 : i32, i32
  }
  func.func @transform_16(%arg0: i32) -> (i32, i32) {
    %c0_i32 = arith.constant 0 : i32
    %c0_i32_0 = arith.constant 0 : i32
    return %arg0, %c0_i32 : i32, i32
  }
}

</mosaic_0001>

<bundles_post_ra>
// kernel: tpu_custom_call.1
= control target key start
LH: loop header
LB: loop body
LE: loop exit
PB: predicated region body
PF: predicated region fallthrough
CT: control target
= control target key end

     0   :  { %v17601_v0 = vmov 0   ;;  %v10415_v17 = vmov 1   ;;  %v10416_v36 = vmov 2   ;;  %s10418_s30 = smov 126   ;;  %s10421_s20 = smov 7   ;;  %s17583_s0 = inlined_call_operand.vmem [shape: f32[128,3], index: 0, kind: input, shape index: {}]   ;;  %s17584_s5 = inlined_call_operand.vmem [shape: f32[128,4], index: 5, kind: input, shape index: {}]   ;;  %s17585_s4 = inlined_call_operand.vmem [shape: f32[3,128], index: 4, kind: input, shape index: {}]   ;;  %s17586_s1 = inlined_call_operand.vmem [shape: f32[128,3], index: 1, kind: input, shape index: {}]   ;;  %s17587_s2 = inlined_call_operand.vmem [shape: f32[128,3], index: 2, kind: input, shape index: {}]   ;;  %s17588_s3 = inlined_call_operand.vmem [shape: f32[128,16], index: 3, kind: input, shape index: {}]   ;;  %s17589_s6 = inlined_call_operand.vmem [shape: f32[1,3], index: 6, kind: input, shape index: {}]   ;;  %s17590_s9 = inlined_call_operand.vmem [shape: f32[88,64], index: 9, kind: input, shape index: {}]   ;;  %s17591_s7 = inlined_call_operand.vmem [shape: f32[1,88], index: 7, kind: input, shape index: {}]   ;;  %s17592_s8 = inlined_call_operand.vmem [shape: f32[32,64], index: 8, kind: input, shape index: {}]   ;;  %s17593_s10 = inlined_call_operand.vmem [shape: f32[88,64], index: 10, kind: input, shape index: {}]   ;;  %s17594_s12 = inlined_call_operand.vmem [shape: f32[64,64], index: 12, kind: input, shape index: {}]   ;;  %s17595_s11 = inlined_call_operand.vmem [shape: f32[1,64], index: 11, kind: input, shape index: {}]   ;;  %s17596_s14 = inlined_call_operand.vmem [shape: f32[64,3], index: 14, kind: input, shape index: {}]   ;;  %s17597_s13 = inlined_call_operand.vmem [shape: f32[1,64], index: 13, kind: input, shape index: {}]   ;;  %s17598_s15 = inlined_call_operand.vmem [shape: f32[1,3], index: 15, kind: input, shape index: {}]   ;;  %s17599_s16 = inlined_call_operand.vmem [shape: f32[128,3], index: 16, kind: output, shape index: {}]  }
   0x1   :  { %17757 = sst [smem:[#allocation262_spill]] %s17583_s0  ;;  %10051 = vset.pattern.permute.xlu1 %v17601_v0  ;;  %10050 = vset.pattern.permute.xlu0 %v17601_v0  ;;  %v70_v18 = vld [vmem:[%s17584_s5] sm:$0xff]  ;;  %v71_v19 = vld [vmem:[%s17584_s5 + $0x8] sm:$0xff]  ;;  %v72_v21 = vld [vmem:[%s17584_s5 + $0x10] sm:$0xff]  ;;  %s10423_s24 = smov 13  }
   0x2   :  { %s17758_s23 = sld [smem:[#allocation262_spill]]  ;;  %v9760_v20 = vpack.c.bf16 %v71_v19, %v70_v18  ;;  %v73_v22 = vld [vmem:[%s17584_s5 + $0x18] sm:$0xff]  ;;  %v74_v24 = vld [vmem:[%s17584_s5 + $0x20] sm:$0xff]  ;;  %v75_v25 = vld [vmem:[%s17584_s5 + $0x28] sm:$0xff]  ;;  %s10426_s19 = smov 30  }
   0x3   :  { %v9764_v23 = vpack.c.bf16 %v73_v22, %v72_v21  ;;  %v9768_v26 = vpack.c.bf16 %v75_v25, %v74_v24  ;;  %v76_v27 = vld [vmem:[%s17584_s5 + $0x30] sm:$0xff]  ;;  %v77_v28 = vld [vmem:[%s17584_s5 + $0x38] sm:$0xff]  ;;  %v78_v30 = vld [vmem:[%s17584_s5 + $0x40] sm:$0xff]  ;;  %s17682_s25 = smov 33   ;;  %s10428_s28 = smov 24  }
   0x4   :  { %9793 = vmatprep.subr.bf16.mxu1 %v9760_v20  ;;  %9761 = vmatprep.subr.bf16.mxu0 %v9760_v20  ;;  %v9772_v29 = vpack.c.bf16 %v77_v28, %v76_v27  ;;  %v79_v31 = vld [vmem:[%s17584_s5 + $0x48] sm:$0xff]  ;;  %v80_v33 = vld [vmem:[%s17584_s5 + $0x50] sm:$0xff]  ;;  %v81_v34 = vld [vmem:[%s17584_s5 + $0x58] sm:$0xff]  ;;  %s17678_s29 = smov 12   ;;  %s10431_s0 = smov 15  }
   0x5   :  { %9795 = vmatpush3.bf16.msra.mxu1 %v9760_v20  ;;  %9763 = vmatpush3.bf16.msra.mxu0 %v9760_v20  ;;  %v9776_v32 = vpack.c.bf16 %v79_v31, %v78_v30  ;;  %v9780_v35 = vpack.c.bf16 %v81_v34, %v80_v33  ;;  %v82_v37 = vld [vmem:[%s17584_s5 + $0x60] sm:$0xff]  ;;  %v83_v38 = vld [vmem:[%s17584_s5 + $0x68] sm:$0xff]  ;;  %v84_v40 = vld [vmem:[%s17584_s5 + $0x70] sm:$0xff]  ;;  %s10432_s17 = smov 18   ;;  %s17717_s18 = smov 6  }
   0x6   :  { %9797 = vmatprep.subr.bf16.mxu1 %v9764_v23  ;;  %9765 = vmatprep.subr.bf16.mxu0 %v9764_v23  ;;  %v9784_v39 = vpack.c.bf16 %v83_v38, %v82_v37  ;;  %v85_v41 = vld [vmem:[%s17584_s5 + $0x78] sm:$0xff]  ;;  %s10417_s5 = smov 127   ;;  %v69_v21 = vld [vmem:[%s17585_s4] sm:$0x7]  ;;  %s17715_s4 = smov 3  }
   0x7   :  { %v9788_v42 = vpack.c.bf16 %v85_v41, %v84_v40  ;;  %s17686_s21 = smov 21   ;;  %s17688_s22 = smov 9  }
   0x8   :  { %v10542_v1 = vld [vmem:[%s17758_s23 + $0x10] sm:$0xff]  ;;  %v10547_v2 = vld [vmem:[%s17758_s23] sm:$0xff]  ;;  %v10554_v3 = vld [vmem:[%s17758_s23 + $0x18] sm:$0xff]  ;;  %s10442_s26 = smov 29   ;;  %s17680_s27 = smov 34  }
   0x9   :  { %98 = vperm.xlu1 %10051, %v10542_v1   ;;  %88 = vperm.xlu0 %10050, %v10547_v2   ;;  %v10559_v4 = vld [vmem:[%s17758_s23 + $0x8] sm:$0xff]  ;;  %v10571_v6 = vld [vmem:[%s17758_s23 + $0x20] sm:$0xff]  ;;  %v10578_v7 = vld [vmem:[%s17758_s23 + $0x38] sm:$0xff]  ;;  %v10715_v43 = vmul.f32 %v10547_v2, %v10547_v2  ;;  %v10722_v44 = vmul.f32 %v10542_v1, %v10542_v1  ;;  %v10760_v50 = vmul.f32 %v10554_v3, %v10554_v3 }
   0xa   :  { %v10566_v5 = vld [vmem:[%s17758_s23 + $0x28] sm:$0xff]  ;;  %v10583_v8 = vld [vmem:[%s17758_s23 + $0x30] sm:$0xff]  ;;  %v10595_v10 = vld [vmem:[%s17758_s23 + $0x40] sm:$0xff]  ;;  %9799 = vmatpush3.bf16.msra.mxu1 %v9764_v23  ;;  %9767 = vmatpush3.bf16.msra.mxu0 %v9764_v23  ;;  %v10729_v45 = vmul.f32 %v10571_v6, %v10571_v6  ;;  %v10748_v48 = vmul.f32 %v10559_v4, %v10559_v4  ;;  %v10784_v54 = vmul.f32 %v10578_v7, %v10578_v7 }
   0xb   :  { %v10590_v9 = vld [vmem:[%s17758_s23 + $0x48] sm:$0xff]  ;;  %v10602_v11 = vld [vmem:[%s17758_s23 + $0x58] sm:$0xff]  ;;  %v10607_v12 = vld [vmem:[%s17758_s23 + $0x50] sm:$0xff]  ;;  %9801 = vmatprep.subr.bf16.mxu1 %v9768_v26  ;;  %9769 = vmatprep.subr.bf16.mxu0 %v9768_v26  ;;  %v10736_v46 = vmul.f32 %v10583_v8, %v10583_v8  ;;  %v10743_v47 = vmul.f32 %v10595_v10, %v10595_v10  ;;  %v10772_v52 = vmul.f32 %v10566_v5, %v10566_v5 }
   0xc   :  { %v10614_v13 = vld [vmem:[%s17758_s23 + $0x68] sm:$0xff]  ;;  %v10619_v14 = vld [vmem:[%s17758_s23 + $0x60] sm:$0xff]  ;;  %v10626_v15 = vld [vmem:[%s17758_s23 + $0x78] sm:$0xff]  ;;  %v10754_v49 = vmul.f32 %v10607_v12, %v10607_v12  ;;  %v10792_v55 = vmul.f32 %v10590_v9, %v10590_v9  ;;  %v10800_v56 = vmul.f32 %v10602_v11, %v10602_v11 }
   0xd   :  { %103 = vperm.xlu1 %10051, %v10554_v3   ;;  %93 = vperm.xlu0 %10050, %v10559_v4   ;;  %v10631_v16 = vld [vmem:[%s17758_s23 + $0x70] sm:$0xff]  ;;  %v10766_v51 = vmul.f32 %v10619_v14, %v10619_v14  ;;  %v10808_v59 = vmul.f32 %v10614_v13, %v10614_v13  ;;  %v10816_v62 = vmul.f32 %v10626_v15, %v10626_v15 }
   0xe   :  { %9803 = vmatpush3.bf16.msra.mxu1 %v9768_v26  ;;  %9771 = vmatpush3.bf16.msra.mxu0 %v9768_v26  ;;  %v10778_v53 = vmul.f32 %v10631_v16, %v10631_v16 }
   0xf   :  { %9805 = vmatprep.subr.bf16.mxu1 %v9772_v29  ;;  %9773 = vmatprep.subr.bf16.mxu0 %v9772_v29  ;;  %17759 = vst [vmem:[#allocation2_spill] sm:$0xff] %v10816_v62 }
  0x11   :  { %113 = vperm.xlu1 %10051, %v10566_v5   ;;  %108 = vperm.xlu0 %10050, %v10571_v6  }
  0x12   :  { %9807 = vmatpush3.bf16.msra.mxu1 %v9772_v29  ;;  %9775 = vmatpush3.bf16.msra.mxu0 %v9772_v29 }
  0x13   :  { %9809 = vmatprep.subr.bf16.mxu1 %v9776_v32  ;;  %9777 = vmatprep.subr.bf16.mxu0 %v9776_v32 }
  0x15   :  { %123 = vperm.xlu1 %10051, %v10578_v7   ;;  %118 = vperm.xlu0 %10050, %v10583_v8  }
  0x16   :  { %9811 = vmatpush3.bf16.msra.mxu1 %v9776_v32  ;;  %9779 = vmatpush3.bf16.msra.mxu0 %v9776_v32 }
  0x17   :  { %9813 = vmatprep.subr.bf16.mxu1 %v9780_v35  ;;  %9781 = vmatprep.subr.bf16.mxu0 %v9780_v35 }
  0x19   :  { %133 = vperm.xlu1 %10051, %v10590_v9   ;;  %128 = vperm.xlu0 %10050, %v10595_v10  }
  0x1a   :  { %9815 = vmatpush3.bf16.msra.mxu1 %v9780_v35  ;;  %9783 = vmatpush3.bf16.msra.mxu0 %v9780_v35 }
  0x1b   :  { %9817 = vmatprep.subr.bf16.mxu1 %v9784_v39  ;;  %9785 = vmatprep.subr.bf16.mxu0 %v9784_v39 }
  0x1d   :  { %143 = vperm.xlu1 %10051, %v10602_v11   ;;  %138 = vperm.xlu0 %10050, %v10607_v12  }
  0x1e   :  { %9819 = vmatpush3.bf16.msra.mxu1 %v9784_v39  ;;  %9787 = vmatpush3.bf16.msra.mxu0 %v9784_v39 }
  0x1f   :  { %9821 = vmatprep.subr.bf16.mxu1 %v9788_v42  ;;  %9789 = vmatprep.subr.bf16.mxu0 %v9788_v42 }
  0x21   :  { %153 = vperm.xlu1 %10051, %v10614_v13   ;;  %148 = vperm.xlu0 %10050, %v10619_v14  }
  0x22   :  { %9823 = vmatpush3.bf16.msra.mxu1 %v9788_v42  ;;  %9791 = vmatpush3.bf16.msra.mxu0 %v9788_v42 }
  0x25   :  { %163 = vperm.xlu1 %10051, %v10626_v15   ;;  %158 = vperm.xlu0 %10050, %v10631_v16  }
  0x29   :  { %10053 = vset.pattern.permute.xlu1 %v10415_v17  ;;  %10052 = vset.pattern.permute.xlu0 %v10415_v17 }
  0x2a   :  { %191 = vperm.xlu1 %10053, %v10559_v4   ;;  %187 = vperm.xlu0 %10052, %v10547_v2  }
  0x2e   :  { %195 = vperm.xlu1 %10053, %v10542_v1   ;;  %199 = vperm.xlu0 %10052, %v10554_v3  }
  0x32   :  { %203 = vperm.xlu1 %10053, %v10571_v6   ;;  %207 = vperm.xlu0 %10052, %v10566_v5  }
  0x36   :  { %211 = vperm.xlu1 %10053, %v10583_v8   ;;  %215 = vperm.xlu0 %10052, %v10578_v7  }
  0x3a   :  { %219 = vperm.xlu1 %10053, %v10595_v10   ;;  %223 = vperm.xlu0 %10052, %v10590_v9  }
  0x3e   :  { %227 = vperm.xlu1 %10053, %v10607_v12   ;;  %231 = vperm.xlu0 %10052, %v10602_v11  }
  0x42   :  { %235 = vperm.xlu1 %10053, %v10619_v14   ;;  %239 = vperm.xlu0 %10052, %v10614_v13  }
  0x46   :  { %10054 = vset.pattern.permute.xlu1 %v10416_v36  ;;  %243 = vperm.xlu0 %10052, %v10631_v16  }
  0x47   :  { %271 = vperm.xlu1 %10054, %v10547_v2  }
  0x4a   :  { %10055 = vset.pattern.permute.xlu0 %v10416_v36 }
  0x4b   :  { %279 = vperm.xlu1 %10054, %v10542_v1   ;;  %275 = vperm.xlu0 %10055, %v10559_v4  }
  0x4f   :  { %283 = vperm.xlu1 %10054, %v10554_v3   ;;  %287 = vperm.xlu0 %10055, %v10571_v6  }
  0x53   :  { %291 = vperm.xlu1 %10054, %v10566_v5   ;;  %295 = vperm.xlu0 %10055, %v10583_v8  }
  0x57   :  { %299 = vperm.xlu1 %10054, %v10578_v7   ;;  %307 = vperm.xlu0 %10055, %v10590_v9  }
  0x5b   :  { %10056 = vset.pattern.permute.xlu1 %v10415_v17  ;;  %319 = vperm.xlu0 %10055, %v10619_v14   ;;  %v166_v14 = vlaneseq }
  0x5c   :  { %247 = vperm.xlu1 %10056, %v10626_v15  }
  0x5d   :  { %v167_v17 = vshrl.u32 %v166_v14, 7 }
  0x5f   :  { %327 = vperm.xlu0 %10055, %v10631_v16   ;;  %v168_v20 = vsub.s32 0, %v167_v17  ;;  %v252_v25 = vsub.s32 1, %v167_v17  ;;  %v336_v28 = vsub.s32 2, %v167_v17 }
  0x60   :  { %10057 = vset.pattern.permute.xlu1 %v10416_v36 }
  0x61   :  { %303 = vperm.xlu1 %10057, %v10595_v10   ;;  %v169_v24 = vrot.slane %v69_v21, %v168_v20  ;;  %v10851_v36 = vrot.slane %v69_v21, %v252_v25  ;;  %v10857_v39 = vrot.slane %v69_v21, %v336_v28 }
  0x63   :  { %1012 = vrot.lane.b32.xlu0 %v10715_v43, %s10417_s5 }
  0x65   :  { %311 = vperm.xlu1 %10057, %v10607_v12  }
  0x67   :  { %1016 = vrot.lane.b32.xlu0 %v10722_v44, %s10417_s5 }
  0x69   :  { %315 = vperm.xlu1 %10057, %v10602_v11  }
  0x6b   :  { %1020 = vrot.lane.b32.xlu0 %v10729_v45, %s10417_s5 }
  0x6d   :  { %323 = vperm.xlu1 %10057, %v10614_v13  }
  0x6f   :  { %1024 = vrot.lane.b32.xlu0 %v10736_v46, %s10417_s5 }
  0x71   :  { %331 = vperm.xlu1 %10057, %v10626_v15  }
  0x73   :  { %1028 = vrot.lane.b32.xlu0 %v10743_v47, %s10417_s5 }
  0x75   :  { %1014 = vrot.lane.b32.xlu1 %v10748_v48, %s10417_s5 }
  0x77   :  { %1032 = vrot.lane.b32.xlu0 %v10754_v49, %s10417_s5 }
  0x79   :  { %1018 = vrot.lane.b32.xlu1 %v10760_v50, %s10417_s5 }
  0x7b   :  { %1036 = vrot.lane.b32.xlu0 %v10766_v51, %s10417_s5 }
  0x7d   :  { %1022 = vrot.lane.b32.xlu1 %v10772_v52, %s10417_s5 }
  0x7f   :  { %1040 = vrot.lane.b32.xlu0 %v10778_v53, %s10417_s5 }
  0x81   :  { %1026 = vrot.lane.b32.xlu1 %v10784_v54, %s10417_s5 }
  0x83   :  { %1076 = vrot.lane.b32.xlu0 %v10715_v43, %s10418_s30 }
  0x85   :  { %1030 = vrot.lane.b32.xlu1 %v10792_v55, %s10417_s5 }
  0x87   :  { %1080 = vrot.lane.b32.xlu0 %v10722_v44, %s10418_s30 }
  0x88   :  { %v99_v57 = vpop.permute.xlu1 %98  ;;  %v89_v58 = vpop.permute.xlu0 %88 }
  0x89   :  { %1034 = vrot.lane.b32.xlu1 %v10800_v56, %s10417_s5  ;;  %v172_v29 = vsub.f32 %v99_v57, %v169_v24  ;;  %v170_v30 = vsub.f32 %v89_v58, %v169_v24 }
  0x8b   :  { %1084 = vrot.lane.b32.xlu0 %v10729_v45, %s10418_s30  ;;  %v356_v40 = vmul.f32 %v172_v29, %v172_v29  ;;  %v354_v41 = vmul.f32 %v170_v30, %v170_v30 }
  0x8c   :  { %v104_v60 = vpop.permute.xlu1 %103  ;;  %v94_v61 = vpop.permute.xlu0 %93 }
  0x8d   :  { %1038 = vrot.lane.b32.xlu1 %v10808_v59, %s10417_s5  ;;  %v173_v31 = vsub.f32 %v104_v60, %v169_v24  ;;  %v171_v32 = vsub.f32 %v94_v61, %v169_v24 }
  0x8f   :  { %1088 = vrot.lane.b32.xlu0 %v10736_v46, %s10418_s30  ;;  %v357_v14 = vmul.f32 %v173_v31, %v173_v31  ;;  %v355_v17 = vmul.f32 %v171_v32, %v171_v32 }
  0x90   :  { %v114_v63 = vpop.permute.xlu1 %113  ;;  %v109_v1 = vpop.permute.xlu0 %108 }
  0x91   :  { %1042 = vrot.lane.b32.xlu1 %v10816_v62, %s10417_s5  ;;  %v175_v33 = vsub.f32 %v114_v63, %v169_v24  ;;  %v174_v34 = vsub.f32 %v109_v1, %v169_v24 }
  0x93   :  { %1092 = vrot.lane.b32.xlu0 %v10743_v47, %s10418_s30  ;;  %v359_v57 = vmul.f32 %v175_v33, %v175_v33  ;;  %v358_v60 = vmul.f32 %v174_v34, %v174_v34 }
  0x94   :  { %v124_v2 = vpop.permute.xlu1 %123  ;;  %v119_v3 = vpop.permute.xlu0 %118 }
  0x95   :  { %1078 = vrot.lane.b32.xlu1 %v10748_v48, %s10418_s30  ;;  %v177_v35 = vsub.f32 %v124_v2, %v169_v24  ;;  %v176_v42 = vsub.f32 %v119_v3, %v169_v24 }
  0x97   :  { %1096 = vrot.lane.b32.xlu0 %v10754_v49, %s10418_s30  ;;  %v361_v61 = vmul.f32 %v177_v35, %v177_v35  ;;  %v360_v30 = vmul.f32 %v176_v42, %v176_v42 }
  0x98   :  { %v134_v4 = vpop.permute.xlu1 %133  ;;  %v129_v5 = vpop.permute.xlu0 %128 }
  0x99   :  { %1082 = vrot.lane.b32.xlu1 %v10760_v50, %s10418_s30  ;;  %v179_v58 = vsub.f32 %v134_v4, %v169_v24  ;;  %v178_v63 = vsub.f32 %v129_v5, %v169_v24 }
  0x9b   :  { %1100 = vrot.lane.b32.xlu0 %v10766_v51, %s10418_s30  ;;  %v10865_v32 = vmul.f32 %v179_v58, %v179_v58 }
  0x9c   :  { %v144_v6 = vpop.permute.xlu1 %143  ;;  %v139_v7 = vpop.permute.xlu0 %138 }
  0x9d   :  { %1086 = vrot.lane.b32.xlu1 %v10772_v52, %s10418_s30  ;;  %v181_v2 = vsub.f32 %v144_v6, %v169_v24  ;;  %v180_v3 = vsub.f32 %v139_v7, %v169_v24 }
  0x9f   :  { %1104 = vrot.lane.b32.xlu0 %v10778_v53, %s10418_s30  ;;  %v10868_v35 = vmul.f32 %v181_v2, %v181_v2 }
  0xa0   :  { %v154_v8 = vpop.permute.xlu1 %153  ;;  %v149_v9 = vpop.permute.xlu0 %148 }
  0xa1   :  { %1090 = vrot.lane.b32.xlu1 %v10784_v54, %s10418_s30  ;;  %v183_v5 = vsub.f32 %v154_v8, %v169_v24  ;;  %v182_v33 = vsub.f32 %v149_v9, %v169_v24 }
  0xa3   :  { %v10873_v9 = vmul.f32 %v183_v5, %v183_v5 }
  0xa4   :  { %v164_v10 = vpop.permute.xlu1 %163  ;;  %v159_v11 = vpop.permute.xlu0 %158 }
  0xa5   :  { %1094 = vrot.lane.b32.xlu1 %v10792_v55, %s10418_s30  ;;  %v184_v34 = vsub.f32 %v159_v11, %v169_v24 }
  0xa9   :  { %v192_v12 = vpop.permute.xlu1 %191  ;;  %v188_v13 = vpop.permute.xlu0 %187  ;;  %1098 = vrot.lane.b32.xlu1 %v10800_v56, %s10418_s30 }
  0xaa   :  { %v255_v1 = vsub.f32 %v192_v12, %v10851_v36  ;;  %v254_v20 = vsub.f32 %v188_v13, %v10851_v36  ;;  %v362_v12 = vmul.f32 %v178_v63, %v178_v63  ;;  %v185_v13 = vsub.f32 %v164_v10, %v169_v24 }
  0xab   :  { %v10880_v63 = vmul.f32 %v184_v34, %v184_v34 }
  0xac   :  { %v10878_v24 = vmul.f32 %v185_v13, %v185_v13 }
  0xad   :  { %v196_v15 = vpop.permute.xlu1 %195  ;;  %v200_v16 = vpop.permute.xlu0 %199  ;;  %1102 = vrot.lane.b32.xlu1 %v10808_v59, %s10418_s30 }
  0xae   :  { %v256_v25 = vsub.f32 %v196_v15, %v10851_v36  ;;  %v257_v21 = vsub.f32 %v200_v16, %v10851_v36  ;;  %v371_v15 = vmul.f32 %v255_v1, %v255_v1  ;;  %v370_v16 = vmul.f32 %v254_v20, %v254_v20 }
  0xb0   :  { %v372_v0 = vmul.f32 %v256_v25, %v256_v25  ;;  %v373_v42 = vmul.f32 %v257_v21, %v257_v21  ;;  %v387_v1 = vadd.f32 %v371_v15, %v355_v17  ;;  %v386_v20 = vadd.f32 %v370_v16, %v354_v41 }
  0xb1   :  { %v204_v18 = vpop.permute.xlu1 %203  ;;  %v208_v19 = vpop.permute.xlu0 %207  ;;  %1106 = vrot.lane.b32.xlu1 %v10816_v62, %s10418_s30  ;;  %v10870_v62 = vmul.f32 %v180_v3, %v180_v3 }
  0xb2   :  { %v258_v31 = vsub.f32 %v204_v18, %v10851_v36  ;;  %v259_v4 = vsub.f32 %v208_v19, %v10851_v36  ;;  %v388_v25 = vadd.f32 %v372_v0, %v356_v40  ;;  %v389_v21 = vadd.f32 %v373_v42, %v357_v14 }
  0xb4   :  { %v374_v18 = vmul.f32 %v258_v31, %v258_v31  ;;  %v375_v19 = vmul.f32 %v259_v4, %v259_v4 }
  0xb5   :  { %v212_v22 = vpop.permute.xlu1 %211  ;;  %v216_v23 = vpop.permute.xlu0 %215 }
  0xb6   :  { %v260_v6 = vsub.f32 %v212_v22, %v10851_v36  ;;  %v261_v58 = vsub.f32 %v216_v23, %v10851_v36  ;;  %v10875_v22 = vmul.f32 %v182_v33, %v182_v33  ;;  %v390_v23 = vadd.f32 %v374_v18, %v358_v60 }
  0xb7   :  { %v10883_v31 = vadd.f32 %v375_v19, %v359_v57 }
  0xb8   :  { %v376_v10 = vmul.f32 %v260_v6, %v260_v6  ;;  %v377_v4 = vmul.f32 %v261_v58, %v261_v58 }
  0xb9   :  { %v220_v26 = vpop.permute.xlu1 %219  ;;  %v10849_v27 = vpop.permute.xlu0 %223 }
  0xba   :  { %v262_v2 = vsub.f32 %v220_v26, %v10851_v36  ;;  %v263_v5 = vsub.f32 %v10849_v27, %v10851_v36  ;;  %v392_v13 = vadd.f32 %v376_v10, %v360_v30  ;;  %v10898_v60 = vadd.f32 %v377_v4, %v361_v61 }
  0xbc   :  { %v378_v41 = vmul.f32 %v262_v2, %v262_v2  ;;  %v379_v30 = vmul.f32 %v263_v5, %v263_v5 }
  0xbd   :  { %v10853_v37 = vpop.permute.xlu1 %227  ;;  %v10855_v38 = vpop.permute.xlu0 %231 }
  0xbe   :  { %v264_v0 = vsub.f32 %v10853_v37, %v10851_v36  ;;  %v265_v40 = vsub.f32 %v10855_v38, %v10851_v36  ;;  %v10419_v37 = vmov 1.0   ;;  %v10909_v61 = vadd.f32 %v378_v41, %v362_v12 }
  0xbf   :  { %v10914_v2 = vadd.f32 %v379_v30, %v10865_v32 }
  0xc0   :  { %v380_v58 = vmul.f32 %v264_v0, %v264_v0  ;;  %v381_v10 = vmul.f32 %v265_v40, %v265_v40 }
  0xc1   :  { %v236_v28 = vpop.permute.xlu1 %235  ;;  %v240_v29 = vpop.permute.xlu0 %239 }
  0xc2   :  { %v266_v14 = vsub.f32 %v236_v28, %v10851_v36  ;;  %v267_v34 = vsub.f32 %v240_v29, %v10851_v36  ;;  %v10926_v32 = vadd.f32 %v380_v58, %v10870_v62 }
  0xc4   :  { %v382_v29 = vmul.f32 %v266_v14, %v266_v14 }
  0xc5   :  { %v244_v7 = vpop.permute.xlu0 %243 }
  0xc6   :  { %v272_v8 = vpop.permute.xlu1 %271  ;;  %v268_v15 = vsub.f32 %v244_v7, %v10851_v36 }
  0xc7   :  { %v338_v11 = vsub.f32 %v272_v8, %v10857_v39 }
  0xc9   :  { %v402_v3 = vmul.f32 %v338_v11, %v338_v11 }
  0xca   :  { %v280_v33 = vpop.permute.xlu1 %279  ;;  %v276_v6 = vpop.permute.xlu0 %275 }
  0xcb   :  { %v10887_v8 = vadd.f32 %v402_v3, %v386_v20  ;;  %v340_v17 = vsub.f32 %v280_v33, %v10857_v39  ;;  %v339_v26 = vsub.f32 %v276_v6, %v10857_v39  ;;  %v384_v20 = vmul.f32 %v268_v15, %v268_v15 }
  0xcc   :  { %v10929_v6 = vadd.f32 %v381_v10, %v10868_v35 }
  0xcd   :  { %v404_v57 = vmul.f32 %v340_v17, %v340_v17  ;;  %v403_v27 = vmul.f32 %v339_v26, %v339_v26  ;;  %vm626_vm0 = vcmp.lt.f32.partialorder %v10887_v8, 0.25  ;;  %10062 = vrsqrt.f32 %v10887_v8 }
  0xce   :  { %v284_v16 = vpop.permute.xlu1 %283  ;;  %9532 = vmatprep.mubr.msk.f32.mxu1 %vm626_vm0, %v10419_v37  ;;  %v288_v38 = vpop.permute.xlu0 %287  ;;  %v10932_v17 = vadd.f32 %v382_v29, %v10875_v22  ;;  %v10941_v62 = vadd.f32 %v384_v20, %v10880_v63  ;;  %vm436_vm5 = vcmp.eq.f32.partialorder %v10887_v8, inf  ;;  %vm438_vm6 = vcmp.eq.f32.partialorder %v10887_v8, 0.0 }
  0xcf   :  { %v10903_v42 = vadd.f32 %v404_v57, %v388_v25  ;;  %v10905_v28 = vadd.f32 %v403_v27, %v387_v1  ;;  %v341_v18 = vsub.f32 %v284_v16, %v10857_v39  ;;  %v342_v19 = vsub.f32 %v288_v38, %v10857_v39 }
  0xd0   :  { %v383_v1 = vmul.f32 %v267_v34, %v267_v34  ;;  %v439_v57 = vand.u32 2147483648, %v10887_v8 }
  0xd1   :  { %v405_v11 = vmul.f32 %v341_v18, %v341_v18  ;;  %v406_v7 = vmul.f32 %v342_v19, %v342_v19  ;;  %vm627_vm1 = vcmp.lt.f32.partialorder %v10905_v28, 0.25  ;;  %vm628_vm2 = vcmp.lt.f32.partialorder %v10903_v42, 0.25 }
  0xd2   :  { %v292_v25 = vpop.permute.xlu1 %291  ;;  %9533 = vmatmul.mubr.msk.f32.vlgmr.msra.gmra.mrb[0].mxu1 %vm627_vm1, %v10419_v37  ;;  %v296_v3 = vpop.permute.xlu0 %295  ;;  %10064 = vrsqrt.f32 %v10905_v28  ;;  %v10938_v26 = vadd.f32 %v383_v1, %v10873_v9  ;;  %vm443_vm9 = vcmp.eq.f32.partialorder %v10905_v28, inf  ;;  %vm445_vm10 = vcmp.eq.f32.partialorder %v10905_v28, 0.0 }
  0xd3   :  { %v10918_v12 = vadd.f32 %v405_v11, %v389_v21  ;;  %v10920_v4 = vadd.f32 %v406_v7, %v390_v23  ;;  %v343_v5 = vsub.f32 %v292_v25, %v10857_v39  ;;  %v344_v33 = vsub.f32 %v296_v3, %v10857_v39  ;;  %9535 = vmatprep.mubr.msk.f32.mxu1 %vm628_vm2, %v10419_v37 }
  0xd4   :  { %10066 = vrsqrt.f32 %v10903_v42  ;;  %v446_v30 = vand.u32 2147483648, %v10905_v28  ;;  %vm450_vm11 = vcmp.eq.f32.partialorder %v10903_v42, inf  ;;  %vm452_vm12 = vcmp.eq.f32.partialorder %v10903_v42, 0.0 }
  0xd5   :  { %v407_v21 = vmul.f32 %v343_v5, %v343_v5  ;;  %v408_v23 = vmul.f32 %v344_v33, %v344_v33  ;;  %vm629_vm3 = vcmp.lt.f32.partialorder %v10918_v12, 0.25  ;;  %vm630_vm4 = vcmp.lt.f32.partialorder %v10920_v4, 0.25 }
  0xd6   :  { %v300_v41 = vpop.permute.xlu1 %299  ;;  %9536 = vmatmul.mubr.msk.f32.gmra.mrb[2].mxu1 %vm629_vm3, %v10419_v37  ;;  %v308_v35 = vpop.permute.xlu0 %307  ;;  %10068 = vrsqrt.f32 %v10918_v12  ;;  %v453_v58 = vand.u32 2147483648, %v10903_v42  ;;  %vm457_vm13 = vcmp.eq.f32.partialorder %v10918_v12, inf  ;;  %vm459_vm15 = vcmp.eq.f32.partialorder %v10918_v12, 0.0 }
  0xd7   :  { %v10063_v22 = vpop.eup %10062  ;;  %v10947_v0 = vadd.f32 %v407_v21, %v10883_v31  ;;  %v10949_v40 = vadd.f32 %v408_v23, %v392_v13  ;;  %v345_v9 = vsub.f32 %v300_v41, %v10857_v39  ;;  %v347_v14 = vsub.f32 %v308_v35, %v10857_v39  ;;  %9538 = vmatprep.mubr.msk.f32.mxu1 %vm630_vm4, %v10419_v37 }
  0xd8   :  { %v435_v63 = vmul.f32 %v10063_v22, %v10887_v8  ;;  %10070 = vrsqrt.f32 %v10920_v4  ;;  %v460_v10 = vand.u32 2147483648, %v10918_v12  ;;  %vm464_vm0 = vcmp.eq.f32.partialorder %v10920_v4, inf }
  0xd9   :  { %v409_v27 = vmul.f32 %v345_v9, %v345_v9  ;;  %vm631_vm7 = vcmp.lt.f32.partialorder %v10947_v0, 0.25  ;;  %vm632_vm8 = vcmp.lt.f32.partialorder %v10949_v40, 0.25  ;;  %10072 = vrsqrt.f32 %v10947_v0 }
  0xda   :  { %9539 = vmatmul.mubr.msk.f32.gmra.mrb[4].mxu1 %vm631_vm7, %v10419_v37  ;;  %v320_v31 = vpop.permute.xlu0 %319  ;;  %v437_v13 = vsel %vm436_vm5, %v10887_v8, %v435_v63  ;;  %v411_v15 = vmul.f32 %v347_v14, %v347_v14  ;;  %10074 = vrsqrt.f32 %v10949_v40  ;;  %vm466_vm1 = vcmp.eq.f32.partialorder %v10920_v4, 0.0 }
  0xdb   :  { %v10969_v34 = vadd.f32 %v409_v27, %v10898_v60  ;;  %v248_v16 = vpop.permute.xlu1 %247  ;;  %9541 = vmatprep.mubr.msk.f32.mxu1 %vm632_vm8, %v10419_v37  ;;  %v440_v38 = vsel %vm438_vm6, %v439_v57, %v437_v13  ;;  %v350_v29 = vsub.f32 %v320_v31, %v10857_v39  ;;  %v467_v41 = vand.u32 2147483648, %v10920_v4 }
  0xdc   :  { %v10065_v18 = vpop.eup %10064  ;;  %v546_v19 = vmul.f32 2.0, %v440_v38  ;;  %v10987_v1 = vadd.f32 %v411_v15, %v10914_v2  ;;  %v269_v20 = vsub.f32 %v248_v16, %v10851_v36  ;;  %vm471_vm2 = vcmp.eq.f32.partialorder %v10947_v0, inf }
  0xdd   :  { %vm633_vm14 = vcmp.lt.f32.partialorder %v10969_v34, 0.25  ;;  %v442_v60 = vmul.f32 %v10065_v18, %v10905_v28  ;;  %vm473_vm3 = vcmp.eq.f32.partialorder %v10947_v0, 0.0  ;;  %v474_v22 = vand.u32 2147483648, %v10947_v0 }
  0xde   :  { %v10067_v8 = vpop.eup %10066  ;;  %9542 = vmatmul.mubr.msk.f32.gmra.mrb[6].mxu1 %vm633_vm14, %v10419_v37  ;;  %v328_v11 = vpop.permute.xlu0 %327  ;;  %v562_v7 = vmul.f32 %v546_v19, %v546_v19  ;;  %v414_v14 = vmul.f32 %v350_v29, %v350_v29  ;;  %v11010_v31 = vmul.f32 %v269_v20, %v269_v20  ;;  %vm635_vm4 = vcmp.lt.f32.partialorder %v10987_v1, 0.25 }
  0xdf   :  { %v444_v25 = vsel %vm443_vm9, %v10905_v28, %v442_v60  ;;  %v449_v3 = vmul.f32 %v10067_v8, %v10903_v42  ;;  %vm478_vm5 = vcmp.eq.f32.partialorder %v10949_v40, inf  ;;  %10076 = vrsqrt.f32 %v10969_v34 }
  0xe0   :  { %v10069_v5 = vpop.eup %10068  ;;  %v304_v33 = vpop.permute.xlu1 %303  ;;  %v578_v21 = vmul.f32 %v562_v7, %v546_v19  ;;  %v447_v23 = vsel %vm445_vm10, %v446_v30, %v444_v25  ;;  %vm480_vm9 = vcmp.eq.f32.partialorder %v10949_v40, 0.0  ;;  %vm485_vm14 = vcmp.eq.f32.partialorder %v10969_v34, inf }
  0xe1   :  { %v346_v36 = vsub.f32 %v304_v33, %v10857_v39  ;;  %v547_v2 = vmul.f32 2.0, %v447_v23  ;;  %v451_v35 = vsel %vm450_vm11, %v10903_v42, %v449_v3  ;;  %v456_v27 = vmul.f32 %v10069_v5, %v10918_v12 }
  0xe2   :  { %v10071_v9 = vpop.eup %10070  ;;  %v11005_v63 = vpop.permute.xlu0 %1012  ;;  %v594_v28 = vsub.f32 1.0, %v578_v21  ;;  %v454_v57 = vsel %vm452_vm12, %v453_v58, %v451_v35 }
  0xe3   :  { %v410_v13 = vmul.f32 %v346_v36, %v346_v36  ;;  %v563_v30 = vmul.f32 %v547_v2, %v547_v2  ;;  %v10073_v15 = vpop.eup %10072  ;;  %v548_v18 = vmul.f32 2.0, %v454_v57  ;;  %v458_v19 = vsel %vm457_vm13, %v10918_v12, %v456_v27 }
  0xe4   :  { %v312_v16 = vpop.permute.xlu1 %311  ;;  %v610_v38 = vmax.f32 %v594_v28, 0.0  ;;  %v463_v60 = vmul.f32 %v10071_v9, %v10920_v4  ;;  %v461_v29 = vsel %vm459_vm15, %v460_v10, %v458_v19  ;;  %v470_v5 = vmul.f32 %v10073_v15, %v10947_v0  ;;  %v10075_v23 = vpop.eup %10074 }
  0xe5   :  { %v11019_v42 = vadd.f32 %v410_v13, %v10909_v61  ;;  %v348_v58 = vsub.f32 %v312_v16, %v10857_v39  ;;  %v579_v8 = vmul.f32 %v563_v30, %v547_v2  ;;  %v564_v20 = vmul.f32 %v548_v18, %v548_v18 }
  0xe6   :  { %9476 = vmatprep.mubr.f32.mxu0 %v610_v38  ;;  %v11024_v7 = vpop.permute.xlu0 %1016  ;;  %v549_v25 = vmul.f32 2.0, %v461_v29  ;;  %v465_v3 = vsel %vm464_vm0, %v10920_v4, %v463_v60  ;;  %v352_v61 = vsub.f32 %v328_v11, %v10857_v39  ;;  %v472_v35 = vsel %vm471_vm2, %v10947_v0, %v470_v5 }
  0xe7   :  { %v412_v33 = vmul.f32 %v348_v58, %v348_v58  ;;  %vm634_vm6 = vcmp.lt.f32.partialorder %v11019_v42, 0.25  ;;  %v595_v21 = vsub.f32 1.0, %v579_v8  ;;  %v580_v10 = vmul.f32 %v564_v20, %v548_v18 }
  0xe8   :  { %v316_v12 = vpop.permute.xlu1 %315  ;;  %9544 = vmatprep.mubr.msk.f32.mxu1 %vm634_vm6, %v10419_v37  ;;  %v565_v36 = vmul.f32 %v549_v25, %v549_v25  ;;  %v468_v2 = vsel %vm466_vm1, %v467_v41, %v465_v3  ;;  %v475_v41 = vsel %vm473_vm3, %v474_v22, %v472_v35  ;;  %v477_v30 = vmul.f32 %v10075_v23, %v10949_v40 }
  0xe9   :  { %v11039_v9 = vadd.f32 %v412_v33, %v10926_v32  ;;  %v349_v11 = vsub.f32 %v316_v12, %v10857_v39  ;;  %9545 = vmatmul.mubr.msk.f32.gmra.mrb[8].mxu1 %vm635_vm4, %v10419_v37  ;;  %v611_v28 = vmax.f32 %v595_v21, 0.0  ;;  %v550_v57 = vmul.f32 2.0, %v468_v2 }
  0xea   :  { %v11045_v27 = vpop.permute.xlu0 %1020  ;;  %v596_v13 = vsub.f32 1.0, %v580_v10  ;;  %v581_v4 = vmul.f32 %v565_v36, %v549_v25  ;;  %v11051_v32 = vadd.f32 %v414_v14, %v10932_v17  ;;  %v416_v38 = vmul.f32 %v352_v61, %v352_v61 }
  0xeb   :  { %v413_v15 = vmul.f32 %v349_v11, %v349_v11  ;;  %9477 = vmatmul.mubr.f32.vlgmr.msra.gmra.mrb[0].mxu0 %v611_v28  ;;  %vm636_vm7 = vcmp.lt.f32.partialorder %v11039_v9, 0.25  ;;  %v566_v16 = vmul.f32 %v550_v57, %v550_v57  ;;  %v551_v58 = vmul.f32 2.0, %v475_v41 }
  0xec   :  { %v612_v18 = vmax.f32 %v596_v13, 0.0  ;;  %v324_v19 = vpop.permute.xlu1 %323  ;;  %9547 = vmatprep.mubr.msk.f32.mxu1 %vm636_vm7, %v10419_v37  ;;  %v597_v60 = vsub.f32 1.0, %v581_v4  ;;  %v479_v17 = vsel %vm478_vm5, %v10949_v40, %v477_v30  ;;  %v481_v25 = vand.u32 2147483648, %v10949_v40 }
  0xed   :  { %v11056_v0 = vadd.f32 %v413_v15, %v10929_v6  ;;  %v351_v22 = vsub.f32 %v324_v19, %v10857_v39  ;;  %v582_v8 = vmul.f32 %v566_v16, %v550_v57  ;;  %v567_v20 = vmul.f32 %v551_v58, %v551_v58 }
  0xee   :  { %9479 = vmatprep.mubr.f32.mxu0 %v612_v18  ;;  %v613_v14 = vmax.f32 %v597_v60, 0.0  ;;  %v1025_v29 = vpop.permute.xlu0 %1024  ;;  %v11067_v6 = vadd.f32 %v416_v38, %v10941_v62  ;;  %vm638_vm10 = vcmp.lt.f32.partialorder %v11051_v32, 0.25  ;;  %v482_v21 = vsel %vm480_vm9, %v481_v25, %v479_v17 }
  0xef   :  { %v415_v3 = vmul.f32 %v351_v22, %v351_v22  ;;  %v598_v5 = vsub.f32 1.0, %v582_v8  ;;  %vm637_vm8 = vcmp.lt.f32.partialorder %v11056_v0, 0.25  ;;  %v583_v33 = vmul.f32 %v567_v20, %v551_v58 }
  0xf0   :  { %9480 = vmatmul.mubr.f32.gmra.mrb[2].mxu0 %v613_v14  ;;  %v332_v61 = vpop.permute.xlu1 %331  ;;  %9548 = vmatmul.mubr.msk.f32.gmra.mrb[10].mxu1 %vm637_vm8, %v10419_v37  ;;  %v552_v40 = vmul.f32 2.0, %v482_v21  ;;  %10078 = vrsqrt.f32 %v11019_v42  ;;  %v401_v2 = vadd.f32 %v11010_v31, %v10878_v24  ;;  %vm640_vm12 = vcmp.lt.f32.partialorder %v11067_v6, 0.25 }
  0xf1   :  { %v11072_v23 = vadd.f32 %v415_v3, %v10938_v26  ;;  %v614_v12 = vmax.f32 %v598_v5, 0.0  ;;  %v353_v10 = vsub.f32 %v332_v61, %v10857_v39  ;;  %9550 = vmatprep.mubr.msk.f32.mxu1 %vm638_vm10, %v10419_v37  ;;  %v599_v36 = vsub.f32 1.0, %v583_v33 }
  0xf2   :  { %v1029_v62 = vpop.permute.xlu0 %1028  ;;  %v568_v11 = vmul.f32 %v552_v40, %v552_v40  ;;  %10080 = vrsqrt.f32 %v10987_v1  ;;  %v11088_v24 = vadd.f32 %v11005_v63, %v10715_v43  ;;  %v11092_v31 = vadd.f32 %v11024_v7, %v10722_v44  ;;  %v10077_v43 = vpop.eup %10076 }
  0xf3   :  { %9482 = vmatprep.mubr.f32.mxu0 %v614_v12  ;;  %v417_v35 = vmul.f32 %v353_v10, %v353_v10  ;;  %vm639_vm11 = vcmp.lt.f32.partialorder %v11072_v23, 0.25  ;;  %v615_v26 = vmax.f32 %v599_v36, 0.0  ;;  %10082 = vrsqrt.f32 %v11039_v9 }
  0xf4   :  { %v1015_v28 = vpop.permute.xlu1 %1014  ;;  %9551 = vmatmul.mubr.msk.f32.gmra.mrb[12].mxu1 %vm639_vm11, %v10419_v37  ;;  %v584_v57 = vmul.f32 %v568_v11, %v552_v40  ;;  %v11097_v4 = vadd.f32 %v11045_v27, %v10729_v45  ;;  %v11100_v41 = vadd.f32 %v1025_v29, %v10736_v46  ;;  %vm487_vm15 = vcmp.eq.f32.partialorder %v10969_v34, 0.0 }
  0xf5   :  { %v11083_v39 = vadd.f32 %v417_v35, %v401_v2  ;;  %9553 = vmatprep.mubr.msk.f32.mxu1 %vm640_vm12, %v10419_v37  ;;  %9483 = vmatmul.mubr.f32.gmra.mrb[4].mxu0 %v615_v26  ;;  %v488_v44 = vand.u32 2147483648, %v10969_v34  ;;  %10084 = vrsqrt.f32 %v11056_v0  ;;  %v11109_v45 = vadd.f32 %v1029_v62, %v10743_v47 }
  0xf6   :  { %v1033_v13 = vpop.permute.xlu0 %1032  ;;  %v600_v30 = vsub.f32 1.0, %v584_v57  ;;  %v484_v7 = vmul.f32 %v10077_v43, %v10969_v34  ;;  %vm492_vm0 = vcmp.eq.f32.partialorder %v11019_v42, inf  ;;  %v11114_v27 = vadd.f32 %v1015_v28, %v10748_v48 }
  0xf7   :  { %vm641_vm13 = vcmp.lt.f32.partialorder %v11083_v39, 0.25  ;;  %vm494_vm1 = vcmp.eq.f32.partialorder %v11019_v42, 0.0  ;;  %v495_v16 = vand.u32 2147483648, %v11019_v42  ;;  %10086 = vrsqrt.f32 %v11051_v32 }
  0xf8   :  { %v1019_v63 = vpop.permute.xlu1 %1018  ;;  %9554 = vmatmul.mubr.msk.f32.gmra.mrb[14].mxu1 %vm641_vm13, %v10419_v37  ;;  %v616_v46 = vmax.f32 %v600_v30, 0.0  ;;  %v486_v47 = vsel %vm485_vm14, %v10969_v34, %v484_v7  ;;  %vm499_vm2 = vcmp.eq.f32.partialorder %v10987_v1, inf  ;;  %vm501_vm3 = vcmp.eq.f32.partialorder %v10987_v1, 0.0 }
  0xf9   :  { %10088 = vrsqrt.f32 %v11072_v23  ;;  %v489_v37 = vsel %vm487_vm15, %v488_v44, %v486_v47  ;;  %v502_v18 = vand.u32 2147483648, %v10987_v1  ;;  %vm506_vm4 = vcmp.eq.f32.partialorder %v11039_v9, inf }
  0xfa   :  { %v1037_v15 = vpop.permute.xlu0 %1036  ;;  %9485 = vmatprep.mubr.f32.mxu0 %v616_v46  ;;  %v10079_v48 = vpop.eup %10078  ;;  %10090 = vrsqrt.f32 %v11067_v6  ;;  %v553_v19 = vmul.f32 2.0, %v489_v37  ;;  %v11131_v60 = vadd.f32 %v1033_v13, %v10754_v49  ;;  %vm508_vm5 = vcmp.eq.f32.partialorder %v11039_v9, 0.0 }
  0xfb   :  { %v491_v58 = vmul.f32 %v10079_v48, %v11019_v42  ;;  %v11136_v8 = vadd.f32 %v1019_v63, %v10760_v50  ;;  %v509_v17 = vand.u32 2147483648, %v11039_v9  ;;  %vm513_vm6 = vcmp.eq.f32.partialorder %v11056_v0, inf }
  0xfc   :  { %v1023_v38 = vpop.permute.xlu1 %1022  ;;  %v10081_v22 = vpop.eup %10080  ;;  %v516_v14 = vand.u32 2147483648, %v11056_v0  ;;  %v569_v29 = vmul.f32 %v553_v19, %v553_v19  ;;  %vm515_vm7 = vcmp.eq.f32.partialorder %v11056_v0, 0.0  ;;  %vm520_vm8 = vcmp.eq.f32.partialorder %v11051_v32, inf }
  0xfd   :  { %v493_v49 = vsel %vm492_vm0, %v11019_v42, %v491_v58  ;;  %v498_v20 = vmul.f32 %v10081_v22, %v10987_v1  ;;  %10092 = vrsqrt.f32 %v11083_v39  ;;  %v10083_v50 = vpop.eup %10082  ;;  %v11149_v25 = vadd.f32 %v1037_v15, %v10766_v51 }
  0xfe   :  { %v1041_v34 = vpop.permute.xlu0 %1040  ;;  %v496_v5 = vsel %vm494_vm1, %v495_v16, %v493_v49  ;;  %v523_v61 = vand.u32 2147483648, %v11051_v32  ;;  %v530_v33 = vand.u32 2147483648, %v11072_v23  ;;  %v585_v21 = vmul.f32 %v569_v29, %v553_v19 }
  0xff   :  { %v11156_v12 = vadd.f32 %v1023_v38, %v10772_v52  ;;  %v554_v10 = vmul.f32 2.0, %v496_v5  ;;  %v500_v40 = vsel %vm499_vm2, %v10987_v1, %v498_v20  ;;  %vm522_vm9 = vcmp.eq.f32.partialorder %v11051_v32, 0.0  ;;  %v10085_v51 = vpop.eup %10084 }
 0x100   :  { %v1027_v3 = vpop.permute.xlu1 %1026  ;;  %vm527_vm10 = vcmp.eq.f32.partialorder %v11072_v23, inf  ;;  %v11164_v42 = vadd.f32 %v1041_v34, %v10778_v53  ;;  %v503_v36 = vsel %vm501_vm3, %v502_v18, %v500_v40  ;;  %v505_v52 = vmul.f32 %v10083_v50, %v11039_v9 }
 0x101   :  { %v537_v2 = vand.u32 2147483648, %v11067_v6  ;;  %v601_v35 = vsub.f32 1.0, %v585_v21  ;;  %v570_v11 = vmul.f32 %v554_v10, %v554_v10  ;;  %v555_v26 = vmul.f32 2.0, %v503_v36  ;;  %v10087_v53 = vpop.eup %10086 }
 0x102   :  { %v1077_v62 = vpop.permute.xlu0 %1076  ;;  %vm529_vm11 = vcmp.eq.f32.partialorder %v11072_v23, 0.0  ;;  %vm534_vm12 = vcmp.eq.f32.partialorder %v11067_v6, inf  ;;  %v11176_v57 = vadd.f32 %v1027_v3, %v10784_v54  ;;  %v507_v13 = vsel %vm506_vm4, %v11039_v9, %v505_v52 }
 0x103   :  { %v11171_v28 = vadd.f32 %v1077_v62, %v11088_v24  ;;  %v512_v30 = vmul.f32 %v10085_v51, %v11056_v0  ;;  %v544_v43 = vand.u32 2147483648, %v11083_v39  ;;  %v10089_v44 = vpop.eup %10088  ;;  %v617_v24 = vmax.f32 %v601_v35, 0.0 }
 0x104   :  { %v1031_v1 = vpop.permute.xlu1 %1030  ;;  %v586_v63 = vmul.f32 %v570_v11, %v554_v10  ;;  %v571_v46 = vmul.f32 %v555_v26, %v555_v26  ;;  %vm536_vm13 = vcmp.eq.f32.partialorder %v11067_v6, 0.0  ;;  %vm541_vm14 = vcmp.eq.f32.partialorder %v11083_v39, inf  ;;  %v10091_v54 = vpop.eup %10090 }
 0x105   :  { %10094 = vrsqrt.f32 %v11171_v28  ;;  %v11187_v7 = vadd.f32 %v1031_v1, %v10792_v55  ;;  %v510_v15 = vsel %vm508_vm5, %v509_v17, %v507_v13  ;;  %v514_v47 = vsel %vm513_vm6, %v11056_v0, %v512_v30  ;;  %9486 = vmatmul.mubr.f32.gmra.mrb[6].mxu0 %v617_v24 }
 0x106   :  { %v1081_v16 = vpop.permute.xlu0 %1080  ;;  %v519_v48 = vmul.f32 %v10087_v53, %v11051_v32  ;;  %v602_v37 = vsub.f32 1.0, %v586_v63  ;;  %v587_v38 = vmul.f32 %v571_v46, %v555_v26  ;;  %v556_v18 = vmul.f32 2.0, %v510_v15  ;;  %v17760_v15 = vld [vmem:[#allocation2_spill] sm:$0xff] }
 0x107   :  { %v11196_v19 = vadd.f32 %v1081_v16, %v11092_v31  ;;  %vm543_vm15 = vcmp.eq.f32.partialorder %v11083_v39, 0.0  ;;  %v517_v9 = vsel %vm515_vm7, %v516_v14, %v514_v47  ;;  %v526_v22 = vmul.f32 %v10089_v44, %v11072_v23  ;;  %v10093_v17 = vpop.eup %10092 }
 0x108   :  { %v1035_v55 = vpop.permute.xlu1 %1034  ;;  %v521_v58 = vsel %vm520_vm8, %v11051_v32, %v519_v48  ;;  %v533_v34 = vmul.f32 %v10091_v54, %v11067_v6  ;;  %v618_v29 = vmax.f32 %v602_v37, 0.0  ;;  %v603_v49 = vsub.f32 1.0, %v587_v38 }
 0x109   :  { %v572_v20 = vmul.f32 %v556_v18, %v556_v18  ;;  %10096 = vrsqrt.f32 %v11196_v19  ;;  %v11208_v31 = vadd.f32 %v1035_v55, %v10800_v56  ;;  %v557_v50 = vmul.f32 2.0, %v517_v9 }
 0x10a   :  { %v524_v0 = vsel %vm522_vm9, %v523_v61, %v521_v58  ;;  %v1085_v14 = vpop.permute.xlu0 %1084  ;;  %v528_v3 = vsel %vm527_vm10, %v11072_v23, %v526_v22  ;;  %9488 = vmatprep.mubr.f32.mxu0 %v618_v29  ;;  %v619_v5 = vmax.f32 %v603_v49, 0.0  ;;  %v535_v32 = vsel %vm534_vm12, %v11067_v6, %v533_v34 }
 0x10b   :  { %v588_v21 = vmul.f32 %v572_v20, %v556_v18  ;;  %v558_v10 = vmul.f32 2.0, %v524_v0  ;;  %v11216_v40 = vadd.f32 %v1085_v14, %v11097_v4  ;;  %v573_v51 = vmul.f32 %v557_v50, %v557_v50 }
 0x10c   :  { %v1039_v36 = vpop.permute.xlu1 %1038  ;;  %v531_v56 = vsel %vm529_vm11, %v530_v33, %v528_v3  ;;  %v540_v61 = vmul.f32 %v10093_v17, %v11083_v39  ;;  %9489 = vmatmul.mubr.f32.gmra.mrb[8].mxu0 %v619_v5  ;;  %v538_v23 = vsel %vm536_vm13, %v537_v2, %v535_v32  ;;  %vm1142_vm0 = vcmp.eq.f32.partialorder %v11171_v28, inf }
 0x10d   :  { %v604_v62 = vsub.f32 1.0, %v588_v21  ;;  %v574_v52 = vmul.f32 %v558_v10, %v558_v10  ;;  %10098 = vrsqrt.f32 %v11216_v40  ;;  %v11228_v4 = vadd.f32 %v1039_v36, %v10808_v59 }
 0x10e   :  { %v589_v35 = vmul.f32 %v573_v51, %v557_v50  ;;  %v559_v11 = vmul.f32 2.0, %v531_v56  ;;  %v1089_v33 = vpop.permute.xlu0 %1088  ;;  %v542_v26 = vsel %vm541_vm14, %v11083_v39, %v540_v61  ;;  %v560_v30 = vmul.f32 2.0, %v538_v23 }
 0x10f   :  { %v10095_v53 = vpop.eup %10094  ;;  %v620_v1 = vmax.f32 %v604_v62, 0.0  ;;  %v590_v13 = vmul.f32 %v574_v52, %v558_v10  ;;  %v11238_v44 = vadd.f32 %v1089_v33, %v11100_v41  ;;  %v545_v6 = vsel %vm543_vm15, %v544_v43, %v542_v26 }
 0x110   :  { %v605_v59 = vsub.f32 1.0, %v589_v35  ;;  %v575_v24 = vmul.f32 %v559_v11, %v559_v11  ;;  %v1043_v63 = vpop.permute.xlu1 %1042  ;;  %v1141_v2 = vmul.f32 %v10095_v53, %v11171_v28  ;;  %v576_v54 = vmul.f32 %v560_v30, %v560_v30 }
 0x111   :  { %9491 = vmatprep.mubr.f32.mxu0 %v620_v1  ;;  %v606_v46 = vsub.f32 1.0, %v590_v13  ;;  %10100 = vrsqrt.f32 %v11238_v44  ;;  %v11247_v16 = vadd.f32 %v1043_v63, %v17760_v15  ;;  %v561_v48 = vmul.f32 2.0, %v545_v6 }
 0x112   :  { %v621_v41 = vmax.f32 %v605_v59, 0.0  ;;  %v591_v47 = vmul.f32 %v575_v24, %v559_v11  ;;  %v1093_v37 = vpop.permute.xlu0 %1092  ;;  %v592_v39 = vmul.f32 %v576_v54, %v560_v30  ;;  %v1143_v55 = vsel %vm1142_vm0, %v11171_v28, %v1141_v2 }
 0x113   :  { %v10097_v38 = vpop.eup %10096  ;;  %v622_v18 = vmax.f32 %v606_v46, 0.0  ;;  %v11251_v43 = vadd.f32 %v1093_v37, %v11109_v45  ;;  %v577_v58 = vmul.f32 %v561_v48, %v561_v48  ;;  %vm1144_vm1 = vcmp.eq.f32.partialorder %v11171_v28, 0.0 }
 0x114   :  { %9492 = vmatmul.mubr.f32.gmra.mrb[10].mxu0 %v621_v41  ;;  %v607_v9 = vsub.f32 1.0, %v591_v47  ;;  %v1079_v22 = vpop.permute.xlu1 %1078  ;;  %v1145_v34 = vand.u32 2147483648, %v11171_v28  ;;  %v608_v17 = vsub.f32 1.0, %v592_v39  ;;  %v1155_v45 = vmul.f32 %v10097_v38, %v11196_v19 }
 0x115   :  { %9494 = vmatprep.mubr.f32.mxu0 %v622_v18  ;;  %10102 = vrsqrt.f32 %v11251_v43  ;;  %v11258_v29 = vadd.f32 %v1079_v22, %v11114_v27  ;;  %v593_v20 = vmul.f32 %v577_v58, %v561_v48  ;;  %vm1156_vm2 = vcmp.eq.f32.partialorder %v11196_v19, inf }
 0x116   :  { %v623_v49 = vmax.f32 %v607_v9, 0.0  ;;  %v1097_v50 = vpop.permute.xlu0 %1096  ;;  %v1146_v0 = vsel %vm1144_vm1, %v1145_v34, %v1143_v55  ;;  %v624_v3 = vmax.f32 %v608_v17, 0.0  ;;  %v1157_v10 = vsel %vm1156_vm2, %v11196_v19, %v1155_v45 }
 0x117   :  { %v10099_v14 = vpop.eup %10098  ;;  %10104 = vrsqrt.f32 %v11258_v29  ;;  %v11264_v28 = vadd.f32 %v1097_v50, %v11131_v60  ;;  %v1252_v5 = vmul.f32 2.0, %v1146_v0  ;;  %v609_v21 = vsub.f32 1.0, %v593_v20 }
 0x118   :  { %9495 = vmatmul.mubr.f32.gmra.mrb[12].mxu0 %v623_v49  ;;  %v1083_v27 = vpop.permute.xlu1 %1082  ;;  %vm1158_vm3 = vcmp.eq.f32.partialorder %v11196_v19, 0.0  ;;  %v1159_v51 = vand.u32 2147483648, %v11196_v19  ;;  %v1169_v60 = vmul.f32 %v10099_v14, %v11216_v40  ;;  %vm1170_vm4 = vcmp.eq.f32.partialorder %v11216_v40, inf }
 0x119   :  { %9497 = vmatprep.mubr.f32.mxu0 %v624_v3  ;;  %10106 = vrsqrt.f32 %v11264_v28  ;;  %v11271_v36 = vadd.f32 %v1083_v27, %v11136_v8  ;;  %v1268_v56 = vmul.f32 %v1252_v5, %v1252_v5  ;;  %v625_v32 = vmax.f32 %v609_v21, 0.0 }
 0x11a   :  { %v1101_v61 = vpop.permute.xlu0 %1100  ;;  %v1160_v62 = vsel %vm1158_vm3, %v1159_v51, %v1157_v10  ;;  %vm1172_vm5 = vcmp.eq.f32.partialorder %v11216_v40, 0.0  ;;  %v1171_v23 = vsel %vm1170_vm4, %v11216_v40, %v1169_v60  ;;  %v1173_v33 = vand.u32 2147483648, %v11216_v40 }
 0x11b   :  { %v10101_v52 = vpop.eup %10100  ;;  %10108 = vrsqrt.f32 %v11271_v36  ;;  %v11278_v19 = vadd.f32 %v1101_v61, %v11149_v25  ;;  %v1284_v35 = vmul.f32 %v1268_v56, %v1252_v5  ;;  %v1254_v11 = vmul.f32 2.0, %v1160_v62 }
 0x11c   :  { %9498 = vmatmul.mubr.f32.gmra.mrb[14].mxu0 %v625_v32  ;;  %v1087_v8 = vpop.permute.xlu1 %1086  ;;  %v1183_v26 = vmul.f32 %v10101_v52, %v11238_v44  ;;  %vm1184_vm6 = vcmp.eq.f32.partialorder %v11238_v44, inf  ;;  %v1174_v30 = vsel %vm1172_vm5, %v1173_v33, %v1171_v23  ;;  %vm1186_vm7 = vcmp.eq.f32.partialorder %v11238_v44, 0.0 }
 0x11d   :  { %10110 = vrsqrt.f32 %v11278_v19  ;;  %v11286_v53 = vadd.f32 %v1087_v8, %v11156_v12  ;;  %v1300_v1 = vsub.f32 1.0, %v1284_v35  ;;  %v1270_v25 = vmul.f32 %v1254_v11, %v1254_v11 }
 0x11e   :  { %v1105_v13 = vpop.permute.xlu0 %1104  ;;  %v1185_v59 = vsel %vm1184_vm6, %v11238_v44, %v1183_v26  ;;  %v1187_v24 = vand.u32 2147483648, %v11238_v44  ;;  %v1256_v54 = vmul.f32 2.0, %v1174_v30  ;;  %vm1198_vm8 = vcmp.eq.f32.partialorder %v11251_v43, inf }
 0x11f   :  { %v10103_v63 = vpop.eup %10102  ;;  %10112 = vrsqrt.f32 %v11286_v53  ;;  %v1316_v6 = vmax.f32 %v1300_v1, 0.0  ;;  %v11295_v2 = vadd.f32 %v1105_v13, %v11164_v42  ;;  %v1286_v12 = vmul.f32 %v1270_v25, %v1254_v11 }
 0x120   :  { %v1091_v46 = vpop.permute.xlu1 %1090  ;;  %v1188_v15 = vsel %vm1186_vm7, %v1187_v24, %v1185_v59  ;;  %v1197_v40 = vmul.f32 %v10103_v63, %v11251_v43  ;;  %v1272_v48 = vmul.f32 %v1256_v54, %v1256_v54  ;;  %vm1200_vm9 = vcmp.eq.f32.partialorder %v11251_v43, 0.0 }
 0x121   :  { %v10105_v41 = vpop.eup %10104  ;;  %1348 = vrot.lane.b32.xlu0 %v1316_v6, %s17715_s4  ;;  %10114 = vrsqrt.f32 %v11295_v2  ;;  %v11302_v44 = vadd.f32 %v1091_v46, %v11176_v57  ;;  %v1302_v47 = vsub.f32 1.0, %v1286_v12  ;;  %v1258_v42 = vmul.f32 2.0, %v1188_v15 }
 0x122   :  { %v1199_v37 = vsel %vm1198_vm8, %v11251_v43, %v1197_v40  ;;  %v1201_v38 = vand.u32 2147483648, %v11251_v43  ;;  %v1148_v9 = vmul.f32 %v10105_v41, %v11258_v29  ;;  %v1288_v22 = vmul.f32 %v1272_v48, %v1256_v54 }
 0x123   :  { %v10107_v18 = vpop.eup %10106  ;;  %10116 = vrsqrt.f32 %v11302_v44  ;;  %v1318_v39 = vmax.f32 %v1302_v47, 0.0  ;;  %v1274_v55 = vmul.f32 %v1258_v42, %v1258_v42  ;;  %vm1149_vm10 = vcmp.eq.f32.partialorder %v11258_v29, inf }
 0x124   :  { %v1095_v58 = vpop.permute.xlu1 %1094  ;;  %v1202_v57 = vsel %vm1200_vm9, %v1201_v38, %v1199_v37  ;;  %vm1151_vm11 = vcmp.eq.f32.partialorder %v11258_v29, 0.0  ;;  %v1150_v49 = vsel %vm1149_vm10, %v11258_v29, %v1148_v9  ;;  %v1304_v20 = vsub.f32 1.0, %v1288_v22 }
 0x125   :  { %v10109_v34 = vpop.eup %10108  ;;  %1352 = vrot.lane.b32.xlu0 %v1318_v39, %s17715_s4  ;;  %v11313_v17 = vadd.f32 %v1095_v58, %v11187_v7  ;;  %v1290_v43 = vmul.f32 %v1274_v55, %v1258_v42  ;;  %v1260_v45 = vmul.f32 2.0, %v1202_v57  ;;  %v1152_v50 = vand.u32 2147483648, %v11258_v29 }
 0x126   :  { %v1211_v0 = vmul.f32 %v10107_v18, %v11264_v28  ;;  %vm1212_vm12 = vcmp.eq.f32.partialorder %v11264_v28, inf  ;;  %vm1214_vm13 = vcmp.eq.f32.partialorder %v11264_v28, 0.0  ;;  %v1320_v7 = vmax.f32 %v1304_v20, 0.0 }
 0x127   :  { %v10111_v14 = vpop.eup %10110  ;;  %10118 = vrsqrt.f32 %v11313_v17  ;;  %v1306_v3 = vsub.f32 1.0, %v1290_v43  ;;  %v1276_v5 = vmul.f32 %v1260_v45, %v1260_v45  ;;  %v1153_v27 = vsel %vm1151_vm11, %v1152_v50, %v1150_v49 }
 0x128   :  { %v1099_v21 = vpop.permute.xlu1 %1098  ;;  %v1213_v10 = vsel %vm1212_vm12, %v11264_v28, %v1211_v0  ;;  %v1215_v51 = vand.u32 2147483648, %v11264_v28  ;;  %v1253_v62 = vmul.f32 2.0, %v1153_v27  ;;  %v1162_v35 = vmul.f32 %v10109_v34, %v11271_v36 }
 0x129   :  { %v10113_v56 = vpop.eup %10112  ;;  %v11326_v60 = vadd.f32 %v1099_v21, %v11208_v31  ;;  %v1322_v32 = vmax.f32 %v1306_v3, 0.0  ;;  %v1292_v61 = vmul.f32 %v1276_v5, %v1260_v45  ;;  %1356 = vrot.lane.b32.xlu0 %v1320_v7, %s17715_s4  ;;  %vm1163_vm14 = vcmp.eq.f32.partialorder %v11271_v36, inf }
 0x12a   :  { %v1216_v52 = vsel %vm1214_vm13, %v1215_v51, %v1213_v10  ;;  %vm1165_vm15 = vcmp.eq.f32.partialorder %v11271_v36, 0.0  ;;  %v1269_v11 = vmul.f32 %v1253_v62, %v1253_v62  ;;  %v1164_v23 = vsel %vm1163_vm14, %v11271_v36, %v1162_v35 }
 0x12b   :  { %v10115_v29 = vpop.eup %10114  ;;  %10120 = vrsqrt.f32 %v11326_v60  ;;  %v1308_v28 = vsub.f32 1.0, %v1292_v61  ;;  %v1262_v8 = vmul.f32 2.0, %v1216_v52  ;;  %v1166_v33 = vand.u32 2147483648, %v11271_v36 }
 0x12c   :  { %v1103_v31 = vpop.permute.xlu1 %1102  ;;  %v1225_v26 = vmul.f32 %v10111_v14, %v11278_v19  ;;  %vm1226_vm0 = vcmp.eq.f32.partialorder %v11278_v19, inf  ;;  %v1285_v30 = vmul.f32 %v1269_v11, %v1253_v62  ;;  %vm1228_vm1 = vcmp.eq.f32.partialorder %v11278_v19, 0.0 }
 0x12d   :  { %v10117_v1 = vpop.eup %10116  ;;  %v11338_v25 = vadd.f32 %v1103_v31, %v11228_v4  ;;  %v1324_v13 = vmax.f32 %v1308_v28, 0.0  ;;  %v1278_v59 = vmul.f32 %v1262_v8, %v1262_v8  ;;  %1360 = vrot.lane.b32.xlu0 %v1322_v32, %s17715_s4  ;;  %v1167_v24 = vsel %vm1165_vm15, %v1166_v33, %v1164_v23 }
 0x12e   :  { %v1227_v63 = vsel %vm1226_vm0, %v11278_v19, %v1225_v26  ;;  %v1229_v6 = vand.u32 2147483648, %v11278_v19  ;;  %v1301_v12 = vsub.f32 1.0, %v1285_v30  ;;  %v1255_v4 = vmul.f32 2.0, %v1167_v24 }
 0x12f   :  { %10122 = vrsqrt.f32 %v11338_v25  ;;  %v1294_v46 = vmul.f32 %v1278_v59, %v1262_v8  ;;  %v1176_v40 = vmul.f32 %v10113_v56, %v11286_v53  ;;  %vm1177_vm2 = vcmp.eq.f32.partialorder %v11286_v53, inf }
 0x130   :  { %v1107_v54 = vpop.permute.xlu1 %1106  ;;  %v1230_v15 = vsel %vm1228_vm1, %v1229_v6, %v1227_v63  ;;  %vm1179_vm3 = vcmp.eq.f32.partialorder %v11286_v53, 0.0  ;;  %v1317_v41 = vmax.f32 %v1301_v12, 0.0  ;;  %v1271_v19 = vmul.f32 %v1255_v4, %v1255_v4 }
 0x131   :  { %v10119_v36 = vpop.eup %10118  ;;  %v11351_v47 = vadd.f32 %v1107_v54, %v11247_v16  ;;  %v1310_v42 = vsub.f32 1.0, %v1294_v46  ;;  %1364 = vrot.lane.b32.xlu0 %v1324_v13, %s17715_s4  ;;  %v1264_v48 = vmul.f32 2.0, %v1230_v15  ;;  %v1178_v37 = vsel %vm1177_vm2, %v11286_v53, %v1176_v40 }
 0x132   :  { %v1180_v38 = vand.u32 2147483648, %v11286_v53  ;;  %v1239_v18 = vmul.f32 %v10115_v29, %v11295_v2  ;;  %1350 = vrot.lane.b32.xlu1 %v1317_v41, %s17715_s4  ;;  %v1287_v55 = vmul.f32 %v1271_v19, %v1255_v4  ;;  %vm1240_vm4 = vcmp.eq.f32.partialorder %v11295_v2, inf }
 0x133   :  { %10124 = vrsqrt.f32 %v11351_v47  ;;  %v1326_v39 = vmax.f32 %v1310_v42, 0.0  ;;  %v1280_v16 = vmul.f32 %v1264_v48, %v1264_v48  ;;  %vm1242_vm5 = vcmp.eq.f32.partialorder %v11295_v2, 0.0 }
 0x134   :  { %v1181_v9 = vsel %vm1179_vm3, %v1180_v38, %v1178_v37  ;;  %v1241_v58 = vsel %vm1240_vm4, %v11295_v2, %v1239_v18  ;;  %v1303_v57 = vsub.f32 1.0, %v1287_v55  ;;  %v1243_v43 = vand.u32 2147483648, %v11295_v2 }
 0x135   :  { %v10121_v22 = vpop.eup %10120  ;;  %v1257_v34 = vmul.f32 2.0, %v1181_v9  ;;  %v1190_v45 = vmul.f32 %v10117_v1, %v11302_v44  ;;  %1368 = vrot.lane.b32.xlu0 %v1326_v39, %s17715_s4  ;;  %v1296_v49 = vmul.f32 %v1280_v16, %v1264_v48  ;;  %vm1191_vm6 = vcmp.eq.f32.partialorder %v11302_v44, inf  ;;  %v11407_v39 = vld [vmem:[%s17586_s1 + $0x10] sm:$0xff] }
 0x136   :  { %vm1193_vm7 = vcmp.eq.f32.partialorder %v11302_v44, 0.0  ;;  %v1194_v53 = vand.u32 2147483648, %v11302_v44  ;;  %v1319_v20 = vmax.f32 %v1303_v57, 0.0  ;;  %v1244_v0 = vsel %vm1242_vm5, %v1243_v43, %v1241_v58  ;;  %v1969_v43 = vld [vmem:[%s17586_s1 + $0x30] sm:$0xff] }
 0x137   :  { %v1273_v50 = vmul.f32 %v1257_v34, %v1257_v34  ;;  %v1192_v14 = vsel %vm1191_vm6, %v11302_v44, %v1190_v45  ;;  %v1312_v3 = vsub.f32 1.0, %v1296_v49  ;;  %v1266_v5 = vmul.f32 2.0, %v1244_v0  ;;  %v11439_v0 = vld [vmem:[%s17586_s1 + $0x18] sm:$0xff] }
 0x138   :  { %v1195_v7 = vsel %vm1193_vm7, %v1194_v53, %v1192_v14  ;;  %v1204_v2 = vmul.f32 %v10119_v36, %v11313_v17  ;;  %1354 = vrot.lane.b32.xlu1 %v1319_v20, %s17715_s4  ;;  %vm1205_vm8 = vcmp.eq.f32.partialorder %v11313_v17, inf  ;;  %vm1207_vm9 = vcmp.eq.f32.partialorder %v11313_v17, 0.0  ;;  %v1971_v53 = vld [vmem:[%s17586_s1 + $0x40] sm:$0xff]  ;;  %v11428_v20 = vld [vmem:[%s17586_s1 + $0x8] sm:$0xff] }
 0x139   :  { %v10123_v21 = vpop.eup %10122  ;;  %v1289_v27 = vmul.f32 %v1273_v50, %v1257_v34  ;;  %v1259_v10 = vmul.f32 2.0, %v1195_v7  ;;  %v1328_v51 = vmax.f32 %v1312_v3, 0.0  ;;  %v1282_v56 = vmul.f32 %v1266_v5, %v1266_v5  ;;  %v1973_v50 = vld [vmem:[%s17586_s1 + $0x50] sm:$0xff]  ;;  %v1975_v14 = vld [vmem:[%s17586_s1 + $0x60] sm:$0xff]  ;;  %v1968_v3 = vld [vmem:[%s17586_s1 + $0x28] sm:$0xff] }
 0x13a   :  { %v1206_v32 = vsel %vm1205_vm8, %v11313_v17, %v1204_v2  ;;  %v1208_v44 = vand.u32 2147483648, %v11313_v17  ;;  %v1218_v52 = vmul.f32 %v10121_v22, %v11326_v60  ;;  %vm1219_vm10 = vcmp.eq.f32.partialorder %v11326_v60, inf  ;;  %v1967_v22 = vld [vmem:[%s17586_s1 + $0x20] sm:$0xff]  ;;  %v1970_v7 = vld [vmem:[%s17586_s1 + $0x38] sm:$0xff] }
 0x13b   :  { %v1305_v61 = vsub.f32 1.0, %v1289_v27  ;;  %v1275_v62 = vmul.f32 %v1259_v10, %v1259_v10  ;;  %1372 = vrot.lane.b32.xlu0 %v1328_v51, %s17715_s4  ;;  %v1298_v35 = vmul.f32 %v1282_v56, %v1266_v5  ;;  %vm1221_vm11 = vcmp.eq.f32.partialorder %v11326_v60, 0.0  ;;  %v1977_v5 = vld [vmem:[%s17586_s1 + $0x70] sm:$0xff]  ;;  %v1979_v2 = vld [vmem:[%s17587_s2] sm:$0xff]  ;;  %v1976_v56 = vld [vmem:[%s17586_s1 + $0x68] sm:$0xff] }
 0x13c   :  { %v1209_v29 = vsel %vm1207_vm9, %v1208_v44, %v1206_v32  ;;  %v1222_v28 = vand.u32 2147483648, %v11326_v60  ;;  %v1220_v17 = vsel %vm1219_vm10, %v11326_v60, %v1218_v52  ;;  %v1232_v1 = vmul.f32 %v10123_v21, %v11338_v25  ;;  %v1972_v21 = vld [vmem:[%s17586_s1 + $0x48] sm:$0xff]  ;;  %v1981_v27 = vld [vmem:[%s17587_s2 + $0x10] sm:$0xff]  ;;  %v1983_v51 = vld [vmem:[%s17587_s2 + $0x20] sm:$0xff] }
 0x13d   :  { %v10125_v11 = vpop.eup %10124  ;;  %v1321_v8 = vmax.f32 %v1305_v61, 0.0  ;;  %v1291_v31 = vmul.f32 %v1275_v62, %v1259_v10  ;;  %v1261_v23 = vmul.f32 2.0, %v1209_v29  ;;  %v1314_v33 = vsub.f32 1.0, %v1298_v35  ;;  %v1974_v10 = vld [vmem:[%s17586_s1 + $0x58] sm:$0xff]  ;;  %v1985_v32 = vld [vmem:[%s17587_s2 + $0x30] sm:$0xff]  ;;  %v1987_v61 = vld [vmem:[%s17587_s2 + $0x40] sm:$0xff] }
 0x13e   :  { %v1223_v26 = vsel %vm1221_vm11, %v1222_v28, %v1220_v17  ;;  %vm1233_vm12 = vcmp.eq.f32.partialorder %v11338_v25, inf  ;;  %vm1235_vm13 = vcmp.eq.f32.partialorder %v11338_v25, 0.0  ;;  %v1236_v6 = vand.u32 2147483648, %v11338_v25  ;;  %v1978_v44 = vld [vmem:[%s17586_s1 + $0x78] sm:$0xff]  ;;  %v1980_v62 = vld [vmem:[%s17587_s2 + $0x8] sm:$0xff]  ;;  %v1989_v52 = vld [vmem:[%s17587_s2 + $0x50] sm:$0xff] }
 0x13f   :  { %1358 = vrot.lane.b32.xlu1 %v1321_v8, %s17715_s4  ;;  %v1307_v13 = vsub.f32 1.0, %v1291_v31  ;;  %v1277_v30 = vmul.f32 %v1261_v23, %v1261_v23  ;;  %v1263_v59 = vmul.f32 2.0, %v1223_v26  ;;  %v1330_v24 = vmax.f32 %v1314_v33, 0.0  ;;  %v1982_v35 = vld [vmem:[%s17587_s2 + $0x18] sm:$0xff]  ;;  %v1991_v29 = vld [vmem:[%s17587_s2 + $0x60] sm:$0xff]  ;;  %v1984_v28 = vld [vmem:[%s17587_s2 + $0x28] sm:$0xff] }
 0x140   :  { %v1234_v63 = vsel %vm1233_vm12, %v11338_v25, %v1232_v1  ;;  %v1246_v60 = vmul.f32 %v10125_v11, %v11351_v47  ;;  %vm1247_vm14 = vcmp.eq.f32.partialorder %v11351_v47, inf  ;;  %v1250_v40 = vand.u32 2147483648, %v11351_v47  ;;  %v11398_v25 = vld [vmem:[%s17586_s1] sm:$0xff]  ;;  %v1993_v11 = vld [vmem:[%s17587_s2 + $0x70] sm:$0xff]  ;;  %v1986_v8 = vld [vmem:[%s17587_s2 + $0x38] sm:$0xff] }
 0x141   :  { %v1323_v12 = vmax.f32 %v1307_v13, 0.0  ;;  %v1293_v46 = vmul.f32 %v1277_v30, %v1261_v23  ;;  %v1279_v4 = vmul.f32 %v1263_v59, %v1263_v59  ;;  %1376 = vrot.lane.b32.xlu0 %v1330_v24, %s17715_s4  ;;  %v1237_v54 = vsel %vm1235_vm13, %v1236_v6, %v1234_v63  ;;  %v1995_v31 = vld [vmem:[%s17588_s3] sm:$0xff]  ;;  %v1988_v23 = vld [vmem:[%s17587_s2 + $0x48] sm:$0xff]  ;;  %v1997_v17 = vld [vmem:[%s17588_s3 + $0x10] sm:$0xff] }
 0x142   :  { %v1248_v15 = vsel %vm1247_vm14, %v11351_v47, %v1246_v60  ;;  %v1265_v42 = vmul.f32 2.0, %v1237_v54  ;;  %vm1249_vm15 = vcmp.eq.f32.partialorder %v11351_v47, 0.0  ;;  %v10422_v49 = vmov 3   ;;  %v1990_v33 = vld [vmem:[%s17587_s2 + $0x58] sm:$0xff]  ;;  %v1999_v26 = vld [vmem:[%s17588_s3 + $0x20] sm:$0xff]  ;;  %v1992_v1 = vld [vmem:[%s17587_s2 + $0x68] sm:$0xff] }
 0x143   :  { %1362 = vrot.lane.b32.xlu1 %v1323_v12, %s17715_s4  ;;  %v1309_v36 = vsub.f32 1.0, %v1293_v46  ;;  %v1295_v41 = vmul.f32 %v1279_v4, %v1263_v59  ;;  %v1251_v19 = vsel %vm1249_vm15, %v1250_v40, %v1248_v15  ;;  %10059 = vset.pattern.permute.xlu0 %v10422_v49  ;;  %v2001_v13 = vld [vmem:[%s17588_s3 + $0x30] sm:$0xff]  ;;  %v1994_v30 = vld [vmem:[%s17587_s2 + $0x78] sm:$0xff]  ;;  %v2003_v59 = vld [vmem:[%s17588_s3 + $0x40] sm:$0xff]  ;;  %s17664_s2 = smov 39  }
 0x144   :  { %v1281_v38 = vmul.f32 %v1265_v42, %v1265_v42  ;;  %v1267_v18 = vmul.f32 2.0, %v1251_v19  ;;  %10058 = vset.pattern.permute.xlu1 %v10422_v49  ;;  %v1996_v63 = vld [vmem:[%s17588_s3 + $0x8] sm:$0xff]  ;;  %v2005_v6 = vld [vmem:[%s17588_s3 + $0x50] sm:$0xff]  ;;  %v1998_v12 = vld [vmem:[%s17588_s3 + $0x18] sm:$0xff] }
 0x145   :  { %v1325_v48 = vmax.f32 %v1309_v36, 0.0  ;;  %v1311_v37 = vsub.f32 1.0, %v1295_v41  ;;  %2091 = vrot.lane.b32.xlu0 %v11398_v25, %s10421_s20  ;;  %v2007_v46 = vld [vmem:[%s17588_s3 + $0x60] sm:$0xff]  ;;  %v2000_v4 = vld [vmem:[%s17588_s3 + $0x28] sm:$0xff]  ;;  %v2009_v15 = vld [vmem:[%s17588_s3 + $0x70] sm:$0xff] }
 0x146   :  { %v1297_v16 = vmul.f32 %v1281_v38, %v1265_v42  ;;  %v1283_v9 = vmul.f32 %v1267_v18, %v1267_v18  ;;  %v2002_v40 = vld [vmem:[%s17588_s3 + $0x38] sm:$0xff]  ;;  %v2004_v41 = vld [vmem:[%s17588_s3 + $0x48] sm:$0xff] }
 0x147   :  { %1366 = vrot.lane.b32.xlu1 %v1325_v48, %s17715_s4  ;;  %v1327_v55 = vmax.f32 %v1311_v37, 0.0  ;;  %v10350_v37 = vld [vmem:[%s17758_s23] sm:$0xff]  ;;  %v2010_v49 = vld [vmem:[%s17588_s3 + $0x78] sm:$0xff] }
 0x148   :  { %v1313_v47 = vsub.f32 1.0, %v1297_v16  ;;  %v1299_v58 = vmul.f32 %v1283_v9, %v1267_v18  ;;  %v2006_v18 = vld [vmem:[%s17588_s3 + $0x58] sm:$0xff]  ;;  %v10351_v9 = vld [vmem:[%s17758_s23 + $0x10] sm:$0xff] }
 0x149   :  { %2095 = vrot.lane.b32.xlu0 %v11407_v39, %s10421_s20 }
 0x14a   :  { %v1329_v57 = vmax.f32 %v1313_v47, 0.0  ;;  %v1315_v34 = vsub.f32 1.0, %v1299_v58 }
 0x14b   :  { %1370 = vrot.lane.b32.xlu1 %v1327_v55, %s17715_s4 }
 0x14c   :  { %v1331_v45 = vmax.f32 %v1315_v34, 0.0  ;;  %v10352_v34 = vld [vmem:[%s17758_s23 + $0x20] sm:$0xff] }
 0x14d   :  { %2099 = vrot.lane.b32.xlu0 %v1967_v22, %s10421_s20  ;;  %v2008_v22 = vld [vmem:[%s17588_s3 + $0x68] sm:$0xff]  ;;  %s10430_s3 = smov 4  }
 0x14f   :  { %1374 = vrot.lane.b32.xlu1 %v1329_v57, %s17715_s4 }
 0x151   :  { %2103 = vrot.lane.b32.xlu0 %v1969_v43, %s10421_s20 }
 0x153   :  { %1378 = vrot.lane.b32.xlu1 %v1331_v45, %s17715_s4 }
 0x155   :  { %2107 = vrot.lane.b32.xlu0 %v1971_v53, %s10421_s20 }
 0x157   :  { %2093 = vrot.lane.b32.xlu1 %v11428_v20, %s10421_s20 }
 0x159   :  { %2111 = vrot.lane.b32.xlu0 %v1973_v50, %s10421_s20 }
 0x15b   :  { %2097 = vrot.lane.b32.xlu1 %v11439_v0, %s10421_s20 }
 0x15d   :  { %2115 = vrot.lane.b32.xlu0 %v1975_v14, %s10421_s20  ;;  %v10353_v14 = vld [vmem:[%s17758_s23 + $0x30] sm:$0xff] }
 0x15f   :  { %2101 = vrot.lane.b32.xlu1 %v1968_v3, %s10421_s20 }
 0x161   :  { %2119 = vrot.lane.b32.xlu0 %v1977_v5, %s10421_s20 }
 0x163   :  { %2105 = vrot.lane.b32.xlu1 %v1970_v7, %s10421_s20 }
 0x165   :  { %2219 = vrot.lane.b32.xlu0 %v1979_v2, %s10423_s24  ;;  %v10354_v2 = vld [vmem:[%s17758_s23 + $0x40] sm:$0xff] }
 0x167   :  { %2109 = vrot.lane.b32.xlu1 %v1972_v21, %s10421_s20  ;;  %v11653_v21 = vld [vmem:[%s17758_s23 + $0x8] sm:$0xff] }
 0x169   :  { %2223 = vrot.lane.b32.xlu0 %v1981_v27, %s10423_s24 }
 0x16b   :  { %2113 = vrot.lane.b32.xlu1 %v1974_v10, %s10421_s20 }
 0x16d   :  { %2227 = vrot.lane.b32.xlu0 %v1983_v51, %s10423_s24 }
 0x16f   :  { %2117 = vrot.lane.b32.xlu1 %v1976_v56, %s10421_s20 }
 0x171   :  { %2231 = vrot.lane.b32.xlu0 %v1985_v32, %s10423_s24  ;;  %v10356_v32 = vld [vmem:[%s17758_s23 + $0x18] sm:$0xff] }
 0x173   :  { %2121 = vrot.lane.b32.xlu1 %v1978_v44, %s10421_s20  ;;  %s10424_s20 = smov 16  }
 0x175   :  { %2235 = vrot.lane.b32.xlu0 %v1987_v61, %s10423_s24 }
 0x177   :  { %2221 = vrot.lane.b32.xlu1 %v1980_v62, %s10423_s24 }
 0x179   :  { %2239 = vrot.lane.b32.xlu0 %v1989_v52, %s10423_s24 }
 0x17b   :  { %2225 = vrot.lane.b32.xlu1 %v1982_v35, %s10423_s24 }
 0x17d   :  { %2243 = vrot.lane.b32.xlu0 %v1991_v29, %s10423_s24 }
 0x17f   :  { %2229 = vrot.lane.b32.xlu1 %v1984_v28, %s10423_s24 }
 0x181   :  { %2247 = vrot.lane.b32.xlu0 %v1993_v11, %s10423_s24 }
 0x183   :  { %2233 = vrot.lane.b32.xlu1 %v1986_v8, %s10423_s24 }
 0x185   :  { %2283 = vrot.lane.b32.xlu0 %v1995_v31, %s10424_s20  ;;  %v10357_v31 = vld [vmem:[%s17758_s23 + $0x28] sm:$0xff] }
 0x187   :  { %2237 = vrot.lane.b32.xlu1 %v1988_v23, %s10423_s24 }
 0x189   :  { %2287 = vrot.lane.b32.xlu0 %v1997_v17, %s10424_s20 }
 0x18b   :  { %2241 = vrot.lane.b32.xlu1 %v1990_v33, %s10423_s24 }
 0x18d   :  { %2291 = vrot.lane.b32.xlu0 %v1999_v26, %s10424_s20 }
 0x18f   :  { %2245 = vrot.lane.b32.xlu1 %v1992_v1, %s10423_s24 }
 0x191   :  { %2295 = vrot.lane.b32.xlu0 %v2001_v13, %s10424_s20 }
 0x193   :  { %2249 = vrot.lane.b32.xlu1 %v1994_v30, %s10423_s24  ;;  %v11559_v24 = vpop.permute.xlu0 %1348  ;;  %s17662_s24 = smov 42  }
 0x195   :  { %2299 = vrot.lane.b32.xlu0 %v2003_v59, %s10424_s20  ;;  %v10358_v59 = vld [vmem:[%s17758_s23 + $0x38] sm:$0xff] }
 0x197   :  { %2285 = vrot.lane.b32.xlu1 %v1996_v63, %s10424_s20  ;;  %v11569_v60 = vpop.permute.xlu0 %1352 }
 0x199   :  { %2303 = vrot.lane.b32.xlu0 %v2005_v6, %s10424_s20 }
 0x19b   :  { %2289 = vrot.lane.b32.xlu1 %v1998_v12, %s10424_s20  ;;  %v11582_v54 = vpop.permute.xlu0 %1356 }
 0x19d   :  { %2307 = vrot.lane.b32.xlu0 %v2007_v46, %s10424_s20 }
 0x19f   :  { %2293 = vrot.lane.b32.xlu1 %v2000_v4, %s10424_s20  ;;  %v11592_v36 = vpop.permute.xlu0 %1360 }
 0x1a1   :  { %2311 = vrot.lane.b32.xlu0 %v2009_v15, %s10424_s20 }
 0x1a3   :  { %2297 = vrot.lane.b32.xlu1 %v2002_v40, %s10424_s20  ;;  %v11599_v42 = vpop.permute.xlu0 %1364 }
 0x1a4   :  { %v1351_v19 = vpop.permute.xlu1 %1350 }
 0x1a5   :  { %v9534_v48 = vpop.f32.mrb[0].mxu1  ;;  %2433 = vrot.lane.b32.xlu0 %v10350_v37, %s17715_s4 }
 0x1a6   :  { %v885_v38 = vpop.f32.mrb[1].mxu1  ;;  %v965_v10 = vsub.f32 128.0, %v9534_v48 }
 0x1a7   :  { %2301 = vrot.lane.b32.xlu1 %v2004_v41, %s10424_s20  ;;  %v11609_v55 = vpop.permute.xlu0 %1368  ;;  %v964_v56 = vsub.f32 128.0, %v885_v38 }
 0x1a8   :  { %v1397_v62 = vmul.f32 %v1351_v19, %v965_v10  ;;  %v10359_v19 = vld [vmem:[%s17758_s23 + $0x48] sm:$0xff] }
 0x1a9   :  { %v9537_v16 = vpop.f32.mrb[2].mxu1  ;;  %2437 = vrot.lane.b32.xlu0 %v10351_v9, %s17715_s4  ;;  %v1396_v29 = vmul.f32 %v11559_v24, %v964_v56 }
 0x1aa   :  { %v895_v47 = vpop.f32.mrb[3].mxu1  ;;  %v1355_v58 = vpop.permute.xlu1 %1354  ;;  %v967_v28 = vsub.f32 128.0, %v9537_v16 }
 0x1ab   :  { %2305 = vrot.lane.b32.xlu1 %v2006_v18, %s10424_s20  ;;  %v966_v8 = vsub.f32 128.0, %v895_v47 }
 0x1ac   :  { %v1399_v13 = vmul.f32 %v1355_v58, %v967_v28 }
 0x1ad   :  { %v11619_v57 = vpop.f32.mrb[4].mxu1  ;;  %2441 = vrot.lane.b32.xlu0 %v10352_v34, %s17715_s4  ;;  %v11625_v43 = vpop.permute.xlu0 %1372  ;;  %v1398_v30 = vmul.f32 %v11569_v60, %v966_v8 }
 0x1ae   :  { %v11627_v45 = vpop.f32.mrb[5].mxu1  ;;  %v969_v6 = vsub.f32 128.0, %v11619_v57 }
 0x1af   :  { %2309 = vrot.lane.b32.xlu1 %v2008_v22, %s10424_s20  ;;  %v968_v60 = vsub.f32 128.0, %v11627_v45 }
 0x1b1   :  { %v1359_v53 = vpop.permute.xlu1 %1358  ;;  %v11633_v50 = vpop.f32.mrb[6].mxu1  ;;  %2445 = vrot.lane.b32.xlu0 %v10353_v14, %s17715_s4  ;;  %v1400_v18 = vmul.f32 %v11582_v54, %v968_v60 }
 0x1b2   :  { %v11639_v3 = vpop.f32.mrb[7].mxu1  ;;  %v1401_v37 = vmul.f32 %v1359_v53, %v969_v6  ;;  %v971_v10 = vsub.f32 128.0, %v11633_v50 }
 0x1b3   :  { %2313 = vrot.lane.b32.xlu1 %v2010_v49, %s10424_s20  ;;  %v11642_v5 = vpop.permute.xlu0 %1376  ;;  %s10425_s20 = smov 27   ;;  %v970_v56 = vsub.f32 128.0, %v11639_v3 }
 0x1b5   :  { %v11644_v7 = vpop.permute.xlu1 %1362  ;;  %2449 = vrot.lane.b32.xlu0 %v10354_v2, %s17715_s4  ;;  %v1402_v8 = vmul.f32 %v11592_v36, %v970_v56 }
 0x1b7   :  { %2435 = vrot.lane.b32.xlu1 %v11653_v21, %s17715_s4  ;;  %v11657_v27 = vpop.permute.xlu0 %2091 }
 0x1b8   :  { %17761 = vst [vmem:[#allocation2_spill] sm:$0xff] %v11657_v27 }
 0x1b9   :  { %v11659_v51 = vpop.permute.xlu1 %1366  ;;  %3807 = vrot.lane.b32.xlu0 %v11398_v25, %s10425_s20 }
 0x1bb   :  { %2439 = vrot.lane.b32.xlu1 %v10356_v32, %s17715_s4  ;;  %v11669_v61 = vpop.permute.xlu0 %2095 }
 0x1bc   :  { %v11667_v44 = vpop.f32.mrb[8].mxu1  ;;  %17762 = vst [vmem:[#allocation3_spill] sm:$0xff] %v11669_v61 }
 0x1bd   :  { %v11671_v52 = vpop.permute.xlu1 %1370  ;;  %v11673_v35 = vpop.f32.mrb[9].mxu1  ;;  %3855 = vrot.lane.b32.xlu0 %v11398_v25, %s10426_s19  ;;  %v973_v3 = vsub.f32 128.0, %v11667_v44 }
 0x1be   :  { %v11678_v11 = vpop.f32.mrb[0].mxu0 }
 0x1bf   :  { %2443 = vrot.lane.b32.xlu1 %v10357_v31, %s17715_s4  ;;  %v11685_v23 = vadd.f32 %v11678_v11, %v1397_v62  ;;  %v11687_v17 = vpop.f32.mrb[1].mxu0  ;;  %v11692_v26 = vpop.permute.xlu0 %2099  ;;  %v1405_v44 = vmul.f32 %v11659_v51, %v973_v3 }
 0x1c0   :  { %v11690_v33 = vadd.f32 %v1396_v29, %v11687_v17  ;;  %17765 = vst [vmem:[#allocation6_spill] sm:$0xff] %v11692_v26  ;;  %v1403_v29 = vmul.f32 %v11644_v7, %v971_v10  ;;  %v972_v7 = vsub.f32 128.0, %v11673_v35 }
 0x1c1   :  { %17763 = vst [vmem:[#allocation4_spill] sm:$0xff] %v11685_v23  ;;  %v11694_v1 = vpop.permute.xlu1 %1374  ;;  %3903 = vrot.lane.b32.xlu0 %v11398_v25, %s17682_s25 }
 0x1c2   :  { %17764 = vst [vmem:[#allocation5_spill] sm:$0xff] %v11690_v33  ;;  %v1428_v53 = vadd.f32 1e-12, %v11690_v33 }
 0x1c3   :  { %2447 = vrot.lane.b32.xlu1 %v10358_v59, %s17715_s4  ;;  %v11703_v24 = vpop.f32.mrb[2].mxu0  ;;  %v11705_v63 = vpop.f32.mrb[10].mxu1 }
 0x1c4   :  { %v11709_v12 = vadd.f32 %v11703_v24, %v1399_v13  ;;  %v11711_v46 = vpop.f32.mrb[3].mxu0  ;;  %v11713_v4 = vpop.f32.mrb[11].mxu1 }
 0x1c5   :  { %v11716_v15 = vpop.permute.xlu1 %1378  ;;  %v11719_v40 = vadd.f32 %v1398_v30, %v11711_v46  ;;  %v11721_v41 = vpop.permute.xlu0 %2103  ;;  %3763 = vrot.lane.b32.xlu0 %v11407_v39, %s10428_s28  ;;  %v974_v10 = vsub.f32 128.0, %v11713_v4 }
 0x1c6   :  { %17766 = vst [vmem:[#allocation7_spill] sm:$0xff] %v11709_v12  ;;  %17768 = vst [vmem:[#allocation9_spill] sm:$0xff] %v11721_v41  ;;  %v1431_v2 = vadd.f32 1e-12, %v11709_v12 }
 0x1c7   :  { %17767 = vst [vmem:[#allocation8_spill] sm:$0xff] %v11719_v40  ;;  %2451 = vrot.lane.b32.xlu1 %v10359_v19, %s17715_s4  ;;  %v11729_v48 = vpop.f32.mrb[12].mxu1  ;;  %v1404_v19 = vmul.f32 %v11599_v42, %v972_v7  ;;  %v1406_v3 = vmul.f32 %v11609_v55, %v974_v10 }
 0x1c8   :  { %v11731_v38 = vpop.f32.mrb[13].mxu1  ;;  %v11736_v9 = vpop.f32.mrb[4].mxu0 }
 0x1c9   :  { %v11734_v16 = vpop.permute.xlu1 %2093  ;;  %3765 = vrot.lane.b32.xlu0 %v11439_v0, %s10428_s28  ;;  %v11741_v47 = vadd.f32 %v11736_v9, %v1401_v37  ;;  %v11743_v58 = vpop.f32.mrb[5].mxu0  ;;  %v976_v4 = vsub.f32 128.0, %v11731_v38 }
 0x1ca   :  { %17769 = vst [vmem:[#allocation10_spill] sm:$0xff] %v11734_v16  ;;  %v11745_v22 = vpop.permute.xlu0 %2107  ;;  %v11750_v57 = vadd.f32 %v1400_v18, %v11743_v58 }
 0x1cb   :  { %17770 = vst [vmem:[#allocation11_spill] sm:$0xff] %v11741_v47  ;;  %17771 = vst [vmem:[#allocation12_spill] sm:$0xff] %v11745_v22  ;;  %3759 = vrot.lane.b32.xlu1 %v11398_v25, %s10428_s28  ;;  %v11752_v54 = vpop.f32.mrb[14].mxu1  ;;  %v1433_v62 = vadd.f32 1e-12, %v11741_v47  ;;  %v1408_v10 = vmul.f32 %v11625_v43, %v976_v4 }
 0x1cc   :  { %17772 = vst [vmem:[#allocation13_spill] sm:$0xff] %v11750_v57  ;;  %v11754_v34 = vpop.f32.mrb[15].mxu1  ;;  %v979_v55 = vsub.f32 128.0, %v11752_v54 }
 0x1cd   :  { %v11756_v45 = vpop.permute.xlu1 %2097  ;;  %3813 = vrot.lane.b32.xlu0 %v11439_v0, %s10425_s20 }
 0x1ce   :  { %17773 = vst [vmem:[#allocation14_spill] sm:$0xff] %v11756_v45  ;;  %v11760_v49 = vpop.permute.xlu0 %2111  ;;  %v1411_v43 = vmul.f32 %v11716_v15, %v979_v55 }
 0x1cf   :  { %17774 = vst [vmem:[#allocation15_spill] sm:$0xff] %v11760_v49  ;;  %3761 = vrot.lane.b32.xlu1 %v11428_v20, %s10428_s28 }
 0x1d1   :  { %v11765_v25 = vpop.permute.xlu1 %2101  ;;  %1446 = vperm.xlu0 %10059, %v1428_v53   ;;  %v975_v53 = vsub.f32 128.0, %v11705_v63  ;;  %v977_v63 = vsub.f32 128.0, %v11729_v48  ;;  %v1430_v48 = vadd.f32 1e-12, %v11719_v40 }
 0x1d2   :  { %17775 = vst [vmem:[#allocation16_spill] sm:$0xff] %v11765_v25  ;;  %v11767_v14 = vpop.permute.xlu0 %2115 }
 0x1d3   :  { %17776 = vst [vmem:[#allocation17_spill] sm:$0xff] %v11767_v14  ;;  %3809 = vrot.lane.b32.xlu1 %v11428_v20, %s10425_s20 }
 0x1d5   :  { %v11773_v0 = vpop.permute.xlu1 %2105  ;;  %1461 = vperm.xlu0 %10059, %v1431_v2  }
 0x1d6   :  { %17777 = vst [vmem:[#allocation18_spill] sm:$0xff] %v11773_v0  ;;  %v11776_v32 = vpop.permute.xlu0 %2119 }
 0x1d7   :  { %17778 = vst [vmem:[#allocation19_spill] sm:$0xff] %v11776_v32  ;;  %3857 = vrot.lane.b32.xlu1 %v11428_v20, %s10426_s19 }
 0x1d8   :  { %v11785_v31 = vpop.f32.mrb[6].mxu0 }
 0x1d9   :  { %v11782_v28 = vpop.permute.xlu1 %2109  ;;  %1471 = vperm.xlu0 %10059, %v1433_v62   ;;  %v11791_v13 = vadd.f32 %v11785_v31, %v1403_v29  ;;  %v11793_v30 = vpop.f32.mrb[7].mxu0  ;;  %v1429_v62 = vadd.f32 1e-12, %v11685_v23  ;;  %v1407_v29 = vmul.f32 %v11671_v52, %v975_v53 }
 0x1da   :  { %17779 = vst [vmem:[#allocation20_spill] sm:$0xff] %v11782_v28  ;;  %v11787_v50 = vpop.permute.xlu0 %2219  ;;  %v11799_v59 = vadd.f32 %v1402_v8, %v11793_v30 }
 0x1db   :  { %17780 = vst [vmem:[#allocation21_spill] sm:$0xff] %v11787_v50  ;;  %17781 = vst [vmem:[#allocation22_spill] sm:$0xff] %v11791_v13  ;;  %3905 = vrot.lane.b32.xlu1 %v11428_v20, %s17682_s25  ;;  %v1435_v6 = vadd.f32 1e-12, %v11791_v13 }
 0x1dc   :  { %17782 = vst [vmem:[#allocation23_spill] sm:$0xff] %v11799_v59  ;;  %v1434_v15 = vadd.f32 1e-12, %v11799_v59 }
 0x1dd   :  { %v11801_v36 = vpop.permute.xlu1 %2113  ;;  %1481 = vperm.xlu0 %10059, %v1435_v6  }
 0x1de   :  { %17783 = vst [vmem:[#allocation24_spill] sm:$0xff] %v11801_v36  ;;  %v11804_v60 = vpop.permute.xlu0 %2223 }
 0x1df   :  { %17784 = vst [vmem:[#allocation25_spill] sm:$0xff] %v11804_v60  ;;  %3811 = vrot.lane.b32.xlu1 %v11407_v39, %s10425_s20  ;;  %v11810_v20 = vpop.f32.mrb[8].mxu0 }
 0x1e0   :  { %v11813_v35 = vadd.f32 %v11810_v20, %v1405_v44  ;;  %v11815_v37 = vpop.f32.mrb[9].mxu0 }
 0x1e1   :  { %v11817_v18 = vpop.permute.xlu1 %2117  ;;  %v11821_v2 = vadd.f32 %v1404_v19, %v11815_v37  ;;  %v1409_v19 = vmul.f32 %v11694_v1, %v977_v63  ;;  %v1432_v63 = vadd.f32 1e-12, %v11750_v57 }
 0x1e2   :  { %17785 = vst [vmem:[#allocation26_spill] sm:$0xff] %v11813_v35  ;;  %17786 = vst [vmem:[#allocation27_spill] sm:$0xff] %v11817_v18  ;;  %v11823_v51 = vpop.permute.xlu0 %2227  ;;  %v1437_v42 = vadd.f32 1e-12, %v11813_v35 }
 0x1e3   :  { %17787 = vst [vmem:[#allocation28_spill] sm:$0xff] %v11821_v2  ;;  %17788 = vst [vmem:[#allocation29_spill] sm:$0xff] %v11823_v51  ;;  %3859 = vrot.lane.b32.xlu1 %v11407_v39, %s10426_s19 }
 0x1e4   :  { %1491 = vperm.xlu0 %10059, %v1437_v42   ;;  %v978_v42 = vsub.f32 128.0, %v11754_v34 }
 0x1e5   :  { %v11829_v56 = vpop.permute.xlu1 %2121 }
 0x1e6   :  { %17789 = vst [vmem:[#allocation30_spill] sm:$0xff] %v11829_v56  ;;  %v11834_v8 = vpop.permute.xlu0 %2231 }
 0x1e7   :  { %17790 = vst [vmem:[#allocation31_spill] sm:$0xff] %v11834_v8  ;;  %v11838_v7 = vpop.f32.mrb[10].mxu0  ;;  %1451 = vperm.xlu1 %10058, %v1429_v62  }
 0x1e8   :  { %v11841_v39 = vadd.f32 %v11838_v7, %v1407_v29  ;;  %v11843_v6 = vpop.f32.mrb[11].mxu0 }
 0x1e9   :  { %v11846_v44 = vadd.f32 %v1406_v3, %v11843_v6  ;;  %v11848_v52 = vpop.permute.xlu1 %2221 }
 0x1ea   :  { %17791 = vst [vmem:[#allocation32_spill] sm:$0xff] %v11841_v39  ;;  %17793 = vst [vmem:[#allocation34_spill] sm:$0xff] %v11848_v52  ;;  %v1439_v38 = vadd.f32 1e-12, %v11841_v39  ;;  %v11854_v53 = vpop.permute.xlu0 %2235 }
 0x1eb   :  { %17792 = vst [vmem:[#allocation33_spill] sm:$0xff] %v11846_v44  ;;  %17794 = vst [vmem:[#allocation35_spill] sm:$0xff] %v11854_v53  ;;  %v11858_v62 = vpop.f32.mrb[12].mxu0  ;;  %1456 = vperm.xlu1 %10058, %v1430_v48   ;;  %v1410_v48 = vmul.f32 %v11642_v5, %v978_v42 }
 0x1ec   :  { %v11861_v29 = vadd.f32 %v11858_v62, %v1409_v19  ;;  %v11863_v3 = vpop.f32.mrb[13].mxu0  ;;  %1501 = vperm.xlu0 %10059, %v1439_v38  }
 0x1ed   :  { %v11866_v1 = vadd.f32 %v1408_v10, %v11863_v3  ;;  %v11868_v54 = vpop.permute.xlu1 %2225 }
 0x1ee   :  { %17795 = vst [vmem:[#allocation36_spill] sm:$0xff] %v11861_v29  ;;  %17797 = vst [vmem:[#allocation38_spill] sm:$0xff] %v11868_v54  ;;  %v1441_v34 = vadd.f32 1e-12, %v11861_v29  ;;  %v11873_v4 = vpop.permute.xlu0 %2239 }
 0x1ef   :  { %17796 = vst [vmem:[#allocation37_spill] sm:$0xff] %v11866_v1  ;;  %17798 = vst [vmem:[#allocation39_spill] sm:$0xff] %v11873_v4  ;;  %v11876_v19 = vpop.f32.mrb[14].mxu0  ;;  %1466 = vperm.xlu1 %10058, %v1432_v63   ;;  %v1436_v63 = vadd.f32 1e-12, %v11821_v2 }
 0x1f0   :  { %v11879_v38 = vadd.f32 %v11876_v19, %v1411_v43  ;;  %v11881_v10 = vpop.f32.mrb[15].mxu0  ;;  %1511 = vperm.xlu0 %10059, %v1441_v34   ;;  %v17804_v43 = vmov 0  }
 0x1f1   :  { %v11884_v56 = vadd.f32 %v1410_v48, %v11881_v10  ;;  %v11886_v32 = vpop.permute.xlu1 %2229  ;;  %v1438_v48 = vadd.f32 1e-12, %v11846_v44 }
 0x1f2   :  { %17799 = vst [vmem:[#allocation40_spill] sm:$0xff] %v11879_v38  ;;  %17801 = vst [vmem:[#allocation42_spill] sm:$0xff] %v11886_v32  ;;  %v1443_v55 = vadd.f32 1e-12, %v11879_v38  ;;  %v11890_v5 = vpop.permute.xlu0 %2243 }
 0x1f3   :  { %17800 = vst [vmem:[#allocation41_spill] sm:$0xff] %v11884_v56  ;;  %1476 = vperm.xlu1 %10058, %v1434_v15   ;;  %17802 = vst [vmem:[#allocation43_spill] sm:$0xff] %v11890_v5  ;;  %v1440_v15 = vadd.f32 1e-12, %v11866_v1 }
 0x1f4   :  { %1521 = vperm.xlu0 %10059, %v1443_v55  }
 0x1f5   :  { %v11892_v42 = vpop.permute.xlu1 %2233 }
 0x1f6   :  { %17803 = vst [vmem:[#allocation44_spill] sm:$0xff] %v11892_v42  ;;  %v11899_v18 = vpop.permute.xlu0 %2247 }
 0x1f7   :  { %1486 = vperm.xlu1 %10058, %v1436_v63   ;;  %17806 = vst [vmem:[#allocation46_spill] sm:$0xff] %v11899_v18  ;;  %v1442_v63 = vadd.f32 1e-12, %v11884_v56 }
 0x1f8   :  { %10060 = vset.pattern.permute.xlu0 %v17804_v43 }
 0x1f9   :  { %v11896_v34 = vpop.permute.xlu1 %2237 }
 0x1fa   :  { %17805 = vst [vmem:[#allocation45_spill] sm:$0xff] %v11896_v34  ;;  %v11904_v55 = vpop.permute.xlu0 %2283 }
 0x1fb   :  { %1496 = vperm.xlu1 %10058, %v1438_v48   ;;  %17808 = vst [vmem:[#allocation48_spill] sm:$0xff] %v11904_v55 }
 0x1fd   :  { %v11901_v4 = vpop.permute.xlu1 %2241 }
 0x1fe   :  { %17807 = vst [vmem:[#allocation47_spill] sm:$0xff] %v11901_v4  ;;  %v11911_v34 = vpop.permute.xlu0 %2287 }
 0x1ff   :  { %1506 = vperm.xlu1 %10058, %v1440_v15   ;;  %17811 = vst [vmem:[#allocation51_spill] sm:$0xff] %v11911_v34 }
 0x201   :  { %v11906_v5 = vpop.permute.xlu1 %2245 }
 0x202   :  { %17809 = vst [vmem:[#allocation49_spill] sm:$0xff] %v11906_v5  ;;  %v11916_v48 = vpop.permute.xlu0 %2291 }
 0x203   :  { %1516 = vperm.xlu1 %10058, %v1442_v63   ;;  %17813 = vst [vmem:[#allocation53_spill] sm:$0xff] %v11916_v48 }
 0x205   :  { %v11909_v38 = vpop.permute.xlu1 %2249 }
 0x206   :  { %17810 = vst [vmem:[#allocation50_spill] sm:$0xff] %v11909_v38  ;;  %v11922_v14 = vpop.permute.xlu0 %2295 }
 0x207   :  { %10061 = vset.pattern.permute.xlu1 %v17804_v43  ;;  %17816 = vst [vmem:[#allocation56_spill] sm:$0xff] %v11922_v14 }
 0x209   :  { %v11914_v18 = vpop.permute.xlu1 %2285 }
 0x20a   :  { %17812 = vst [vmem:[#allocation52_spill] sm:$0xff] %v11914_v18  ;;  %v11926_v53 = vpop.permute.xlu0 %2299 }
 0x20b   :  { %17818 = vst [vmem:[#allocation58_spill] sm:$0xff] %v11926_v53 }
 0x20d   :  { %v11918_v4 = vpop.permute.xlu1 %2289 }
 0x20e   :  { %17814 = vst [vmem:[#allocation54_spill] sm:$0xff] %v11918_v4  ;;  %v11932_v42 = vpop.permute.xlu0 %2303 }
 0x20f   :  { %17821 = vst [vmem:[#allocation61_spill] sm:$0xff] %v11932_v42 }
 0x211   :  { %v11920_v15 = vpop.permute.xlu1 %2293 }
 0x212   :  { %17815 = vst [vmem:[#allocation55_spill] sm:$0xff] %v11920_v15  ;;  %v11936_v49 = vpop.permute.xlu0 %2307 }
 0x213   :  { %17823 = vst [vmem:[#allocation63_spill] sm:$0xff] %v11936_v49 }
 0x215   :  { %v11924_v5 = vpop.permute.xlu1 %2297 }
 0x216   :  { %17817 = vst [vmem:[#allocation57_spill] sm:$0xff] %v11924_v5  ;;  %v11942_v15 = vpop.permute.xlu0 %2311 }
 0x217   :  { %17826 = vst [vmem:[#allocation66_spill] sm:$0xff] %v11942_v15 }
 0x219   :  { %v11928_v63 = vpop.permute.xlu1 %2301 }
 0x21a   :  { %17819 = vst [vmem:[#allocation59_spill] sm:$0xff] %v11928_v63  ;;  %v11946_v5 = vpop.permute.xlu0 %2433 }
 0x21b   :  { %17828 = vst [vmem:[#allocation68_spill] sm:$0xff] %v11946_v5 }
 0x21d   :  { %v11930_v38 = vpop.permute.xlu1 %2305 }
 0x21e   :  { %17820 = vst [vmem:[#allocation60_spill] sm:$0xff] %v11930_v38  ;;  %v11952_v38 = vpop.permute.xlu0 %2437 }
 0x21f   :  { %17831 = vst [vmem:[#allocation71_spill] sm:$0xff] %v11952_v38 }
 0x221   :  { %v11934_v43 = vpop.permute.xlu1 %2309 }
 0x222   :  { %17822 = vst [vmem:[#allocation62_spill] sm:$0xff] %v11934_v43  ;;  %v11956_v43 = vpop.permute.xlu0 %2441 }
 0x223   :  { %17833 = vst [vmem:[#allocation73_spill] sm:$0xff] %v11956_v43 }
 0x225   :  { %v11938_v48 = vpop.permute.xlu1 %2313 }
 0x226   :  { %17824 = vst [vmem:[#allocation64_spill] sm:$0xff] %v11938_v48  ;;  %v11960_v48 = vpop.permute.xlu0 %2445 }
 0x227   :  { %17835 = vst [vmem:[#allocation75_spill] sm:$0xff] %v11960_v48 }
 0x229   :  { %v11940_v8 = vpop.permute.xlu1 %2435 }
 0x22a   :  { %17825 = vst [vmem:[#allocation65_spill] sm:$0xff] %v11940_v8  ;;  %v11964_v15 = vpop.permute.xlu0 %2449 }
 0x22b   :  { %17837 = vst [vmem:[#allocation77_spill] sm:$0xff] %v11964_v15 }
 0x22d   :  { %v11944_v14 = vpop.permute.xlu1 %2439 }
 0x22e   :  { %17827 = vst [vmem:[#allocation67_spill] sm:$0xff] %v11944_v14  ;;  %v11968_v34 = vpop.permute.xlu0 %3807 }
 0x22f   :  { %17839 = vst [vmem:[#allocation79_spill] sm:$0xff] %v11968_v34 }
 0x231   :  { %v11948_v53 = vpop.permute.xlu1 %2443 }
 0x232   :  { %17829 = vst [vmem:[#allocation69_spill] sm:$0xff] %v11948_v53  ;;  %v11972_v55 = vpop.permute.xlu0 %3855 }
 0x233   :  { %17841 = vst [vmem:[#allocation81_spill] sm:$0xff] %v11972_v55 }
 0x235   :  { %v11950_v63 = vpop.permute.xlu1 %2447 }
 0x236   :  { %17830 = vst [vmem:[#allocation70_spill] sm:$0xff] %v11950_v63  ;;  %v11976_v36 = vpop.permute.xlu0 %3903 }
 0x237   :  { %17843 = vst [vmem:[#allocation83_spill] sm:$0xff] %v11976_v36 }
 0x239   :  { %v11954_v42 = vpop.permute.xlu1 %2451 }
 0x23a   :  { %17832 = vst [vmem:[#allocation72_spill] sm:$0xff] %v11954_v42  ;;  %v11980_v60 = vpop.permute.xlu0 %3763 }
 0x23b   :  { %17845 = vst [vmem:[#allocation85_spill] sm:$0xff] %v11980_v60 }
 0x23d   :  { %v11958_v49 = vpop.permute.xlu1 %3759 }
 0x23e   :  { %17834 = vst [vmem:[#allocation74_spill] sm:$0xff] %v11958_v49  ;;  %v11984_v54 = vpop.permute.xlu0 %3765 }
 0x23f   :  { %17847 = vst [vmem:[#allocation87_spill] sm:$0xff] %v11984_v54 }
 0x241   :  { %v11962_v51 = vpop.permute.xlu1 %3761 }
 0x242   :  { %17836 = vst [vmem:[#allocation76_spill] sm:$0xff] %v11962_v51  ;;  %v11986_v52 = vpop.permute.xlu0 %3813 }
 0x243   :  { %17848 = vst [vmem:[#allocation88_spill] sm:$0xff] %v11986_v52 }
 0x245   :  { %v11966_v32 = vpop.permute.xlu1 %3809 }
 0x246   :  { %17838 = vst [vmem:[#allocation78_spill] sm:$0xff] %v11966_v32 }
 0x249   :  { %v11970_v4 = vpop.permute.xlu1 %3857 }
 0x24a   :  { %17840 = vst [vmem:[#allocation80_spill] sm:$0xff] %v11970_v4 }
 0x24d   :  { %v11974_v18 = vpop.permute.xlu1 %3905 }
 0x24e   :  { %17842 = vst [vmem:[#allocation82_spill] sm:$0xff] %v11974_v18 }
 0x250   :  { %v1447_v41 = vpop.permute.xlu0 %1446 }
 0x251   :  { %v11978_v22 = vpop.permute.xlu1 %3811 }
 0x252   :  { %17844 = vst [vmem:[#allocation84_spill] sm:$0xff] %v11978_v22 }
 0x255   :  { %v11982_v50 = vpop.permute.xlu1 %3859 }
 0x256   :  { %17846 = vst [vmem:[#allocation86_spill] sm:$0xff] %v11982_v50 }
 0x266   :  { %v1452_v15 = vpop.permute.xlu1 %1451 }
 0x267   :  { %10126 = vrcp.f32 %v1452_v15 }
 0x268   :  { %10128 = vrcp.f32 %v1447_v41 }
 0x271   :  { %v10127_v28 = vpop.eup %10126 }
 0x272   :  { %v11989_v0 = vmul.f32 %v10127_v28, %v11678_v11  ;;  %v1462_v11 = vpop.permute.xlu0 %1461  ;;  %v10129_v28 = vpop.eup %10128 }
 0x273   :  { %10130 = vrcp.f32 %v1462_v11  ;;  %v12008_v41 = vmul.f32 %v10129_v28, %v11687_v17  ;;  %v12032_v11 = vld [vmem:[%s17589_s6] ss:$0 sm:$0xff]  ;;  %s17684_s6 = smov 28  }
 0x274   :  { %3569 = vrot.lane.b32.xlu0 %v11989_v0, %s17678_s29  ;;  %2029 = vrot.lane.b32.xlu1 %v11989_v0, %s10430_s3  ;;  %v12036_v28 = vsub.f32 %v11989_v0, %v12032_v11 }
 0x275   :  { %v12056_v26 = vsub.f32 %v12008_v41, %v12032_v11 }
 0x276   :  { %v1472_v61 = vpop.permute.xlu0 %1471 }
 0x277   :  { %v12064_v25 = vmul.f32 %v12056_v26, %v12056_v26 }
 0x278   :  { %3617 = vrot.lane.b32.xlu0 %v11989_v0, %s10431_s0  ;;  %3425 = vrot.lane.b32.xlu1 %v11989_v0, %s17715_s4 }
 0x27c   :  { %3665 = vrot.lane.b32.xlu0 %v11989_v0, %s10432_s17  ;;  %3473 = vrot.lane.b32.xlu1 %v11989_v0, %s17717_s18 }
 0x27d   :  { %v10131_v15 = vpop.eup %10130 }
 0x27e   :  { %v12023_v17 = vmul.f32 %v10131_v15, %v11703_v24  ;;  %v12044_v24 = vmul.f32 %v12036_v28, %v12036_v28  ;;  %v1457_v15 = vpop.permute.xlu1 %1456 }
 0x27f   :  { %10132 = vrcp.f32 %v1457_v15 }
 0x280   :  { %3713 = vrot.lane.b32.xlu0 %v11989_v0, %s17686_s21  ;;  %3521 = vrot.lane.b32.xlu1 %v11989_v0, %s17688_s22  ;;  %17849 = vst [vmem:[#allocation89_spill] sm:$0xff] %v12023_v17  ;;  %10134 = vrcp.f32 %v1472_v61 }
 0x282   :  { %v1467_v45 = vpop.permute.xlu1 %1466 }
 0x283   :  { %10136 = vrcp.f32 %v1467_v45  ;;  %v1482_v45 = vpop.permute.xlu0 %1481 }
 0x284   :  { %3615 = vrot.lane.b32.xlu1 %v12008_v41, %s10431_s0  ;;  %2027 = vrot.lane.b32.xlu0 %v12008_v41, %s10430_s3  ;;  %10138 = vrcp.f32 %v1482_v45 }
 0x286   :  { %v1477_v42 = vpop.permute.xlu1 %1476 }
 0x287   :  { %10140 = vrcp.f32 %v1477_v42 }
 0x288   :  { %3663 = vrot.lane.b32.xlu1 %v12008_v41, %s10432_s17  ;;  %3423 = vrot.lane.b32.xlu0 %v12008_v41, %s17715_s4 }
 0x289   :  { %v10133_v15 = vpop.eup %10132 }
 0x28a   :  { %v12075_v27 = vmul.f32 %v10133_v15, %v11711_v46  ;;  %v12091_v46 = vsub.f32 %v12023_v17, %v12032_v11  ;;  %v10135_v15 = vpop.eup %10134  ;;  %v1487_v29 = vpop.permute.xlu1 %1486 }
 0x28b   :  { %v12098_v61 = vmul.f32 %v10135_v15, %v11736_v9 }
 0x28c   :  { %3711 = vrot.lane.b32.xlu1 %v12008_v41, %s17686_s21  ;;  %3471 = vrot.lane.b32.xlu0 %v12008_v41, %s17717_s18  ;;  %17850 = vst [vmem:[#allocation90_spill] sm:$0xff] %v12075_v27  ;;  %v12102_v16 = vmul.f32 %v12091_v46, %v12091_v46  ;;  %v12118_v9 = vsub.f32 %v12075_v27, %v12032_v11 }
 0x28d   :  { %17851 = vst [vmem:[#allocation91_spill] sm:$0xff] %v12098_v61  ;;  %v10137_v15 = vpop.eup %10136  ;;  %v12152_v35 = vsub.f32 %v12098_v61, %v12032_v11 }
 0x28e   :  { %v12125_v56 = vmul.f32 %v10137_v15, %v11743_v58  ;;  %v12129_v1 = vmul.f32 %v12118_v9, %v12118_v9  ;;  %v1492_v58 = vpop.permute.xlu0 %1491  ;;  %v1497_v39 = vpop.permute.xlu1 %1496 }
 0x28f   :  { %v10139_v44 = vpop.eup %10138  ;;  %10142 = vrcp.f32 %v1492_v58 }
 0x290   :  { %3519 = vrot.lane.b32.xlu0 %v12008_v41, %s17688_s22  ;;  %2033 = vrot.lane.b32.xlu1 %v12023_v17, %s10430_s3  ;;  %17852 = vst [vmem:[#allocation92_spill] sm:$0xff] %v12125_v56  ;;  %v12148_v45 = vmul.f32 %v10139_v44, %v11785_v31  ;;  %v12156_v2 = vsub.f32 %v12125_v56, %v12032_v11  ;;  %10144 = vrcp.f32 %v1487_v29 }
 0x291   :  { %v12164_v31 = vmul.f32 %v12152_v35, %v12152_v35  ;;  %v10141_v43 = vpop.eup %10140 }
 0x292   :  { %v1502_v15 = vpop.permute.xlu0 %1501  ;;  %17853 = vst [vmem:[#allocation93_spill] sm:$0xff] %v12148_v45  ;;  %v1507_v48 = vpop.permute.xlu1 %1506  ;;  %v12168_v44 = vmul.f32 %v12156_v2, %v12156_v2  ;;  %v12181_v14 = vmul.f32 %v10141_v43, %v11793_v30  ;;  %v12197_v52 = vsub.f32 %v12148_v45, %v12032_v11 }
 0x293   :  { %10146 = vrcp.f32 %v1502_v15 }
 0x294   :  { %3567 = vrot.lane.b32.xlu0 %v12008_v41, %s17678_s29  ;;  %3573 = vrot.lane.b32.xlu1 %v12023_v17, %s17678_s29  ;;  %17854 = vst [vmem:[#allocation94_spill] sm:$0xff] %v12181_v14  ;;  %v12212_v54 = vmul.f32 %v12197_v52, %v12197_v52  ;;  %v12216_v8 = vsub.f32 %v12181_v14, %v12032_v11  ;;  %10148 = vrcp.f32 %v1497_v39 }
 0x296   :  { %v1512_v63 = vpop.permute.xlu0 %1511  ;;  %v12174_v53 = vpop.permute.xlu1 %1516 }
 0x297   :  { %10150 = vrcp.f32 %v1512_v63 }
 0x298   :  { %1613 = vrot.lane.b32.xlu0 %v12044_v24, %s10417_s5  ;;  %3621 = vrot.lane.b32.xlu1 %v12023_v17, %s10431_s0  ;;  %10152 = vrcp.f32 %v1507_v48 }
 0x299   :  { %v10143_v30 = vpop.eup %10142 }
 0x29a   :  { %v1522_v42 = vpop.permute.xlu0 %1521  ;;  %v12204_v43 = vmul.f32 %v10143_v30, %v11810_v20  ;;  %v12228_v30 = vmul.f32 %v12216_v8, %v12216_v8  ;;  %v10145_v5 = vpop.eup %10144 }
 0x29b   :  { %v12235_v50 = vmul.f32 %v10145_v5, %v11815_v37  ;;  %10154 = vrcp.f32 %v1522_v42 }
 0x29c   :  { %1677 = vrot.lane.b32.xlu0 %v12044_v24, %s10418_s30  ;;  %3669 = vrot.lane.b32.xlu1 %v12023_v17, %s10432_s17  ;;  %17859 = vst [vmem:[#allocation99_spill] sm:$0xff] %v12204_v43  ;;  %10156 = vrcp.f32 %v12174_v53 }
 0x29d   :  { %17864 = vst [vmem:[#allocation104_spill] sm:$0xff] %v12235_v50  ;;  %v10147_v47 = vpop.eup %10146 }
 0x29e   :  { %v12250_v39 = vmul.f32 %v10147_v47, %v11838_v7  ;;  %v10149_v57 = vpop.eup %10148 }
 0x29f   :  { %v12281_v18 = vmul.f32 %v10149_v57, %v11843_v6 }
 0x2a0   :  { %3429 = vrot.lane.b32.xlu0 %v12023_v17, %s17715_s4  ;;  %3717 = vrot.lane.b32.xlu1 %v12023_v17, %s17686_s21  ;;  %17867 = vst [vmem:[#allocation107_spill] sm:$0xff] %v12250_v39  ;;  %v12289_v51 = vsub.f32 %v12250_v39, %v12032_v11 }
 0x2a1   :  { %17872 = vst [vmem:[#allocation112_spill] sm:$0xff] %v12281_v18 }
 0x2a4   :  { %3477 = vrot.lane.b32.xlu0 %v12023_v17, %s17717_s18  ;;  %1611 = vrot.lane.b32.xlu1 %v12064_v25, %s10417_s5 }
 0x2a8   :  { %3525 = vrot.lane.b32.xlu0 %v12023_v17, %s17688_s22  ;;  %1675 = vrot.lane.b32.xlu1 %v12064_v25, %s10418_s30  ;;  %v12243_v17 = vsub.f32 %v12204_v43, %v12032_v11 }
 0x2ac   :  { %2031 = vrot.lane.b32.xlu0 %v12075_v27, %s10430_s3  ;;  %3427 = vrot.lane.b32.xlu1 %v12075_v27, %s17715_s4 }
 0x2b0   :  { %3619 = vrot.lane.b32.xlu0 %v12075_v27, %s10431_s0  ;;  %3475 = vrot.lane.b32.xlu1 %v12075_v27, %s17717_s18 }
 0x2b4   :  { %3667 = vrot.lane.b32.xlu0 %v12075_v27, %s10432_s17  ;;  %3523 = vrot.lane.b32.xlu1 %v12075_v27, %s17688_s22 }
 0x2b8   :  { %3715 = vrot.lane.b32.xlu0 %v12075_v27, %s17686_s21  ;;  %3571 = vrot.lane.b32.xlu1 %v12075_v27, %s17678_s29  ;;  %v12262_v27 = vsub.f32 %v12235_v50, %v12032_v11 }
 0x2ba   :  { %v12274_v63 = vmul.f32 %v12262_v27, %v12262_v27 }
 0x2bc   :  { %1617 = vrot.lane.b32.xlu0 %v12102_v16, %s10417_s5  ;;  %2037 = vrot.lane.b32.xlu1 %v12098_v61, %s10430_s3 }
 0x2c0   :  { %1681 = vrot.lane.b32.xlu0 %v12102_v16, %s10418_s30  ;;  %3433 = vrot.lane.b32.xlu1 %v12098_v61, %s17715_s4 }
 0x2c4   :  { %3577 = vrot.lane.b32.xlu0 %v12098_v61, %s17678_s29  ;;  %3481 = vrot.lane.b32.xlu1 %v12098_v61, %s17717_s18 }
 0x2c8   :  { %3625 = vrot.lane.b32.xlu0 %v12098_v61, %s10431_s0  ;;  %3529 = vrot.lane.b32.xlu1 %v12098_v61, %s17688_s22 }
 0x2cc   :  { %2035 = vrot.lane.b32.xlu0 %v12125_v56, %s10430_s3  ;;  %1615 = vrot.lane.b32.xlu1 %v12129_v1, %s10417_s5 }
 0x2d0   :  { %3431 = vrot.lane.b32.xlu0 %v12125_v56, %s17715_s4  ;;  %1679 = vrot.lane.b32.xlu1 %v12129_v1, %s10418_s30 }
 0x2d4   :  { %3479 = vrot.lane.b32.xlu0 %v12125_v56, %s17717_s18  ;;  %3623 = vrot.lane.b32.xlu1 %v12125_v56, %s10431_s0 }
 0x2d8   :  { %3527 = vrot.lane.b32.xlu0 %v12125_v56, %s17688_s22  ;;  %3671 = vrot.lane.b32.xlu1 %v12125_v56, %s10432_s17 }
 0x2dc   :  { %3575 = vrot.lane.b32.xlu0 %v12125_v56, %s17678_s29  ;;  %2041 = vrot.lane.b32.xlu1 %v12148_v45, %s10430_s3 }
 0x2e0   :  { %1621 = vrot.lane.b32.xlu0 %v12164_v31, %s10417_s5  ;;  %1619 = vrot.lane.b32.xlu1 %v12168_v44, %s10417_s5 }
 0x2e4   :  { %1685 = vrot.lane.b32.xlu0 %v12164_v31, %s10418_s30  ;;  %1683 = vrot.lane.b32.xlu1 %v12168_v44, %s10418_s30 }
 0x2e6   :  { %v12183_v38 = vpop.permute.xlu1 %2029  ;;  %v12185_v13 = vpop.permute.xlu0 %3569 }
 0x2e7   :  { %17855 = vst [vmem:[#allocation95_spill] sm:$0xff] %v12183_v38  ;;  %17856 = vst [vmem:[#allocation96_spill] sm:$0xff] %v12185_v13 }
 0x2e8   :  { %3437 = vrot.lane.b32.xlu0 %v12148_v45, %s17715_s4  ;;  %3435 = vrot.lane.b32.xlu1 %v12181_v14, %s17715_s4 }
 0x2ea   :  { %v12191_v58 = vpop.permute.xlu1 %3425  ;;  %v12193_v59 = vpop.permute.xlu0 %3617 }
 0x2eb   :  { %17857 = vst [vmem:[#allocation97_spill] sm:$0xff] %v12191_v58  ;;  %17858 = vst [vmem:[#allocation98_spill] sm:$0xff] %v12193_v59 }
 0x2ec   :  { %2039 = vrot.lane.b32.xlu0 %v12181_v14, %s10430_s3  ;;  %3483 = vrot.lane.b32.xlu1 %v12181_v14, %s17717_s18 }
 0x2ee   :  { %v12206_v29 = vpop.permute.xlu1 %3473  ;;  %v12208_v38 = vpop.permute.xlu0 %3665 }
 0x2ef   :  { %17860 = vst [vmem:[#allocation100_spill] sm:$0xff] %v12206_v29  ;;  %17861 = vst [vmem:[#allocation101_spill] sm:$0xff] %v12208_v38  ;;  %v12308_v38 = vsub.f32 %v12281_v18, %v12032_v11 }
 0x2f0   :  { %1625 = vrot.lane.b32.xlu0 %v12212_v54, %s10417_s5  ;;  %2045 = vrot.lane.b32.xlu1 %v12204_v43, %s10430_s3 }
 0x2f2   :  { %v12222_v20 = vpop.permute.xlu1 %3521  ;;  %v12224_v15 = vpop.permute.xlu0 %3713 }
 0x2f3   :  { %17862 = vst [vmem:[#allocation102_spill] sm:$0xff] %v12222_v20  ;;  %17863 = vst [vmem:[#allocation103_spill] sm:$0xff] %v12224_v15  ;;  %v10151_v15 = vpop.eup %10150 }
 0x2f4   :  { %1689 = vrot.lane.b32.xlu0 %v12212_v54, %s10418_s30  ;;  %1623 = vrot.lane.b32.xlu1 %v12228_v30, %s10417_s5  ;;  %v12296_v48 = vmul.f32 %v10151_v15, %v11858_v62  ;;  %v12321_v15 = vmul.f32 %v12308_v38, %v12308_v38 }
 0x2f6   :  { %v12237_v22 = vpop.permute.xlu1 %3615  ;;  %v12239_v60 = vpop.permute.xlu0 %2027  ;;  %17875 = vst [vmem:[#allocation115_spill] sm:$0xff] %v12296_v48 }
 0x2f7   :  { %17865 = vst [vmem:[#allocation105_spill] sm:$0xff] %v12237_v22  ;;  %17866 = vst [vmem:[#allocation106_spill] sm:$0xff] %v12239_v60  ;;  %v12258_v60 = vmul.f32 %v12243_v17, %v12243_v17  ;;  %v10363_v22 = vld [vmem:[%s17586_s1 + $0x28] sm:$0xff] }
 0x2f8   :  { %2043 = vrot.lane.b32.xlu0 %v12235_v50, %s10430_s3  ;;  %1687 = vrot.lane.b32.xlu1 %v12228_v30, %s10418_s30 }
 0x2fa   :  { %v12252_v37 = vpop.permute.xlu1 %3663  ;;  %v12254_v5 = vpop.permute.xlu0 %3423 }
 0x2fb   :  { %17868 = vst [vmem:[#allocation108_spill] sm:$0xff] %v12252_v37  ;;  %17869 = vst [vmem:[#allocation109_spill] sm:$0xff] %v12254_v5 }
 0x2fc   :  { %1629 = vrot.lane.b32.xlu0 %v12258_v60, %s10417_s5  ;;  %2049 = vrot.lane.b32.xlu1 %v12250_v39, %s10430_s3 }
 0x2fe   :  { %v12268_v47 = vpop.permute.xlu1 %3711  ;;  %v12270_v7 = vpop.permute.xlu0 %3471 }
 0x2ff   :  { %17870 = vst [vmem:[#allocation110_spill] sm:$0xff] %v12268_v47  ;;  %17871 = vst [vmem:[#allocation111_spill] sm:$0xff] %v12270_v7 }
 0x300   :  { %1693 = vrot.lane.b32.xlu0 %v12258_v60, %s10418_s30  ;;  %1627 = vrot.lane.b32.xlu1 %v12274_v63, %s10417_s5 }
 0x302   :  { %v12283_v4 = vpop.permute.xlu1 %2033  ;;  %v12285_v32 = vpop.permute.xlu0 %3519 }
 0x303   :  { %17873 = vst [vmem:[#allocation113_spill] sm:$0xff] %v12283_v4  ;;  %17874 = vst [vmem:[#allocation114_spill] sm:$0xff] %v12285_v32  ;;  %v12304_v4 = vmul.f32 %v12289_v51, %v12289_v51 }
 0x304   :  { %2047 = vrot.lane.b32.xlu0 %v12281_v18, %s10430_s3  ;;  %1691 = vrot.lane.b32.xlu1 %v12274_v63, %s10418_s30 }
 0x306   :  { %v12298_v57 = vpop.permute.xlu1 %3573  ;;  %v12300_v6 = vpop.permute.xlu0 %3567 }
 0x307   :  { %17876 = vst [vmem:[#allocation116_spill] sm:$0xff] %v12298_v57  ;;  %17877 = vst [vmem:[#allocation117_spill] sm:$0xff] %v12300_v6  ;;  %v10153_v57 = vpop.eup %10152 }
 0x308   :  { %1633 = vrot.lane.b32.xlu0 %v12304_v4, %s10417_s5  ;;  %2053 = vrot.lane.b32.xlu1 %v12296_v48, %s10430_s3  ;;  %v12328_v59 = vmul.f32 %v10153_v57, %v11863_v3  ;;  %v10155_v20 = vpop.eup %10154 }
 0x309   :  { %v12343_v29 = vmul.f32 %v10155_v20, %v11876_v19  ;;  %v10157_v36 = vpop.eup %10156 }
 0x30a   :  { %v12315_v62 = vpop.permute.xlu1 %3621  ;;  %v12317_v42 = vpop.permute.xlu0 %1613  ;;  %17879 = vst [vmem:[#allocation119_spill] sm:$0xff] %v12328_v59  ;;  %v12355_v58 = vsub.f32 %v12328_v59, %v12032_v11  ;;  %v12362_v19 = vmul.f32 %v10157_v36, %v11881_v10 }
 0x30b   :  { %17878 = vst [vmem:[#allocation118_spill] sm:$0xff] %v12315_v62  ;;  %v12336_v62 = vsub.f32 %v12296_v48, %v12032_v11  ;;  %17881 = vst [vmem:[#allocation121_spill] sm:$0xff] %v12343_v29  ;;  %v12386_v10 = vsub.f32 %v12343_v29, %v12032_v11 }
 0x30c   :  { %1697 = vrot.lane.b32.xlu0 %v12304_v4, %s10418_s30  ;;  %1631 = vrot.lane.b32.xlu1 %v12321_v15, %s10417_s5  ;;  %17884 = vst [vmem:[#allocation124_spill] sm:$0xff] %v12362_v19  ;;  %v12382_v36 = vsub.f32 %v12362_v19, %v12032_v11 }
 0x30d   :  { %v12402_v49 = vmul.f32 %v12386_v10, %v12386_v10 }
 0x30e   :  { %v12330_v13 = vpop.permute.xlu1 %3669  ;;  %v12332_v53 = vpop.permute.xlu0 %1677 }
 0x30f   :  { %17880 = vst [vmem:[#allocation120_spill] sm:$0xff] %v12330_v13  ;;  %v12351_v13 = vmul.f32 %v12336_v62, %v12336_v62 }
 0x310   :  { %2051 = vrot.lane.b32.xlu0 %v12328_v59, %s10430_s3  ;;  %1695 = vrot.lane.b32.xlu1 %v12321_v15, %s10418_s30  ;;  %v1660_v59 = vadd.f32 %v12317_v42, %v12044_v24 }
 0x312   :  { %v12345_v3 = vpop.permute.xlu1 %3717  ;;  %v12347_v57 = vpop.permute.xlu0 %3429 }
 0x313   :  { %17882 = vst [vmem:[#allocation122_spill] sm:$0xff] %v12345_v3  ;;  %17883 = vst [vmem:[#allocation123_spill] sm:$0xff] %v12347_v57  ;;  %v12370_v57 = vmul.f32 %v12355_v58, %v12355_v58 }
 0x314   :  { %1637 = vrot.lane.b32.xlu0 %v12351_v13, %s10417_s5  ;;  %2057 = vrot.lane.b32.xlu1 %v12343_v29, %s10430_s3 }
 0x316   :  { %v12364_v20 = vpop.permute.xlu1 %1611  ;;  %v12366_v3 = vpop.permute.xlu0 %3477 }
 0x317   :  { %17885 = vst [vmem:[#allocation125_spill] sm:$0xff] %v12366_v3 }
 0x318   :  { %1701 = vrot.lane.b32.xlu0 %v12351_v13, %s10418_s30  ;;  %1635 = vrot.lane.b32.xlu1 %v12370_v57, %s10417_s5 }
 0x31a   :  { %v12376_v48 = vpop.permute.xlu1 %1675  ;;  %v12378_v55 = vpop.permute.xlu0 %3525 }
 0x31b   :  { %17886 = vst [vmem:[#allocation126_spill] sm:$0xff] %v12378_v55  ;;  %v12398_v55 = vmul.f32 %v12382_v36, %v12382_v36 }
 0x31c   :  { %2055 = vrot.lane.b32.xlu0 %v12362_v19, %s10430_s3  ;;  %1699 = vrot.lane.b32.xlu1 %v12370_v57, %s10418_s30  ;;  %s17659_s3 = smov 45  }
 0x31e   :  { %v12392_v3 = vpop.permute.xlu1 %3427  ;;  %v12394_v34 = vpop.permute.xlu0 %2031 }
 0x31f   :  { %17887 = vst [vmem:[#allocation127_spill] sm:$0xff] %v12392_v3  ;;  %17888 = vst [vmem:[#allocation128_spill] sm:$0xff] %v12394_v34 }
 0x320   :  { %1639 = vrot.lane.b32.xlu1 %v12398_v55, %s10417_s5  ;;  %1641 = vrot.lane.b32.xlu0 %v12402_v49, %s10417_s5  ;;  %s17676_s5 = smov 36  }
 0x322   :  { %v12408_v11 = vpop.permute.xlu1 %3475  ;;  %v12410_v29 = vpop.permute.xlu0 %3619 }
 0x323   :  { %17889 = vst [vmem:[#allocation129_spill] sm:$0xff] %v12408_v11  ;;  %17890 = vst [vmem:[#allocation130_spill] sm:$0xff] %v12410_v29 }
 0x324   :  { %1703 = vrot.lane.b32.xlu1 %v12398_v55, %s10418_s30  ;;  %1705 = vrot.lane.b32.xlu0 %v12402_v49, %s10418_s30  ;;  %s10438_s30 = smov 10  }
 0x326   :  { %v12416_v34 = vpop.permute.xlu1 %3523  ;;  %v12418_v3 = vpop.permute.xlu0 %3667 }
 0x327   :  { %17891 = vst [vmem:[#allocation131_spill] sm:$0xff] %v12416_v34  ;;  %17892 = vst [vmem:[#allocation132_spill] sm:$0xff] %v12418_v3  ;;  %v10360_v3 = vld [vmem:[%s17586_s1 + $0x10] sm:$0xff] }
 0x328   :  { %3531 = vrot.lane.b32.xlu1 %v12181_v14, %s17688_s22  ;;  %3485 = vrot.lane.b32.xlu0 %v12148_v45, %s17717_s18 }
 0x32a   :  { %v12424_v19 = vpop.permute.xlu1 %3571  ;;  %v12426_v11 = vpop.permute.xlu0 %3715 }
 0x32b   :  { %17893 = vst [vmem:[#allocation133_spill] sm:$0xff] %v12424_v19  ;;  %17894 = vst [vmem:[#allocation134_spill] sm:$0xff] %v12426_v11  ;;  %v10361_v11 = vld [vmem:[%s17586_s1 + $0x18] sm:$0xff] }
 0x32c   :  { %3719 = vrot.lane.b32.xlu1 %v12125_v56, %s17686_s21  ;;  %3673 = vrot.lane.b32.xlu0 %v12098_v61, %s10432_s17 }
 0x32e   :  { %v12432_v29 = vpop.permute.xlu1 %2037  ;;  %v12434_v34 = vpop.permute.xlu0 %1617 }
 0x32f   :  { %17895 = vst [vmem:[#allocation135_spill] sm:$0xff] %v12432_v29  ;;  %v1662_v42 = vadd.f32 %v12434_v34, %v12102_v16 }
 0x330   :  { %3907 = vrot.lane.b32.xlu1 %v10360_v3, %s17682_s25  ;;  %3861 = vrot.lane.b32.xlu0 %v10361_v11, %s10426_s19  ;;  %v10362_v3 = vld [vmem:[%s17586_s1 + $0x20] sm:$0xff] }
 0x332   :  { %v12444_v56 = vpop.permute.xlu1 %3433  ;;  %v12446_v19 = vpop.permute.xlu0 %1681 }
 0x333   :  { %17896 = vst [vmem:[#allocation136_spill] sm:$0xff] %v12444_v56 }
 0x334   :  { %3579 = vrot.lane.b32.xlu1 %v12181_v14, %s17678_s29  ;;  %3533 = vrot.lane.b32.xlu0 %v12148_v45, %s17688_s22 }
 0x336   :  { %v12452_v29 = vpop.permute.xlu1 %3481  ;;  %v12454_v47 = vpop.permute.xlu0 %3577 }
 0x337   :  { %17897 = vst [vmem:[#allocation137_spill] sm:$0xff] %v12452_v29  ;;  %17898 = vst [vmem:[#allocation138_spill] sm:$0xff] %v12454_v47 }
 0x338   :  { %3767 = vrot.lane.b32.xlu1 %v10362_v3, %s10428_s28  ;;  %3721 = vrot.lane.b32.xlu0 %v12098_v61, %s17686_s21 }
 0x33a   :  { %v12462_v56 = vpop.permute.xlu1 %3529  ;;  %v12464_v37 = vpop.permute.xlu0 %3625 }
 0x33b   :  { %17899 = vst [vmem:[#allocation139_spill] sm:$0xff] %v12462_v56  ;;  %17900 = vst [vmem:[#allocation140_spill] sm:$0xff] %v12464_v37 }
 0x33c   :  { %3581 = vrot.lane.b32.xlu1 %v12148_v45, %s17678_s29  ;;  %3909 = vrot.lane.b32.xlu0 %v10361_v11, %s17682_s25 }
 0x33e   :  { %v12469_v29 = vpop.permute.xlu1 %1615  ;;  %v12471_v47 = vpop.permute.xlu0 %2035 }
 0x33f   :  { %17901 = vst [vmem:[#allocation141_spill] sm:$0xff] %v12471_v47 }
 0x340   :  { %3769 = vrot.lane.b32.xlu1 %v10363_v22, %s10428_s28  ;;  %3627 = vrot.lane.b32.xlu0 %v12181_v14, %s10431_s0 }
 0x342   :  { %v12479_v56 = vpop.permute.xlu1 %1679  ;;  %v12481_v37 = vpop.permute.xlu0 %3431 }
 0x343   :  { %17902 = vst [vmem:[#allocation142_spill] sm:$0xff] %v12481_v37 }
 0x344   :  { %3629 = vrot.lane.b32.xlu1 %v12148_v45, %s10431_s0  ;;  %3815 = vrot.lane.b32.xlu0 %v10362_v3, %s10425_s20 }
 0x346   :  { %v12486_v11 = vpop.permute.xlu1 %3623  ;;  %v12488_v47 = vpop.permute.xlu0 %3479 }
 0x347   :  { %17903 = vst [vmem:[#allocation143_spill] sm:$0xff] %v12486_v11  ;;  %17904 = vst [vmem:[#allocation144_spill] sm:$0xff] %v12488_v47 }
 0x348   :  { %3817 = vrot.lane.b32.xlu1 %v10363_v22, %s10425_s20  ;;  %3675 = vrot.lane.b32.xlu0 %v12181_v14, %s10432_s17 }
 0x34a   :  { %v12493_v61 = vpop.permute.xlu1 %3671  ;;  %v12495_v6 = vpop.permute.xlu0 %3527 }
 0x34b   :  { %17905 = vst [vmem:[#allocation145_spill] sm:$0xff] %v12493_v61  ;;  %17906 = vst [vmem:[#allocation146_spill] sm:$0xff] %v12495_v6 }
 0x34c   :  { %3677 = vrot.lane.b32.xlu1 %v12148_v45, %s10432_s17  ;;  %3863 = vrot.lane.b32.xlu0 %v10362_v3, %s10426_s19 }
 0x34e   :  { %v12500_v37 = vpop.permute.xlu1 %2041  ;;  %v12502_v32 = vpop.permute.xlu0 %3575 }
 0x34f   :  { %17907 = vst [vmem:[#allocation147_spill] sm:$0xff] %v12500_v37  ;;  %17908 = vst [vmem:[#allocation148_spill] sm:$0xff] %v12502_v32  ;;  %v10364_v37 = vld [vmem:[%s17586_s1 + $0x30] sm:$0xff] }
 0x350   :  { %3865 = vrot.lane.b32.xlu1 %v10363_v22, %s10426_s19  ;;  %3723 = vrot.lane.b32.xlu0 %v12181_v14, %s17686_s21 }
 0x352   :  { %v1620_v11 = vpop.permute.xlu1 %1619  ;;  %v1622_v47 = vpop.permute.xlu0 %1621 }
 0x354   :  { %3725 = vrot.lane.b32.xlu1 %v12148_v45, %s17686_s21  ;;  %3911 = vrot.lane.b32.xlu0 %v10362_v3, %s17682_s25  ;;  %v10365_v3 = vld [vmem:[%s17586_s1 + $0x38] sm:$0xff] }
 0x356   :  { %v1684_v61 = vpop.permute.xlu1 %1683  ;;  %v1686_v6 = vpop.permute.xlu0 %1685 }
 0x358   :  { %3913 = vrot.lane.b32.xlu1 %v10363_v22, %s17682_s25  ;;  %3771 = vrot.lane.b32.xlu0 %v10364_v37, %s10428_s28 }
 0x35a   :  { %v12515_v32 = vpop.permute.xlu1 %3435  ;;  %v12517_v14 = vpop.permute.xlu0 %3437 }
 0x35b   :  { %17909 = vst [vmem:[#allocation149_spill] sm:$0xff] %v12515_v32  ;;  %17910 = vst [vmem:[#allocation150_spill] sm:$0xff] %v12517_v14 }
 0x35c   :  { %3819 = vrot.lane.b32.xlu1 %v10364_v37, %s10425_s20  ;;  %3773 = vrot.lane.b32.xlu0 %v10365_v3, %s10428_s28 }
 0x35e   :  { %v12524_v45 = vpop.permute.xlu1 %3483  ;;  %v12526_v22 = vpop.permute.xlu0 %2039 }
 0x35f   :  { %17911 = vst [vmem:[#allocation151_spill] sm:$0xff] %v12524_v45  ;;  %17912 = vst [vmem:[#allocation152_spill] sm:$0xff] %v12526_v22 }
 0x360   :  { %3867 = vrot.lane.b32.xlu1 %v10364_v37, %s10426_s19  ;;  %3821 = vrot.lane.b32.xlu0 %v10365_v3, %s10425_s20 }
 0x362   :  { %v12530_v7 = vpop.permute.xlu1 %2045  ;;  %v1626_v32 = vpop.permute.xlu0 %1625 }
 0x363   :  { %17913 = vst [vmem:[#allocation153_spill] sm:$0xff] %v12530_v7  ;;  %v1659_v7 = vadd.f32 %v12364_v20, %v12064_v25 }
 0x364   :  { %3915 = vrot.lane.b32.xlu1 %v10364_v37, %s17682_s25  ;;  %3869 = vrot.lane.b32.xlu0 %v10365_v3, %s10426_s19  ;;  %v12548_v37 = vld [vmem:[%s17758_s23] sm:$0xff] }
 0x366   :  { %v1624_v14 = vpop.permute.xlu1 %1623  ;;  %v1690_v5 = vpop.permute.xlu0 %1689 }
 0x368   :  { %2483 = vrot.lane.b32.xlu1 %v11653_v21, %s17717_s18  ;;  %3917 = vrot.lane.b32.xlu0 %v10365_v3, %s17682_s25  ;;  %v12553_v3 = vadd.f32 %v12332_v53, %v1660_v59 }
 0x36a   :  { %v1688_v45 = vpop.permute.xlu1 %1687  ;;  %v12537_v22 = vpop.permute.xlu0 %2043  ;;  %10158 = vrsqrt.f32 %v12553_v3  ;;  %vm1748_vm1 = vcmp.eq.f32.partialorder %v12553_v3, inf  ;;  %vm1750_vm3 = vcmp.eq.f32.partialorder %v12553_v3, 0.0 }
 0x36b   :  { %17914 = vst [vmem:[#allocation154_spill] sm:$0xff] %v12537_v22  ;;  %v12556_v22 = vadd.f32 %v12376_v48, %v1659_v7  ;;  %v12569_v7 = vadd.f32 %v12446_v19, %v1662_v42  ;;  %v1661_v48 = vadd.f32 %v12469_v29, %v12129_v1  ;;  %v1663_v1 = vadd.f32 %v1620_v11, %v12168_v44 }
 0x36c   :  { %2531 = vrot.lane.b32.xlu1 %v11653_v21, %s17688_s22  ;;  %2481 = vrot.lane.b32.xlu0 %v12548_v37, %s17717_s18  ;;  %v1664_v29 = vadd.f32 %v1622_v47, %v12164_v31  ;;  %v1666_v44 = vadd.f32 %v1626_v32, %v12212_v54  ;;  %v12607_v31 = vld [vmem:[%s17758_s23 + $0x8] sm:$0xff] }
 0x36d   :  { %10160 = vrsqrt.f32 %v12556_v22  ;;  %v12583_v16 = vadd.f32 %v12479_v56, %v1661_v48  ;;  %v12595_v20 = vadd.f32 %v1684_v61, %v1663_v1  ;;  %v1665_v61 = vadd.f32 %v1624_v14, %v12228_v30  ;;  %v12626_v14 = vld [vmem:[%s17758_s23 + $0x18] sm:$0xff] }
 0x36e   :  { %v12558_v24 = vpop.permute.xlu1 %2049  ;;  %v1630_v25 = vpop.permute.xlu0 %1629  ;;  %10162 = vrsqrt.f32 %v12569_v7  ;;  %v12613_v47 = vadd.f32 %v1690_v5, %v1666_v44  ;;  %vm1741_vm0 = vcmp.eq.f32.partialorder %v12556_v22, inf  ;;  %vm1743_vm2 = vcmp.eq.f32.partialorder %v12556_v22, 0.0 }
 0x36f   :  { %17915 = vst [vmem:[#allocation155_spill] sm:$0xff] %v12558_v24  ;;  %10164 = vrsqrt.f32 %v12583_v16  ;;  %v12616_v32 = vadd.f32 %v1688_v45, %v1665_v61  ;;  %v1751_v61 = vand.u32 2147483648, %v12553_v3  ;;  %vm1762_vm4 = vcmp.eq.f32.partialorder %v12569_v7, inf }
 0x370   :  { %2579 = vrot.lane.b32.xlu1 %v11653_v21, %s17678_s29  ;;  %2529 = vrot.lane.b32.xlu0 %v12548_v37, %s17688_s22  ;;  %v12576_v21 = vld [vmem:[%s17758_s23 + $0x10] sm:$0xff]  ;;  %10166 = vrsqrt.f32 %v12595_v20  ;;  %vm1764_vm5 = vcmp.eq.f32.partialorder %v12569_v7, 0.0  ;;  %vm1755_vm6 = vcmp.eq.f32.partialorder %v12583_v16, inf  ;;  %vm1757_vm7 = vcmp.eq.f32.partialorder %v12583_v16, 0.0 }
 0x371   :  { %vm1769_vm8 = vcmp.eq.f32.partialorder %v12595_v20, inf  ;;  %vm1771_vm10 = vcmp.eq.f32.partialorder %v12595_v20, 0.0  ;;  %vm1790_vm12 = vcmp.eq.f32.partialorder %v12613_v47, inf  ;;  %vm1783_vm13 = vcmp.eq.f32.partialorder %v12616_v32, inf }
 0x372   :  { %v1628_v59 = vpop.permute.xlu1 %1627  ;;  %v1694_v53 = vpop.permute.xlu0 %1693  ;;  %vm1792_vm14 = vcmp.eq.f32.partialorder %v12613_v47, 0.0  ;;  %vm1785_vm15 = vcmp.eq.f32.partialorder %v12616_v32, 0.0 }
 0x373   :  { %v1667_v45 = vadd.f32 %v1628_v59, %v12274_v63 }
 0x374   :  { %2485 = vrot.lane.b32.xlu1 %v12576_v21, %s17717_s18  ;;  %2577 = vrot.lane.b32.xlu0 %v12548_v37, %s17678_s29  ;;  %v10159_v48 = vpop.eup %10158 }
 0x375   :  { %v1747_v1 = vmul.f32 %v10159_v48, %v12553_v3 }
 0x376   :  { %v1692_v34 = vpop.permute.xlu1 %1691  ;;  %v12585_v19 = vpop.permute.xlu0 %2047 }
 0x377   :  { %17916 = vst [vmem:[#allocation156_spill] sm:$0xff] %v12585_v19  ;;  %v12599_v19 = vadd.f32 %v1686_v6, %v1664_v29  ;;  %v10161_v24 = vpop.eup %10160  ;;  %v1668_v29 = vadd.f32 %v1630_v25, %v12258_v60  ;;  %v12639_v25 = vadd.f32 %v1692_v34, %v1667_v45  ;;  %v1749_v44 = vsel %vm1748_vm1, %v12553_v3, %v1747_v1 }
 0x378   :  { %2673 = vrot.lane.b32.xlu1 %v12548_v37, %s10432_s17  ;;  %2625 = vrot.lane.b32.xlu0 %v12548_v37, %s10431_s0  ;;  %v1740_v54 = vmul.f32 %v10161_v24, %v12556_v22  ;;  %v10163_v30 = vpop.eup %10162  ;;  %v1752_v45 = vsel %vm1750_vm3, %v1751_v61, %v1749_v44 }
 0x379   :  { %10168 = vrsqrt.f32 %v12599_v19  ;;  %v12632_v5 = vadd.f32 %v1694_v53, %v1668_v29  ;;  %v10165_v63 = vpop.eup %10164  ;;  %v1744_v53 = vand.u32 2147483648, %v12556_v22  ;;  %v1761_v34 = vmul.f32 %v10163_v30, %v12569_v7 }
 0x37a   :  { %v12597_v56 = vpop.permute.xlu1 %2053  ;;  %v1634_v42 = vpop.permute.xlu0 %1633  ;;  %10170 = vrsqrt.f32 %v12613_v47  ;;  %v1742_v48 = vsel %vm1741_vm0, %v12556_v22, %v1740_v54  ;;  %v1765_v30 = vand.u32 2147483648, %v12569_v7  ;;  %vm1776_vm9 = vcmp.eq.f32.partialorder %v12599_v19, inf }
 0x37b   :  { %17917 = vst [vmem:[#allocation157_spill] sm:$0xff] %v12597_v56  ;;  %10172 = vrsqrt.f32 %v12616_v32  ;;  %v1670_v59 = vadd.f32 %v1634_v42, %v12304_v4  ;;  %v1745_v1 = vsel %vm1743_vm2, %v1744_v53, %v1742_v48  ;;  %v10167_v22 = vpop.eup %10166  ;;  %v1763_v3 = vsel %vm1762_vm4, %v12569_v7, %v1761_v34 }
 0x37c   :  { %2533 = vrot.lane.b32.xlu1 %v12576_v21, %s17688_s22  ;;  %2627 = vrot.lane.b32.xlu0 %v12607_v31, %s10431_s0  ;;  %10174 = vrsqrt.f32 %v12632_v5  ;;  %v1768_v61 = vmul.f32 %v10167_v22, %v12595_v20  ;;  %vm1778_vm11 = vcmp.eq.f32.partialorder %v12599_v19, 0.0  ;;  %vm1797_vm0 = vcmp.eq.f32.partialorder %v12639_v25, inf }
 0x37d   :  { %10176 = vrsqrt.f32 %v12639_v25  ;;  %vm1804_vm1 = vcmp.eq.f32.partialorder %v12632_v5, inf  ;;  %vm1799_vm2 = vcmp.eq.f32.partialorder %v12639_v25, 0.0  ;;  %vm1806_vm3 = vcmp.eq.f32.partialorder %v12632_v5, 0.0 }
 0x37e   :  { %v1632_v6 = vpop.permute.xlu1 %1631  ;;  %v1698_v11 = vpop.permute.xlu0 %1697 }
 0x37f   :  { %v1669_v29 = vadd.f32 %v1632_v6, %v12321_v15  ;;  %v12655_v4 = vadd.f32 %v1698_v11, %v1670_v59  ;;  %v1754_v15 = vmul.f32 %v10165_v63, %v12583_v16  ;;  %v1766_v63 = vsel %vm1764_vm5, %v1765_v30, %v1763_v3 }
 0x380   :  { %2721 = vrot.lane.b32.xlu1 %v12548_v37, %s17686_s21  ;;  %2487 = vrot.lane.b32.xlu0 %v12626_v14, %s17717_s18  ;;  %v1772_v30 = vand.u32 2147483648, %v12595_v20 }
 0x381   :  { %10178 = vrsqrt.f32 %v12655_v4  ;;  %v1756_v59 = vsel %vm1755_vm6, %v12583_v16, %v1754_v15  ;;  %vm1818_vm4 = vcmp.eq.f32.partialorder %v12655_v4, inf }
 0x382   :  { %v1696_v24 = vpop.permute.xlu1 %1695  ;;  %v12634_v60 = vpop.permute.xlu0 %2051 }
 0x383   :  { %17918 = vst [vmem:[#allocation158_spill] sm:$0xff] %v12634_v60  ;;  %v12660_v56 = vadd.f32 %v1696_v24, %v1669_v29  ;;  %v10169_v6 = vpop.eup %10168 }
 0x384   :  { %2535 = vrot.lane.b32.xlu1 %v12626_v14, %s17688_s22  ;;  %2675 = vrot.lane.b32.xlu0 %v12607_v31, %s10432_s17  ;;  %v10171_v53 = vpop.eup %10170  ;;  %v1775_v7 = vmul.f32 %v10169_v6, %v12599_v19 }
 0x385   :  { %10180 = vrsqrt.f32 %v12660_v56  ;;  %v10173_v34 = vpop.eup %10172  ;;  %v1789_v22 = vmul.f32 %v10171_v53, %v12613_v47  ;;  %vm1811_vm5 = vcmp.eq.f32.partialorder %v12660_v56, inf  ;;  %vm1813_vm6 = vcmp.eq.f32.partialorder %v12660_v56, 0.0 }
 0x386   :  { %v12657_v42 = vpop.permute.xlu1 %2057  ;;  %v1638_v54 = vpop.permute.xlu0 %1637  ;;  %v1782_v6 = vmul.f32 %v10173_v34, %v12616_v32  ;;  %v1793_v34 = vand.u32 2147483648, %v12613_v47 }
 0x387   :  { %17919 = vst [vmem:[#allocation159_spill] sm:$0xff] %v12657_v42  ;;  %v1672_v11 = vadd.f32 %v1638_v54, %v12351_v13  ;;  %v1758_v13 = vand.u32 2147483648, %v12583_v16  ;;  %v10175_v3 = vpop.eup %10174  ;;  %v1777_v16 = vsel %vm1776_vm9, %v12599_v19, %v1775_v7 }
 0x388   :  { %1853 = vperm.xlu1 %10061, %v1745_v1   ;;  %1858 = vperm.xlu0 %10060, %v1752_v45   ;;  %v1784_v7 = vsel %vm1783_vm13, %v12616_v32, %v1782_v6 }
 0x389   :  { %v1759_v45 = vsel %vm1757_vm7, %v1758_v13, %v1756_v59  ;;  %v1791_v13 = vsel %vm1790_vm12, %v12613_v47, %v1789_v22  ;;  %vm1820_vm7 = vcmp.eq.f32.partialorder %v12655_v4, 0.0 }
 0x38a   :  { %v1636_v48 = vpop.permute.xlu1 %1635  ;;  %v1702_v44 = vpop.permute.xlu0 %1701  ;;  %v1794_v6 = vsel %vm1792_vm14, %v1793_v34, %v1791_v13 }
 0x38b   :  { %v12671_v24 = vadd.f32 %v1702_v44, %v1672_v11  ;;  %v1671_v29 = vadd.f32 %v1636_v48, %v12370_v57  ;;  %v1770_v57 = vsel %vm1769_vm8, %v12595_v20, %v1768_v61  ;;  %v10177_v11 = vpop.eup %10176  ;;  %v1779_v48 = vand.u32 2147483648, %v12599_v19 }
 0x38c   :  { %1868 = vperm.xlu1 %10061, %v1766_v63   ;;  %3439 = vrot.lane.b32.xlu0 %v12235_v50, %s17715_s4  ;;  %v1773_v59 = vsel %vm1771_vm10, %v1772_v30, %v1770_v57  ;;  %v10179_v61 = vpop.eup %10178  ;;  %v1803_v20 = vmul.f32 %v10175_v3, %v12632_v5  ;;  %v1786_v57 = vand.u32 2147483648, %v12616_v32 }
 0x38d   :  { %10182 = vrsqrt.f32 %v12671_v24  ;;  %v1780_v53 = vsel %vm1778_vm11, %v1779_v48, %v1777_v16  ;;  %vm1832_vm9 = vcmp.eq.f32.partialorder %v12671_v24, inf  ;;  %vm1834_vm11 = vcmp.eq.f32.partialorder %v12671_v24, 0.0 }
 0x38e   :  { %v1700_v54 = vpop.permute.xlu1 %1699  ;;  %v12681_v1 = vpop.permute.xlu0 %2055  ;;  %v1805_v30 = vsel %vm1804_vm1, %v12632_v5, %v1803_v20  ;;  %vm3185_vm1 = vcmask 48128  }
 0x38f   :  { %17920 = vst [vmem:[#allocation160_spill] sm:$0xff] %v12681_v1  ;;  %v12685_v15 = vadd.f32 %v1700_v54, %v1671_v29  ;;  %v1796_v29 = vmul.f32 %v10177_v11, %v12639_v25  ;;  %v10181_v19 = vpop.eup %10180 }
 0x390   :  { %1863 = vperm.xlu1 %10061, %v1759_v45   ;;  %2581 = vrot.lane.b32.xlu0 %v12576_v21, %s17678_s29  ;;  %v1810_v32 = vmul.f32 %v10181_v19, %v12660_v56 }
 0x391   :  { %10184 = vrsqrt.f32 %v12685_v15  ;;  %v1798_v47 = vsel %vm1797_vm0, %v12639_v25, %v1796_v29  ;;  %vm1825_vm8 = vcmp.eq.f32.partialorder %v12685_v15, inf  ;;  %vm1827_vm10 = vcmp.eq.f32.partialorder %v12685_v15, 0.0 }
 0x392   :  { %v1640_v44 = vpop.permute.xlu1 %1639  ;;  %v1642_v63 = vpop.permute.xlu0 %1641  ;;  %v1812_v29 = vsel %vm1811_vm5, %v12660_v56, %v1810_v32  ;;  %vm17753_vm0 = vcmask 23552   ;;  %vm17697_vm5 = vcmask 146432  }
 0x393   :  { %v1673_v54 = vadd.f32 %v1640_v44, %v12398_v55  ;;  %v1674_v45 = vadd.f32 %v1642_v63, %v12402_v49  ;;  %v1787_v55 = vsel %vm1785_vm15, %v1786_v57, %v1784_v7  ;;  %v1817_v49 = vmul.f32 %v10179_v61, %v12655_v4 }
 0x394   :  { %1873 = vperm.xlu0 %10060, %v1773_v59   ;;  %1878 = vperm.xlu1 %10061, %v1780_v53   ;;  %v1800_v44 = vand.u32 2147483648, %v12639_v25  ;;  %v1807_v63 = vand.u32 2147483648, %v12632_v5  ;;  %v1814_v25 = vand.u32 2147483648, %v12660_v56  ;;  %v1821_v5 = vand.u32 2147483648, %v12655_v4 }
 0x395   :  { %v1819_v34 = vsel %vm1818_vm4, %v12655_v4, %v1817_v49  ;;  %v1835_v49 = vand.u32 2147483648, %v12671_v24  ;;  %vm17698_vm4 = vcmask 121856  }
 0x396   :  { %v1704_v22 = vpop.permute.xlu1 %1703  ;;  %v1706_v16 = vpop.permute.xlu0 %1705  ;;  %v1801_v61 = vsel %vm1799_vm2, %v1800_v44, %v1798_v47  ;;  %v1808_v7 = vsel %vm1806_vm3, %v1807_v63, %v1805_v30  ;;  %v1815_v57 = vsel %vm1813_vm6, %v1814_v25, %v1812_v29  ;;  %vm3202_vm2 = vcmask 72704  }
 0x397   :  { %v12713_v11 = vadd.f32 %v1704_v22, %v1673_v54  ;;  %v12715_v3 = vadd.f32 %v1706_v16, %v1674_v45  ;;  %v10183_v48 = vpop.eup %10182  ;;  %v1822_v22 = vsel %vm1820_vm7, %v1821_v5, %v1819_v34  ;;  %vm3219_vm3 = vcmask 97280  }
 0x398   :  { %1883 = vperm.xlu0 %10060, %v1787_v55   ;;  %1888 = vperm.xlu1 %10061, %v1794_v6   ;;  %v1831_v19 = vmul.f32 %v10183_v48, %v12671_v24  ;;  %v1828_v55 = vand.u32 2147483648, %v12685_v15  ;;  %vm17694_vm6 = vcmask 171008   ;;  %vm17695_vm7 = vcmask 195584  }
 0x399   :  { %10186 = vrsqrt.f32 %v12713_v11  ;;  %vm1839_vm12 = vcmp.eq.f32.partialorder %v12713_v11, inf  ;;  %v1842_v63 = vand.u32 2147483648, %v12713_v11  ;;  %vm1841_vm13 = vcmp.eq.f32.partialorder %v12713_v11, 0.0 }
 0x39a   :  { %10188 = vrsqrt.f32 %v12715_v3  ;;  %v12725_v59 = vpop.permute.xlu1 %3531  ;;  %v12727_v53 = vpop.permute.xlu0 %3485  ;;  %v1833_v6 = vsel %vm1832_vm9, %v12671_v24, %v1831_v19  ;;  %vm1846_vm14 = vcmp.eq.f32.partialorder %v12715_v3, inf  ;;  %vm1848_vm15 = vcmp.eq.f32.partialorder %v12715_v3, 0.0 }
 0x39b   :  { %17921 = vst [vmem:[#allocation161_spill] sm:$0xff] %v12725_v59  ;;  %17922 = vst [vmem:[#allocation162_spill] sm:$0xff] %v12727_v53  ;;  %v10185_v13 = vpop.eup %10184  ;;  %v1836_v32 = vsel %vm1834_vm11, %v1835_v49, %v1833_v6  ;;  %vm17751_vm9 = vcmask 244736   ;;  %vm17696_vm11 = vcmask 293888  }
 0x39c   :  { %1893 = vperm.xlu0 %10060, %v1801_v61   ;;  %1898 = vperm.xlu1 %10061, %v1808_v7   ;;  %v1824_v20 = vmul.f32 %v10185_v13, %v12685_v15 }
 0x39e   :  { %v12739_v54 = vpop.permute.xlu1 %3719  ;;  %v12741_v45 = vpop.permute.xlu0 %3673  ;;  %v1826_v16 = vsel %vm1825_vm8, %v12685_v15, %v1824_v20  ;;  %v1849_v15 = vand.u32 2147483648, %v12715_v3  ;;  %vm17752_vm8 = vcmask 220160  }
 0x39f   :  { %17923 = vst [vmem:[#allocation163_spill] sm:$0xff] %v12739_v54  ;;  %17924 = vst [vmem:[#allocation164_spill] sm:$0xff] %v12741_v45  ;;  %v1829_v30 = vsel %vm1827_vm10, %v1828_v55, %v1826_v16  ;;  %vm17750_vm10 = vcmask 269312  }
 0x3a0   :  { %1903 = vperm.xlu0 %10060, %v1815_v57   ;;  %1908 = vperm.xlu1 %10061, %v1822_v22  }
 0x3a2   :  { %v12751_v47 = vpop.permute.xlu1 %3907  ;;  %v12753_v56 = vpop.permute.xlu0 %3861 }
 0x3a3   :  { %v10187_v4 = vpop.eup %10186 }
 0x3a4   :  { %v10189_v48 = vpop.eup %10188  ;;  %1913 = vperm.xlu0 %10060, %v1829_v30   ;;  %1918 = vperm.xlu1 %10061, %v1836_v32   ;;  %v1838_v44 = vmul.f32 %v10187_v4, %v12713_v11 }
 0x3a5   :  { %v1845_v13 = vmul.f32 %v10189_v48, %v12715_v3 }
 0x3a6   :  { %v12761_v61 = vpop.permute.xlu1 %3579  ;;  %v12763_v7 = vpop.permute.xlu0 %3533  ;;  %v1840_v24 = vsel %vm1839_vm12, %v12713_v11, %v1838_v44  ;;  %vm17692_vm12 = vcmask 318464  }
 0x3a7   :  { %17925 = vst [vmem:[#allocation165_spill] sm:$0xff] %v12761_v61  ;;  %17926 = vst [vmem:[#allocation166_spill] sm:$0xff] %v12763_v7  ;;  %v1843_v34 = vsel %vm1841_vm13, %v1842_v63, %v1840_v24  ;;  %v1847_v29 = vsel %vm1846_vm14, %v12715_v3, %v1845_v13  ;;  %vm17691_vm13 = vcmask 343040   ;;  %vm17690_vm14 = vcmask 367616  }
 0x3a8   :  { %1923 = vperm.xlu0 %10060, %v1843_v34   ;;  %v1850_v20 = vsel %vm1848_vm15, %v1849_v15, %v1847_v29  ;;  %vm17693_vm15 = vcmask 252928  }
 0x3a9   :  { %1928 = vperm.xlu1 %10061, %v1850_v20  }
 0x3aa   :  { %v12771_v19 = vpop.permute.xlu1 %3767  ;;  %v12773_v25 = vpop.permute.xlu0 %3721 }
 0x3ab   :  { %17927 = vst [vmem:[#allocation167_spill] sm:$0xff] %v12771_v19  ;;  %17928 = vst [vmem:[#allocation168_spill] sm:$0xff] %v12773_v25  ;;  %v13165_v25 = vld [vmem:[%s17586_s1 + $0x40] sm:$0xff]  ;;  %v18001_v19 = vld [vmem:[#allocation117_spill] sm:$0xff] }
 0x3ac   :  { %2769 = vrot.lane.b32.xlu0 %v12548_v37, %s10428_s28 }
 0x3ad   :  { %2723 = vrot.lane.b32.xlu1 %v12607_v31, %s17686_s21 }
 0x3ae   :  { %v12779_v11 = vpop.permute.xlu1 %3581  ;;  %v12781_v5 = vpop.permute.xlu0 %3909 }
 0x3af   :  { %17929 = vst [vmem:[#allocation169_spill] sm:$0xff] %v12779_v11 }
 0x3b0   :  { %3487 = vrot.lane.b32.xlu0 %v12235_v50, %s17717_s18 }
 0x3b1   :  { %3441 = vrot.lane.b32.xlu1 %v12204_v43, %s17715_s4 }
 0x3b2   :  { %v12787_v3 = vpop.permute.xlu1 %3769  ;;  %v12789_v57 = vpop.permute.xlu0 %3627 }
 0x3b3   :  { %17930 = vst [vmem:[#allocation170_spill] sm:$0xff] %v12787_v3  ;;  %17931 = vst [vmem:[#allocation171_spill] sm:$0xff] %v12789_v57 }
 0x3b4   :  { %2629 = vrot.lane.b32.xlu0 %v12576_v21, %s10431_s0 }
 0x3b5   :  { %2583 = vrot.lane.b32.xlu1 %v12626_v14, %s17678_s29 }
 0x3b6   :  { %v12795_v22 = vpop.permute.xlu1 %3629  ;;  %v12797_v16 = vpop.permute.xlu0 %3815 }
 0x3b7   :  { %17932 = vst [vmem:[#allocation172_spill] sm:$0xff] %v12795_v22  ;;  %17933 = vst [vmem:[#allocation173_spill] sm:$0xff] %v12797_v16 }
 0x3b8   :  { %2817 = vrot.lane.b32.xlu0 %v12548_v37, %s10425_s20  ;;  %v12820_v37 = vld [vmem:[%s17758_s23 + $0x20] sm:$0xff] }
 0x3b9   :  { %2771 = vrot.lane.b32.xlu1 %v12607_v31, %s10428_s28 }
 0x3ba   :  { %v12803_v6 = vpop.permute.xlu1 %3817  ;;  %v12805_v55 = vpop.permute.xlu0 %3675 }
 0x3bb   :  { %17934 = vst [vmem:[#allocation174_spill] sm:$0xff] %v12803_v6  ;;  %17935 = vst [vmem:[#allocation175_spill] sm:$0xff] %v12805_v55 }
 0x3bc   :  { %3535 = vrot.lane.b32.xlu0 %v12235_v50, %s17688_s22 }
 0x3bd   :  { %3489 = vrot.lane.b32.xlu1 %v12204_v43, %s17717_s18 }
 0x3be   :  { %v12811_v49 = vpop.permute.xlu1 %3677  ;;  %v12813_v4 = vpop.permute.xlu0 %3863 }
 0x3bf   :  { %17936 = vst [vmem:[#allocation176_spill] sm:$0xff] %v12811_v49  ;;  %17937 = vst [vmem:[#allocation177_spill] sm:$0xff] %v12813_v4 }
 0x3c0   :  { %2631 = vrot.lane.b32.xlu0 %v12626_v14, %s10431_s0 }
 0x3c1   :  { %2489 = vrot.lane.b32.xlu1 %v12820_v37, %s17717_s18 }
 0x3c2   :  { %v12824_v30 = vpop.permute.xlu1 %3865  ;;  %v12826_v32 = vpop.permute.xlu0 %3723 }
 0x3c3   :  { %17938 = vst [vmem:[#allocation178_spill] sm:$0xff] %v12824_v30  ;;  %17939 = vst [vmem:[#allocation179_spill] sm:$0xff] %v12826_v32 }
 0x3c4   :  { %2819 = vrot.lane.b32.xlu0 %v12607_v31, %s10425_s20  ;;  %v12847_v31 = vld [vmem:[%s17758_s23 + $0x28] sm:$0xff] }
 0x3c5   :  { %2677 = vrot.lane.b32.xlu1 %v12576_v21, %s10432_s17 }
 0x3c6   :  { %v12832_v48 = vpop.permute.xlu1 %3725  ;;  %v12834_v44 = vpop.permute.xlu0 %3911 }
 0x3c7   :  { %17940 = vst [vmem:[#allocation180_spill] sm:$0xff] %v12832_v48  ;;  %17941 = vst [vmem:[#allocation181_spill] sm:$0xff] %v12834_v44 }
 0x3c8   :  { %3537 = vrot.lane.b32.xlu0 %v12204_v43, %s17688_s22 }
 0x3c9   :  { %2881 = vrot.lane.b32.xlu1 %v11690_v33, %s10425_s20 }
 0x3ca   :  { %v12840_v63 = vpop.permute.xlu1 %3913  ;;  %v12842_v13 = vpop.permute.xlu0 %3771 }
 0x3cb   :  { %17942 = vst [vmem:[#allocation182_spill] sm:$0xff] %v12840_v63  ;;  %17943 = vst [vmem:[#allocation183_spill] sm:$0xff] %v12842_v13 }
 0x3cc   :  { %2491 = vrot.lane.b32.xlu0 %v12847_v31, %s17717_s18 }
 0x3cd   :  { %3583 = vrot.lane.b32.xlu1 %v12235_v50, %s17678_s29 }
 0x3ce   :  { %v12853_v24 = vpop.permute.xlu1 %3819  ;;  %v12855_v15 = vpop.permute.xlu0 %3773 }
 0x3cf   :  { %17944 = vst [vmem:[#allocation184_spill] sm:$0xff] %v12853_v24  ;;  %17945 = vst [vmem:[#allocation185_spill] sm:$0xff] %v12855_v15 }
 0x3d0   :  { %2679 = vrot.lane.b32.xlu0 %v12626_v14, %s10432_s17 }
 0x3d1   :  { %2537 = vrot.lane.b32.xlu1 %v12820_v37, %s17688_s22 }
 0x3d2   :  { %v12861_v34 = vpop.permute.xlu1 %3867  ;;  %v12863_v29 = vpop.permute.xlu0 %3821 }
 0x3d3   :  { %17946 = vst [vmem:[#allocation186_spill] sm:$0xff] %v12861_v34  ;;  %17947 = vst [vmem:[#allocation187_spill] sm:$0xff] %v12863_v29 }
 0x3d4   :  { %2883 = vrot.lane.b32.xlu0 %v11685_v23, %s10425_s20 }
 0x3d5   :  { %2725 = vrot.lane.b32.xlu1 %v12576_v21, %s17686_s21 }
 0x3d6   :  { %v12869_v20 = vpop.permute.xlu1 %3915  ;;  %v12871_v42 = vpop.permute.xlu0 %3869 }
 0x3d7   :  { %17948 = vst [vmem:[#allocation188_spill] sm:$0xff] %v12869_v20  ;;  %17949 = vst [vmem:[#allocation189_spill] sm:$0xff] %v12871_v42 }
 0x3d9   :  { %2929 = vrot.lane.b32.xlu1 %v11690_v33, %s17684_s6 }
 0x3da   :  { %v12875_v1 = vpop.permute.xlu1 %2483  ;;  %v12877_v60 = vpop.permute.xlu0 %3917 }
 0x3db   :  { %17950 = vst [vmem:[#allocation190_spill] sm:$0xff] %v12877_v60 }
 0x3de   :  { %v12879_v15 = vpop.permute.xlu0 %2481  ;;  %v12881_v29 = vpop.permute.xlu1 %2531 }
 0x3e2   :  { %v12883_v48 = vpop.permute.xlu0 %2529  ;;  %v12885_v49 = vpop.permute.xlu1 %2579 }
 0x3e6   :  { %v12887_v22 = vpop.permute.xlu0 %2577  ;;  %v12889_v11 = vpop.permute.xlu1 %2485 }
 0x3e7   :  { %17951 = vst [vmem:[#allocation191_spill] sm:$0xff] %v12889_v11 }
 0x3ea   :  { %v12891_v42 = vpop.permute.xlu0 %2625  ;;  %v12893_v7 = vpop.permute.xlu1 %2673 }
 0x3ee   :  { %v12895_v20 = vpop.permute.xlu0 %2627  ;;  %v12897_v53 = vpop.permute.xlu1 %2533 }
 0x3ef   :  { %17952 = vst [vmem:[#allocation192_spill] sm:$0xff] %v12897_v53 }
 0x3f2   :  { %v12899_v60 = vpop.permute.xlu0 %2487  ;;  %v12901_v34 = vpop.permute.xlu1 %2721 }
 0x3f3   :  { %17953 = vst [vmem:[#allocation193_spill] sm:$0xff] %v12899_v60 }
 0x3f6   :  { %v12903_v24 = vpop.permute.xlu0 %2675  ;;  %v12905_v13 = vpop.permute.xlu1 %2535 }
 0x3f7   :  { %17954 = vst [vmem:[#allocation194_spill] sm:$0xff] %v12905_v13 }
 0x407   :  { %v1859_v32 = vpop.permute.xlu0 %1858  ;;  %v1854_v55 = vpop.permute.xlu1 %1853 }
 0x408   :  { %10190 = vrcp.f32 %v1859_v32 }
 0x409   :  { %10192 = vrcp.f32 %v1854_v55 }
 0x40b   :  { %v1869_v57 = vpop.permute.xlu1 %1868  ;;  %v12910_v60 = vpop.permute.xlu0 %3439 }
 0x40c   :  { %10194 = vrcp.f32 %v1869_v57  ;;  %17955 = vst [vmem:[#allocation195_spill] sm:$0xff] %v12910_v60 }
 0x40f   :  { %v1864_v53 = vpop.permute.xlu1 %1863  ;;  %v12915_v55 = vpop.permute.xlu0 %2581 }
 0x410   :  { %17956 = vst [vmem:[#allocation196_spill] sm:$0xff] %v12915_v55  ;;  %10196 = vrcp.f32 %v1864_v53 }
 0x412   :  { %v10191_v61 = vpop.eup %10190 }
 0x413   :  { %v1934_v59 = vmul.f32 %v10191_v61, %v12036_v28  ;;  %v10193_v11 = vpop.eup %10192  ;;  %v1879_v28 = vpop.permute.xlu1 %1878 }
 0x414   :  { %v1932_v13 = vmul.f32 %v10193_v11, %v12056_v26  ;;  %v1874_v26 = vpop.permute.xlu0 %1873  ;;  %10198 = vrcp.f32 %v1879_v28 }
 0x415   :  { %3953 = vrot.lane.b32.xlu0 %v1934_v59, %s17676_s5  ;;  %2157 = vrot.lane.b32.xlu1 %v1934_v59, %s10438_s30  ;;  %10200 = vrcp.f32 %v1874_v26 }
 0x416   :  { %v10195_v61 = vpop.eup %10194 }
 0x417   :  { %v1889_v11 = vpop.permute.xlu1 %1888  ;;  %v1938_v57 = vmul.f32 %v10195_v61, %v12091_v46 }
 0x418   :  { %v1884_v60 = vpop.permute.xlu0 %1883  ;;  %10202 = vrcp.f32 %v1889_v11 }
 0x419   :  { %4001 = vrot.lane.b32.xlu0 %v1934_v59, %s17664_s2  ;;  %3999 = vrot.lane.b32.xlu1 %v1932_v13, %s17664_s2  ;;  %10204 = vrcp.f32 %v1884_v60 }
 0x41a   :  { %v10197_v32 = vpop.eup %10196 }
 0x41b   :  { %v1899_v55 = vpop.permute.xlu1 %1898  ;;  %v1936_v53 = vmul.f32 %v10197_v32, %v12118_v9 }
 0x41c   :  { %10206 = vrcp.f32 %v1899_v55 }
 0x41d   :  { %4049 = vrot.lane.b32.xlu0 %v1934_v59, %s17662_s24  ;;  %4047 = vrot.lane.b32.xlu1 %v1932_v13, %s17662_s24 }
 0x41f   :  { %v1909_v46 = vpop.permute.xlu1 %1908 }
 0x421   :  { %4097 = vrot.lane.b32.xlu0 %v1934_v59, %s17659_s3  ;;  %4095 = vrot.lane.b32.xlu1 %v1932_v13, %s17659_s3  ;;  %v1894_v59 = vpop.permute.xlu0 %1893 }
 0x422   :  { %10208 = vrcp.f32 %v1894_v59 }
 0x423   :  { %v1919_v63 = vpop.permute.xlu1 %1918  ;;  %10210 = vrcp.f32 %v1909_v46 }
 0x425   :  { %2155 = vrot.lane.b32.xlu0 %v1932_v13, %s10438_s30  ;;  %2161 = vrot.lane.b32.xlu1 %v1938_v57, %s10438_s30  ;;  %v1904_v61 = vpop.permute.xlu0 %1903 }
 0x426   :  { %10212 = vrcp.f32 %v1904_v61 }
 0x427   :  { %10214 = vrcp.f32 %v1919_v63 }
 0x428   :  { %v1929_v28 = vpop.permute.xlu1 %1928 }
 0x429   :  { %3951 = vrot.lane.b32.xlu0 %v1932_v13, %s17676_s5  ;;  %3957 = vrot.lane.b32.xlu1 %v1938_v57, %s17676_s5  ;;  %v10199_v13 = vpop.eup %10198  ;;  %v1914_v9 = vpop.permute.xlu0 %1913 }
 0x42a   :  { %v1942_v32 = vmul.f32 %v10199_v13, %v12152_v35  ;;  %v10201_v30 = vpop.eup %10200  ;;  %10216 = vrcp.f32 %v1914_v9 }
 0x42b   :  { %v1940_v26 = vmul.f32 %v10201_v30, %v12156_v2 }
 0x42c   :  { %v12939_v3 = vpop.permute.xlu1 %2723 }
 0x42d   :  { %2159 = vrot.lane.b32.xlu0 %v1936_v53, %s10438_s30  ;;  %4005 = vrot.lane.b32.xlu1 %v1938_v57, %s17664_s2  ;;  %v1924_v6 = vpop.permute.xlu0 %1923 }
 0x42e   :  { %10218 = vrcp.f32 %v1924_v6 }
 0x42f   :  { %10220 = vrcp.f32 %v1929_v28 }
 0x431   :  { %4003 = vrot.lane.b32.xlu0 %v1936_v53, %s17664_s2  ;;  %4053 = vrot.lane.b32.xlu1 %v1938_v57, %s17662_s24  ;;  %v12945_v35 = vpop.permute.xlu0 %2769 }
 0x435   :  { %4051 = vrot.lane.b32.xlu0 %v1936_v53, %s17662_s24  ;;  %4101 = vrot.lane.b32.xlu1 %v1938_v57, %s17659_s3  ;;  %v12947_v57 = vpop.permute.xlu1 %3441  ;;  %v12952_v30 = vpop.permute.xlu0 %3487 }
 0x436   :  { %17957 = vst [vmem:[#allocation197_spill] sm:$0xff] %v12947_v57  ;;  %17958 = vst [vmem:[#allocation198_spill] sm:$0xff] %v12952_v30 }
 0x439   :  { %4099 = vrot.lane.b32.xlu0 %v1936_v53, %s17659_s3  ;;  %3955 = vrot.lane.b32.xlu1 %v1936_v53, %s17676_s5  ;;  %v10203_v53 = vpop.eup %10202  ;;  %v12954_v11 = vpop.permute.xlu1 %2583 }
 0x43a   :  { %v1946_v2 = vmul.f32 %v10203_v53, %v12197_v52  ;;  %17959 = vst [vmem:[#allocation199_spill] sm:$0xff] %v12954_v11  ;;  %v10205_v60 = vpop.eup %10204  ;;  %v12960_v13 = vpop.permute.xlu0 %2629 }
 0x43b   :  { %17960 = vst [vmem:[#allocation200_spill] sm:$0xff] %v12960_v13  ;;  %v1944_v57 = vmul.f32 %v10205_v60, %v12216_v8  ;;  %v10207_v8 = vpop.eup %10206 }
 0x43c   :  { %v10209_v46 = vpop.eup %10208  ;;  %v12982_v63 = vmul.f32 %v10207_v8, %v12243_v17 }
 0x43d   :  { %3961 = vrot.lane.b32.xlu0 %v1942_v32, %s17676_s5  ;;  %2165 = vrot.lane.b32.xlu1 %v1942_v32, %s10438_s30  ;;  %v12985_v61 = vmul.f32 %v10209_v46, %v12262_v27 }
 0x43e   :  { %v12967_v52 = vpop.permute.xlu0 %2817 }
 0x441   :  { %4009 = vrot.lane.b32.xlu0 %v1942_v32, %s17664_s2  ;;  %4007 = vrot.lane.b32.xlu1 %v1940_v26, %s17664_s2 }
 0x442   :  { %v12975_v55 = vpop.permute.xlu0 %3535 }
 0x443   :  { %17962 = vst [vmem:[#allocation202_spill] sm:$0xff] %v12975_v55 }
 0x445   :  { %4057 = vrot.lane.b32.xlu0 %v1942_v32, %s17662_s24  ;;  %4055 = vrot.lane.b32.xlu1 %v1940_v26, %s17662_s24 }
 0x449   :  { %4105 = vrot.lane.b32.xlu0 %v1942_v32, %s17659_s3  ;;  %4103 = vrot.lane.b32.xlu1 %v1940_v26, %s17659_s3  ;;  %v12962_v32 = vpop.permute.xlu1 %2771 }
 0x44d   :  { %2169 = vrot.lane.b32.xlu1 %v1946_v2, %s10438_s30  ;;  %2163 = vrot.lane.b32.xlu0 %v1940_v26, %s10438_s30  ;;  %v12969_v53 = vpop.permute.xlu1 %3489 }
 0x44e   :  { %17961 = vst [vmem:[#allocation201_spill] sm:$0xff] %v12969_v53 }
 0x451   :  { %3965 = vrot.lane.b32.xlu1 %v1946_v2, %s17676_s5  ;;  %3959 = vrot.lane.b32.xlu0 %v1940_v26, %s17676_s5  ;;  %v12977_v59 = vpop.permute.xlu1 %2489  ;;  %v10211_v26 = vpop.eup %10210 }
 0x452   :  { %17963 = vst [vmem:[#allocation203_spill] sm:$0xff] %v12977_v59  ;;  %v10213_v9 = vpop.eup %10212  ;;  %v12996_v28 = vmul.f32 %v10211_v26, %v12289_v51 }
 0x453   :  { %v10215_v6 = vpop.eup %10214  ;;  %v12999_v17 = vmul.f32 %v10213_v9, %v12308_v38 }
 0x454   :  { %17966 = vst [vmem:[#allocation206_spill] sm:$0xff] %v12996_v28  ;;  %v10217_v27 = vpop.eup %10216  ;;  %v13010_v53 = vmul.f32 %v10215_v6, %v12336_v62 }
 0x455   :  { %4013 = vrot.lane.b32.xlu1 %v1946_v2, %s17664_s2  ;;  %2167 = vrot.lane.b32.xlu0 %v1944_v57, %s10438_s30  ;;  %v12989_v60 = vpop.permute.xlu1 %2677  ;;  %v13013_v51 = vmul.f32 %v10217_v27, %v12355_v58 }
 0x456   :  { %17965 = vst [vmem:[#allocation205_spill] sm:$0xff] %v12989_v60  ;;  %17967 = vst [vmem:[#allocation207_spill] sm:$0xff] %v13010_v53 }
 0x457   :  { %17968 = vst [vmem:[#allocation208_spill] sm:$0xff] %v13013_v51 }
 0x459   :  { %4061 = vrot.lane.b32.xlu1 %v1946_v2, %s17662_s24  ;;  %4011 = vrot.lane.b32.xlu0 %v1944_v57, %s17664_s2  ;;  %v13007_v46 = vpop.permute.xlu1 %2881  ;;  %s10444_s2 = smov 37  }
 0x45d   :  { %4109 = vrot.lane.b32.xlu1 %v1946_v2, %s17659_s3  ;;  %4059 = vrot.lane.b32.xlu0 %v1944_v57, %s17662_s24  ;;  %v12987_v2 = vpop.permute.xlu0 %2631  ;;  %v13027_v62 = vpop.permute.xlu1 %3583  ;;  %s18076_s24 = smov 39  }
 0x45e   :  { %17964 = vst [vmem:[#allocation204_spill] sm:$0xff] %v12987_v2  ;;  %17972 = vst [vmem:[#allocation212_spill] sm:$0xff] %v13027_v62 }
 0x461   :  { %3963 = vrot.lane.b32.xlu1 %v1944_v57, %s17676_s5  ;;  %4107 = vrot.lane.b32.xlu0 %v1944_v57, %s17659_s3  ;;  %v10219_v57 = vpop.eup %10218  ;;  %v13005_v8 = vpop.permute.xlu0 %2819  ;;  %s18112_s3 = smov 33  }
 0x462   :  { %v10221_v38 = vpop.eup %10220  ;;  %v13023_v9 = vmul.f32 %v10219_v57, %v12382_v36  ;;  %v13039_v36 = vpop.permute.xlu1 %2537 }
 0x463   :  { %v13020_v26 = vmul.f32 %v10221_v38, %v12386_v10  ;;  %17974 = vst [vmem:[#allocation214_spill] sm:$0xff] %v13039_v36 }
 0x464   :  { %17970 = vst [vmem:[#allocation210_spill] sm:$0xff] %v13023_v9 }
 0x465   :  { %2173 = vrot.lane.b32.xlu1 %v12982_v63, %s10438_s30  ;;  %2171 = vrot.lane.b32.xlu0 %v12985_v61, %s10438_s30  ;;  %17969 = vst [vmem:[#allocation209_spill] sm:$0xff] %v13020_v26  ;;  %v13025_v55 = vpop.permute.xlu0 %3537 }
 0x466   :  { %17971 = vst [vmem:[#allocation211_spill] sm:$0xff] %v13025_v55  ;;  %v13047_v6 = vpop.permute.xlu1 %2725 }
 0x467   :  { %17976 = vst [vmem:[#allocation216_spill] sm:$0xff] %v13047_v6 }
 0x469   :  { %2177 = vrot.lane.b32.xlu1 %v12996_v28, %s10438_s30  ;;  %2175 = vrot.lane.b32.xlu0 %v12999_v17, %s10438_s30  ;;  %v13037_v58 = vpop.permute.xlu0 %2491  ;;  %v13232_v28 = vld [vmem:[%s17586_s1 + $0x48] sm:$0xff] }
 0x46a   :  { %17973 = vst [vmem:[#allocation213_spill] sm:$0xff] %v13037_v58  ;;  %v13059_v57 = vpop.permute.xlu1 %2929 }
 0x46d   :  { %2181 = vrot.lane.b32.xlu1 %v13010_v53, %s10438_s30  ;;  %2179 = vrot.lane.b32.xlu0 %v13013_v51, %s10438_s30  ;;  %v13045_v10 = vpop.permute.xlu0 %2679 }
 0x46e   :  { %17975 = vst [vmem:[#allocation215_spill] sm:$0xff] %v13045_v10 }
 0x471   :  { %2185 = vrot.lane.b32.xlu1 %v13020_v26, %s10438_s30  ;;  %2183 = vrot.lane.b32.xlu0 %v13023_v9, %s10438_s30  ;;  %v13057_v27 = vpop.permute.xlu0 %2883  ;;  %s10445_s30 = smov 40  }
 0x475   :  { %3585 = vrot.lane.b32.xlu1 %v12204_v43, %s17678_s29  ;;  %3443 = vrot.lane.b32.xlu0 %v12281_v18, %s17715_s4 }
 0x479   :  { %2539 = vrot.lane.b32.xlu1 %v12847_v31, %s17688_s22  ;;  %3631 = vrot.lane.b32.xlu0 %v12235_v50, %s10431_s0 }
 0x47d   :  { %2727 = vrot.lane.b32.xlu1 %v12626_v14, %s17686_s21  ;;  %2585 = vrot.lane.b32.xlu0 %v12820_v37, %s17678_s29 }
 0x481   :  { %2931 = vrot.lane.b32.xlu1 %v11685_v23, %s17684_s6  ;;  %2773 = vrot.lane.b32.xlu0 %v12576_v21, %s10428_s28 }
 0x485   :  { %3445 = vrot.lane.b32.xlu1 %v12250_v39, %s17715_s4  ;;  %2977 = vrot.lane.b32.xlu0 %v11690_v33, %s10442_s26 }
 0x487   :  { %v13065_v38 = vpop.permute.xlu1 %2157  ;;  %v13067_v55 = vpop.permute.xlu0 %3953 }
 0x488   :  { %17977 = vst [vmem:[#allocation217_spill] sm:$0xff] %v13065_v38 }
 0x489   :  { %3633 = vrot.lane.b32.xlu1 %v12204_v43, %s10431_s0  ;;  %3491 = vrot.lane.b32.xlu0 %v12281_v18, %s17717_s18 }
 0x48b   :  { %v13073_v62 = vpop.permute.xlu1 %3999  ;;  %v13075_v30 = vpop.permute.xlu0 %4001 }
 0x48d   :  { %2587 = vrot.lane.b32.xlu1 %v12847_v31, %s17678_s29  ;;  %3679 = vrot.lane.b32.xlu0 %v12235_v50, %s10432_s17 }
 0x48f   :  { %v13081_v58 = vpop.permute.xlu1 %4047  ;;  %v13083_v38 = vpop.permute.xlu0 %4049 }
 0x491   :  { %2775 = vrot.lane.b32.xlu1 %v12626_v14, %s10428_s28  ;;  %2633 = vrot.lane.b32.xlu0 %v12820_v37, %s10431_s0 }
 0x493   :  { %v13089_v36 = vpop.permute.xlu1 %4095  ;;  %v13091_v59 = vpop.permute.xlu0 %4097 }
 0x495   :  { %2979 = vrot.lane.b32.xlu1 %v11685_v23, %s10442_s26  ;;  %2821 = vrot.lane.b32.xlu0 %v12576_v21, %s10425_s20 }
 0x497   :  { %v13097_v26 = vpop.permute.xlu1 %2161  ;;  %v13099_v9 = vpop.permute.xlu0 %2155 }
 0x498   :  { %17978 = vst [vmem:[#allocation218_spill] sm:$0xff] %v13097_v26  ;;  %17979 = vst [vmem:[#allocation219_spill] sm:$0xff] %v13099_v9  ;;  %v13120_v9 = vld [vmem:[%s17758_s23 + $0x30] sm:$0xff] }
 0x499   :  { %3493 = vrot.lane.b32.xlu1 %v12250_v39, %s17717_s18  ;;  %3025 = vrot.lane.b32.xlu0 %v11690_v33, %s10426_s19 }
 0x49b   :  { %v13105_v53 = vpop.permute.xlu1 %3957  ;;  %v13107_v10 = vpop.permute.xlu0 %3951 }
 0x49d   :  { %3681 = vrot.lane.b32.xlu1 %v12204_v43, %s10432_s17  ;;  %3539 = vrot.lane.b32.xlu0 %v12281_v18, %s17688_s22 }
 0x49f   :  { %v13113_v21 = vpop.permute.xlu1 %4005  ;;  %v13115_v26 = vpop.permute.xlu0 %2159 }
 0x4a0   :  { %17980 = vst [vmem:[#allocation220_spill] sm:$0xff] %v13115_v26 }
 0x4a1   :  { %2493 = vrot.lane.b32.xlu1 %v13120_v9, %s17717_s18  ;;  %3727 = vrot.lane.b32.xlu0 %v12235_v50, %s17686_s21 }
 0x4a3   :  { %v13126_v33 = vpop.permute.xlu1 %4053  ;;  %v13128_v2 = vpop.permute.xlu0 %4003 }
 0x4a5   :  { %2681 = vrot.lane.b32.xlu1 %v12820_v37, %s10432_s17  ;;  %2635 = vrot.lane.b32.xlu0 %v12847_v31, %s10431_s0 }
 0x4a7   :  { %v13134_v26 = vpop.permute.xlu1 %4101  ;;  %v13136_v11 = vpop.permute.xlu0 %4051 }
 0x4a9   :  { %2885 = vrot.lane.b32.xlu1 %v11719_v40, %s10425_s20  ;;  %2823 = vrot.lane.b32.xlu0 %v12626_v14, %s10425_s20 }
 0x4ab   :  { %v13142_v50 = vpop.permute.xlu1 %3955  ;;  %v13144_v51 = vpop.permute.xlu0 %4099 }
 0x4ad   :  { %3073 = vrot.lane.b32.xlu1 %v12008_v41, %s17680_s27  ;;  %3027 = vrot.lane.b32.xlu0 %v11685_v23, %s10426_s19 }
 0x4af   :  { %v13150_v6 = vpop.permute.xlu1 %2165  ;;  %v13152_v60 = vpop.permute.xlu0 %3961 }
 0x4b0   :  { %17981 = vst [vmem:[#allocation221_spill] sm:$0xff] %v13150_v6  ;;  %17982 = vst [vmem:[#allocation222_spill] sm:$0xff] %v13152_v60 }
 0x4b1   :  { %3587 = vrot.lane.b32.xlu1 %v12281_v18, %s17678_s29  ;;  %3541 = vrot.lane.b32.xlu0 %v12250_v39, %s17688_s22 }
 0x4b3   :  { %v13158_v14 = vpop.permute.xlu1 %4007  ;;  %v13160_v13 = vpop.permute.xlu0 %4009 }
 0x4b4   :  { %17983 = vst [vmem:[#allocation223_spill] sm:$0xff] %v13158_v14  ;;  %17984 = vst [vmem:[#allocation224_spill] sm:$0xff] %v13160_v13  ;;  %v13180_v13 = vld [vmem:[%s17758_s23 + $0x38] sm:$0xff] }
 0x4b5   :  { %3775 = vrot.lane.b32.xlu1 %v13165_v25, %s10428_s28  ;;  %3729 = vrot.lane.b32.xlu0 %v12204_v43, %s17686_s21 }
 0x4b7   :  { %v13171_v6 = vpop.permute.xlu1 %4055  ;;  %v13173_v23 = vpop.permute.xlu0 %4057 }
 0x4b8   :  { %17985 = vst [vmem:[#allocation225_spill] sm:$0xff] %v13171_v6  ;;  %17986 = vst [vmem:[#allocation226_spill] sm:$0xff] %v13173_v23 }
 0x4b9   :  { %2541 = vrot.lane.b32.xlu1 %v13120_v9, %s17688_s22  ;;  %2495 = vrot.lane.b32.xlu0 %v13180_v13, %s17717_s18 }
 0x4bb   :  { %v13184_v60 = vpop.permute.xlu1 %4103  ;;  %v13186_v45 = vpop.permute.xlu0 %4105 }
 0x4bc   :  { %17987 = vst [vmem:[#allocation227_spill] sm:$0xff] %v13184_v60  ;;  %17988 = vst [vmem:[#allocation228_spill] sm:$0xff] %v13186_v45  ;;  %v17995_v45 = vld [vmem:[#allocation119_spill] sm:$0xff] }
 0x4bd   :  { %2729 = vrot.lane.b32.xlu1 %v12820_v37, %s17686_s21  ;;  %2683 = vrot.lane.b32.xlu0 %v12847_v31, %s10432_s17 }
 0x4bf   :  { %v13192_v43 = vpop.permute.xlu1 %2169  ;;  %v13194_v23 = vpop.permute.xlu0 %2163 }
 0x4c0   :  { %17989 = vst [vmem:[#allocation229_spill] sm:$0xff] %v13192_v43  ;;  %17990 = vst [vmem:[#allocation230_spill] sm:$0xff] %v13194_v23 }
 0x4c1   :  { %2933 = vrot.lane.b32.xlu1 %v11719_v40, %s17684_s6  ;;  %2887 = vrot.lane.b32.xlu0 %v11709_v12, %s10425_s20 }
 0x4c3   :  { %v13200_v6 = vpop.permute.xlu1 %3965  ;;  %v13202_v60 = vpop.permute.xlu0 %3959 }
 0x4c4   :  { %17991 = vst [vmem:[#allocation231_spill] sm:$0xff] %v13200_v6  ;;  %17992 = vst [vmem:[#allocation232_spill] sm:$0xff] %v13202_v60  ;;  %v17996_v6 = vld [vmem:[#allocation109_spill] sm:$0xff]  ;;  %v17997_v60 = vld [vmem:[#allocation111_spill] sm:$0xff] }
 0x4c5   :  { %3121 = vrot.lane.b32.xlu1 %v12008_v41, %s10444_s2  ;;  %3075 = vrot.lane.b32.xlu0 %v11989_v0, %s17680_s27  ;;  %v4143_v14 = vsel %vm17753_vm0, %v12008_v41, %v17996_v6 }
 0x4c6   :  { %v4159_v44 = vsel %vm3185_vm1, %v4143_v14, %v17997_v60 }
 0x4c7   :  { %v13208_v43 = vpop.permute.xlu1 %4013  ;;  %v13210_v23 = vpop.permute.xlu0 %2167 }
 0x4c8   :  { %17993 = vst [vmem:[#allocation233_spill] sm:$0xff] %v13208_v43  ;;  %17994 = vst [vmem:[#allocation234_spill] sm:$0xff] %v13210_v23  ;;  %v18000_v23 = vld [vmem:[#allocation114_spill] sm:$0xff] }
 0x4c9   :  { %3589 = vrot.lane.b32.xlu1 %v12250_v39, %s17678_s29  ;;  %3447 = vrot.lane.b32.xlu0 %v17995_v45, %s17715_s4  ;;  %v4175_v16 = vsel %vm3202_vm2, %v4159_v44, %v18000_v23  ;;  %v18004_v23 = vld [vmem:[#allocation105_spill] sm:$0xff] }
 0x4ca   :  { %v4191_v54 = vsel %vm3219_vm3, %v4175_v16, %v18001_v19  ;;  %v18005_v19 = vld [vmem:[#allocation108_spill] sm:$0xff] }
 0x4cb   :  { %v13221_v4 = vpop.permute.xlu1 %4061  ;;  %v13223_v43 = vpop.permute.xlu0 %4011  ;;  %v4207_v44 = vsel %vm17698_vm4, %v4191_v54, %v18004_v23  ;;  %v18008_v54 = vld [vmem:[#allocation110_spill] sm:$0xff] }
 0x4cc   :  { %17998 = vst [vmem:[#allocation109_spill] sm:$0xff] %v13221_v4  ;;  %17999 = vst [vmem:[#allocation111_spill] sm:$0xff] %v13223_v43  ;;  %v4223_v16 = vsel %vm17697_vm5, %v4207_v44, %v18005_v19  ;;  %v18011_v44 = vld [vmem:[#allocation74_spill] sm:$0xff] }
 0x4cd   :  { %3777 = vrot.lane.b32.xlu1 %v13232_v28, %s10428_s28  ;;  %3635 = vrot.lane.b32.xlu0 %v12281_v18, %s10431_s0  ;;  %v4239_v23 = vsel %vm17694_vm6, %v4223_v16, %v18008_v54  ;;  %v18014_v16 = vld [vmem:[#allocation79_spill] sm:$0xff] }
 0x4ce   :  { %v4255_v19 = vsel %vm17695_vm7, %v4239_v23, %v18011_v44  ;;  %v18015_v23 = vld [vmem:[#allocation81_spill] sm:$0xff] }
 0x4cf   :  { %v13238_v41 = vpop.permute.xlu1 %4109  ;;  %v13240_v60 = vpop.permute.xlu0 %4059  ;;  %v4271_v54 = vsel %vm17752_vm8, %v4255_v19, %v18014_v16  ;;  %v18018_v19 = vld [vmem:[#allocation115_spill] sm:$0xff] }
 0x4d0   :  { %18002 = vst [vmem:[#allocation114_spill] sm:$0xff] %v13238_v41  ;;  %18003 = vst [vmem:[#allocation117_spill] sm:$0xff] %v13240_v60  ;;  %v4287_v44 = vsel %vm17751_vm9, %v4271_v54, %v18015_v23  ;;  %v18019_v16 = vld [vmem:[#allocation83_spill] sm:$0xff]  ;;  %v18022_v23 = vld [vmem:[#allocation97_spill] sm:$0xff] }
 0x4d1   :  { %2543 = vrot.lane.b32.xlu1 %v13180_v13, %s17688_s22  ;;  %3823 = vrot.lane.b32.xlu0 %v13165_v25, %s10425_s20 }
 0x4d3   :  { %v13250_v6 = vpop.permute.xlu1 %3963  ;;  %v13252_v14 = vpop.permute.xlu0 %4107 }
 0x4d4   :  { %18006 = vst [vmem:[#allocation105_spill] sm:$0xff] %v13250_v6  ;;  %18007 = vst [vmem:[#allocation108_spill] sm:$0xff] %v13252_v14 }
 0x4d5   :  { %2731 = vrot.lane.b32.xlu1 %v12847_v31, %s17686_s21  ;;  %2589 = vrot.lane.b32.xlu0 %v13120_v9, %s17678_s29 }
 0x4d7   :  { %v13260_v41 = vpop.permute.xlu1 %2173  ;;  %v13262_v4 = vpop.permute.xlu0 %2171 }
 0x4d8   :  { %18009 = vst [vmem:[#allocation110_spill] sm:$0xff] %v13260_v41  ;;  %18010 = vst [vmem:[#allocation235_spill] sm:$0xff] %v13262_v4 }
 0x4d9   :  { %2935 = vrot.lane.b32.xlu1 %v11709_v12, %s17684_s6  ;;  %2777 = vrot.lane.b32.xlu0 %v12820_v37, %s10428_s28 }
 0x4db   :  { %v13270_v14 = vpop.permute.xlu1 %2177  ;;  %v13272_v60 = vpop.permute.xlu0 %2175 }
 0x4dc   :  { %18012 = vst [vmem:[#allocation74_spill] sm:$0xff] %v13270_v14  ;;  %18013 = vst [vmem:[#allocation236_spill] sm:$0xff] %v13272_v60  ;;  %v4303_v14 = vsel %vm17750_vm10, %v4287_v44, %v18019_v16  ;;  %v18023_v16 = vld [vmem:[#allocation100_spill] sm:$0xff] }
 0x4dd   :  { %3123 = vrot.lane.b32.xlu1 %v11989_v0, %s10444_s2  ;;  %2981 = vrot.lane.b32.xlu0 %v11719_v40, %s10442_s26  ;;  %v4320_v60 = vsel %vm17696_vm11, %v4303_v14, %v13107_v10 }
 0x4de   :  { %v4337_v44 = vsel %vm17692_vm12, %v4320_v60, %v13073_v62  ;;  %v18027_v62 = vld [vmem:[#allocation96_spill] sm:$0xff] }
 0x4df   :  { %v13282_v41 = vpop.permute.xlu1 %2181  ;;  %v13284_v4 = vpop.permute.xlu0 %2179 }
 0x4e0   :  { %18016 = vst [vmem:[#allocation79_spill] sm:$0xff] %v13282_v41  ;;  %18017 = vst [vmem:[#allocation81_spill] sm:$0xff] %v13284_v4  ;;  %v4144_v41 = vsel %vm17753_vm0, %v11989_v0, %v18022_v23  ;;  %v4354_v0 = vsel %vm17691_vm13, %v4337_v44, %v13081_v58 }
 0x4e1   :  { %3495 = vrot.lane.b32.xlu1 %v17995_v45, %s17717_s18  ;;  %3449 = vrot.lane.b32.xlu0 %v18018_v19, %s17715_s4  ;;  %v4160_v10 = vsel %vm3185_vm1, %v4144_v41, %v18023_v16  ;;  %v18030_v16 = vld [vmem:[#allocation98_spill] sm:$0xff] }
 0x4e3   :  { %v13294_v43 = vpop.permute.xlu1 %2185  ;;  %v13296_v54 = vpop.permute.xlu0 %2183 }
 0x4e4   :  { %18020 = vst [vmem:[#allocation83_spill] sm:$0xff] %v13294_v43  ;;  %18021 = vst [vmem:[#allocation237_spill] sm:$0xff] %v13296_v54  ;;  %v18026_v54 = vld [vmem:[#allocation102_spill] sm:$0xff] }
 0x4e5   :  { %3683 = vrot.lane.b32.xlu1 %v12281_v18, %s10432_s17  ;;  %3637 = vrot.lane.b32.xlu0 %v12250_v39, %s10431_s0  ;;  %v4176_v4 = vsel %vm3202_vm2, %v4160_v10, %v18026_v54  ;;  %v4371_v54 = vsel %vm17690_vm14, %v4354_v0, %v13089_v36  ;;  %v18033_v10 = vld [vmem:[#allocation101_spill] sm:$0xff] }
 0x4e6   :  { %v4192_v41 = vsel %vm3219_vm3, %v4176_v4, %v18027_v62 }
 0x4e7   :  { %v13309_v14 = vpop.permute.xlu1 %3585  ;;  %v13311_v43 = vpop.permute.xlu0 %3443  ;;  %v4208_v58 = vsel %vm17698_vm4, %v4192_v41, %v18030_v16  ;;  %v18036_v16 = vld [vmem:[#allocation76_spill] sm:$0xff] }
 0x4e8   :  { %18024 = vst [vmem:[#allocation97_spill] sm:$0xff] %v13309_v14  ;;  %18025 = vst [vmem:[#allocation100_spill] sm:$0xff] %v13311_v43  ;;  %v4224_v62 = vsel %vm17697_vm5, %v4208_v58, %v18033_v10 }
 0x4e9   :  { %3871 = vrot.lane.b32.xlu1 %v13165_v25, %s10426_s19  ;;  %3825 = vrot.lane.b32.xlu0 %v13232_v28, %s10425_s20 }
 0x4eb   :  { %v13323_v60 = vpop.permute.xlu1 %2539  ;;  %v13325_v23 = vpop.permute.xlu0 %3631 }
 0x4ec   :  { %18028 = vst [vmem:[#allocation102_spill] sm:$0xff] %v13323_v60  ;;  %18029 = vst [vmem:[#allocation96_spill] sm:$0xff] %v13325_v23 }
 0x4ed   :  { %2591 = vrot.lane.b32.xlu1 %v13180_v13, %s17678_s29  ;;  %4403 = vrot.lane.b32.xlu0 %v4371_v54, %s10445_s30  ;;  %v18035_v54 = vld [vmem:[#allocation103_spill] sm:$0xff] }
 0x4ee   :  { %v4240_v41 = vsel %vm17694_vm6, %v4224_v62, %v18035_v54  ;;  %v18038_v62 = vld [vmem:[#allocation78_spill] sm:$0xff] }
 0x4ef   :  { %v13334_v44 = vpop.permute.xlu1 %2727  ;;  %v13336_v4 = vpop.permute.xlu0 %2585  ;;  %v4256_v58 = vsel %vm17695_vm7, %v4240_v41, %v18036_v16 }
 0x4f0   :  { %18031 = vst [vmem:[#allocation98_spill] sm:$0xff] %v13334_v44  ;;  %18032 = vst [vmem:[#allocation238_spill] sm:$0xff] %v13336_v4  ;;  %v4272_v54 = vsel %vm17752_vm8, %v4256_v58, %v18038_v62  ;;  %v18074_v4 = vld [vmem:[#allocation131_spill] sm:$0xff] }
 0x4f1   :  { %2779 = vrot.lane.b32.xlu1 %v12847_v31, %s10428_s28  ;;  %2637 = vrot.lane.b32.xlu0 %v13120_v9, %s10431_s0 }
 0x4f3   :  { %v13344_v36 = vpop.permute.xlu1 %2931  ;;  %v13346_v0 = vpop.permute.xlu0 %2773 }
 0x4f4   :  { %18034 = vst [vmem:[#allocation101_spill] sm:$0xff] %v13346_v0  ;;  %v18091_v0 = vld [vmem:[#allocation86_spill] sm:$0xff] }
 0x4f5   :  { %2983 = vrot.lane.b32.xlu1 %v11709_v12, %s10442_s26  ;;  %2825 = vrot.lane.b32.xlu0 %v12820_v37, %s10425_s20  ;;  %v18041_v37 = vld [vmem:[#allocation80_spill] sm:$0xff] }
 0x4f6   :  { %v4288_v41 = vsel %vm17751_vm9, %v4272_v54, %v18041_v37 }
 0x4f7   :  { %v13356_v10 = vpop.permute.xlu1 %3445  ;;  %v13358_v43 = vpop.permute.xlu0 %2977 }
 0x4f8   :  { %18037 = vst [vmem:[#allocation103_spill] sm:$0xff] %v13356_v10 }
 0x4f9   :  { %3497 = vrot.lane.b32.xlu1 %v18018_v19, %s17717_s18  ;;  %3029 = vrot.lane.b32.xlu0 %v11719_v40, %s10426_s19  ;;  %v18044_v40 = vld [vmem:[#allocation82_spill] sm:$0xff] }
 0x4fa   :  { %v4304_v58 = vsel %vm17750_vm10, %v4288_v41, %v18044_v40 }
 0x4fb   :  { %v13366_v14 = vpop.permute.xlu1 %3633  ;;  %v13368_v23 = vpop.permute.xlu0 %3491  ;;  %v4321_v62 = vsel %vm17696_vm11, %v4304_v58, %v13067_v55 }
 0x4fc   :  { %18039 = vst [vmem:[#allocation76_spill] sm:$0xff] %v13366_v14  ;;  %18040 = vst [vmem:[#allocation78_spill] sm:$0xff] %v13368_v23  ;;  %v4338_v54 = vsel %vm17692_vm12, %v4321_v62, %v13075_v30  ;;  %v18052_v62 = vld [vmem:[#allocation90_spill] sm:$0xff] }
 0x4fd   :  { %3685 = vrot.lane.b32.xlu1 %v12250_v39, %s10432_s17  ;;  %3543 = vrot.lane.b32.xlu0 %v17995_v45, %s17688_s22  ;;  %v4355_v37 = vsel %vm17691_vm13, %v4338_v54, %v13083_v38 }
 0x4fe   :  { %v4372_v40 = vsel %vm17690_vm14, %v4355_v37, %v13091_v59  ;;  %v18049_v59 = vld [vmem:[#allocation13_spill] sm:$0xff] }
 0x4ff   :  { %v13376_v16 = vpop.permute.xlu1 %2587  ;;  %v13378_v10 = vpop.permute.xlu0 %3679 }
 0x500   :  { %18042 = vst [vmem:[#allocation80_spill] sm:$0xff] %v13376_v16  ;;  %18043 = vst [vmem:[#allocation239_spill] sm:$0xff] %v13378_v10 }
 0x501   :  { %3873 = vrot.lane.b32.xlu1 %v13232_v28, %s10426_s19  ;;  %3731 = vrot.lane.b32.xlu0 %v12281_v18, %s17686_s21 }
 0x503   :  { %v13392_v23 = vpop.permute.xlu1 %2775  ;;  %v13394_v14 = vpop.permute.xlu0 %2633 }
 0x504   :  { %18045 = vst [vmem:[#allocation82_spill] sm:$0xff] %v13392_v23  ;;  %18046 = vst [vmem:[#allocation240_spill] sm:$0xff] %v13394_v14 }
 0x505   :  { %4405 = vrot.lane.b32.xlu1 %v4372_v40, %s10445_s30  ;;  %3919 = vrot.lane.b32.xlu0 %v13165_v25, %s17682_s25 }
 0x507   :  { %v13401_v55 = vpop.permute.xlu1 %2979  ;;  %v13403_v41 = vpop.permute.xlu0 %2821 }
 0x508   :  { %18047 = vst [vmem:[#allocation241_spill] sm:$0xff] %v13403_v41  ;;  %v7811_v41 = vld [vmem:[%s17590_s9 + $0x20] sm:$0xff] }
 0x509   :  { %2685 = vrot.lane.b32.xlu1 %v13120_v9, %s10432_s17  ;;  %2639 = vrot.lane.b32.xlu0 %v13180_v13, %s10431_s0 }
 0x50b   :  { %v13409_v30 = vpop.permute.xlu1 %3493  ;;  %v13411_v38 = vpop.permute.xlu0 %3025 }
 0x50c   :  { %18048 = vst [vmem:[#allocation242_spill] sm:$0xff] %v13409_v30  ;;  %v13440_v30 = vld [vmem:[%s17586_s1 + $0x50] sm:$0xff] }
 0x50d   :  { %2889 = vrot.lane.b32.xlu1 %v18049_v59, %s10425_s20  ;;  %2827 = vrot.lane.b32.xlu0 %v12847_v31, %s10425_s20 }
 0x50f   :  { %v13417_v25 = vpop.permute.xlu1 %3681  ;;  %v13419_v58 = vpop.permute.xlu0 %3539 }
 0x510   :  { %18050 = vst [vmem:[#allocation243_spill] sm:$0xff] %v13417_v25  ;;  %18051 = vst [vmem:[#allocation244_spill] sm:$0xff] %v13419_v58 }
 0x511   :  { %3077 = vrot.lane.b32.xlu1 %v18052_v62, %s17680_s27  ;;  %3031 = vrot.lane.b32.xlu0 %v11709_v12, %s10426_s19  ;;  %v18061_v12 = vld [vmem:[#allocation11_spill] sm:$0xff] }
 0x513   :  { %v13425_v54 = vpop.permute.xlu1 %2493  ;;  %v13427_v37 = vpop.permute.xlu0 %3727 }
 0x514   :  { %18053 = vst [vmem:[#allocation90_spill] sm:$0xff] %v13425_v54  ;;  %18054 = vst [vmem:[#allocation245_spill] sm:$0xff] %v13427_v37 }
 0x515   :  { %3591 = vrot.lane.b32.xlu1 %v17995_v45, %s17678_s29  ;;  %3545 = vrot.lane.b32.xlu0 %v18018_v19, %s17688_s22  ;;  %s18110_s22 = smov 21  }
 0x517   :  { %v13433_v31 = vpop.permute.xlu1 %2681  ;;  %v13435_v40 = vpop.permute.xlu0 %2635 }
 0x518   :  { %18055 = vst [vmem:[#allocation246_spill] sm:$0xff] %v13433_v31  ;;  %18056 = vst [vmem:[#allocation247_spill] sm:$0xff] %v13435_v40  ;;  %v18064_v40 = vld [vmem:[#allocation89_spill] sm:$0xff]  ;;  %v18072_v31 = vld [vmem:[#allocation127_spill] sm:$0xff] }
 0x519   :  { %3779 = vrot.lane.b32.xlu1 %v13440_v30, %s10428_s28  ;;  %3733 = vrot.lane.b32.xlu0 %v12250_v39, %s17686_s21 }
 0x51b   :  { %v13446_v58 = vpop.permute.xlu1 %2885  ;;  %v13448_v18 = vpop.permute.xlu0 %2823 }
 0x51c   :  { %18057 = vst [vmem:[#allocation248_spill] sm:$0xff] %v13446_v58  ;;  %18058 = vst [vmem:[#allocation249_spill] sm:$0xff] %v13448_v18  ;;  %v18075_v18 = vld [vmem:[#allocation133_spill] sm:$0xff] }
 0x51d   :  { %3967 = vrot.lane.b32.xlu1 %v12985_v61, %s17676_s5  ;;  %3921 = vrot.lane.b32.xlu0 %v13232_v28, %s17682_s25  ;;  %s18118_s25 = smov 45  }
 0x51f   :  { %v13454_v25 = vpop.permute.xlu1 %3073  ;;  %v13456_v37 = vpop.permute.xlu0 %3027 }
 0x521   :  { %2733 = vrot.lane.b32.xlu1 %v13120_v9, %s17686_s21  ;;  %2687 = vrot.lane.b32.xlu0 %v13180_v13, %s10432_s17 }
 0x523   :  { %v13462_v39 = vpop.permute.xlu1 %3587  ;;  %v13464_v10 = vpop.permute.xlu0 %3541 }
 0x524   :  { %18059 = vst [vmem:[#allocation250_spill] sm:$0xff] %v13462_v39  ;;  %18060 = vst [vmem:[#allocation251_spill] sm:$0xff] %v13464_v10  ;;  %v18067_v10 = vld [vmem:[#allocation124_spill] sm:$0xff] }
 0x525   :  { %2937 = vrot.lane.b32.xlu1 %v18049_v59, %s17684_s6  ;;  %2891 = vrot.lane.b32.xlu0 %v18061_v12, %s10425_s20 }
 0x527   :  { %v13470_v28 = vpop.permute.xlu1 %3775  ;;  %v13472_v54 = vpop.permute.xlu0 %3729 }
 0x528   :  { %18062 = vst [vmem:[#allocation252_spill] sm:$0xff] %v13470_v28  ;;  %18063 = vst [vmem:[#allocation253_spill] sm:$0xff] %v13472_v54  ;;  %v13493_v54 = vld [vmem:[%s17586_s1 + $0x58] sm:$0xff] }
 0x529   :  { %3125 = vrot.lane.b32.xlu1 %v18052_v62, %s10444_s2  ;;  %3079 = vrot.lane.b32.xlu0 %v18064_v40, %s17680_s27  ;;  %s18093_s27 = smov 42  }
 0x52b   :  { %v13478_v16 = vpop.permute.xlu1 %2541  ;;  %v13480_v39 = vpop.permute.xlu0 %2495 }
 0x52c   :  { %18065 = vst [vmem:[#allocation89_spill] sm:$0xff] %v13478_v16  ;;  %18066 = vst [vmem:[#allocation254_spill] sm:$0xff] %v13480_v39 }
 0x52d   :  { %3593 = vrot.lane.b32.xlu1 %v18018_v19, %s17678_s29  ;;  %3451 = vrot.lane.b32.xlu0 %v18067_v10, %s17715_s4  ;;  %s18127_s29 = smov 12  }
 0x52f   :  { %v13486_v60 = vpop.permute.xlu1 %2729  ;;  %v13488_v28 = vpop.permute.xlu0 %2683 }
 0x530   :  { %18068 = vst [vmem:[#allocation255_spill] sm:$0xff] %v13486_v60  ;;  %18069 = vst [vmem:[#allocation256_spill] sm:$0xff] %v13488_v28  ;;  %v4145_v60 = vsel %vm17753_vm0, %v18052_v62, %v18072_v31  ;;  %v18073_v28 = vld [vmem:[#allocation129_spill] sm:$0xff] }
 0x531   :  { %3781 = vrot.lane.b32.xlu1 %v13493_v54, %s10428_s28  ;;  %3639 = vrot.lane.b32.xlu0 %v17995_v45, %s10431_s0  ;;  %v4161_v14 = vsel %vm3185_vm1, %v4145_v60, %v18073_v28  ;;  %v18077_v60 = vld [vmem:[#allocation130_spill] sm:$0xff] }
 0x532   :  { %v4177_v6 = vsel %vm3202_vm2, %v4161_v14, %v18074_v4  ;;  %v18080_v14 = vld [vmem:[#allocation132_spill] sm:$0xff] }
 0x533   :  { %v13499_v39 = vpop.permute.xlu1 %2933  ;;  %v13501_v16 = vpop.permute.xlu0 %2887  ;;  %v4193_v23 = vsel %vm3219_vm3, %v4177_v6, %v18075_v18 }
 0x534   :  { %18070 = vst [vmem:[#allocation257_spill] sm:$0xff] %v13499_v39  ;;  %18071 = vst [vmem:[#allocation258_spill] sm:$0xff] %v13501_v16  ;;  %v4209_v62 = vsel %vm17698_vm4, %v4193_v23, %v18077_v60  ;;  %v18083_v39 = vld [vmem:[#allocation134_spill] sm:$0xff] }
 0x535   :  { %3969 = vrot.lane.b32.xlu1 %v12982_v63, %s17676_s5  ;;  %3827 = vrot.lane.b32.xlu0 %v13440_v30, %s10425_s20  ;;  %v4225_v18 = vsel %vm17697_vm5, %v4209_v62, %v18080_v14  ;;  %v7807_v60 = vld [vmem:[%s17590_s9] sm:$0xff]  ;;  %v7808_v62 = vld [vmem:[%s17590_s9 + $0x8] sm:$0xff]  ;;  %s18128_s5 = smov 36  }
 0x536   :  { %v4241_v23 = vsel %vm17694_vm6, %v4225_v18, %v18083_v39  ;;  %v7809_v14 = vld [vmem:[%s17590_s9 + $0x10] sm:$0xff]  ;;  %v7810_v39 = vld [vmem:[%s17590_s9 + $0x18] sm:$0xff] }
 0x537   :  { %v13516_v16 = vpop.permute.xlu1 %3121  ;;  %v13518_v44 = vpop.permute.xlu0 %3075  ;;  %v9828_v18 = vpack.c.bf16 %v7810_v39, %v7809_v14 }
 0x539   :  { %2735 = vrot.lane.b32.xlu1 %v13180_v13, %s17686_s21  ;;  %4015 = vrot.lane.b32.xlu0 %v12985_v61, %s18076_s24  ;;  %s18134_s21 = smov 28  }
 0x53b   :  { %v13526_v31 = vpop.permute.xlu1 %3589  ;;  %v13528_v28 = vpop.permute.xlu0 %3447 }
 0x53c   :  { %18078 = vst [vmem:[#allocation127_spill] sm:$0xff] %v13526_v31  ;;  %18079 = vst [vmem:[#allocation129_spill] sm:$0xff] %v13528_v28  ;;  %v9824_v28 = vpack.c.bf16 %v7808_v62, %v7807_v60  ;;  %v18084_v31 = vld [vmem:[#allocation85_spill] sm:$0xff]  ;;  %v7812_v60 = vld [vmem:[%s17590_s9 + $0x28] sm:$0xff] }
 0x53d   :  { %2939 = vrot.lane.b32.xlu1 %v18061_v12, %s17684_s6  ;;  %2781 = vrot.lane.b32.xlu0 %v13120_v9, %s10428_s28  ;;  %v9832_v14 = vpack.c.bf16 %v7812_v60, %v7811_v41  ;;  %s18107_s6 = smov 9  }
 0x53e   :  { %9825 = vmatprep.subr.bf16.mxu0 %v9824_v28  ;;  %9904 = vmatprep.subr.bf16.mxu1 %v9824_v28 }
 0x53f   :  { %v13536_v6 = vpop.permute.xlu1 %3777  ;;  %v13538_v4 = vpop.permute.xlu0 %3635  ;;  %9827 = vmatpush3.bf16.msra.mxu0 %v9824_v28  ;;  %9910 = vmatpush3.bf16.msra.mxu1 %v9824_v28  ;;  %v7813_v28 = vld [vmem:[%s17590_s9 + $0x30] sm:$0xff] }
 0x540   :  { %18081 = vst [vmem:[#allocation131_spill] sm:$0xff] %v13536_v6  ;;  %18082 = vst [vmem:[#allocation133_spill] sm:$0xff] %v13538_v4  ;;  %v4257_v4 = vsel %vm17695_vm7, %v4241_v23, %v18084_v31  ;;  %v18087_v31 = vld [vmem:[#allocation121_spill] sm:$0xff]  ;;  %v18088_v23 = vld [vmem:[#allocation84_spill] sm:$0xff]  ;;  %9829 = vmatprep.subr.bf16.mxu0 %v9828_v18  ;;  %9905 = vmatprep.subr.bf16.mxu1 %v9828_v18 }
 0x541   :  { %3127 = vrot.lane.b32.xlu1 %v18064_v40, %s10444_s2  ;;  %2985 = vrot.lane.b32.xlu0 %v18049_v59, %s10442_s26  ;;  %v4273_v62 = vsel %vm17752_vm8, %v4257_v4, %v18088_v23 }
 0x542   :  { %v4289_v4 = vsel %vm17751_vm9, %v4273_v62, %v18091_v0  ;;  %v7815_v0 = vld [vmem:[%s17590_s9 + $0x40] sm:$0xff]  ;;  %v7816_v62 = vld [vmem:[%s17590_s9 + $0x48] sm:$0xff] }
 0x543   :  { %v13560_v6 = vpop.permute.xlu1 %2543  ;;  %v13562_v58 = vpop.permute.xlu0 %3823  ;;  %9831 = vmatpush3.bf16.msra.mxu0 %v9828_v18  ;;  %9911 = vmatpush3.bf16.msra.mxu1 %v9828_v18  ;;  %v4305_v41 = vsel %vm17750_vm10, %v4289_v4, %v12751_v47  ;;  %v9840_v47 = vpack.c.bf16 %v7816_v62, %v7815_v0  ;;  %v18094_v0 = vld [vmem:[#allocation123_spill] sm:$0xff] }
 0x544   :  { %18085 = vst [vmem:[#allocation130_spill] sm:$0xff] %v13560_v6  ;;  %18086 = vst [vmem:[#allocation132_spill] sm:$0xff] %v13562_v58  ;;  %v7814_v6 = vld [vmem:[%s17590_s9 + $0x38] sm:$0xff]  ;;  %9833 = vmatprep.subr.bf16.mxu0 %v9832_v14  ;;  %9906 = vmatprep.subr.bf16.mxu1 %v9832_v14  ;;  %v4322_v23 = vsel %vm17696_vm11, %v4305_v41, %v13142_v50  ;;  %v4146_v62 = vsel %vm17753_vm0, %v18064_v40, %v18094_v0 }
 0x545   :  { %3499 = vrot.lane.b32.xlu1 %v18067_v10, %s17717_s18  ;;  %3453 = vrot.lane.b32.xlu0 %v18087_v31, %s17715_s4  ;;  %v9836_v60 = vpack.c.bf16 %v7814_v6, %v7813_v28  ;;  %v4339_v50 = vsel %vm17692_vm12, %v4322_v23, %v13128_v2  ;;  %v10378_v6 = vld [vmem:[%s17758_s23] sm:$0xff]  ;;  %v18092_v28 = vld [vmem:[#allocation68_spill] sm:$0xff]  ;;  %vm17720_vm12 = vcmask 302080  }
 0x546   :  { %v3169_v4 = vsel %vm17753_vm0, %v10378_v6, %v18092_v28  ;;  %v4356_v23 = vsel %vm17691_vm13, %v4339_v50, %v13136_v11  ;;  %v18098_v6 = vld [vmem:[#allocation126_spill] sm:$0xff]  ;;  %vm17723_vm13 = vcmask 277504  }
 0x547   :  { %v13576_v39 = vpop.permute.xlu1 %2731  ;;  %v13578_v58 = vpop.permute.xlu0 %2589  ;;  %9835 = vmatpush3.bf16.msra.mxu0 %v9832_v14  ;;  %9912 = vmatpush3.bf16.msra.mxu1 %v9832_v14  ;;  %v4373_v40 = vsel %vm17690_vm14, %v4356_v23, %v13144_v51  ;;  %vm17749_vm14 = vcmask 261120  }
 0x548   :  { %18089 = vst [vmem:[#allocation134_spill] sm:$0xff] %v13576_v39  ;;  %18090 = vst [vmem:[#allocation85_spill] sm:$0xff] %v13578_v58  ;;  %9837 = vmatprep.subr.bf16.mxu0 %v9836_v60  ;;  %9907 = vmatprep.subr.bf16.mxu1 %v9836_v60  ;;  %v3186_v39 = vsel %vm3185_vm1, %v3169_v4, %v12879_v15 }
 0x549   :  { %3687 = vrot.lane.b32.xlu1 %v17995_v45, %s10432_s17  ;;  %3641 = vrot.lane.b32.xlu0 %v18018_v19, %s10431_s0  ;;  %v3203_v2 = vsel %vm3202_vm2, %v3186_v39, %v12883_v48 }
 0x54a   :  { %v3220_v15 = vsel %vm3219_vm3, %v3203_v2, %v12887_v22  ;;  %v18099_v22 = vld [vmem:[#allocation116_spill] sm:$0xff] }
 0x54b   :  { %v13596_v58 = vpop.permute.xlu1 %2935  ;;  %v13598_v18 = vpop.permute.xlu0 %2777  ;;  %9839 = vmatpush3.bf16.msra.mxu0 %v9836_v60  ;;  %9913 = vmatpush3.bf16.msra.mxu1 %v9836_v60  ;;  %v18095_v60 = vld [vmem:[#allocation125_spill] sm:$0xff]  ;;  %v3237_v11 = vsel %vm17698_vm4, %v3220_v15, %v12891_v42 }
 0x54c   :  { %9841 = vmatprep.subr.bf16.mxu0 %v9840_v47  ;;  %9908 = vmatprep.subr.bf16.mxu1 %v9840_v47  ;;  %v4162_v48 = vsel %vm3185_vm1, %v4146_v62, %v18095_v60  ;;  %v3254_v42 = vsel %vm17697_vm5, %v3237_v11, %v12893_v7  ;;  %v18102_v7 = vld [vmem:[#allocation118_spill] sm:$0xff]  ;;  %v7817_v60 = vld [vmem:[%s17590_s9 + $0x50] sm:$0xff]  ;;  %s18124_s9 = smov 34  }
 0x54d   :  { %3875 = vrot.lane.b32.xlu1 %v13440_v30, %s10426_s19  ;;  %3829 = vrot.lane.b32.xlu0 %v13493_v54, %s10425_s20  ;;  %v4178_v28 = vsel %vm3202_vm2, %v4162_v48, %v18098_v6  ;;  %v3271_v2 = vsel %vm17694_vm6, %v3254_v42, %v12901_v34  ;;  %v18105_v48 = vld [vmem:[#allocation120_spill] sm:$0xff] }
 0x54e   :  { %v4194_v4 = vsel %vm3219_vm3, %v4178_v28, %v18099_v22  ;;  %v3288_v51 = vsel %vm17695_vm7, %v3271_v2, %v12945_v35 }
 0x54f   :  { %v13617_v14 = vpop.permute.xlu1 %3123  ;;  %v13619_v41 = vpop.permute.xlu0 %2981  ;;  %9843 = vmatpush3.bf16.msra.mxu0 %v9840_v47  ;;  %9914 = vmatpush3.bf16.msra.mxu1 %v9840_v47  ;;  %v3305_v47 = vsel %vm17752_vm8, %v3288_v51, %v12967_v52  ;;  %v4210_v34 = vsel %vm17698_vm4, %v4194_v4, %v18102_v7  ;;  %v18108_v4 = vld [vmem:[#allocation65_spill] sm:$0xff]  ;;  %v18109_v51 = vld [vmem:[#allocation87_spill] sm:$0xff] }
 0x550   :  { %v3322_v23 = vsel %vm17751_vm9, %v3305_v47, %v13007_v46  ;;  %9576 = vmatprep.subr.mxu0 %v7817_v60  ;;  %9909 = vmatprep.subr.mxu1 %v7817_v60  ;;  %v4226_v46 = vsel %vm17697_vm5, %v4210_v34, %v18105_v48 }
 0x551   :  { %4063 = vrot.lane.b32.xlu1 %v12985_v61, %s18093_s27  ;;  %4017 = vrot.lane.b32.xlu0 %v12982_v63, %s18076_s24  ;;  %v3339_v35 = vsel %vm17693_vm15, %v3322_v23, %v13059_v57  ;;  %vm17719_vm15 = vcmask 326656  }
 0x553   :  { %v13640_v39 = vpop.permute.xlu1 %3495  ;;  %v13642_v50 = vpop.permute.xlu0 %3449  ;;  %9577 = vmatpush3.msra.mxu0 %v7817_v60  ;;  %9915 = vmatpush3.msra.mxu1 %v7817_v60 }
 0x554   :  { %18096 = vst [vmem:[#allocation84_spill] sm:$0xff] %v13640_v39  ;;  %18097 = vst [vmem:[#allocation86_spill] sm:$0xff] %v13642_v50 }
 0x555   :  { %2783 = vrot.lane.b32.xlu1 %v13180_v13, %s10428_s28  ;;  %4407 = vrot.lane.b32.xlu0 %v4373_v40, %s10445_s30  ;;  %v18106_v40 = vld [vmem:[#allocation122_spill] sm:$0xff] }
 0x556   :  { %v4242_v42 = vsel %vm17694_vm6, %v4226_v46, %v18106_v40 }
 0x557   :  { %v13657_v0 = vpop.permute.xlu1 %3683  ;;  %v13659_v62 = vpop.permute.xlu0 %3637  ;;  %v4258_v47 = vsel %vm17695_vm7, %v4242_v42, %v18109_v51 }
 0x558   :  { %18100 = vst [vmem:[#allocation68_spill] sm:$0xff] %v13657_v0  ;;  %18101 = vst [vmem:[#allocation123_spill] sm:$0xff] %v13659_v62 }
 0x559   :  { %2987 = vrot.lane.b32.xlu1 %v18061_v12, %s10442_s26  ;;  %2829 = vrot.lane.b32.xlu0 %v13120_v9, %s10425_s20  ;;  %v3356_v9 = vsel %vm17749_vm14, %v3339_v35, %v13358_v43  ;;  %v13697_v43 = vld [vmem:[%s17591_s7] ss:$0 sm:$0xff] }
 0x55a   :  { %v3373_v57 = vsel %vm17750_vm10, %v3356_v9, %v13411_v38 }
 0x55b   :  { %v13675_v15 = vpop.permute.xlu1 %3871  ;;  %v13677_v52 = vpop.permute.xlu0 %3825  ;;  %v3390_v11 = vsel %vm17723_vm13, %v3373_v57, %v13454_v25 }
 0x55c   :  { %18103 = vst [vmem:[#allocation125_spill] sm:$0xff] %v13675_v15  ;;  %18104 = vst [vmem:[#allocation126_spill] sm:$0xff] %v13677_v52  ;;  %v3407_v38 = vsel %vm17720_vm12, %v3390_v11, %v13516_v16  ;;  %v10379_v16 = vld [vmem:[%s17758_s23 + $0x8] sm:$0xff] }
 0x55d   :  { %3501 = vrot.lane.b32.xlu1 %v18087_v31, %s17717_s18  ;;  %3033 = vrot.lane.b32.xlu0 %v18049_v59, %s10426_s19  ;;  %v3170_v2 = vsel %vm17753_vm0, %v10379_v16, %v18108_v4 }
 0x55e   :  { %v3187_v7 = vsel %vm3185_vm1, %v3170_v2, %v12875_v1  ;;  %v18111_v1 = vld [vmem:[#allocation88_spill] sm:$0xff] }
 0x55f   :  { %v13701_v6 = vpop.permute.xlu1 %2591  ;;  %v4404_v28 = vpop.permute.xlu0 %4403  ;;  %v3204_v60 = vsel %vm3202_vm2, %v3187_v7, %v12881_v29  ;;  %v4274_v46 = vsel %vm17752_vm8, %v4258_v47, %v18111_v1 }
 0x560   :  { %v4452_v22 = vsel %vm17719_vm15, %v3407_v38, %v4404_v28  ;;  %v3221_v9 = vsel %vm3219_vm3, %v3204_v60, %v12885_v49  ;;  %v4290_v11 = vsel %vm17751_vm9, %v4274_v46, %v12753_v56  ;;  %v17712_v46 = vmov 2131351028  }
 0x561   :  { %v13707_v25 = vmul.f32 %v13697_v43, %v4452_v22  ;;  %3689 = vrot.lane.b32.xlu1 %v18018_v19, %s10432_s17  ;;  %3547 = vrot.lane.b32.xlu0 %v18067_v10, %s18107_s6  ;;  %v3238_v57 = vsel %vm17698_vm4, %v3221_v9, %v12895_v20  ;;  %v4306_v40 = vsel %vm17750_vm10, %v4290_v11, %v12781_v5  ;;  %vm18117_vm4 = vcmask 252928  }
 0x562   :  { %v3255_v29 = vsel %vm17697_vm5, %v3238_v57, %v12903_v24  ;;  %v4323_v56 = vsel %vm17696_vm11, %v4306_v40, %v13105_v53  ;;  %vm18116_vm5 = vcmask 367616   ;;  %v17705_v57 = vmov 2102212464  }
 0x563   :  { %v4494_v34 = vand.u32 2139095040, %v13707_v25  ;;  %v13723_v23 = vpop.permute.xlu1 %2779  ;;  %v13725_v35 = vpop.permute.xlu0 %2637  ;;  %v3272_v42 = vsel %vm17694_vm6, %v3255_v29, %v12939_v3  ;;  %v17699_v22 = vand.u32 2147483647, %v13707_v25  ;;  %vm18113_vm6 = vcmask 318464   ;;  %v18121_v29 = vld [vmem:[#allocation23_spill] sm:$0xff] }
 0x564   :  { %v3289_v20 = vsel %vm17695_vm7, %v3272_v42, %v12962_v32  ;;  %v4340_v3 = vsel %vm18113_vm6, %v4323_v56, %v13113_v21  ;;  %vm18114_vm7 = vcmask 343040   ;;  %v17703_v40 = vmov 920167782  }
 0x565   :  { %v4495_v48 = vshrl.u32 %v4494_v34, 23  ;;  %3877 = vrot.lane.b32.xlu1 %v13493_v54, %s10426_s19  ;;  %3735 = vrot.lane.b32.xlu0 %v17995_v45, %s18110_s22  ;;  %v3306_v5 = vsel %vm17752_vm8, %v3289_v20, %v13005_v8  ;;  %v4357_v32 = vsel %vm18114_vm7, %v4340_v3, %v13126_v33  ;;  %v4498_v21 = vand.u32 8388607, %v17699_v22 }
 0x566   :  { %v3323_v16 = vsel %vm17751_vm9, %v3306_v5, %v13057_v27  ;;  %v17700_v56 = vmov 1326507024   ;;  %v18139_v45 = vmov 683565275  }
 0x567   :  { %v9047_v49 = vadd.s32 4294967169, %v4495_v48  ;;  %v13743_v38 = vpop.permute.xlu1 %2983  ;;  %v13745_v28 = vpop.permute.xlu0 %2825  ;;  %v3340_v8 = vsel %vm18117_vm4, %v3323_v16, %v13344_v36  ;;  %v4499_v34 = vor.u32 8388608, %v4498_v21  ;;  %v17710_v48 = vmov 2475754826  }
 0x568   :  { %v3357_v27 = vsel %vm17749_vm14, %v3340_v8, %v13401_v55  ;;  %v17707_v55 = vmov 683565275  }
 0x569   :  { %v4501_v24 = vadd.s32 1, %v9047_v49  ;;  %4065 = vrot.lane.b32.xlu1 %v12982_v63, %s18093_s27  ;;  %3923 = vrot.lane.b32.xlu0 %v13440_v30, %s18112_s3  ;;  %v4374_v30 = vsel %vm18116_vm5, %v4357_v32, %v13134_v26  ;;  %v3374_v33 = vsel %vm17750_vm10, %v3357_v27, %v13456_v37 }
 0x56a   :  { %v3391_v26 = vsel %vm17723_vm13, %v3374_v33, %v13518_v44 }
 0x56b   :  { %vm4502_vm11 = vcmp.gt.s32.totalorder %v4501_v24, 0  ;;  %v13768_v53 = vpop.permute.xlu1 %3497  ;;  %v13770_v4 = vpop.permute.xlu0 %3029  ;;  %v3408_v5 = vsel %vm17720_vm12, %v3391_v26, %v13617_v14  ;;  %vm7818_vm12 = vcmask 719872  }
 0x56c   :  { %18115 = vst [vmem:[#allocation116_spill] sm:$0xff] %v13768_v53  ;;  %v4503_v2 = vsel %vm4502_vm11, %v4501_v24, 0 }
 0x56d   :  { %v4505_v51 = vand.u32 31, %v4503_v2  ;;  %4409 = vrot.lane.b32.xlu1 %v4374_v30, %s10445_s30  ;;  %4111 = vrot.lane.b32.xlu0 %v12985_v61, %s18118_s25  ;;  %v4504_v60 = vshrl.u32 %v4503_v2, 5 }
 0x56f   :  { %v4506_v36 = vsub.s32 32, %v4505_v51  ;;  %v13787_v47 = vpop.permute.xlu1 %3685  ;;  %v13789_v7 = vpop.permute.xlu0 %3543  ;;  %v4508_v9 = vshll.u32 %v17707_v55, %v4505_v51  ;;  %v4511_v1 = vshll.u32 %v17710_v48, %v4505_v51  ;;  %v4514_v44 = vshll.u32 %v17712_v46, %v4505_v51 }
 0x570   :  { %18119 = vst [vmem:[#allocation118_spill] sm:$0xff] %v13787_v47  ;;  %18120 = vst [vmem:[#allocation120_spill] sm:$0xff] %v13789_v7  ;;  %v4517_v49 = vshll.u32 %v17705_v57, %v4505_v51  ;;  %v4520_v20 = vshll.u32 %v17703_v40, %v4505_v51  ;;  %vm4523_vm4 = vcmp.lt.s32.totalorder %v4504_v60, 1  ;;  %vm4526_vm5 = vcmp.lt.s32.totalorder %v4504_v60, 4 }
 0x571   :  { %v4509_v61 = vshrl.u32 %v17710_v48, %v4506_v36  ;;  %v4512_v37 = vshrl.u32 %v17712_v46, %v4506_v36  ;;  %v4515_v11 = vshrl.u32 %v17705_v57, %v4506_v36  ;;  %2893 = vrot.lane.b32.xlu1 %v18121_v29, %s10425_s20  ;;  %v4518_v42 = vshrl.u32 %v17703_v40, %v4506_v36  ;;  %v18132_v40 = vld [vmem:[#allocation91_spill] sm:$0xff] }
 0x572   :  { %v4521_v24 = vshrl.u32 %v17700_v56, %v4506_v36  ;;  %2831 = vrot.lane.b32.xlu0 %v13180_v13, %s10425_s20  ;;  %v4507_v27 = vshrl.u32 %v17707_v55, %v4506_v36  ;;  %v18125_v13 = vld [vmem:[#allocation92_spill] sm:$0xff]  ;;  %vm4525_vm6 = vcmp.lt.s32.totalorder %v4504_v60, 3  ;;  %vm4524_vm7 = vcmp.lt.s32.totalorder %v4504_v60, 2 }
 0x573   :  { %v4510_v3 = vor.u32 %v4509_v61, %v4508_v9  ;;  %v4513_v16 = vor.u32 %v4512_v37, %v4511_v1  ;;  %v4516_v32 = vor.u32 %v4515_v11, %v4514_v44  ;;  %v13807_v30 = vpop.permute.xlu1 %3873  ;;  %v13809_v8 = vpop.permute.xlu0 %3731  ;;  %v4519_v21 = vor.u32 %v4518_v42, %v4517_v49 }
 0x574   :  { %18122 = vst [vmem:[#allocation122_spill] sm:$0xff] %v13807_v30  ;;  %18123 = vst [vmem:[#allocation65_spill] sm:$0xff] %v13809_v8  ;;  %v4522_v2 = vor.u32 %v4521_v24, %v4520_v20  ;;  %v4539_v9 = vshll.u32 %v4499_v34, 8  ;;  %v18178_v30 = vld [vmem:[#allocation140_spill] sm:$0xff] }
 0x575   :  { %v4528_v51 = vsel %vm4526_vm5, %v4516_v32, 2102212464  ;;  %v4531_v33 = vsel %vm4523_vm4, %v4510_v3, %v4513_v16  ;;  %v4535_v22 = vsel %vm4523_vm4, %v4513_v16, %v4516_v32  ;;  %3081 = vrot.lane.b32.xlu1 %v18125_v13, %s18124_s9  ;;  %v4532_v14 = vsel %vm4526_vm5, %v4519_v21, 920167782 }
 0x576   :  { %v4536_v26 = vsel %vm4526_vm5, %v4522_v2, 1326507024  ;;  %3035 = vrot.lane.b32.xlu0 %v18061_v12, %s10426_s19  ;;  %v4527_v1 = vsel %vm4523_vm4, %v4507_v27, %v4510_v3  ;;  %v4533_v61 = vsel %vm4525_vm6, %v4516_v32, %v4532_v14  ;;  %v4529_v36 = vsel %vm4525_vm6, %v4513_v16, %v4528_v51  ;;  %v13845_v27 = vld [vmem:[%s17586_s1 + $0x60] sm:$0xff] }
 0x577   :  { %v4537_v37 = vsel %vm4525_vm6, %v4519_v21, %v4536_v26  ;;  %v4406_v44 = vpop.permute.xlu1 %4405  ;;  %v13816_v11 = vpop.permute.xlu0 %3919  ;;  %v4534_v49 = vsel %vm4524_vm7, %v4531_v33, %v4533_v61  ;;  %v4530_v3 = vsel %vm4524_vm7, %v4527_v1, %v4529_v36 }
 0x578   :  { %18126 = vst [vmem:[#allocation87_spill] sm:$0xff] %v13816_v11  ;;  %v4538_v42 = vsel %vm4524_vm7, %v4535_v22, %v4537_v37  ;;  %v4453_v20 = vsel %vm17719_vm15, %v3408_v5, %v4406_v44  ;;  %v13822_v2 = vmul.u32.u64.low %v4539_v9, %v4534_v49  ;;  %v13823_v34 = vmul.u32.u64.high %v4539_v9, %v4534_v49, %v13822_v2 }
 0x579   :  { %v13819_v24 = vmul.u32.u64.low %v4539_v9, %v4538_v42  ;;  %v13820_v56 = vmul.u32.u64.high %v4539_v9, %v4538_v42, %v13819_v24  ;;  %3595 = vrot.lane.b32.xlu1 %v18067_v10, %s18127_s29  ;;  %v13829_v60 = vmul.f32 %v13697_v43, %v4453_v20  ;;  %v4546_v51 = vmul.u32 %v4539_v9, %v4530_v3  ;;  %v18129_v3 = vld [vmem:[#allocation22_spill] sm:$0xff] }
 0x57a   :  { %3549 = vrot.lane.b32.xlu0 %v18087_v31, %s18107_s6  ;;  %v4549_v32 = vadd.s32 1, %v13823_v34 }
 0x57b   :  { %v13833_v22 = vpop.permute.xlu1 %2685  ;;  %v13835_v5 = vpop.permute.xlu0 %2639  ;;  %v4598_v16 = vand.u32 2139095040, %v13829_v60  ;;  %vm4548_vm11 = vc.u32 %v13820_v56, %v13822_v2  ;;  %v17702_v21 = vand.u32 2147483647, %v13829_v60 }
 0x57c   :  { %v4550_v14 = vsel %vm4548_vm11, %v4549_v32, %v13823_v34 }
 0x57d   :  { %3783 = vrot.lane.b32.xlu1 %v13845_v27, %s10428_s28  ;;  %v4599_v33 = vshrl.u32 %v4598_v16, 23  ;;  %v4551_v61 = vadd.s32 %v4550_v14, %v4546_v51  ;;  %v4602_v44 = vand.u32 8388607, %v17702_v21 }
 0x57e   :  { %3737 = vrot.lane.b32.xlu0 %v18018_v19, %s18110_s22  ;;  %v18136_v19 = vmov 1326507024  }
 0x57f   :  { %v13852_v26 = vpop.permute.xlu1 %2889  ;;  %v13854_v1 = vpop.permute.xlu0 %2827  ;;  %v9051_v37 = vadd.s32 4294967169, %v4599_v33  ;;  %v4552_v36 = vadd.s32 536870912, %v4551_v61  ;;  %v4603_v24 = vor.u32 8388608, %v4602_v44 }
 0x581   :  { %3971 = vrot.lane.b32.xlu1 %v12999_v17, %s18128_s5  ;;  %v4605_v9 = vadd.s32 1, %v9051_v37  ;;  %v13866_v20 = vshrl.u32 %v4552_v36, 30  ;;  %v13884_v21 = vshll.u32 %v4603_v24, 8 }
 0x582   :  { %3925 = vrot.lane.b32.xlu0 %v13493_v54, %s18112_s3 }
 0x583   :  { %v13862_v49 = vpop.permute.xlu1 %3077  ;;  %v13864_v42 = vpop.permute.xlu0 %3031  ;;  %vm4606_vm4 = vcmp.gt.s32.totalorder %v4605_v9, 0  ;;  %v4554_v16 = vshll.u32 %v13866_v20, 30 }
 0x584   :  { %v4607_v34 = vsel %vm4606_vm4, %v4605_v9, 0 }
 0x585   :  { %2895 = vrot.lane.b32.xlu1 %v18129_v3, %s10425_s20  ;;  %v4609_v32 = vand.u32 31, %v4607_v34  ;;  %v13877_v33 = vsub.s32 %v4551_v61, %v4554_v16  ;;  %v13879_v14 = vshrl.u32 %v4607_v34, 5  ;;  %v18133_v34 = vmov 2102212464  }
 0x586   :  { %4113 = vrot.lane.b32.xlu0 %v12982_v63, %s18118_s25 }
 0x587   :  { %v13873_v51 = vpop.permute.xlu1 %3591  ;;  %v13875_v54 = vpop.permute.xlu0 %3545  ;;  %v4610_v37 = vsub.s32 32, %v4609_v32  ;;  %v4612_v44 = vshll.u32 %v17707_v55, %v4609_v32  ;;  %v4615_v36 = vshll.u32 %v17710_v48, %v4609_v32  ;;  %v4618_v9 = vshll.u32 %v17712_v46, %v4609_v32 }
 0x588   :  { %18130 = vst [vmem:[#allocation88_spill] sm:$0xff] %v13873_v51  ;;  %18131 = vst [vmem:[#allocation92_spill] sm:$0xff] %v13875_v54  ;;  %v4557_v63 = vsub.s32 0, %v13877_v33  ;;  %v4621_v16 = vshll.u32 %v18133_v34, %v4609_v32  ;;  %v18135_v54 = vmov 920167782   ;;  %vm4627_vm5 = vcmp.lt.s32.totalorder %v13879_v14, 1 }
 0x589   :  { %3083 = vrot.lane.b32.xlu1 %v18132_v40, %s18124_s9  ;;  %v4613_v57 = vshrl.u32 %v17710_v48, %v4610_v37  ;;  %v4616_v61 = vshrl.u32 %v17712_v46, %v4610_v37  ;;  %v4619_v55 = vshrl.u32 %v18133_v34, %v4610_v37  ;;  %v4622_v53 = vshrl.u32 %v18135_v54, %v4610_v37 }
 0x58a   :  { %2941 = vrot.lane.b32.xlu0 %v18121_v29, %s18134_s21  ;;  %v4624_v24 = vshll.u32 %v18135_v54, %v4609_v32  ;;  %v4625_v50 = vshrl.u32 %v18136_v19, %v4610_v37  ;;  %v9048_v48 = vmin.u32 %v4557_v63, %v13877_v33  ;;  %v4611_v47 = vshrl.u32 %v18139_v45, %v4610_v37 }
 0x58b   :  { %v13898_v51 = vpop.permute.xlu1 %3779  ;;  %v13900_v7 = vpop.permute.xlu0 %3733  ;;  %v4614_v46 = vor.u32 %v4613_v57, %v4612_v44  ;;  %v4617_v39 = vor.u32 %v4616_v61, %v4615_v36  ;;  %v4620_v62 = vor.u32 %v4619_v55, %v4618_v9  ;;  %v4623_v8 = vor.u32 %v4622_v53, %v4621_v16 }
 0x58c   :  { %18137 = vst [vmem:[#allocation91_spill] sm:$0xff] %v13898_v51  ;;  %18138 = vst [vmem:[#allocation259_spill] sm:$0xff] %v13900_v7  ;;  %v4626_v0 = vor.u32 %v4625_v50, %v4624_v24  ;;  %v4559_v32 = vclz %v9048_v48  ;;  %vm4629_vm6 = vcmp.lt.s32.totalorder %v13879_v14, 3  ;;  %vm4630_vm7 = vcmp.lt.s32.totalorder %v13879_v14, 4  ;;  %v13933_v24 = vld [vmem:[%s17586_s1 + $0x68] sm:$0xff]  ;;  %v18144_v7 = vld [vmem:[#allocation146_spill] sm:$0xff] }
 0x58d   :  { %3597 = vrot.lane.b32.xlu1 %v18087_v31, %s18127_s29  ;;  %v4635_v63 = vsel %vm4627_vm5, %v4614_v46, %v4617_v39  ;;  %v4632_v57 = vsel %vm4630_vm7, %v4620_v62, 2102212464  ;;  %v4636_v44 = vsel %vm4630_vm7, %v4623_v8, 920167782  ;;  %v4639_v53 = vsel %vm4627_vm5, %v4617_v39, %v4620_v62 }
 0x58e   :  { %3129 = vrot.lane.b32.xlu0 %v18125_v13, %s10444_s2  ;;  %v4640_v50 = vsel %vm4630_vm7, %v4626_v0, 1326507024  ;;  %v9049_v48 = vadd.s32 4294967294, %v4559_v32  ;;  %vm4628_vm11 = vcmp.lt.s32.totalorder %v13879_v14, 2  ;;  %v4637_v36 = vsel %vm4629_vm6, %v4620_v62, %v4636_v44 }
 0x58f   :  { %v13915_v55 = vpop.permute.xlu1 %3967  ;;  %v13917_v37 = vpop.permute.xlu0 %3921  ;;  %v4641_v9 = vsel %vm4629_vm6, %v4623_v8, %v4640_v50  ;;  %v4631_v61 = vsel %vm4627_vm5, %v4611_v47, %v4614_v46  ;;  %v4638_v16 = vsel %vm4628_vm11, %v4635_v63, %v4637_v36  ;;  %v4633_v62 = vsel %vm4629_vm6, %v4617_v39, %v4632_v57  ;;  %v18142_v8 = vld [vmem:[#allocation142_spill] sm:$0xff]  ;;  %v18143_v57 = vld [vmem:[#allocation144_spill] sm:$0xff] }
 0x590   :  { %18140 = vst [vmem:[#allocation260_spill] sm:$0xff] %v13915_v55  ;;  %18141 = vst [vmem:[#allocation261_spill] sm:$0xff] %v13917_v37  ;;  %v4642_v0 = vsel %vm4628_vm11, %v4639_v53, %v4641_v9  ;;  %vm9050_vm4 = vcmp.lt.s32.totalorder %v9049_v48, 0  ;;  %v4147_v32 = vsel %vm17753_vm0, %v18125_v13, %v18142_v8  ;;  %v4547_v9 = vadd.s32 %v13822_v2, %v13820_v56  ;;  %v18146_v56 = vld [vmem:[#allocation148_spill] sm:$0xff] }
 0x591   :  { %3785 = vrot.lane.b32.xlu1 %v13933_v24, %s10428_s28  ;;  %v13940_v47 = vmul.u32.u64.low %v13884_v21, %v4642_v0  ;;  %v13941_v46 = vmul.u32.u64.high %v13884_v21, %v4642_v0, %v13940_v47  ;;  %v4562_v63 = vsel %vm9050_vm4, 0, %v9049_v48  ;;  %v4163_v36 = vsel %vm3185_vm1, %v4147_v32, %v18143_v57  ;;  %v18147_v57 = vld [vmem:[#allocation143_spill] sm:$0xff] }
 0x592   :  { %3643 = vrot.lane.b32.xlu0 %v18067_v10, %s10431_s0  ;;  %v13949_v44 = vmul.u32.u64.low %v13884_v21, %v4638_v16  ;;  %v13950_v53 = vmul.u32.u64.high %v13884_v21, %v4638_v16, %v13949_v44  ;;  %v4563_v0 = vsub.s32 32, %v4562_v63  ;;  %v4567_v47 = vsub.s32 4294967266, %v4562_v63  ;;  %v18145_v16 = vld [vmem:[#allocation206_spill] sm:$0xff] }
 0x593   :  { %v13953_v50 = vpop.permute.xlu1 %2733  ;;  %v13955_v39 = vpop.permute.xlu0 %2687  ;;  %v4179_v13 = vsel %vm3202_vm2, %v4163_v36, %v18144_v7  ;;  %v4634_v48 = vsel %vm4628_vm11, %v4631_v61, %v4633_v62  ;;  %v4564_v8 = vshll.u32 %v13877_v33, %v4562_v63  ;;  %vm18148_vm6 = vcmask 121856  }
 0x594   :  { %v4565_v51 = vshrl.u32 %v4547_v9, %v4563_v0  ;;  %v4568_v37 = vadd.s32 127, %v4567_v47  ;;  %vm4652_vm5 = vc.u32 %v13941_v46, %v13949_v44  ;;  %v4195_v2 = vsel %vm3219_vm3, %v4179_v13, %v18146_v56 }
 0x595   :  { %3973 = vrot.lane.b32.xlu1 %v18145_v16, %s18128_s5  ;;  %v4653_v7 = vadd.s32 1, %v13950_v53  ;;  %v4650_v33 = vmul.u32 %v13884_v21, %v4634_v48  ;;  %v4211_v36 = vsel %vm18148_vm6, %v4195_v2, %v18147_v57  ;;  %v18149_v48 = vld [vmem:[#allocation145_spill] sm:$0xff]  ;;  %vm18150_vm7 = vcmask 146432  }
 0x596   :  { %3831 = vrot.lane.b32.xlu0 %v13845_v27, %s10425_s20  ;;  %v4566_v62 = vor.u32 %v4565_v51, %v4564_v8  ;;  %v4569_v32 = vshll.u32 %v4568_v37, 23  ;;  %v18151_v8 = vld [vmem:[#allocation163_spill] sm:$0xff]  ;;  %vm18152_vm11 = vcmask 171008   ;;  %vm18154_vm4 = vcmask 195584  }
 0x597   :  { %v13975_v14 = vpop.permute.xlu1 %2937  ;;  %v13977_v61 = vpop.permute.xlu0 %2891  ;;  %v4654_v63 = vsel %vm4652_vm5, %v4653_v7, %v13950_v53  ;;  %v4227_v53 = vsel %vm18150_vm7, %v4211_v36, %v18149_v48  ;;  %v18157_v36 = vld [vmem:[#allocation173_spill] sm:$0xff]  ;;  %vm4493_vm5 = vcmp.lt.s32.totalorder %v13707_v25, 0  ;;  %vm18164_vm7 = vcmask 293888  }
 0x598   :  { %v4570_v9 = vor.u32 4788187, %v4569_v32  ;;  %v4655_v0 = vadd.s32 %v4654_v63, %v4650_v33  ;;  %v4573_v37 = vcvt.s32.f32 %v4566_v62  ;;  %v4243_v56 = vsel %vm18152_vm11, %v4227_v53, %v18151_v8  ;;  %v18153_v33 = vld [vmem:[#allocation167_spill] sm:$0xff] }
 0x599   :  { %2943 = vrot.lane.b32.xlu1 %v18129_v3, %s18134_s21  ;;  %v4577_v32 = vsub.s32 4, %v13866_v20  ;;  %v4259_v62 = vsel %vm18154_vm4, %v4243_v56, %v18153_v33  ;;  %v18159_v56 = vand.u32 2147483647, %v13707_v25  ;;  %vm18168_vm11 = vcmask 318464  }
 0x59a   :  { %4019 = vrot.lane.b32.xlu0 %v12999_v17, %s18076_s24  ;;  %v4571_v51 = vand.u32 2147483647, %v4570_v9  ;;  %v4656_v21 = vadd.s32 536870912, %v4655_v0  ;;  %v4275_v9 = vsel %vm17752_vm8, %v4259_v62, %v18157_v36  ;;  %v18160_v62 = vld [vmem:[#allocation181_spill] sm:$0xff]  ;;  %vm18173_vm4 = vcmask 343040  }
 0x59b   :  { %v13987_v47 = vpop.permute.xlu1 %3125  ;;  %v13989_v13 = vpop.permute.xlu0 %3079  ;;  %vm4492_vm6 = vcmp.le.f32.partialorder %v18159_v56, 0.7853982  ;;  %v4578_v33 = vsel %vm4493_vm5, %v4577_v32, %v13866_v20  ;;  %v18165_v20 = vld [vmem:[#allocation136_spill] sm:$0xff]  ;;  %v18167_v56 = vld [vmem:[#allocation223_spill] sm:$0xff] }
 0x59c   :  { %v4574_v2 = vmul.f32 %v4573_v37, %v4571_v51  ;;  %v13997_v7 = vshrl.u32 %v4656_v21, 30  ;;  %v18158_v37 = vld [vmem:[#allocation177_spill] sm:$0xff]  ;;  %v4148_v32 = vsel %vm17753_vm0, %v18132_v40, %v18165_v20 }
 0x59d   :  { %3131 = vrot.lane.b32.xlu1 %v18132_v40, %s10444_s2  ;;  %v4291_v21 = vsel %vm17751_vm9, %v4275_v9, %v18158_v37 }
 0x59e   :  { %2989 = vrot.lane.b32.xlu0 %v18121_v29, %s10442_s26  ;;  %v4575_v48 = vxor.u32 2147483648, %v4574_v2  ;;  %v4658_v51 = vshll.u32 %v13997_v7, 30  ;;  %v4307_v36 = vsel %vm17750_vm10, %v4291_v21, %v18160_v62  ;;  %v18166_v21 = vld [vmem:[#allocation137_spill] sm:$0xff] }
 0x59f   :  { %v14004_v63 = vpop.permute.xlu1 %3593  ;;  %v14006_v57 = vpop.permute.xlu0 %3451 }
 0x5a0   :  { %18155 = vst [vmem:[#allocation142_spill] sm:$0xff] %v14004_v63  ;;  %18156 = vst [vmem:[#allocation144_spill] sm:$0xff] %v14006_v57  ;;  %v4576_v53 = vsel %vm4493_vm5, %v4575_v48, %v4574_v2  ;;  %v4659_v8 = vsub.s32 %v4655_v0, %v4658_v51  ;;  %v18163_v63 = vld [vmem:[#allocation232_spill] sm:$0xff]  ;;  %v4580_v48 = vsel %vm4492_vm6, 0, %v4578_v33  ;;  %v18171_v33 = vld [vmem:[#allocation139_spill] sm:$0xff] }
 0x5a1   :  { %3691 = vrot.lane.b32.xlu1 %v18067_v10, %s10432_s17  ;;  %v4579_v37 = vsel %vm4492_vm6, %v13707_v25, %v4576_v53  ;;  %v4324_v0 = vsel %vm18164_vm7, %v4307_v36, %v18163_v63  ;;  %v4164_v53 = vsel %vm3185_vm1, %v4148_v32, %v18166_v21  ;;  %vm18177_vm6 = vcmask 367616  }
 0x5a2   :  { %3645 = vrot.lane.b32.xlu0 %v18087_v31, %s10431_s0  ;;  %v4661_v2 = vsub.s32 0, %v4659_v8  ;;  %10222 = vcosq.f32 %v4579_v37  ;;  %v4341_v63 = vsel %vm18168_vm11, %v4324_v0, %v18167_v56  ;;  %v18174_v0 = vld [vmem:[#allocation138_spill] sm:$0xff]  ;;  %vm18179_vm7 = vcmask 121856  }
 0x5a3   :  { %v14023_v57 = vpop.permute.xlu1 %3781  ;;  %v14025_v9 = vpop.permute.xlu0 %3639  ;;  %10224 = vsinq.f32 %v4579_v37  ;;  %v4180_v37 = vsel %vm3202_vm2, %v4164_v53, %v18171_v33  ;;  %v6248_v53 = vand.u32 3, %v4580_v48  ;;  %vm18181_vm11 = vcmask 146432  }
 0x5a4   :  { %18161 = vst [vmem:[#allocation146_spill] sm:$0xff] %v14023_v57  ;;  %18162 = vst [vmem:[#allocation206_spill] sm:$0xff] %v14025_v9  ;;  %v9052_v51 = vmin.u32 %v4661_v2, %v4659_v8  ;;  %v4584_v57 = vadd.s32 3, %v4580_v48  ;;  %v18172_v2 = vld [vmem:[#allocation225_spill] sm:$0xff]  ;;  %v4196_v32 = vsel %vm3219_vm3, %v4180_v37, %v18174_v0  ;;  %v4651_v37 = vadd.s32 %v13949_v44, %v13941_v46 }
 0x5a5   :  { %3879 = vrot.lane.b32.xlu1 %v13845_v27, %s10426_s19  ;;  %v4358_v20 = vsel %vm18173_vm4, %v4341_v63, %v18172_v2  ;;  %v4212_v63 = vsel %vm18179_vm7, %v4196_v32, %v18178_v30  ;;  %vm6253_vm4 = vcmp.eq.s32.totalorder %v6248_v53, 2  ;;  %v18182_v32 = vld [vmem:[#allocation168_spill] sm:$0xff] }
 0x5a6   :  { %3833 = vrot.lane.b32.xlu0 %v13933_v24, %s10425_s20  ;;  %v4663_v9 = vclz %v9052_v51  ;;  %v4585_v51 = vand.u32 3, %v4584_v57  ;;  %v18180_v57 = vld [vmem:[#allocation164_spill] sm:$0xff] }
 0x5a7   :  { %v14041_v62 = vpop.permute.xlu1 %3969  ;;  %v14043_v36 = vpop.permute.xlu0 %3827 }
 0x5a8   :  { %18169 = vst [vmem:[#allocation148_spill] sm:$0xff] %v14041_v62  ;;  %18170 = vst [vmem:[#allocation143_spill] sm:$0xff] %v14043_v36  ;;  %v9053_v40 = vadd.s32 4294967294, %v4663_v9  ;;  %v18176_v9 = vld [vmem:[#allocation227_spill] sm:$0xff]  ;;  %vm4587_vm7 = vcmp.eq.s32.totalorder %v4585_v51, 0  ;;  %vm4586_vm15 = vcmp.lt.s32.totalorder %v4585_v51, 2 }
 0x5a9   :  { %4067 = vrot.lane.b32.xlu1 %v12999_v17, %s18093_s27  ;;  %v4375_v36 = vsel %vm18177_vm6, %v4358_v20, %v18176_v9  ;;  %vm18183_vm6 = vcmask 171008  }
 0x5aa   :  { %4021 = vrot.lane.b32.xlu0 %v18145_v16, %s18076_s24  ;;  %vm9054_vm5 = vcmp.lt.s32.totalorder %v9053_v40, 0 }
 0x5ab   :  { %v14055_v21 = vpop.permute.xlu1 %2735  ;;  %v14057_v56 = vpop.permute.xlu0 %4015  ;;  %v4666_v33 = vsel %vm9054_vm5, 0, %v9053_v40  ;;  %v4228_v40 = vsel %vm18181_vm11, %v4212_v63, %v18180_v57  ;;  %vm4590_vm5 = vcmp.eq.s32.totalorder %v4585_v51, 2  ;;  %vm6250_vm11 = vcmp.eq.s32.totalorder %v6248_v53, 0 }
 0x5ac   :  { %18175 = vst [vmem:[#allocation145_spill] sm:$0xff] %v14057_v56  ;;  %v10223_v62 = vpop.eup %10222  ;;  %v4667_v2 = vsub.s32 32, %v4666_v33  ;;  %v4671_v0 = vsub.s32 4294967266, %v4666_v33  ;;  %v4668_v9 = vshll.u32 %v4659_v8, %v4666_v33  ;;  %v4244_v46 = vsel %vm18183_vm6, %v4228_v40, %v18182_v32 }
 0x5ad   :  { %2991 = vrot.lane.b32.xlu1 %v18129_v3, %s10442_s26  ;;  %v10225_v48 = vpop.eup %10224  ;;  %v4591_v20 = vxor.u32 2147483648, %v10223_v62  ;;  %vm4583_vm6 = vweird.f32 %v13707_v25 }
 0x5ae   :  { %4411 = vrot.lane.b32.xlu0 %v4375_v36, %s10445_s30  ;;  %v4669_v55 = vshrl.u32 %v4651_v37, %v4667_v2  ;;  %v4672_v30 = vadd.s32 127, %v4671_v0  ;;  %v4588_v44 = vxor.u32 2147483648, %v10225_v48 }
 0x5af   :  { %v14070_v52 = vpop.permute.xlu1 %2939  ;;  %v14072_v56 = vpop.permute.xlu0 %2781  ;;  %v4592_v36 = vsel %vm4590_vm5, %v4591_v20, %v10225_v48  ;;  %v6255_v11 = vsel %vm6253_vm4, %v4591_v20, %v10225_v48  ;;  %vm6249_vm4 = vcmp.lt.s32.totalorder %v6248_v53, 2  ;;  %vm18185_vm5 = vcmask 195584  }
 0x5b0   :  { %v4670_v63 = vor.u32 %v4669_v55, %v4668_v9  ;;  %v4673_v57 = vshll.u32 %v4672_v30, 23  ;;  %v4589_v33 = vsel %vm4587_vm7, %v10223_v62, %v4588_v44  ;;  %v6252_v2 = vsel %vm6250_vm11, %v10223_v62, %v4588_v44  ;;  %v18184_v55 = vld [vmem:[#allocation170_spill] sm:$0xff] }
 0x5b1   :  { %3693 = vrot.lane.b32.xlu1 %v18087_v31, %s10432_s17  ;;  %v4593_v40 = vsel %vm4586_vm15, %v4589_v33, %v4592_v36  ;;  %v4260_v48 = vsel %vm18185_vm5, %v4244_v46, %v18184_v55  ;;  %v6256_v9 = vsel %vm6249_vm4, %v6252_v2, %v6255_v11  ;;  %v18186_v30 = vld [vmem:[#allocation174_spill] sm:$0xff]  ;;  %v10382_v11 = vld [vmem:[%s17758_s23 + $0x10] sm:$0xff]  ;;  %v18191_v36 = vld [vmem:[#allocation71_spill] sm:$0xff]  ;;  %vm18195_vm15 = vcmask 293888  }
 0x5b2   :  { %3037 = vrot.lane.b32.xlu0 %v18121_v29, %s10426_s19  ;;  %v4674_v0 = vor.u32 4788187, %v4673_v57  ;;  %v4594_v20 = vsel %vm4583_vm6, nan, %v4593_v40  ;;  %v4276_v51 = vsel %vm17752_vm8, %v4260_v48, %v18186_v30  ;;  %v4677_v15 = vcvt.s32.f32 %v4670_v63  ;;  %v18188_v62 = vld [vmem:[#allocation178_spill] sm:$0xff]  ;;  %v18193_v40 = vld [vmem:[#allocation191_spill] sm:$0xff] }
 0x5b3   :  { %v14080_v8 = vpop.permute.xlu1 %3127  ;;  %v14082_v37 = vpop.permute.xlu0 %2985  ;;  %9578 = vmatprep.mubr.msk.f32.mxu0 %vm7818_vm12, %v4594_v20  ;;  %v14094_v25 = vsel %vm4583_vm6, nan, %v6256_v9  ;;  %v4292_v53 = vsel %vm17751_vm9, %v4276_v51, %v18188_v62  ;;  %v3171_v63 = vsel %vm17753_vm0, %v10382_v11, %v18191_v36  ;;  %v18192_v57 = vld [vmem:[#allocation182_spill] sm:$0xff]  ;;  %v18196_v9 = vld [vmem:[#allocation192_spill] sm:$0xff]  ;;  %vm18198_vm7 = vcmask 318464  }
 0x5b4   :  { %v4675_v32 = vand.u32 2147483647, %v4674_v0  ;;  %18187 = vst [vmem:[#allocation163_spill] sm:$0xff] %v14094_v25  ;;  %v4308_v33 = vsel %vm17750_vm10, %v4292_v53, %v18192_v57  ;;  %v4681_v0 = vsub.s32 4, %v13997_v7  ;;  %v3188_v55 = vsel %vm3185_vm1, %v3171_v63, %v18193_v40  ;;  %v18194_v48 = vld [vmem:[#allocation222_spill] sm:$0xff]  ;;  %v18197_v51 = vld [vmem:[#allocation224_spill] sm:$0xff] }
 0x5b5   :  { %3881 = vrot.lane.b32.xlu1 %v13933_v24, %s10426_s19  ;;  %v4325_v20 = vsel %vm18195_vm15, %v4308_v33, %v18194_v48  ;;  %v3205_v30 = vsel %vm3202_vm2, %v3188_v55, %v18196_v9  ;;  %v18200_v53 = vld [vmem:[#allocation226_spill] sm:$0xff]  ;;  %vm18201_vm11 = vcmask 343040   ;;  %vm4597_vm6 = vcmp.lt.s32.totalorder %v13829_v60, 0  ;;  %v18204_v33 = vld [vmem:[#allocation228_spill] sm:$0xff] }
 0x5b6   :  { %3739 = vrot.lane.b32.xlu0 %v18067_v10, %s18110_s22  ;;  %v4678_v2 = vmul.f32 %v4677_v15, %v4675_v32  ;;  %v4342_v62 = vsel %vm18198_vm7, %v4325_v20, %v18197_v51  ;;  %v18199_v15 = vld [vmem:[#allocation196_spill] sm:$0xff]  ;;  %vm18205_vm4 = vcmask 367616   ;;  %v18206_v55 = vand.u32 2147483647, %v13829_v60  ;;  %v18209_v51 = vld [vmem:[#allocation205_spill] sm:$0xff] }
 0x5b7   :  { %v14098_v46 = vpop.permute.xlu1 %3499  ;;  %v14100_v44 = vpop.permute.xlu0 %3453  ;;  %v3222_v32 = vsel %vm3219_vm3, %v3205_v30, %v18199_v15  ;;  %v4359_v36 = vsel %vm18201_vm11, %v4342_v62, %v18200_v53  ;;  %v18207_v20 = vld [vmem:[#allocation200_spill] sm:$0xff]  ;;  %vm18208_vm15 = vcmask 121856   ;;  %vm18210_vm7 = vcmask 146432  }
 0x5b8   :  { %18189 = vst [vmem:[#allocation167_spill] sm:$0xff] %v14098_v46  ;;  %18190 = vst [vmem:[#allocation173_spill] sm:$0xff] %v14100_v44  ;;  %v4679_v11 = vxor.u32 2147483648, %v4678_v2  ;;  %v4376_v40 = vsel %vm18205_vm4, %v4359_v36, %v18204_v33  ;;  %vm4596_vm5 = vcmp.le.f32.partialorder %v18206_v55, 0.7853982  ;;  %v3239_v9 = vsel %vm18208_vm15, %v3222_v32, %v18207_v20  ;;  %v18211_v15 = vld [vmem:[#allocation216_spill] sm:$0xff] }
 0x5b9   :  { %4069 = vrot.lane.b32.xlu1 %v18145_v16, %s18093_s27  ;;  %v3256_v62 = vsel %vm18210_vm7, %v3239_v9, %v18209_v51  ;;  %vm18212_vm11 = vcmask 171008   ;;  %v18217_v36 = vld [vmem:[#allocation241_spill] sm:$0xff]  ;;  %v18219_v55 = vld [vmem:[#allocation248_spill] sm:$0xff]  ;;  %vm18221_vm4 = vcmask 252928   ;;  %vm18231_vm7 = vcmask 326656   ;;  %v18234_v44 = vld [vmem:[#allocation175_spill] sm:$0xff] }
 0x5ba   :  { %3927 = vrot.lane.b32.xlu0 %v13845_v27, %s18112_s3  ;;  %v4680_v48 = vsel %vm4597_vm6, %v4679_v11, %v4678_v2  ;;  %v4682_v27 = vsel %vm4597_vm6, %v4681_v0, %v13997_v7  ;;  %v3273_v53 = vsel %vm18212_vm11, %v3256_v62, %v18211_v15  ;;  %v18215_v11 = vld [vmem:[#allocation101_spill] sm:$0xff]  ;;  %vm18216_vm6 = vcmask 195584   ;;  %v18233_v46 = vld [vmem:[#allocation208_spill] sm:$0xff] }
 0x5bb   :  { %v14127_v63 = vpop.permute.xlu1 %3687  ;;  %v14129_v57 = vpop.permute.xlu0 %3641  ;;  %v4683_v30 = vsel %vm4596_vm5, %v13829_v60, %v4680_v48  ;;  %v4684_v0 = vsel %vm4596_vm5, 0, %v4682_v27  ;;  %v3290_v32 = vsel %vm18216_vm6, %v3273_v53, %v18215_v11  ;;  %v18220_v20 = vld [vmem:[#allocation257_spill] sm:$0xff]  ;;  %v18225_v53 = vld [vmem:[#allocation151_spill] sm:$0xff]  ;;  %vm18228_vm5 = vcmask 302080  }
 0x5bc   :  { %18202 = vst [vmem:[#allocation177_spill] sm:$0xff] %v14127_v63  ;;  %18203 = vst [vmem:[#allocation181_spill] sm:$0xff] %v14129_v57  ;;  %10226 = vcosq.f32 %v4683_v30  ;;  %v3307_v33 = vsel %vm17752_vm8, %v3290_v32, %v18217_v36  ;;  %v4688_v48 = vadd.s32 3, %v4684_v0  ;;  %v18224_v51 = vld [vmem:[#allocation149_spill] sm:$0xff]  ;;  %v14178_v36 = vld [vmem:[%s17586_s1 + $0x70] sm:$0xff]  ;;  %vm18235_vm11 = vcmask 146432  }
 0x5bd   :  { %4413 = vrot.lane.b32.xlu1 %v4376_v40, %s10445_s30  ;;  %10228 = vsinq.f32 %v4683_v30  ;;  %v18218_v40 = vld [vmem:[#allocation94_spill] sm:$0xff]  ;;  %v18243_v57 = vld [vmem:[#allocation215_spill] sm:$0xff] }
 0x5be   :  { %4115 = vrot.lane.b32.xlu0 %v12999_v17, %s18118_s25  ;;  %v3324_v17 = vsel %vm17751_vm9, %v3307_v33, %v18219_v55  ;;  %v4149_v62 = vsel %vm17753_vm0, %v18218_v40, %v18224_v51  ;;  %v18226_v33 = vld [vmem:[#allocation161_spill] sm:$0xff]  ;;  %v18246_v63 = vld [vmem:[#allocation183_spill] sm:$0xff] }
 0x5bf   :  { %v14146_v2 = vpop.permute.xlu1 %3875  ;;  %v14148_v7 = vpop.permute.xlu0 %3829  ;;  %v3341_v9 = vsel %vm18221_vm4, %v3324_v17, %v18220_v20  ;;  %v4165_v11 = vsel %vm3185_vm1, %v4149_v62, %v18225_v53  ;;  %v4689_v17 = vand.u32 3, %v4688_v48  ;;  %v18227_v20 = vld [vmem:[#allocation165_spill] sm:$0xff] }
 0x5c0   :  { %18213 = vst [vmem:[#allocation232_spill] sm:$0xff] %v14146_v2  ;;  %18214 = vst [vmem:[#allocation136_spill] sm:$0xff] %v14148_v7  ;;  %v3358_v15 = vsel %vm17749_vm14, %v3341_v9, %v13619_v41  ;;  %v4181_v55 = vsel %vm3202_vm2, %v4165_v11, %v18226_v33  ;;  %v10384_v53 = vld [vmem:[%s17758_s23 + $0x18] sm:$0xff]  ;;  %v18229_v11 = vld [vmem:[#allocation67_spill] sm:$0xff] }
 0x5c1   :  { %3085 = vrot.lane.b32.xlu1 %v18218_v40, %s18124_s9  ;;  %v3375_v32 = vsel %vm17750_vm10, %v3358_v15, %v13770_v4  ;;  %v4197_v4 = vsel %vm3219_vm3, %v4181_v55, %v18227_v20  ;;  %v18232_v20 = vld [vmem:[#allocation193_spill] sm:$0xff]  ;;  %vm4694_vm6 = vcmp.eq.s32.totalorder %v4689_v17, 2  ;;  %vm4691_vm4 = vcmp.eq.s32.totalorder %v4689_v17, 0 }
 0x5c2   :  { %3039 = vrot.lane.b32.xlu0 %v18129_v3, %s10426_s19  ;;  %v3392_v41 = vsel %vm17723_vm13, %v3375_v32, %v13862_v49  ;;  %v3172_v49 = vsel %vm17753_vm0, %v10384_v53, %v18229_v11  ;;  %v18230_v32 = vld [vmem:[#allocation171_spill] sm:$0xff]  ;;  %v18236_v11 = vld [vmem:[#allocation194_spill] sm:$0xff] }
 0x5c3   :  { %v14162_v27 = vpop.permute.xlu1 %4063  ;;  %v14164_v30 = vpop.permute.xlu0 %4017  ;;  %v3409_v9 = vsel %vm18228_vm5, %v3392_v41, %v13987_v47  ;;  %v4213_v48 = vsel %vm18208_vm15, %v4197_v4, %v18230_v32  ;;  %v3189_v47 = vsel %vm3185_vm1, %v3172_v49, %v18232_v20  ;;  %vm18239_vm5 = vmmov %vm18208_vm15  ;;  %vm4687_vm15 = vweird.f32 %v13829_v60 }
 0x5c4   :  { %18222 = vst [vmem:[#allocation137_spill] sm:$0xff] %v14162_v27  ;;  %18223 = vst [vmem:[#allocation223_spill] sm:$0xff] %v14164_v30  ;;  %v4229_v53 = vsel %vm18235_vm11, %v4213_v48, %v18234_v44  ;;  %v3206_v4 = vsel %vm3202_vm2, %v3189_v47, %v18236_v11  ;;  %v18238_v44 = vld [vmem:[#allocation204_spill] sm:$0xff]  ;;  %v18240_v11 = vld [vmem:[#allocation93_spill] sm:$0xff] }
 0x5c5   :  { %3787 = vrot.lane.b32.xlu1 %v14178_v36, %s10428_s28 }
 0x5c6   :  { %3741 = vrot.lane.b32.xlu0 %v18087_v31, %s18110_s22  ;;  %v10227_v15 = vpop.eup %10226  ;;  %v6351_v31 = vand.u32 3, %v4684_v0 }
 0x5c7   :  { %v14192_v51 = vpop.permute.xlu1 %2783  ;;  %v4408_v62 = vpop.permute.xlu0 %4407  ;;  %v4695_v10 = vxor.u32 2147483648, %v10227_v15 }
 0x5c8   :  { %v4454_v33 = vsel %vm18231_vm7, %v3409_v9, %v4408_v62  ;;  %v10229_v55 = vpop.eup %10228  ;;  %v18237_v62 = vld [vmem:[#allocation199_spill] sm:$0xff]  ;;  %vm4690_vm7 = vcmp.lt.s32.totalorder %v4689_v17, 2  ;;  %vm6353_vm11 = vcmp.eq.s32.totalorder %v6351_v31, 0  ;;  %vm6356_vm13 = vcmp.eq.s32.totalorder %v6351_v31, 2 }
 0x5c9   :  { %v14205_v41 = vmul.f32 %v13697_v43, %v4454_v33  ;;  %3975 = vrot.lane.b32.xlu1 %v18233_v46, %s18128_s5  ;;  %v4692_v9 = vxor.u32 2147483648, %v10229_v55  ;;  %v3223_v43 = vsel %vm3219_vm3, %v3206_v4, %v18237_v62  ;;  %v4696_v0 = vsel %vm4694_vm6, %v4695_v10, %v10229_v55 }
 0x5ca   :  { %3929 = vrot.lane.b32.xlu0 %v13933_v24, %s18112_s3  ;;  %v3240_v48 = vsel %vm18239_vm5, %v3223_v43, %v18238_v44  ;;  %vm6352_vm6 = vcmp.lt.s32.totalorder %v6351_v31, 2  ;;  %v6358_v43 = vsel %vm6356_vm13, %v4695_v10, %v10229_v55  ;;  %v18241_v44 = vld [vmem:[#allocation179_spill] sm:$0xff]  ;;  %vm18242_vm5 = vcmask 171008   ;;  %v18248_v31 = vld [vmem:[#allocation98_spill] sm:$0xff] }
 0x5cb   :  { %v4702_v49 = vand.u32 2139095040, %v14205_v41  ;;  %v14218_v32 = vpop.permute.xlu1 %2987  ;;  %v14220_v33 = vpop.permute.xlu0 %2829  ;;  %v4693_v24 = vsel %vm4691_vm4, %v10227_v15, %v4692_v9  ;;  %v6355_v62 = vsel %vm6353_vm11, %v10227_v15, %v4692_v9  ;;  %v4245_v17 = vsel %vm18242_vm5, %v4229_v53, %v18241_v44  ;;  %vm18249_vm11 = vmmov %vm18242_vm5  ;;  %v18252_v9 = vld [vmem:[#allocation82_spill] sm:$0xff]  ;;  %v18256_v44 = vld [vmem:[#allocation249_spill] sm:$0xff] }
 0x5cc   :  { %v4697_v47 = vsel %vm4690_vm7, %v4693_v24, %v4696_v0  ;;  %vm18244_vm4 = vcmask 146432   ;;  %vm18247_vm7 = vcmask 195584   ;;  %v17724_v15 = vand.u32 2147483647, %v14205_v41 }
 0x5cd   :  { %v4703_v20 = vshrl.u32 %v4702_v49, 23  ;;  %3087 = vrot.lane.b32.xlu1 %v18240_v11, %s18124_s9  ;;  %v4698_v4 = vsel %vm4687_vm15, nan, %v4697_v47  ;;  %v3257_v49 = vsel %vm18244_vm4, %v3240_v48, %v18243_v57  ;;  %v6359_v47 = vsel %vm6352_vm6, %v6355_v62, %v6358_v43  ;;  %v18251_v57 = vld [vmem:[#allocation184_spill] sm:$0xff]  ;;  %vm18253_vm13 = vmmov %vm18247_vm7  ;;  %v18255_v62 = vld [vmem:[#allocation186_spill] sm:$0xff] }
 0x5ce   :  { %4117 = vrot.lane.b32.xlu0 %v18145_v16, %s18118_s25  ;;  %9579 = vmatmul.mubr.msk.f32.vlgmr.msra.gmra.mrb[16].mxu0 %vm7818_vm12, %v4698_v4  ;;  %v4261_v16 = vsel %vm18247_vm7, %v4245_v17, %v18246_v63  ;;  %v3274_v10 = vsel %vm18249_vm11, %v3257_v49, %v18248_v31  ;;  %v14247_v55 = vsel %vm4687_vm15, nan, %v6359_v47  ;;  %v14256_v63 = vld [vmem:[%s17586_s1 + $0x78] sm:$0xff]  ;;  %v18254_v4 = vld [vmem:[#allocation150_spill] sm:$0xff]  ;;  %v18258_v47 = vld [vmem:[#allocation188_spill] sm:$0xff]  ;;  %vm18263_vm6 = vcmask 293888  }
 0x5cf   :  { %v9055_v0 = vadd.s32 4294967169, %v4703_v20  ;;  %v14236_v24 = vpop.permute.xlu1 %3501  ;;  %v14238_v25 = vpop.permute.xlu0 %3033  ;;  %18250 = vst [vmem:[#allocation225_spill] sm:$0xff] %v14247_v55  ;;  %v4277_v53 = vsel %vm17752_vm8, %v4261_v16, %v18251_v57  ;;  %v3291_v48 = vsel %vm18253_vm13, %v3274_v10, %v18252_v9  ;;  %v4150_v60 = vsel %vm17753_vm0, %v18240_v11, %v18254_v4  ;;  %v18257_v49 = vld [vmem:[#allocation162_spill] sm:$0xff] }
 0x5d0   :  { %18245 = vst [vmem:[#allocation139_spill] sm:$0xff] %v14236_v24  ;;  %v4293_v43 = vsel %vm17751_vm9, %v4277_v53, %v18255_v62  ;;  %v3308_v17 = vsel %vm17752_vm8, %v3291_v48, %v18256_v44  ;;  %v18259_v31 = vld [vmem:[#allocation258_spill] sm:$0xff]  ;;  %v18262_v53 = vld [vmem:[#allocation105_spill] sm:$0xff]  ;;  %vm18264_vm5 = vcmask 252928   ;;  %v4706_v4 = vand.u32 8388607, %v17724_v15 }
 0x5d1   :  { %v4709_v20 = vadd.s32 1, %v9055_v0  ;;  %3789 = vrot.lane.b32.xlu1 %v14256_v63, %s10428_s28  ;;  %v4166_v0 = vsel %vm3185_vm1, %v4150_v60, %v18257_v49  ;;  %v4309_v16 = vsel %vm17750_vm10, %v4293_v43, %v18258_v47  ;;  %v3325_v10 = vsel %vm17751_vm9, %v3308_v17, %v18259_v31  ;;  %v18265_v62 = vld [vmem:[#allocation166_spill] sm:$0xff]  ;;  %v18266_v49 = vld [vmem:[#allocation207_spill] sm:$0xff]  ;;  %v18267_v47 = vld [vmem:[#allocation169_spill] sm:$0xff] }
 0x5d2   :  { %3133 = vrot.lane.b32.xlu0 %v18218_v40, %s10444_s2  ;;  %v4326_v48 = vsel %vm18263_vm6, %v4309_v16, %v18262_v53  ;;  %v3342_v40 = vsel %vm18264_vm5, %v3325_v10, %v13596_v58  ;;  %v4182_v43 = vsel %vm3202_vm2, %v4166_v0, %v18265_v62  ;;  %vm18269_vm4 = vcmask 121856   ;;  %v18270_v0 = vld [vmem:[#allocation111_spill] sm:$0xff] }
 0x5d3   :  { %vm4710_vm15 = vcmp.gt.s32.totalorder %v4709_v20, 0  ;;  %v14275_v57 = vpop.permute.xlu1 %3689  ;;  %v14277_v9 = vpop.permute.xlu0 %3547  ;;  %v3359_v44 = vsel %vm17749_vm14, %v3342_v40, %v13743_v38  ;;  %v4198_v16 = vsel %vm3219_vm3, %v4182_v43, %v18267_v47  ;;  %vm18271_vm7 = vcmask 318464  }
 0x5d4   :  { %18260 = vst [vmem:[#allocation138_spill] sm:$0xff] %v14275_v57  ;;  %18261 = vst [vmem:[#allocation227_spill] sm:$0xff] %v14277_v9  ;;  %v4711_v60 = vsel %vm4710_vm15, %v4709_v20, 0  ;;  %v3376_v58 = vsel %vm17750_vm10, %v3359_v44, %v13864_v42  ;;  %v18268_v20 = vld [vmem:[#allocation172_spill] sm:$0xff]  ;;  %v4343_v10 = vsel %vm18271_vm7, %v4326_v48, %v18270_v0  ;;  %vm18272_vm11 = vcmask 277504  }
 0x5d5   :  { %v4713_v17 = vand.u32 31, %v4711_v60  ;;  %3977 = vrot.lane.b32.xlu1 %v18266_v49, %s18128_s5  ;;  %v4214_v31 = vsel %vm18269_vm4, %v4198_v16, %v18268_v20  ;;  %v3393_v38 = vsel %vm18272_vm11, %v3376_v58, %v13989_v13  ;;  %v4707_v43 = vor.u32 8388608, %v4706_v4 }
 0x5d6   :  { %3835 = vrot.lane.b32.xlu0 %v14178_v36, %s10425_s20  ;;  %v4712_v47 = vshrl.u32 %v4711_v60, 5  ;;  %v18275_v44 = vmov 2475754826   ;;  %v18276_v16 = vmov 2131351028   ;;  %vm18277_vm13 = vcmask 302080  }
 0x5d7   :  { %v4714_v53 = vsub.s32 32, %v4713_v17  ;;  %v14303_v40 = vpop.permute.xlu1 %3877  ;;  %v14305_v62 = vpop.permute.xlu0 %3735  ;;  %v4716_v42 = vshll.u32 %v18139_v45, %v4713_v17  ;;  %v4719_v15 = vshll.u32 %v18275_v44, %v4713_v17  ;;  %v4722_v48 = vshll.u32 %v18276_v16, %v4713_v17 }
 0x5d8   :  { %18273 = vst [vmem:[#allocation140_spill] sm:$0xff] %v14303_v40  ;;  %18274 = vst [vmem:[#allocation164_spill] sm:$0xff] %v14305_v62  ;;  %v4725_v13 = vshll.u32 %v18133_v34, %v4713_v17  ;;  %v4728_v60 = vshll.u32 %v18135_v54, %v4713_v17  ;;  %v3410_v24 = vsel %vm18277_vm13, %v3393_v38, %v14080_v8  ;;  %vm4731_vm15 = vcmp.lt.s32.totalorder %v4712_v47, 1 }
 0x5d9   :  { %v4717_v9 = vshrl.u32 %v18275_v44, %v4714_v53  ;;  %v4720_v20 = vshrl.u32 %v18276_v16, %v4714_v53  ;;  %v4723_v0 = vshrl.u32 %v18133_v34, %v4714_v53  ;;  %3135 = vrot.lane.b32.xlu1 %v18240_v11, %s10444_s2  ;;  %v4726_v4 = vshrl.u32 %v18135_v54, %v4714_v53 }
 0x5da   :  { %v4729_v58 = vshrl.u32 %v18136_v19, %v4714_v53  ;;  %4023 = vrot.lane.b32.xlu0 %v18233_v46, %s18076_s24  ;;  %vm4734_vm6 = vcmp.lt.s32.totalorder %v4712_v47, 4  ;;  %v4715_v17 = vshrl.u32 %v18139_v45, %v4714_v53  ;;  %vm4733_vm5 = vcmp.lt.s32.totalorder %v4712_v47, 3 }
 0x5db   :  { %v4718_v57 = vor.u32 %v4717_v9, %v4716_v42  ;;  %v4721_v55 = vor.u32 %v4720_v20, %v4719_v15  ;;  %v4724_v62 = vor.u32 %v4723_v0, %v4722_v48  ;;  %v14323_v40 = vpop.permute.xlu1 %4065  ;;  %v14325_v11 = vpop.permute.xlu0 %3923  ;;  %v4727_v7 = vor.u32 %v4726_v4, %v4725_v13 }
 0x5dc   :  { %18278 = vst [vmem:[#allocation168_spill] sm:$0xff] %v14323_v40  ;;  %18279 = vst [vmem:[#allocation170_spill] sm:$0xff] %v14325_v11  ;;  %v4730_v2 = vor.u32 %v4729_v58, %v4728_v60  ;;  %v4747_v9 = vshll.u32 %v4707_v43, 8  ;;  %vm4732_vm4 = vcmp.lt.s32.totalorder %v4712_v47, 2  ;;  %vm18281_vm7 = vcmask 326656   ;;  %v18296_v47 = vld [vmem:[#allocation231_spill] sm:$0xff] }
 0x5dd   :  { %v4736_v30 = vsel %vm4734_vm6, %v4724_v62, 2102212464  ;;  %v4739_v27 = vsel %vm4731_vm15, %v4718_v57, %v4721_v55  ;;  %v4743_v29 = vsel %vm4731_vm15, %v4721_v55, %v4724_v62  ;;  %3883 = vrot.lane.b32.xlu1 %v14178_v36, %s10426_s19  ;;  %v4740_v8 = vsel %vm4734_vm6, %v4727_v7, 920167782 }
 0x5de   :  { %v4744_v15 = vsel %vm4734_vm6, %v4730_v2, 1326507024  ;;  %3837 = vrot.lane.b32.xlu0 %v14256_v63, %s10425_s20  ;;  %v4735_v38 = vsel %vm4731_vm15, %v4715_v17, %v4718_v57  ;;  %v4741_v42 = vsel %vm4733_vm5, %v4724_v62, %v4740_v8  ;;  %v4737_v53 = vsel %vm4733_vm5, %v4721_v55, %v4736_v30  ;;  %v18284_v30 = vld [vmem:[#allocation117_spill] sm:$0xff]  ;;  %v18286_v55 = vld [vmem:[#allocation180_spill] sm:$0xff] }
 0x5df   :  { %v4745_v20 = vsel %vm4733_vm5, %v4727_v7, %v4744_v15  ;;  %v4410_v48 = vpop.permute.xlu1 %4409  ;;  %v14332_v0 = vpop.permute.xlu0 %4111  ;;  %v4742_v13 = vsel %vm4732_vm4, %v4739_v27, %v4741_v42  ;;  %v18282_v7 = vld [vmem:[#allocation176_spill] sm:$0xff]  ;;  %vm18283_vm11 = vcmask 146432   ;;  %vm18285_vm13 = vcmask 343040   ;;  %v18288_v8 = vld [vmem:[#allocation185_spill] sm:$0xff] }
 0x5e0   :  { %18280 = vst [vmem:[#allocation174_spill] sm:$0xff] %v14332_v0  ;;  %v4746_v4 = vsel %vm4732_vm4, %v4743_v29, %v4745_v20  ;;  %v4455_v60 = vsel %vm18281_vm7, %v3410_v24, %v4410_v48  ;;  %v14340_v43 = vmul.u32.u64.low %v4747_v9, %v4742_v13  ;;  %v14341_v11 = vmul.u32.u64.high %v4747_v9, %v4742_v13, %v14340_v43  ;;  %v14353_v29 = vld [vmem:[%s17591_s7] ss:$0 sm:$0xff]  ;;  %v18291_v20 = vld [vmem:[#allocation108_spill] sm:$0xff] }
 0x5e1   :  { %v14337_v58 = vmul.u32.u64.low %v4747_v9, %v4746_v4  ;;  %v14338_v2 = vmul.u32.u64.high %v4747_v9, %v4746_v4, %v14337_v58  ;;  %4071 = vrot.lane.b32.xlu1 %v18233_v46, %s18093_s27  ;;  %v4230_v57 = vsel %vm18283_vm11, %v4214_v31, %v18282_v7  ;;  %v4360_v27 = vsel %vm18285_vm13, %v4343_v10, %v18284_v30 }
 0x5e2   :  { %v14356_v24 = vmul.f32 %v14353_v29, %v4455_v60  ;;  %4025 = vrot.lane.b32.xlu0 %v18266_v49, %s18076_s24  ;;  %vm18287_vm15 = vcmask 171008   ;;  %v4738_v17 = vsel %vm4732_vm4, %v4735_v38, %v4737_v53  ;;  %vm18289_vm6 = vcmask 195584   ;;  %v18293_v38 = vld [vmem:[#allocation187_spill] sm:$0xff]  ;;  %v18294_v58 = vld [vmem:[#allocation189_spill] sm:$0xff] }
 0x5e3   :  { %v4246_v62 = vsel %vm18287_vm15, %v4230_v57, %v18286_v55  ;;  %v14363_v31 = vpop.permute.xlu1 %2893  ;;  %vm18292_vm5 = vcmask 367616   ;;  %vm4756_vm7 = vc.u32 %v14338_v2, %v14340_v43  ;;  %v4757_v13 = vadd.s32 1, %v14341_v11 }
 0x5e4   :  { %v4262_v10 = vsel %vm18289_vm6, %v4246_v62, %v18288_v8  ;;  %v4806_v15 = vand.u32 2139095040, %v14356_v24  ;;  %v14368_v42 = vpop.permute.xlu0 %2831  ;;  %v4377_v48 = vsel %vm18292_vm5, %v4360_v27, %v18291_v20  ;;  %v4754_v4 = vmul.u32 %v4747_v9, %v4738_v17  ;;  %v18295_v27 = vld [vmem:[#allocation190_spill] sm:$0xff]  ;;  %vm18304_vm15 = vmmov %vm18292_vm5 }
 0x5e5   :  { %18290 = vst [vmem:[#allocation178_spill] sm:$0xff] %v14368_v42  ;;  %3885 = vrot.lane.b32.xlu1 %v14256_v63, %s10426_s19  ;;  %v4278_v53 = vsel %vm17752_vm8, %v4262_v10, %v18293_v38  ;;  %v4758_v57 = vsel %vm4756_vm7, %v4757_v13, %v14341_v11  ;;  %vm18297_vm4 = vcmask 293888   ;;  %v18298_v17 = vand.u32 2147483647, %v14356_v24  ;;  %v18301_v38 = vld [vmem:[#allocation109_spill] sm:$0xff] }
 0x5e6   :  { %v4807_v60 = vshrl.u32 %v4806_v15, 23  ;;  %4415 = vrot.lane.b32.xlu0 %v4377_v48, %s10445_s30  ;;  %v4294_v7 = vsel %vm17751_vm9, %v4278_v53, %v18294_v58  ;;  %v4759_v62 = vadd.s32 %v4758_v57, %v4754_v4  ;;  %v18299_v15 = vld [vmem:[#allocation233_spill] sm:$0xff]  ;;  %vm18300_vm11 = vcmask 318464  }
 0x5e7   :  { %v14384_v30 = vpop.permute.xlu1 %3081  ;;  %v4310_v55 = vsel %vm17750_vm10, %v4294_v7, %v18295_v27  ;;  %v4810_v10 = vand.u32 8388607, %v18298_v17  ;;  %v18311_v42 = vld [vmem:[#allocation209_spill] sm:$0xff] }
 0x5e8   :  { %v9059_v8 = vadd.s32 4294967169, %v4807_v60  ;;  %v14388_v20 = vpop.permute.xlu0 %3035  ;;  %v4327_v9 = vsel %vm18297_vm4, %v4310_v55, %v18296_v47  ;;  %v4760_v48 = vadd.s32 536870912, %v4759_v62  ;;  %v18303_v47 = vld [vmem:[#allocation114_spill] sm:$0xff] }
 0x5e9   :  { %4073 = vrot.lane.b32.xlu1 %v18266_v49, %s18093_s27  ;;  %v4344_v11 = vsel %vm18300_vm11, %v4327_v9, %v18299_v15  ;;  %v4811_v57 = vor.u32 8388608, %v4810_v10 }
 0x5ea   :  { %v4813_v13 = vadd.s32 1, %v9059_v8  ;;  %3931 = vrot.lane.b32.xlu0 %v14178_v36, %s18112_s3  ;;  %v4361_v53 = vsel %vm18285_vm13, %v4344_v11, %v18301_v38  ;;  %v14406_v58 = vshrl.u32 %v4760_v48, 30 }
 0x5eb   :  { %v14402_v4 = vpop.permute.xlu1 %3595  ;;  %v4378_v60 = vsel %vm18304_vm15, %v4361_v53, %v18303_v47  ;;  %v14423_v38 = vshll.u32 %v4811_v57, 8  ;;  %v18308_v53 = vld [vmem:[#allocation210_spill] sm:$0xff] }
 0x5ec   :  { %18302 = vst [vmem:[#allocation71_spill] sm:$0xff] %v14402_v4  ;;  %vm4814_vm6 = vcmp.gt.s32.totalorder %v4813_v13, 0  ;;  %v14408_v7 = vpop.permute.xlu0 %3549  ;;  %v4762_v55 = vshll.u32 %v14406_v58, 30 }
 0x5ed   :  { %18305 = vst [vmem:[#allocation182_spill] sm:$0xff] %v14408_v7  ;;  %v4815_v27 = vsel %vm4814_vm6, %v4813_v13, 0  ;;  %4417 = vrot.lane.b32.xlu1 %v4378_v60, %s10445_s30  ;;  %vm4701_vm6 = vcmp.lt.s32.totalorder %v14205_v41, 0 }
 0x5ee   :  { %v4817_v36 = vand.u32 31, %v4815_v27  ;;  %4119 = vrot.lane.b32.xlu0 %v18233_v46, %s18118_s25  ;;  %v14416_v9 = vsub.s32 %v4759_v62, %v4762_v55  ;;  %v4816_v17 = vshrl.u32 %v4815_v27, 5 }
 0x5ef   :  { %v14414_v8 = vpop.permute.xlu1 %3783 }
 0x5f0   :  { %18306 = vst [vmem:[#allocation191_spill] sm:$0xff] %v14414_v8  ;;  %v4818_v15 = vsub.s32 32, %v4817_v36  ;;  %v14418_v11 = vpop.permute.xlu0 %3737  ;;  %v4820_v48 = vshll.u32 %v18139_v45, %v4817_v36  ;;  %v4823_v10 = vshll.u32 %v18275_v44, %v4817_v36  ;;  %v4826_v13 = vshll.u32 %v18276_v16, %v4817_v36 }
 0x5f1   :  { %18307 = vst [vmem:[#allocation222_spill] sm:$0xff] %v14418_v11  ;;  %3979 = vrot.lane.b32.xlu1 %v18308_v53, %s18128_s5  ;;  %v4765_v46 = vsub.s32 0, %v14416_v9  ;;  %v4829_v60 = vshll.u32 %v18133_v34, %v4817_v36  ;;  %v4832_v57 = vshll.u32 %v18135_v54, %v4817_v36  ;;  %vm4835_vm5 = vcmp.lt.s32.totalorder %v4816_v17, 1 }
 0x5f2   :  { %v4821_v62 = vshrl.u32 %v18275_v44, %v4818_v15  ;;  %v4824_v47 = vshrl.u32 %v18276_v16, %v4818_v15  ;;  %3933 = vrot.lane.b32.xlu0 %v14256_v63, %s18112_s3  ;;  %v4827_v27 = vshrl.u32 %v18133_v34, %v4818_v15  ;;  %v4830_v55 = vshrl.u32 %v18135_v54, %v4818_v15  ;;  %s18317_s3 = smov 6  }
 0x5f3   :  { %v4833_v4 = vshrl.u32 %v18136_v19, %v4818_v15  ;;  %v14437_v7 = vpop.permute.xlu1 %3971  ;;  %v9056_v11 = vmin.u32 %v4765_v46, %v14416_v9  ;;  %v4819_v3 = vshrl.u32 %v18139_v45, %v4818_v15  ;;  %vm4837_vm7 = vcmp.lt.s32.totalorder %v4816_v17, 3 }
 0x5f4   :  { %18309 = vst [vmem:[#allocation192_spill] sm:$0xff] %v14437_v7  ;;  %v4822_v8 = vor.u32 %v4821_v62, %v4820_v48  ;;  %v4825_v40 = vor.u32 %v4824_v47, %v4823_v10  ;;  %v14440_v0 = vpop.permute.xlu0 %3925  ;;  %v4828_v63 = vor.u32 %v4827_v27, %v4826_v13  ;;  %v4831_v59 = vor.u32 %v4830_v55, %v4829_v60 }
 0x5f5   :  { %18310 = vst [vmem:[#allocation224_spill] sm:$0xff] %v14440_v0  ;;  %v4834_v12 = vor.u32 %v4833_v4, %v4832_v57  ;;  %3981 = vrot.lane.b32.xlu1 %v18311_v42, %s18128_s5  ;;  %v4767_v36 = vclz %v9056_v11  ;;  %vm4838_vm4 = vcmp.lt.s32.totalorder %v4816_v17, 4  ;;  %vm4836_vm11 = vcmp.lt.s32.totalorder %v4816_v17, 2 }
 0x5f6   :  { %v4843_v7 = vsel %vm4835_vm5, %v4822_v8, %v4825_v40  ;;  %4121 = vrot.lane.b32.xlu0 %v18266_v49, %s18118_s25  ;;  %v4840_v48 = vsel %vm4838_vm4, %v4828_v63, 2102212464  ;;  %v4844_v10 = vsel %vm4838_vm4, %v4831_v59, 920167782  ;;  %v4847_v46 = vsel %vm4835_vm5, %v4825_v40, %v4828_v63 }
 0x5f7   :  { %v4848_v62 = vsel %vm4838_vm4, %v4834_v12, 1326507024  ;;  %v14449_v15 = vpop.permute.xlu1 %2895  ;;  %v9057_v13 = vadd.s32 4294967294, %v4767_v36  ;;  %v4845_v4 = vsel %vm4837_vm7, %v4828_v63, %v4844_v10  ;;  %v4839_v60 = vsel %vm4835_vm5, %v4819_v3, %v4822_v8 }
 0x5f8   :  { %v4849_v11 = vsel %vm4837_vm7, %v4831_v59, %v4848_v62  ;;  %v14453_v47 = vpop.permute.xlu0 %4113  ;;  %v4846_v27 = vsel %vm4836_vm11, %v4843_v7, %v4845_v4  ;;  %v4841_v12 = vsel %vm4837_vm7, %v4825_v40, %v4840_v48  ;;  %v4755_v63 = vadd.s32 %v14340_v43, %v14338_v2 }
 0x5f9   :  { %18312 = vst [vmem:[#allocation196_spill] sm:$0xff] %v14453_v47  ;;  %v4850_v49 = vsel %vm4836_vm11, %v4847_v46, %v4849_v11  ;;  %4029 = vrot.lane.b32.xlu1 %v18311_v42, %s18076_s24  ;;  %vm9058_vm13 = vcmp.lt.s32.totalorder %v9057_v13, 0  ;;  %v14468_v3 = vmul.u32.u64.low %v14423_v38, %v4846_v27  ;;  %v14469_v8 = vmul.u32.u64.high %v14423_v38, %v4846_v27, %v14468_v3 }
 0x5fa   :  { %v14462_v55 = vmul.u32.u64.low %v14423_v38, %v4850_v49  ;;  %v14463_v57 = vmul.u32.u64.high %v14423_v38, %v4850_v49, %v14462_v55  ;;  %4027 = vrot.lane.b32.xlu0 %v18308_v53, %s18076_s24  ;;  %v4770_v59 = vsel %vm9058_vm13, 0, %v9057_v13  ;;  %v4842_v10 = vsel %vm4836_vm11, %v4839_v60, %v4841_v12 }
 0x5fb   :  { %v14472_v7 = vpop.permute.xlu1 %3083  ;;  %v4771_v36 = vsub.s32 32, %v4770_v59  ;;  %v4775_v40 = vsub.s32 4294967266, %v4770_v59  ;;  %v4772_v46 = vshll.u32 %v14416_v9, %v4770_v59  ;;  %v4861_v2 = vadd.s32 1, %v14469_v8 }
 0x5fc   :  { %v14476_v48 = vpop.permute.xlu0 %2941  ;;  %vm4860_vm15 = vc.u32 %v14463_v57, %v14468_v3  ;;  %v4858_v11 = vmul.u32 %v14423_v38, %v4842_v10  ;;  %v14504_v38 = vld [vmem:[%s17758_s23 + $0x48] sm:$0xff]  ;;  %vm18330_vm7 = vcmask 121856   ;;  %vm18332_vm4 = vcmask 146432  }
 0x5fd   :  { %4077 = vrot.lane.b32.xlu1 %v18311_v42, %s18093_s27  ;;  %v4773_v62 = vshrl.u32 %v4755_v63, %v4771_v36  ;;  %v4776_v13 = vadd.s32 127, %v4775_v40  ;;  %v4862_v9 = vsel %vm4860_vm15, %v4861_v2, %v14469_v8  ;;  %18316 = vst [vmem:[#allocation205_spill] sm:$0xff] %v14504_v38  ;;  %vm18334_vm11 = vcmask 171008  }
 0x5fe   :  { %4075 = vrot.lane.b32.xlu0 %v18308_v53, %s18093_s27  ;;  %v4863_v49 = vadd.s32 %v4862_v9, %v4858_v11  ;;  %v18321_v11 = vand.u32 2147483647, %v14205_v41  ;;  %s18325_s27 = smov 3   ;;  %vm18336_vm13 = vcmask 195584  }
 0x5ff   :  { %v14487_v43 = vpop.permute.xlu1 %3597  ;;  %v4774_v4 = vor.u32 %v4773_v62, %v4772_v46  ;;  %v4777_v17 = vshll.u32 %v4776_v13, 23 }
 0x600   :  { %18313 = vst [vmem:[#allocation226_spill] sm:$0xff] %v14487_v43  ;;  %v14490_v60 = vpop.permute.xlu0 %3129  ;;  %v4864_v63 = vadd.s32 536870912, %v4863_v49  ;;  %vm4700_vm5 = vcmp.le.f32.partialorder %v18321_v11, 0.7853982  ;;  %v18328_v43 = vld [vmem:[#allocation238_spill] sm:$0xff] }
 0x601   :  { %4125 = vrot.lane.b32.xlu1 %v18311_v42, %s18118_s25  ;;  %v4778_v27 = vor.u32 4788187, %v4777_v17  ;;  %v4781_v59 = vcvt.s32.f32 %v4774_v4  ;;  %v4785_v42 = vsub.s32 4, %v14406_v58 }
 0x602   :  { %4123 = vrot.lane.b32.xlu0 %v18308_v53, %s18118_s25  ;;  %v14509_v40 = vshrl.u32 %v4864_v63, 30  ;;  %v14514_v53 = vld [vmem:[%s17758_s23 + $0x40] sm:$0xff] }
 0x603   :  { %v14497_v12 = vpop.permute.xlu1 %3785  ;;  %v4779_v55 = vand.u32 2147483647, %v4778_v27  ;;  %18318 = vst [vmem:[#allocation216_spill] sm:$0xff] %v14514_v53  ;;  %v4786_v2 = vsel %vm4701_vm6, %v4785_v42, %v14406_v58  ;;  %v14539_v58 = vld [vmem:[%s17758_s23 + $0x20] sm:$0xff] }
 0x604   :  { %18314 = vst [vmem:[#allocation228_spill] sm:$0xff] %v14497_v12  ;;  %v14499_v36 = vpop.permute.xlu0 %3643  ;;  %v4866_v62 = vshll.u32 %v14509_v40, 30  ;;  %v4788_v63 = vsel %vm4700_vm5, 0, %v4786_v2  ;;  %18323 = vst [vmem:[#allocation248_spill] sm:$0xff] %v14539_v58 }
 0x605   :  { %18315 = vst [vmem:[#allocation200_spill] sm:$0xff] %v14499_v36  ;;  %2499 = vrot.lane.b32.xlu1 %v14504_v38, %s18317_s3  ;;  %v4782_v8 = vmul.f32 %v4781_v59, %v4779_v55  ;;  %v4792_v36 = vadd.s32 3, %v4788_v63 }
 0x606   :  { %2497 = vrot.lane.b32.xlu0 %v14514_v53, %s18317_s3  ;;  %v4867_v17 = vsub.s32 %v4863_v49, %v4866_v62  ;;  %v18324_v49 = vld [vmem:[#allocation73_spill] sm:$0xff] }
 0x607   :  { %v14518_v10 = vpop.permute.xlu1 %3973  ;;  %v4783_v46 = vxor.u32 2147483648, %v4782_v8  ;;  %v3173_v42 = vsel %vm17753_vm0, %v14539_v58, %v18324_v49 }
 0x608   :  { %18319 = vst [vmem:[#allocation101_spill] sm:$0xff] %v14518_v10  ;;  %v14522_v13 = vpop.permute.xlu0 %3831  ;;  %v4869_v55 = vsub.s32 0, %v4867_v17 }
 0x609   :  { %18320 = vst [vmem:[#allocation241_spill] sm:$0xff] %v14522_v13  ;;  %2547 = vrot.lane.b32.xlu1 %v14504_v38, %s18107_s6  ;;  %v4784_v4 = vsel %vm4701_vm6, %v4783_v46, %v4782_v8  ;;  %v14547_v8 = vld [vmem:[%s17758_s23 + $0x50] sm:$0xff]  ;;  %v18326_v46 = vld [vmem:[#allocation203_spill] sm:$0xff] }
 0x60a   :  { %2545 = vrot.lane.b32.xlu0 %v14514_v53, %s18107_s6  ;;  %v4787_v27 = vsel %vm4700_vm5, %v14205_v41, %v4784_v4  ;;  %v3190_v62 = vsel %vm3185_vm1, %v3173_v42, %v18326_v46  ;;  %v9060_v2 = vmin.u32 %v4869_v55, %v4867_v17  ;;  %v18327_v4 = vld [vmem:[#allocation214_spill] sm:$0xff] }
 0x60b   :  { %v14531_v9 = vpop.permute.xlu1 %2943  ;;  %10230 = vcosq.f32 %v4787_v27  ;;  %v3207_v11 = vsel %vm3202_vm2, %v3190_v62, %v18327_v4  ;;  %v18331_v55 = vld [vmem:[#allocation246_spill] sm:$0xff]  ;;  %v6454_v62 = vand.u32 3, %v4788_v63  ;;  %v18333_v4 = vld [vmem:[#allocation255_spill] sm:$0xff] }
 0x60c   :  { %v14534_v59 = vpop.permute.xlu0 %4019  ;;  %10232 = vsinq.f32 %v4787_v27  ;;  %v3224_v12 = vsel %vm3219_vm3, %v3207_v11, %v18328_v43  ;;  %v4871_v13 = vclz %v9060_v2  ;;  %v18329_v27 = vld [vmem:[#allocation240_spill] sm:$0xff]  ;;  %v4793_v11 = vand.u32 3, %v4792_v36 }
 0x60d   :  { %18322 = vst [vmem:[#allocation94_spill] sm:$0xff] %v14534_v59  ;;  %2453 = vrot.lane.b32.xlu1 %v14547_v8, %s18325_s27  ;;  %v3241_v0 = vsel %vm18330_vm7, %v3224_v12, %v18329_v27  ;;  %vm6455_vm6 = vcmp.lt.s32.totalorder %v6454_v62, 2  ;;  %vm6456_vm7 = vcmp.eq.s32.totalorder %v6454_v62, 0 }
 0x60e   :  { %2593 = vrot.lane.b32.xlu0 %v14514_v53, %s18127_s29  ;;  %v3258_v42 = vsel %vm18332_vm4, %v3241_v0, %v18331_v55  ;;  %v9061_v46 = vadd.s32 4294967294, %v4871_v13  ;;  %v4859_v55 = vadd.s32 %v14468_v3, %v14463_v57  ;;  %vm4798_vm5 = vcmp.eq.s32.totalorder %v4793_v11, 2 }
 0x60f   :  { %v14557_v49 = vpop.permute.xlu1 %3131  ;;  %v3275_v43 = vsel %vm18334_vm11, %v3258_v42, %v18333_v4  ;;  %vm6459_vm4 = vcmp.eq.s32.totalorder %v6454_v62, 2  ;;  %vm4794_vm11 = vcmp.lt.s32.totalorder %v4793_v11, 2 }
 0x610   :  { %v14561_v10 = vpop.permute.xlu0 %2989  ;;  %v3292_v12 = vsel %vm18336_vm13, %v3275_v43, %v13598_v18  ;;  %vm9062_vm15 = vcmp.lt.s32.totalorder %v9061_v46, 0  ;;  %v14588_v18 = vld [vmem:[%s17758_s23 + $0x58] sm:$0xff]  ;;  %vm4795_vm13 = vcmp.eq.s32.totalorder %v4793_v11, 0 }
 0x611   :  { %2641 = vrot.lane.b32.xlu1 %v14514_v53, %s10431_s0  ;;  %v3309_v0 = vsel %vm17752_vm8, %v3292_v12, %v13745_v28  ;;  %v4874_v13 = vsel %vm9062_vm15, 0, %v9061_v46  ;;  %vm4791_vm15 = vweird.f32 %v14205_v41 }
 0x612   :  { %2595 = vrot.lane.b32.xlu0 %v14504_v38, %s18127_s29  ;;  %v4875_v42 = vsub.s32 32, %v4874_v13  ;;  %v4879_v4 = vsub.s32 4294967266, %v4874_v13  ;;  %v4876_v43 = vshll.u32 %v4867_v17, %v4874_v13  ;;  %v3326_v13 = vsel %vm17751_vm9, %v3309_v0, %v13852_v26 }
 0x613   :  { %v14573_v2 = vpop.permute.xlu1 %3691 }
 0x614   :  { %18335 = vst [vmem:[#allocation257_spill] sm:$0xff] %v14573_v2  ;;  %v14577_v27 = vpop.permute.xlu0 %3645  ;;  %v4877_v57 = vshrl.u32 %v4859_v55, %v4875_v42  ;;  %v4880_v3 = vadd.s32 127, %v4879_v4 }
 0x615   :  { %18337 = vst [vmem:[#allocation149_spill] sm:$0xff] %v14577_v27  ;;  %2501 = vrot.lane.b32.xlu1 %v14547_v8, %s18317_s3  ;;  %v10231_v63 = vpop.eup %10230 }
 0x616   :  { %2455 = vrot.lane.b32.xlu0 %v14588_v18, %s18325_s27  ;;  %v10233_v28 = vpop.eup %10232  ;;  %v4799_v46 = vxor.u32 2147483648, %v10231_v63  ;;  %v4878_v47 = vor.u32 %v4877_v57, %v4876_v43  ;;  %v4881_v58 = vshll.u32 %v4880_v3, 23  ;;  %v18348_v57 = vld [vmem:[#allocation213_spill] sm:$0xff] }
 0x617   :  { %v14592_v36 = vpop.permute.xlu1 %3879  ;;  %v4796_v2 = vxor.u32 2147483648, %v10233_v28 }
 0x618   :  { %18338 = vst [vmem:[#allocation151_spill] sm:$0xff] %v14592_v36  ;;  %v14594_v12 = vpop.permute.xlu0 %3833  ;;  %v4800_v27 = vsel %vm4798_vm5, %v4799_v46, %v10233_v28  ;;  %v6461_v59 = vsel %vm6459_vm4, %v4799_v46, %v10233_v28  ;;  %vm18341_vm5 = vcmask 252928   ;;  %v4882_v28 = vor.u32 4788187, %v4881_v58 }
 0x619   :  { %18339 = vst [vmem:[#allocation161_spill] sm:$0xff] %v14594_v12  ;;  %2689 = vrot.lane.b32.xlu1 %v14514_v53, %s10432_s17  ;;  %v4797_v36 = vsel %vm4795_vm13, %v10231_v63, %v4796_v2  ;;  %v6458_v17 = vsel %vm6456_vm7, %v10231_v63, %v4796_v2  ;;  %v3343_v4 = vsel %vm18341_vm5, %v3326_v13, %v13975_v14  ;;  %v4885_v62 = vcvt.s32.f32 %v4878_v47  ;;  %v18347_v47 = vld [vmem:[#allocation69_spill] sm:$0xff]  ;;  %v18350_v13 = vld [vmem:[#allocation102_spill] sm:$0xff] }
 0x61a   :  { %2643 = vrot.lane.b32.xlu0 %v14504_v38, %s10431_s0  ;;  %v4801_v42 = vsel %vm4794_vm11, %v4797_v36, %v4800_v27  ;;  %v6462_v11 = vsel %vm6455_vm6, %v6458_v17, %v6461_v59  ;;  %v3360_v2 = vsel %vm17749_vm14, %v3343_v4, %v14082_v37  ;;  %v4883_v59 = vand.u32 2147483647, %v4882_v28 }
 0x61b   :  { %v14603_v55 = vpop.permute.xlu1 %4067  ;;  %v4802_v46 = vsel %vm4791_vm15, nan, %v4801_v42  ;;  %v14616_v26 = vsel %vm4791_vm15, nan, %v6462_v11  ;;  %v3377_v41 = vsel %vm17750_vm10, %v3360_v2, %v14238_v25  ;;  %vm18344_vm6 = vcmask 277504   ;;  %v14634_v25 = vld [vmem:[%s17758_s23 + $0x28] sm:$0xff] }
 0x61c   :  { %18340 = vst [vmem:[#allocation165_spill] sm:$0xff] %v14603_v55  ;;  %v14609_v43 = vpop.permute.xlu0 %4021  ;;  %9581 = vmatprep.mubr.msk.f32.mxu0 %vm7818_vm12, %v4802_v46  ;;  %18343 = vst [vmem:[#allocation171_spill] sm:$0xff] %v14616_v26  ;;  %v3394_v14 = vsel %vm18344_vm6, %v3377_v41, %v14384_v30  ;;  %v4886_v37 = vmul.f32 %v4885_v62, %v4883_v59  ;;  %vm18345_vm7 = vcmask 302080   ;;  %vm18346_vm4 = vcmask 326656   ;;  %v18351_v46 = vld [vmem:[#allocation80_spill] sm:$0xff]  ;;  %v18352_v59 = vld [vmem:[#allocation247_spill] sm:$0xff] }
 0x61d   :  { %18342 = vst [vmem:[#allocation67_spill] sm:$0xff] %v14609_v43  ;;  %2549 = vrot.lane.b32.xlu1 %v14547_v8, %s18107_s6  ;;  %v3411_v27 = vsel %vm18345_vm7, %v3394_v14, %v14490_v60  ;;  %v3174_v30 = vsel %vm17753_vm0, %v14634_v25, %v18347_v47  ;;  %v4889_v60 = vsub.s32 4, %v14509_v40  ;;  %vm4805_vm11 = vcmp.lt.s32.totalorder %v14356_v24, 0 }
 0x61e   :  { %2503 = vrot.lane.b32.xlu0 %v14588_v18, %s18317_s3  ;;  %v3191_v3 = vsel %vm3185_vm1, %v3174_v30, %v18348_v57  ;;  %v4887_v11 = vxor.u32 2147483648, %v4886_v37  ;;  %vm18353_vm13 = vcmask 121856   ;;  %vm18355_vm15 = vcmask 146432   ;;  %v18357_v30 = vld [vmem:[#allocation134_spill] sm:$0xff] }
 0x61f   :  { %v14624_v58 = vpop.permute.xlu1 %2991  ;;  %v3208_v42 = vsel %vm3202_vm2, %v3191_v3, %v18350_v13  ;;  %vm18358_vm5 = vcmask 171008   ;;  %vm18361_vm7 = vcmask 195584  }
 0x620   :  { %v4412_v0 = vpop.permute.xlu0 %4411  ;;  %v3225_v2 = vsel %vm3219_vm3, %v3208_v42, %v18351_v46  ;;  %v4888_v3 = vsel %vm4805_vm11, %v4887_v11, %v4886_v37  ;;  %v18360_v46 = vand.u32 2147483647, %v14356_v24 }
 0x621   :  { %v4456_v63 = vsel %vm18346_vm4, %v3411_v27, %v4412_v0  ;;  %2737 = vrot.lane.b32.xlu1 %v14514_v53, %s18110_s22  ;;  %v3242_v62 = vsel %vm18353_vm13, %v3225_v2, %v18352_v59  ;;  %v4890_v27 = vsel %vm4805_vm11, %v4889_v60, %v14509_v40  ;;  %v18354_v0 = vld [vmem:[#allocation256_spill] sm:$0xff]  ;;  %vm18363_vm4 = vcmask 252928  }
 0x622   :  { %v14640_v36 = vmul.f32 %v14353_v29, %v4456_v63  ;;  %2691 = vrot.lane.b32.xlu0 %v14504_v38, %s10432_s17  ;;  %v3259_v63 = vsel %vm18355_vm15, %v3242_v62, %v18354_v0  ;;  %vm4804_vm6 = vcmp.le.f32.partialorder %v18360_v46, 0.7853982  ;;  %v18365_v0 = vld [vmem:[#allocation75_spill] sm:$0xff]  ;;  %vm18368_vm13 = vcmask 277504  }
 0x623   :  { %v14647_v17 = vpop.permute.xlu1 %3693  ;;  %v3276_v57 = vsel %vm18358_vm5, %v3259_v63, %v18357_v30  ;;  %v14681_v60 = vsel %vm4804_vm6, 0, %v4890_v27  ;;  %vm18370_vm15 = vcmask 302080  }
 0x624   :  { %18349 = vst [vmem:[#allocation193_spill] sm:$0xff] %v14647_v17  ;;  %v4910_v4 = vand.u32 2139095040, %v14640_v36  ;;  %v14652_v28 = vpop.permute.xlu0 %3037  ;;  %v17730_v41 = vand.u32 2147483647, %v14640_v36  ;;  %v4896_v27 = vadd.s32 3, %v14681_v60 }
 0x625   :  { %2597 = vrot.lane.b32.xlu1 %v14547_v8, %s18127_s29 }
 0x626   :  { %v4911_v14 = vshrl.u32 %v4910_v4, 23  ;;  %2551 = vrot.lane.b32.xlu0 %v14588_v18, %s18107_s6  ;;  %v3293_v4 = vsel %vm18361_vm7, %v3276_v57, %v13723_v23  ;;  %v4914_v40 = vand.u32 8388607, %v17730_v41  ;;  %v4891_v23 = vsel %vm4804_vm6, %v14356_v24, %v4888_v3  ;;  %v18366_v3 = vld [vmem:[#allocation70_spill] sm:$0xff] }
 0x627   :  { %v14667_v47 = vpop.permute.xlu1 %3881  ;;  %v3310_v37 = vsel %vm17752_vm8, %v3293_v4, %v13854_v1  ;;  %v14700_v1 = vld [vmem:[%s17758_s23 + $0x30] sm:$0xff]  ;;  %10234 = vsinq.f32 %v4891_v23  ;;  %vm18372_vm6 = vcmask 326656  }
 0x628   :  { %18356 = vst [vmem:[#allocation208_spill] sm:$0xff] %v14667_v47  ;;  %v9063_v13 = vadd.s32 4294967169, %v4911_v14  ;;  %v14671_v42 = vpop.permute.xlu0 %3739  ;;  %v3327_v2 = vsel %vm17751_vm9, %v3310_v37, %v13977_v61  ;;  %v3175_v61 = vsel %vm17753_vm0, %v14700_v1, %v18365_v0  ;;  %v4915_v30 = vor.u32 8388608, %v4914_v40  ;;  %v18367_v40 = vld [vmem:[#allocation90_spill] sm:$0xff] }
 0x629   :  { %18359 = vst [vmem:[#allocation175_spill] sm:$0xff] %v14671_v42  ;;  %2785 = vrot.lane.b32.xlu1 %v14514_v53, %s10428_s28  ;;  %v3344_v62 = vsel %vm18363_vm4, %v3327_v2, %v14070_v52  ;;  %v14712_v52 = vld [vmem:[%s17758_s23 + $0x38] sm:$0xff]  ;;  %v3192_v37 = vsel %vm3185_vm1, %v3175_v61, %v18367_v40  ;;  %10236 = vcosq.f32 %v4891_v23  ;;  %v14740_v42 = vand.u32 3, %v4896_v27 }
 0x62a   :  { %v4917_v11 = vadd.s32 1, %v9063_v13  ;;  %2739 = vrot.lane.b32.xlu0 %v14504_v38, %s18110_s22  ;;  %v3361_v63 = vsel %vm17749_vm14, %v3344_v62, %v14218_v32  ;;  %v14717_v13 = vsel %vm17753_vm0, %v14712_v52, %v18366_v3  ;;  %v14724_v32 = vld [vmem:[%s17758_s23 + $0x60] sm:$0xff] }
 0x62b   :  { %v14689_v59 = vpop.permute.xlu1 %4069  ;;  %v3378_v46 = vsel %vm17750_vm10, %v3361_v63, %v14388_v20  ;;  %v18369_v20 = vld [vmem:[#allocation89_spill] sm:$0xff] }
 0x62c   :  { %18362 = vst [vmem:[#allocation194_spill] sm:$0xff] %v14689_v59  ;;  %vm4918_vm11 = vcmp.gt.s32.totalorder %v4917_v11, 0  ;;  %v14694_v14 = vpop.permute.xlu0 %3927  ;;  %v3209_v0 = vsel %vm3202_vm2, %v3192_v37, %v18369_v20 }
 0x62d   :  { %18364 = vst [vmem:[#allocation199_spill] sm:$0xff] %v14694_v14  ;;  %v4919_v57 = vsel %vm4918_vm11, %v4917_v11, 0  ;;  %2599 = vrot.lane.b32.xlu1 %v14588_v18, %s18127_s29  ;;  %v3395_v11 = vsel %vm18368_vm13, %v3378_v46, %v14472_v7  ;;  %vm4899_vm13 = vcmp.eq.s32.totalorder %v14740_v42, 0 }
 0x62e   :  { %v4921_v4 = vand.u32 31, %v4919_v57  ;;  %2457 = vrot.lane.b32.xlu0 %v14724_v32, %s18325_s27  ;;  %v14732_v2 = vshrl.u32 %v4919_v57, 5  ;;  %v3412_v63 = vsel %vm18370_vm15, %v3395_v11, %v14557_v49  ;;  %v14745_v57 = vshll.u32 %v4915_v30, 8 }
 0x62f   :  { %v4414_v62 = vpop.permute.xlu1 %4413  ;;  %vm4902_vm15 = vcmp.eq.s32.totalorder %v14740_v42, 2 }
 0x630   :  { %v4922_v3 = vsub.s32 32, %v4921_v4  ;;  %v14738_v41 = vpop.permute.xlu0 %4115  ;;  %v4924_v61 = vshll.u32 %v18139_v45, %v4921_v4  ;;  %v4927_v40 = vshll.u32 %v18275_v44, %v4921_v4  ;;  %v4930_v7 = vshll.u32 %v18276_v16, %v4921_v4 }
 0x631   :  { %18371 = vst [vmem:[#allocation204_spill] sm:$0xff] %v14738_v41  ;;  %2787 = vrot.lane.b32.xlu1 %v14504_v38, %s10428_s28  ;;  %v4933_v27 = vshll.u32 %v18133_v34, %v4921_v4  ;;  %v4936_v11 = vshll.u32 %v18135_v54, %v4921_v4  ;;  %vm4939_vm5 = vcmp.lt.s32.totalorder %v14732_v2, 1  ;;  %v4457_v26 = vsel %vm18372_vm6, %v3412_v63, %v4414_v62  ;;  %v14771_v4 = vld [vmem:[%s17758_s23 + $0x68] sm:$0xff] }
 0x632   :  { %v4925_v23 = vshrl.u32 %v18275_v44, %v4922_v3  ;;  %v4928_v49 = vshrl.u32 %v18276_v16, %v4922_v3  ;;  %v4931_v46 = vshrl.u32 %v18133_v34, %v4922_v3  ;;  %2645 = vrot.lane.b32.xlu0 %v14547_v8, %s10431_s0  ;;  %v4934_v37 = vshrl.u32 %v18135_v54, %v4922_v3 }
 0x633   :  { %v4937_v30 = vshrl.u32 %v18136_v19, %v4922_v3  ;;  %v14759_v20 = vpop.permute.xlu1 %3085  ;;  %vm4942_vm7 = vcmp.lt.s32.totalorder %v14732_v2, 4  ;;  %v14766_v41 = vmul.f32 %v14353_v29, %v4457_v26  ;;  %vm4940_vm4 = vcmp.lt.s32.totalorder %v14732_v2, 2 }
 0x634   :  { %v4926_v17 = vor.u32 %v4925_v23, %v4924_v61  ;;  %v4929_v47 = vor.u32 %v4928_v49, %v4927_v40  ;;  %v4932_v12 = vor.u32 %v4931_v46, %v4930_v7  ;;  %v14762_v14 = vpop.permute.xlu0 %3039  ;;  %v4935_v59 = vor.u32 %v4934_v37, %v4933_v27  ;;  %v14786_v49 = vpop.eup %10234 }
 0x635   :  { %v4938_v43 = vor.u32 %v4937_v30, %v4936_v11  ;;  %18373 = vst [vmem:[#allocation93_spill] sm:$0xff] %v14766_v41  ;;  %2459 = vrot.lane.b32.xlu1 %v14771_v4, %s18325_s27  ;;  %v4923_v61 = vshrl.u32 %v18139_v45, %v4922_v3  ;;  %vm4941_vm11 = vcmp.lt.s32.totalorder %v14732_v2, 3  ;;  %v14792_v30 = vpop.eup %10236  ;;  %vm4898_vm6 = vcmp.lt.s32.totalorder %v14740_v42, 2  ;;  %v7804_v42 = vld [vmem:[%s17592_s8 + $0x8] sm:$0xff] }
 0x636   :  { %v4944_v62 = vsel %vm4942_vm7, %v4932_v12, 2102212464  ;;  %v4947_v63 = vsel %vm4939_vm5, %v4926_v17, %v4929_v47  ;;  %v4951_v40 = vsel %vm4939_vm5, %v4929_v47, %v4932_v12  ;;  %2833 = vrot.lane.b32.xlu0 %v14514_v53, %s10425_s20  ;;  %v4948_v26 = vsel %vm4942_vm7, %v4935_v59, 920167782 }
 0x637   :  { %v4952_v7 = vsel %vm4942_vm7, %v4938_v43, 1326507024  ;;  %v14784_v23 = vpop.permute.xlu1 %3787  ;;  %v4943_v3 = vsel %vm4939_vm5, %v4923_v61, %v4926_v17  ;;  %v4945_v46 = vsel %vm4941_vm11, %v4929_v47, %v4944_v62  ;;  %v4949_v27 = vsel %vm4941_vm11, %v4932_v12, %v4948_v26  ;;  %v18376_v61 = vld [vmem:[#allocation254_spill] sm:$0xff] }
 0x638   :  { %18374 = vst [vmem:[#allocation179_spill] sm:$0xff] %v14784_v23  ;;  %v4953_v37 = vsel %vm4941_vm11, %v4935_v59, %v4952_v7  ;;  %v14790_v11 = vpop.permute.xlu0 %3741  ;;  %v4950_v55 = vsel %vm4940_vm4, %v4947_v63, %v4949_v27  ;;  %v17732_v23 = vand.u32 2147483647, %v14766_v41  ;;  %v5014_v53 = vand.u32 2139095040, %v14766_v41  ;;  %v18377_v63 = vld [vmem:[#allocation85_spill] sm:$0xff] }
 0x639   :  { %18375 = vst [vmem:[#allocation215_spill] sm:$0xff] %v14790_v11  ;;  %v4954_v43 = vsel %vm4940_vm4, %v4951_v40, %v4953_v37  ;;  %2647 = vrot.lane.b32.xlu1 %v14588_v18, %s10431_s0  ;;  %v14807_v47 = vmul.u32.u64.low %v14745_v57, %v4950_v55  ;;  %v14808_v59 = vmul.u32.u64.high %v14745_v57, %v4950_v55, %v14807_v47  ;;  %v3193_v62 = vsel %vm3185_vm1, %v14717_v13, %v18376_v61 }
 0x63a   :  { %v14803_v12 = vmul.u32.u64.low %v14745_v57, %v4954_v43  ;;  %v14804_v17 = vmul.u32.u64.high %v14745_v57, %v4954_v43, %v14803_v12  ;;  %2505 = vrot.lane.b32.xlu0 %v14724_v32, %s18317_s3  ;;  %v3226_v40 = vsel %vm3219_vm3, %v3209_v0, %v18377_v63  ;;  %v5015_v26 = vshrl.u32 %v5014_v53, 23 }
 0x63b   :  { %v4900_v7 = vxor.u32 2147483648, %v14786_v49  ;;  %v14819_v27 = vpop.permute.xlu1 %3975  ;;  %v4946_v55 = vsel %vm4940_vm4, %v4943_v3, %v4945_v46  ;;  %v4903_v37 = vxor.u32 2147483648, %v14792_v30  ;;  %v6557_v12 = vand.u32 3, %v14681_v60 }
 0x63c   :  { %18378 = vst [vmem:[#allocation183_spill] sm:$0xff] %v14819_v27  ;;  %v14825_v43 = vpop.permute.xlu0 %3929  ;;  %v9067_v13 = vadd.s32 4294967169, %v5015_v26  ;;  %v5018_v0 = vand.u32 8388607, %v17732_v23  ;;  %vm4964_vm5 = vc.u32 %v14804_v17, %v14807_v47  ;;  %v4965_v2 = vadd.s32 1, %v14808_v59  ;;  %v7803_v26 = vld [vmem:[%s17592_s8] sm:$0xff] }
 0x63d   :  { %18379 = vst [vmem:[#allocation98_spill] sm:$0xff] %v14825_v43  ;;  %v4901_v53 = vsel %vm4899_vm13, %v14792_v30, %v4900_v7  ;;  %2835 = vrot.lane.b32.xlu1 %v14504_v38, %s10425_s20  ;;  %v4904_v60 = vsel %vm4902_vm15, %v4903_v37, %v14786_v49  ;;  %v4962_v3 = vmul.u32 %v14745_v57, %v4946_v55  ;;  %vm4895_vm7 = vweird.f32 %v14356_v24 }
 0x63e   :  { %2693 = vrot.lane.b32.xlu0 %v14547_v8, %s10432_s17  ;;  %v5021_v46 = vadd.s32 1, %v9067_v13  ;;  %v4905_v61 = vsel %vm4898_vm6, %v4901_v53, %v4904_v60  ;;  %vm18380_vm4 = vcmask 121856   ;;  %v4966_v11 = vsel %vm4964_vm5, %v4965_v2, %v14808_v59  ;;  %v7805_v13 = vld [vmem:[%s17592_s8 + $0x10] sm:$0xff]  ;;  %v7806_v53 = vld [vmem:[%s17592_s8 + $0x18] sm:$0xff] }
 0x63f   :  { %v14843_v63 = vpop.permute.xlu1 %3087  ;;  %v3243_v23 = vsel %vm18380_vm4, %v3226_v40, %v13725_v35  ;;  %v4906_v57 = vsel %vm4895_vm7, nan, %v4905_v61  ;;  %vm6559_vm11 = vcmp.eq.s32.totalorder %v6557_v12, 0  ;;  %v4967_v60 = vadd.s32 %v4966_v11, %v4962_v3  ;;  %v18382_v59 = vld [vmem:[#allocation28_spill] sm:$0xff] }
 0x640   :  { %v14856_v55 = vpop.permute.xlu0 %4117  ;;  %v5019_v43 = vor.u32 8388608, %v5018_v0  ;;  %vm5022_vm13 = vcmp.gt.s32.totalorder %v5021_v46, 0  ;;  %9582 = vmatmul.mubr.msk.f32.gmra.mrb[18].mxu0 %vm7818_vm12, %v4906_v57  ;;  %vm6562_vm15 = vcmp.eq.s32.totalorder %v6557_v12, 2  ;;  %v9844_v40 = vpack.c.bf16 %v7804_v42, %v7803_v26  ;;  %v18384_v0 = vld [vmem:[#allocation130_spill] sm:$0xff] }
 0x641   :  { %18381 = vst [vmem:[#allocation184_spill] sm:$0xff] %v14856_v55  ;;  %2507 = vrot.lane.b32.xlu1 %v14771_v4, %s18317_s3  ;;  %v5023_v35 = vsel %vm5022_vm13, %v5021_v46, 0  ;;  %v9848_v2 = vpack.c.bf16 %v7806_v53, %v7805_v13  ;;  %v6561_v61 = vsel %vm6559_vm11, %v14792_v30, %v4900_v7  ;;  %v4968_v27 = vadd.s32 536870912, %v4967_v60 }
 0x642   :  { %2897 = vrot.lane.b32.xlu0 %v18382_v59, %s10425_s20  ;;  %v5025_v55 = vand.u32 31, %v5023_v35  ;;  %vm6558_vm5 = vcmp.lt.s32.totalorder %v6557_v12, 2  ;;  %v6564_v11 = vsel %vm6562_vm15, %v4903_v37, %v14786_v49  ;;  %v14875_v3 = vsel %vm3202_vm2, %v3193_v62, %v18384_v0  ;;  %9845 = vmatprep.subr.bf16.mxu0 %v9844_v40 }
 0x643   :  { %v14870_v41 = vpop.permute.xlu1 %3789  ;;  %vm18385_vm6 = vcmask 146432   ;;  %v14881_v26 = vsel %vm6558_vm5, %v6561_v61, %v6564_v11  ;;  %vm18386_vm4 = vcmask 171008   ;;  %v14885_v7 = vshrl.u32 %v4968_v27, 30  ;;  %9847 = vmatpush3.bf16.msra.mxu0 %v9844_v40 }
 0x644   :  { %18383 = vst [vmem:[#allocation82_spill] sm:$0xff] %v14870_v41  ;;  %v3260_v46 = vsel %vm18385_vm6, %v3243_v23, %v13833_v22  ;;  %v14879_v57 = vpop.permute.xlu0 %3133  ;;  %v14887_v12 = vshrl.u32 %v5023_v35, 5  ;;  %v5026_v49 = vsub.s32 32, %v5025_v55  ;;  %v5028_v62 = vshll.u32 %v18139_v45, %v5025_v55  ;;  %9849 = vmatprep.subr.bf16.mxu0 %v9848_v2 }
 0x645   :  { %v3277_v30 = vsel %vm18386_vm4, %v3260_v46, %v13953_v50  ;;  %2695 = vrot.lane.b32.xlu1 %v14588_v18, %s10432_s17  ;;  %v5031_v22 = vshll.u32 %v18275_v44, %v5025_v55  ;;  %v5034_v23 = vshll.u32 %v18276_v16, %v5025_v55  ;;  %v14894_v37 = vshll.u32 %v5019_v43, 8 }
 0x646   :  { %2553 = vrot.lane.b32.xlu0 %v14724_v32, %s18107_s6  ;;  %v4970_v50 = vshll.u32 %v14885_v7, 30  ;;  %v5029_v27 = vshrl.u32 %v18275_v44, %v5026_v49  ;;  %v5032_v42 = vshrl.u32 %v18276_v16, %v5026_v49  ;;  %v5037_v13 = vshll.u32 %v18133_v34, %v5025_v55  ;;  %v18389_v16 = vld [vmem:[#allocation26_spill] sm:$0xff] }
 0x647   :  { %v14902_v53 = vpop.permute.xlu1 %3977  ;;  %v5035_v35 = vshrl.u32 %v18133_v34, %v5026_v49  ;;  %v5038_v40 = vshrl.u32 %v18135_v54, %v5026_v49  ;;  %v5040_v43 = vshll.u32 %v18135_v54, %v5025_v55  ;;  %v5041_v61 = vshrl.u32 %v18136_v19, %v5026_v49  ;;  %9851 = vmatpush3.bf16.msra.mxu0 %v9848_v2 }
 0x648   :  { %18387 = vst [vmem:[#allocation150_spill] sm:$0xff] %v14902_v53  ;;  %v14908_v11 = vpop.permute.xlu0 %3835  ;;  %v14910_v0 = vsub.s32 %v4967_v60, %v4970_v50  ;;  %v5030_v46 = vor.u32 %v5029_v27, %v5028_v62  ;;  %v5033_v41 = vor.u32 %v5032_v42, %v5031_v22  ;;  %vm5043_vm11 = vcmp.lt.s32.totalorder %v14887_v12, 1 }
 0x649   :  { %18388 = vst [vmem:[#allocation186_spill] sm:$0xff] %v14908_v11  ;;  %2899 = vrot.lane.b32.xlu1 %v18389_v16, %s10425_s20  ;;  %v5027_v53 = vshrl.u32 %v18139_v45, %v5026_v49  ;;  %v5036_v34 = vor.u32 %v5035_v35, %v5034_v23  ;;  %v5039_v44 = vor.u32 %v5038_v40, %v5037_v13  ;;  %vm5045_vm13 = vcmp.lt.s32.totalorder %v14887_v12, 3 }
 0x64a   :  { %v5042_v38 = vor.u32 %v5041_v61, %v5040_v43  ;;  %2741 = vrot.lane.b32.xlu0 %v14547_v8, %s18110_s22  ;;  %v4973_v55 = vsub.s32 0, %v14910_v0  ;;  %vm5046_vm15 = vcmp.lt.s32.totalorder %v14887_v12, 4  ;;  %v5051_v60 = vsel %vm5043_vm11, %v5030_v46, %v5033_v41 }
 0x64b   :  { %v14923_v62 = vpop.permute.xlu1 %3135  ;;  %v5048_v2 = vsel %vm5046_vm15, %v5036_v34, 2102212464  ;;  %v5052_v22 = vsel %vm5046_vm15, %v5039_v44, 920167782  ;;  %v5055_v49 = vsel %vm5043_vm11, %v5033_v41, %v5036_v34  ;;  %vm5044_vm5 = vcmp.lt.s32.totalorder %v14887_v12, 2 }
 0x64c   :  { %v5056_v23 = vsel %vm5046_vm15, %v5042_v38, 1326507024  ;;  %v14927_v50 = vpop.permute.xlu0 %4023  ;;  %v9064_v27 = vmin.u32 %v4973_v55, %v14910_v0  ;;  %v5053_v42 = vsel %vm5045_vm13, %v5036_v34, %v5052_v22  ;;  %vm18391_vm6 = vcmask 195584  }
 0x64d   :  { %18390 = vst [vmem:[#allocation249_spill] sm:$0xff] %v14927_v50  ;;  %v5057_v13 = vsel %vm5045_vm13, %v5039_v44, %v5056_v23  ;;  %2555 = vrot.lane.b32.xlu1 %v14771_v4, %s18107_s6  ;;  %v3294_v35 = vsel %vm18391_vm6, %v3277_v30, %v14072_v56  ;;  %v5047_v38 = vsel %vm5043_vm11, %v5027_v53, %v5030_v46  ;;  %v8205_v30 = vld [vmem:[%s17593_s10] sm:$0xff]  ;;  %v8206_v53 = vld [vmem:[%s17593_s10 + $0x8] sm:$0xff]  ;;  %vm18394_vm4 = vcmask 121856  }
 0x64e   :  { %v5054_v40 = vsel %vm5044_vm5, %v5051_v60, %v5053_v42  ;;  %v5058_v43 = vsel %vm5044_vm5, %v5055_v49, %v5057_v13  ;;  %2945 = vrot.lane.b32.xlu0 %v18382_v59, %s18134_s21  ;;  %v4975_v34 = vclz %v9064_v27  ;;  %v5049_v44 = vsel %vm5045_vm13, %v5033_v41, %v5048_v2 }
 0x64f   :  { %v14950_v61 = vmul.u32.u64.low %v14894_v37, %v5058_v43  ;;  %v14951_v55 = vmul.u32.u64.high %v14894_v37, %v5058_v43, %v14950_v61  ;;  %v14953_v56 = vpop.permute.xlu1 %3883  ;;  %v3227_v46 = vsel %vm3219_vm3, %v14875_v3, %v13701_v6  ;;  %v3311_v41 = vsel %vm17752_vm8, %v3294_v35, %v14220_v33 }
 0x650   :  { %18392 = vst [vmem:[#allocation162_spill] sm:$0xff] %v14953_v56  ;;  %v14967_v60 = vmul.u32.u64.low %v14894_v37, %v5054_v40  ;;  %v14968_v2 = vmul.u32.u64.high %v14894_v37, %v5054_v40, %v14967_v60  ;;  %v14971_v22 = vpop.permute.xlu0 %3837  ;;  %v3244_v49 = vsel %vm18394_vm4, %v3227_v46, %v13835_v5  ;;  %v3328_v23 = vsel %vm17751_vm9, %v3311_v41, %v14363_v31  ;;  %v18405_v61 = vld [vmem:[#allocation178_spill] sm:$0xff] }
 0x651   :  { %18393 = vst [vmem:[#allocation188_spill] sm:$0xff] %v14971_v22  ;;  %v9065_v27 = vadd.s32 4294967294, %v4975_v34  ;;  %2743 = vrot.lane.b32.xlu1 %v14588_v18, %s18110_s22  ;;  %vm18395_vm11 = vcmask 252928   ;;  %v5050_v33 = vsel %vm5044_vm5, %v5047_v38, %v5049_v44  ;;  %v14985_v3 = vpack.c.bf16 %v8206_v53, %v8205_v30 }
 0x652   :  { %v3345_v6 = vsel %vm18395_vm11, %v3328_v23, %v14476_v48  ;;  %2601 = vrot.lane.b32.xlu0 %v14724_v32, %s18127_s29  ;;  %v14990_v5 = vsel %vm4895_vm7, nan, %v14881_v26  ;;  %vm18398_vm13 = vcmask 146432   ;;  %vm5068_vm5 = vc.u32 %v14951_v55, %v14967_v60  ;;  %v18408_v23 = vld [vmem:[#allocation4_spill] sm:$0xff] }
 0x653   :  { %18396 = vst [vmem:[#allocation258_spill] sm:$0xff] %v14985_v3  ;;  %18397 = vst [vmem:[#allocation105_spill] sm:$0xff] %v14990_v5  ;;  %v3261_v31 = vsel %vm18398_vm13, %v3244_v49, %v13955_v39  ;;  %v3362_v42 = vsel %vm17749_vm14, %v3345_v6, %v14561_v10  ;;  %vm9066_vm15 = vcmp.lt.s32.totalorder %v9065_v27, 0  ;;  %v14998_v48 = vpop.permute.xlu1 %4071  ;;  %vm18400_vm6 = vcmask 171008   ;;  %9853 = vmatprep.subr.bf16.mxu0 %v14985_v3  ;;  %v10398_v49 = vld [vmem:[%s17758_s23 + $0x8] sm:$0xff]  ;;  %v18409_v6 = vld [vmem:[#allocation5_spill] sm:$0xff] }
 0x654   :  { %18399 = vst [vmem:[#allocation166_spill] sm:$0xff] %v14998_v48  ;;  %v3278_v12 = vsel %vm18400_vm6, %v3261_v31, %v14055_v21  ;;  %v4978_v13 = vsel %vm9066_vm15, 0, %v9065_v27  ;;  %v3379_v24 = vsel %vm17750_vm10, %v3362_v42, %v14652_v28  ;;  %v5069_v26 = vadd.s32 1, %v14968_v2  ;;  %v15005_v35 = vpop.permute.xlu0 %4025  ;;  %v10399_v27 = vld [vmem:[%s17758_s23] sm:$0xff] }
 0x655   :  { %18401 = vst [vmem:[#allocation207_spill] sm:$0xff] %v15005_v35  ;;  %v4963_v39 = vadd.s32 %v14807_v47, %v14804_v17  ;;  %v4979_v10 = vsub.s32 32, %v4978_v13  ;;  %v4983_v38 = vsub.s32 4294967266, %v4978_v13  ;;  %v5066_v40 = vmul.u32 %v14894_v37, %v5050_v33  ;;  %2947 = vrot.lane.b32.xlu1 %v18389_v16, %s18134_s21 }
 0x656   :  { %vm18402_vm7 = vcmask 195584   ;;  %v5070_v28 = vsel %vm5068_vm5, %v5069_v26, %v14968_v2  ;;  %vm18403_vm4 = vcmask 277504   ;;  %2789 = vrot.lane.b32.xlu0 %v14547_v8, %s10428_s28  ;;  %v4980_v17 = vshll.u32 %v14910_v0, %v4978_v13  ;;  %v15031_v0 = vld [vmem:[%s17758_s23 + $0x70] sm:$0xff]  ;;  %v18411_v13 = vld [vmem:[#allocation7_spill] sm:$0xff] }
 0x657   :  { %v3295_v21 = vsel %vm18402_vm7, %v3278_v12, %v14192_v51  ;;  %v3396_v43 = vsel %vm18403_vm4, %v3379_v24, %v14759_v20  ;;  %v4981_v47 = vshrl.u32 %v4963_v39, %v4979_v10  ;;  %v4984_v34 = vadd.s32 127, %v4983_v38  ;;  %v15021_v37 = vpop.permute.xlu1 %3885  ;;  %v10400_v12 = vld [vmem:[%s17758_s23 + $0x18] sm:$0xff]  ;;  %vm18416_vm5 = vmmov %vm18403_vm4 }
 0x658   :  { %v5071_v44 = vadd.s32 %v5070_v28, %v5066_v40  ;;  %18404 = vst [vmem:[#allocation169_spill] sm:$0xff] %v15021_v37  ;;  %v3312_v30 = vsel %vm17752_vm8, %v3295_v21, %v18405_v61  ;;  %vm18406_vm11 = vcmask 302080   ;;  %v4416_v53 = vpop.permute.xlu0 %4415  ;;  %vm18407_vm13 = vcmask 326656  }
 0x659   :  { %v3413_v51 = vsel %vm18406_vm11, %v3396_v43, %v14879_v57  ;;  %v4982_v46 = vor.u32 %v4981_v47, %v4980_v17  ;;  %v4985_v41 = vshll.u32 %v4984_v34, 23  ;;  %2461 = vrot.lane.b32.xlu1 %v15031_v0, %s18325_s27  ;;  %v15040_v57 = vsel %vm17753_vm0, %v10398_v49, %v18408_v23  ;;  %v18415_v34 = vld [vmem:[#allocation8_spill] sm:$0xff]  ;;  %vm18417_vm7 = vmmov %vm18406_vm11 }
 0x65a   :  { %v5072_v20 = vadd.s32 536870912, %v5071_v44  ;;  %v4458_v2 = vsel %vm18407_vm13, %v3413_v51, %v4416_v53  ;;  %v15047_v33 = vsel %vm17753_vm0, %v10399_v27, %v18409_v6  ;;  %v3329_v31 = vsel %vm17751_vm9, %v3312_v30, %v14449_v15  ;;  %2993 = vrot.lane.b32.xlu0 %v18382_v59, %s10442_s26  ;;  %vm18419_vm4 = vmmov %vm18407_vm13 }
 0x65b   :  { %v15052_v42 = vmul.f32 %v14353_v29, %v4458_v2  ;;  %v15061_v24 = vsel %vm17753_vm0, %v10400_v12, %v18411_v13  ;;  %vm18412_vm15 = vcmask 252928   ;;  %v4986_v39 = vor.u32 4788187, %v4985_v41  ;;  %v15067_v15 = vpop.permute.xlu1 %4073  ;;  %v18418_v2 = vld [vmem:[#allocation11_spill] sm:$0xff] }
 0x65c   :  { %v3346_v26 = vsel %vm18412_vm15, %v3329_v31, %v14531_v9  ;;  %v15065_v10 = vshrl.u32 %v5072_v20, 30  ;;  %18413 = vst [vmem:[#allocation111_spill] sm:$0xff] %v15067_v15  ;;  %v15073_v21 = vpop.permute.xlu0 %3931  ;;  %v4993_v28 = vsub.s32 4, %v14885_v7  ;;  %v4989_v17 = vcvt.s32.f32 %v4982_v46  ;;  %v18422_v31 = vld [vmem:[#allocation248_spill] sm:$0xff] }
 0x65d   :  { %18410 = vst [vmem:[#allocation172_spill] sm:$0xff] %v15052_v42  ;;  %v3363_v29 = vsel %vm17749_vm14, %v3346_v26, %v14624_v58  ;;  %v17740_v38 = vand.u32 2147483647, %v15052_v42  ;;  %v5118_v40 = vand.u32 2139095040, %v15052_v42  ;;  %18414 = vst [vmem:[#allocation176_spill] sm:$0xff] %v15073_v21  ;;  %2649 = vrot.lane.b32.xlu1 %v14724_v32, %s10431_s0  ;;  %v10401_v58 = vld [vmem:[%s17758_s23 + $0x10] sm:$0xff] }
 0x65e   :  { %v4987_v43 = vand.u32 2147483647, %v4986_v39  ;;  %v5074_v9 = vshll.u32 %v15065_v10, 30  ;;  %v3380_v47 = vsel %vm17750_vm10, %v3363_v29, %v14762_v14  ;;  %v15086_v61 = vsel %vm17753_vm0, %v10401_v58, %v18415_v34  ;;  %2603 = vrot.lane.b32.xlu0 %v14771_v4, %s18127_s29  ;;  %v18423_v39 = vld [vmem:[#allocation22_spill] sm:$0xff] }
 0x65f   :  { %v3397_v30 = vsel %vm18416_vm5, %v3380_v47, %v14843_v63  ;;  %v5119_v51 = vshrl.u32 %v5118_v40, 23  ;;  %v5122_v53 = vand.u32 8388607, %v17740_v38  ;;  %vm4909_vm6 = vcmp.lt.s32.totalorder %v14640_v36, 0  ;;  %v4418_v20 = vpop.permute.xlu1 %4417 }
 0x660   :  { %v4990_v14 = vmul.f32 %v4989_v17, %v4987_v43  ;;  %v15095_v46 = vsub.s32 %v5071_v44, %v5074_v9  ;;  %v3414_v41 = vsel %vm18417_vm7, %v3397_v30, %v14923_v62  ;;  %v15102_v63 = vsel %vm17753_vm0, %v14634_v25, %v18418_v2  ;;  %v15105_v27 = vpop.permute.xlu0 %4119  ;;  %v18421_v44 = vld [vmem:[#allocation13_spill] sm:$0xff]  ;;  %v10402_v25 = vld [vmem:[%s17591_s7] ss:$0 sm:$0xff] }
 0x661   :  { %v9071_v49 = vadd.s32 4294967169, %v5119_v51  ;;  %v4459_v23 = vsel %vm18419_vm4, %v3414_v41, %v4418_v20  ;;  %18420 = vst [vmem:[#allocation117_spill] sm:$0xff] %v15105_v27  ;;  %v4994_v6 = vsel %vm4909_vm6, %v4993_v28, %v14885_v7  ;;  %v15113_v12 = vsel %vm17753_vm0, %v18422_v31, %v18421_v44  ;;  %2837 = vrot.lane.b32.xlu1 %v14547_v8, %s10425_s20  ;;  %v18429_v41 = vld [vmem:[#allocation216_spill] sm:$0xff] }
 0x662   :  { %v4991_v62 = vxor.u32 2147483648, %v4990_v14  ;;  %v5077_v13 = vsub.s32 0, %v15095_v46  ;;  %v15119_v26 = vmul.f32 %v10402_v25, %v4459_v23  ;;  %v15126_v7 = vsel %vm17753_vm0, %v14712_v52, %v18423_v39  ;;  %2791 = vrot.lane.b32.xlu0 %v14588_v18, %s10428_s28  ;;  %v18426_v52 = vld [vmem:[#allocation23_spill] sm:$0xff] }
 0x663   :  { %v5123_v29 = vor.u32 8388608, %v5122_v53  ;;  %v5125_v40 = vadd.s32 1, %v9071_v49  ;;  %v18424_v28 = vand.u32 2147483647, %v14640_v36  ;;  %v15136_v9 = vpop.permute.xlu1 %3979  ;;  %v15143_v58 = vsel %vm17753_vm0, %v14700_v1, %v18426_v52  ;;  %v18428_v53 = vld [vmem:[#allocation205_spill] sm:$0xff] }
 0x664   :  { %v4992_v43 = vsel %vm4909_vm6, %v4991_v62, %v4990_v14  ;;  %v9068_v17 = vmin.u32 %v5077_v13, %v15095_v46  ;;  %v17739_v8 = vand.u32 2147483647, %v15119_v26  ;;  %18425 = vst [vmem:[#allocation180_spill] sm:$0xff] %v15136_v9  ;;  %v5222_v34 = vand.u32 2139095040, %v15119_v26  ;;  %v15146_v30 = vpop.permute.xlu0 %3933 }
 0x665   :  { %vm4908_vm11 = vcmp.le.f32.partialorder %v18424_v28, 0.7853982  ;;  %vm5126_vm13 = vcmp.gt.s32.totalorder %v5125_v40, 0  ;;  %18427 = vst [vmem:[#allocation185_spill] sm:$0xff] %v15146_v30  ;;  %v15152_v14 = vsel %vm17753_vm0, %v18428_v53, %v18389_v16  ;;  %v15157_v20 = vsel %vm17753_vm0, %v18429_v41, %v18382_v59  ;;  %3041 = vrot.lane.b32.xlu1 %v18382_v59, %s10426_s19 }
 0x666   :  { %v15138_v47 = vsel %vm4908_vm11, 0, %v4994_v6  ;;  %v4995_v51 = vsel %vm4908_vm11, %v14640_v36, %v4992_v43  ;;  %v5079_v2 = vclz %v9068_v17  ;;  %v5127_v1 = vsel %vm5126_vm13, %v5125_v40, 0  ;;  %2995 = vrot.lane.b32.xlu0 %v18389_v16, %s10442_s26 }
 0x667   :  { %v5067_v49 = vadd.s32 %v14967_v60, %v14951_v55  ;;  %v5129_v23 = vand.u32 31, %v5127_v1  ;;  %v15163_v6 = vshll.u32 %v5123_v29, 8  ;;  %v15168_v44 = vadd.s32 3, %v15138_v47  ;;  %v15176_v59 = vpop.permute.xlu1 %3981 }
 0x668   :  { %v9069_v31 = vadd.s32 4294967294, %v5079_v2  ;;  %v15170_v62 = vshrl.u32 %v5127_v1, 5  ;;  %v15174_v13 = vand.u32 8388607, %v17739_v8  ;;  %18430 = vst [vmem:[#allocation108_spill] sm:$0xff] %v15176_v59  ;;  %10238 = vcosq.f32 %v4995_v51  ;;  %v15179_v39 = vpop.permute.xlu0 %4121 }
 0x669   :  { %v5130_v55 = vsub.s32 32, %v5129_v23  ;;  %v5132_v60 = vshll.u32 %v18139_v45, %v5129_v23  ;;  %v5223_v25 = vshrl.u32 %v5222_v34, 23  ;;  %18431 = vst [vmem:[#allocation187_spill] sm:$0xff] %v15179_v39  ;;  %10240 = vsinq.f32 %v4995_v51  ;;  %2509 = vrot.lane.b32.xlu1 %v15031_v0, %s18317_s3  ;;  %v15192_v51 = vld [vmem:[%s17758_s23 + $0x78] sm:$0xff] }
 0x66a   :  { %vm9070_vm15 = vcmp.lt.s32.totalorder %v9069_v31, 0  ;;  %v18432_v29 = vmov 2475754826   ;;  %v18433_v28 = vmov 2131351028   ;;  %v5144_v34 = vshll.u32 %v18135_v54, %v5129_v23  ;;  %2463 = vrot.lane.b32.xlu0 %v15192_v51, %s18325_s27 }
 0x66b   :  { %v5135_v40 = vshll.u32 %v18432_v29, %v5129_v23  ;;  %v5138_v43 = vshll.u32 %v18433_v28, %v5129_v23  ;;  %v18434_v17 = vmov 2102212464   ;;  %v5082_v53 = vsel %vm9070_vm15, 0, %v9069_v31  ;;  %v15198_v31 = vpop.permute.xlu1 %4029 }
 0x66c   :  { %v5141_v52 = vshll.u32 %v18434_v17, %v5129_v23  ;;  %v5133_v41 = vshrl.u32 %v18432_v29, %v5130_v55  ;;  %v5136_v2 = vshrl.u32 %v18433_v28, %v5130_v55  ;;  %v5083_v1 = vsub.s32 32, %v5082_v53  ;;  %18435 = vst [vmem:[#allocation189_spill] sm:$0xff] %v15198_v31  ;;  %v15202_v30 = vpop.permute.xlu0 %4027 }
 0x66d   :  { %v5087_v8 = vsub.s32 4294967266, %v5082_v53  ;;  %v5139_v38 = vshrl.u32 %v18434_v17, %v5130_v55  ;;  %vm5147_vm5 = vcmp.lt.s32.totalorder %v15170_v62, 1  ;;  %v5142_v23 = vshrl.u32 %v18135_v54, %v5130_v55  ;;  %18436 = vst [vmem:[#allocation190_spill] sm:$0xff] %v15202_v30  ;;  %2697 = vrot.lane.b32.xlu1 %v14724_v32, %s10432_s17 }
 0x66e   :  { %v5134_v9 = vor.u32 %v5133_v41, %v5132_v60  ;;  %v5137_v59 = vor.u32 %v5136_v2, %v5135_v40  ;;  %v5145_v21 = vshrl.u32 %v18136_v19, %v5130_v55  ;;  %v5084_v56 = vshll.u32 %v15095_v46, %v5082_v53  ;;  %2651 = vrot.lane.b32.xlu0 %v14771_v4, %s10431_s0 }
 0x66f   :  { %v5085_v37 = vshrl.u32 %v5067_v49, %v5083_v1  ;;  %v5088_v11 = vadd.s32 127, %v5087_v8  ;;  %v5140_v22 = vor.u32 %v5139_v38, %v5138_v43  ;;  %v5131_v39 = vshrl.u32 %v18139_v45, %v5130_v55  ;;  %v15214_v38 = vpop.permute.xlu1 %4077 }
 0x670   :  { %v5143_v15 = vor.u32 %v5142_v23, %v5141_v52  ;;  %v5146_v31 = vor.u32 %v5145_v21, %v5144_v34  ;;  %vm5150_vm6 = vcmp.lt.s32.totalorder %v15170_v62, 4  ;;  %vm5148_vm7 = vcmp.lt.s32.totalorder %v15170_v62, 2  ;;  %18437 = vst [vmem:[#allocation231_spill] sm:$0xff] %v15214_v38  ;;  %v18439_v52 = vld [vmem:[#allocation33_spill] sm:$0xff] }
 0x671   :  { %v5086_v60 = vor.u32 %v5085_v37, %v5084_v56  ;;  %v5089_v40 = vshll.u32 %v5088_v11, 23  ;;  %v5152_v46 = vsel %vm5150_vm6, %v5140_v22, 2102212464  ;;  %vm5149_vm4 = vcmp.lt.s32.totalorder %v15170_v62, 3  ;;  %v15223_v56 = vpop.permute.xlu0 %4075  ;;  %2901 = vrot.lane.b32.xlu1 %v18439_v52, %s10425_s20  ;;  %v18447_v62 = vld [vmem:[#allocation212_spill] sm:$0xff] }
 0x672   :  { %v5151_v8 = vsel %vm5147_vm5, %v5131_v39, %v5134_v9  ;;  %v5155_v21 = vsel %vm5147_vm5, %v5134_v9, %v5137_v59  ;;  %v5156_v49 = vsel %vm5150_vm6, %v5143_v15, 920167782  ;;  %18438 = vst [vmem:[#allocation233_spill] sm:$0xff] %v15223_v56  ;;  %v15225_v11 = vpop.eup %10238  ;;  %v5153_v55 = vsel %vm5149_vm4, %v5137_v59, %v5152_v46  ;;  %2839 = vrot.lane.b32.xlu0 %v14588_v18, %s10425_s20  ;;  %v18442_v46 = vld [vmem:[#allocation104_spill] sm:$0xff] }
 0x673   :  { %v5090_v37 = vor.u32 4788187, %v5089_v40  ;;  %v5157_v43 = vsel %vm5149_vm4, %v5140_v22, %v5156_v49  ;;  %v5159_v39 = vsel %vm5147_vm5, %v5137_v59, %v5140_v22  ;;  %v15235_v9 = vpop.eup %10240  ;;  %v5093_v53 = vcvt.s32.f32 %v5086_v60  ;;  %v15250_v60 = vpop.permute.xlu1 %4125  ;;  %v18441_v40 = vld [vmem:[#allocation195_spill] sm:$0xff] }
 0x674   :  { %v5158_v41 = vsel %vm5148_vm7, %v5155_v21, %v5157_v43  ;;  %v5160_v2 = vsel %vm5150_vm6, %v5146_v31, 1326507024  ;;  %v9075_v34 = vadd.s32 4294967169, %v5223_v25  ;;  %18440 = vst [vmem:[#allocation109_spill] sm:$0xff] %v15250_v60  ;;  %v4151_v21 = vsel %vm17753_vm0, %v18442_v46, %v18441_v40  ;;  %v18444_v40 = vld [vmem:[#allocation198_spill] sm:$0xff] }
 0x675   :  { %v5091_v1 = vand.u32 2147483647, %v5090_v37  ;;  %v5161_v22 = vsel %vm5149_vm4, %v5143_v15, %v5160_v2  ;;  %v15246_v59 = vmul.u32.u64.low %v15163_v6, %v5158_v41  ;;  %v15247_v23 = vmul.u32.u64.high %v15163_v6, %v5158_v41, %v15246_v59  ;;  %v15260_v37 = vpop.permute.xlu0 %4123  ;;  %3089 = vrot.lane.b32.xlu1 %v18442_v46, %s18124_s9 }
 0x676   :  { %v5162_v25 = vsel %vm5148_vm7, %v5159_v39, %v5161_v22  ;;  %v5229_v31 = vadd.s32 1, %v9075_v34  ;;  %v15258_v49 = vand.u32 3, %v15168_v44  ;;  %18443 = vst [vmem:[#allocation114_spill] sm:$0xff] %v15260_v37  ;;  %v5227_v2 = vor.u32 8388608, %v15174_v13  ;;  %3043 = vrot.lane.b32.xlu0 %v18389_v16, %s10426_s19  ;;  %v18446_v13 = vld [vmem:[#allocation202_spill] sm:$0xff] }
 0x677   :  { %v15262_v15 = vmul.f32 %v5093_v53, %v5091_v1  ;;  %v15265_v43 = vmul.u32.u64.low %v15163_v6, %v5162_v25  ;;  %v15266_v41 = vmul.u32.u64.high %v15163_v6, %v5162_v25, %v15265_v43  ;;  %v4167_v39 = vsel %vm3185_vm1, %v4151_v21, %v18444_v40  ;;  %v18445_v53 = vld [vmem:[#allocation32_spill] sm:$0xff] }
 0x678   :  { %v5154_v44 = vsel %vm5148_vm7, %v5151_v8, %v5153_v55  ;;  %vm5230_vm11 = vcmp.gt.s32.totalorder %v5229_v31, 0  ;;  %v17741_v34 = vxor.u32 2147483648, %v15235_v9  ;;  %v15281_v1 = vsel %vm17753_vm0, %v14588_v18, %v18445_v53  ;;  %v15286_v43 = vpop.permute.xlu1 %2499 }
 0x679   :  { %v4183_v22 = vsel %vm3202_vm2, %v4167_v39, %v18446_v13  ;;  %v5173_v25 = vadd.s32 1, %v15247_v23  ;;  %v5231_v21 = vsel %vm5230_vm11, %v5229_v31, 0  ;;  %vm5003_vm13 = vcmp.eq.s32.totalorder %v15258_v49, 0  ;;  %v15293_v16 = vpop.permute.xlu0 %2497  ;;  %2557 = vrot.lane.b32.xlu1 %v15031_v0, %s18107_s6 }
 0x67a   :  { %v15290_v8 = vsel %vm3219_vm3, %v4183_v22, %v18447_v62  ;;  %v5233_v55 = vand.u32 31, %v5231_v21  ;;  %18448 = vst [vmem:[#allocation210_spill] sm:$0xff] %v15293_v16  ;;  %v5095_v40 = vxor.u32 2147483648, %v15262_v15  ;;  %v5170_v39 = vmul.u32 %v15163_v6, %v5154_v44  ;;  %2511 = vrot.lane.b32.xlu0 %v15192_v51, %s18317_s3  ;;  %v18449_v6 = vld [vmem:[#allocation93_spill] sm:$0xff] }
 0x67b   :  { %vm5172_vm15 = vc.u32 %v15266_v41, %v15246_v59  ;;  %v15300_v31 = vshll.u32 %v5227_v2, 8  ;;  %v15305_v22 = vshrl.u32 %v5231_v21, 5  ;;  %v15310_v18 = vsel %vm5003_vm13, %v15225_v11, %v17741_v34 }
 0x67c   :  { %v5174_v13 = vsel %vm5172_vm15, %v5173_v25, %v15247_v23  ;;  %v5234_v62 = vsub.s32 32, %v5233_v55  ;;  %vm5013_vm5 = vcmp.lt.s32.totalorder %v18449_v6, 0  ;;  %v5236_v44 = vshll.u32 %v18139_v45, %v5233_v55  ;;  %v15318_v25 = vpop.permute.xlu1 %2547 }
 0x67d   :  { %v5175_v2 = vadd.s32 %v5174_v13, %v5170_v39  ;;  %v5239_v37 = vshll.u32 %v18432_v29, %v5233_v55  ;;  %v5242_v23 = vshll.u32 %v18433_v28, %v5233_v55  ;;  %v5245_v56 = vshll.u32 %v18434_v17, %v5233_v55  ;;  %v15325_v38 = vpop.permute.xlu0 %2545  ;;  %2745 = vrot.lane.b32.xlu1 %v14724_v32, %s18110_s22 }
 0x67e   :  { %v5237_v21 = vshrl.u32 %v18432_v29, %v5234_v62  ;;  %v5240_v60 = vshrl.u32 %v18433_v28, %v5234_v62  ;;  %v5243_v34 = vshrl.u32 %v18434_v17, %v5234_v62  ;;  %vm5006_vm6 = vcmp.eq.s32.totalorder %v15258_v49, 2  ;;  %18450 = vst [vmem:[#allocation209_spill] sm:$0xff] %v15325_v38  ;;  %2699 = vrot.lane.b32.xlu0 %v14771_v4, %s10432_s17 }
 0x67f   :  { %v5176_v39 = vadd.s32 536870912, %v5175_v2  ;;  %v5246_v13 = vshrl.u32 %v18135_v54, %v5234_v62  ;;  %v5248_v30 = vshll.u32 %v18135_v54, %v5233_v55  ;;  %v5249_v16 = vshrl.u32 %v18136_v19, %v5234_v62 }
 0x680   :  { %vm5002_vm7 = vcmp.lt.s32.totalorder %v15258_v49, 2  ;;  %v5235_v28 = vshrl.u32 %v18139_v45, %v5234_v62  ;;  %v5238_v29 = vor.u32 %v5237_v21, %v5236_v44  ;;  %v5241_v17 = vor.u32 %v5240_v60, %v5239_v37  ;;  %v15339_v55 = vpop.permute.xlu1 %2453  ;;  %v18462_v49 = vld [vmem:[#allocation245_spill] sm:$0xff] }
 0x681   :  { %v5244_v35 = vor.u32 %v5243_v34, %v5242_v23  ;;  %v15336_v38 = vshrl.u32 %v5176_v39, 30  ;;  %v5247_v27 = vor.u32 %v5246_v13, %v5245_v56  ;;  %v5250_v5 = vor.u32 %v5249_v16, %v5248_v30  ;;  %v15343_v44 = vpop.permute.xlu0 %2593  ;;  %2949 = vrot.lane.b32.xlu1 %v18439_v52, %s18134_s21 }
 0x682   :  { %vm5251_vm4 = vcmp.lt.s32.totalorder %v15305_v22, 1  ;;  %vm5253_vm11 = vcmp.lt.s32.totalorder %v15305_v22, 3  ;;  %vm5254_vm13 = vcmp.lt.s32.totalorder %v15305_v22, 4  ;;  %18451 = vst [vmem:[#allocation73_spill] sm:$0xff] %v15343_v44  ;;  %vm5252_vm15 = vcmp.lt.s32.totalorder %v15305_v22, 2  ;;  %2903 = vrot.lane.b32.xlu0 %v18445_v53, %s10425_s20 }
 0x683   :  { %v5259_v19 = vsel %vm5251_vm4, %v5238_v29, %v5241_v17  ;;  %v5263_v62 = vsel %vm5251_vm4, %v5241_v17, %v5244_v35  ;;  %v5178_v60 = vshll.u32 %v15336_v38, 30  ;;  %v5256_v37 = vsel %vm5254_vm13, %v5244_v35, 2102212464 }
 0x684   :  { %v5260_v34 = vsel %vm5254_vm13, %v5247_v27, 920167782  ;;  %v5255_v30 = vsel %vm5251_vm4, %v5235_v28, %v5238_v29  ;;  %v5264_v16 = vsel %vm5254_vm13, %v5250_v5, 1326507024  ;;  %v5257_v39 = vsel %vm5253_vm11, %v5241_v17, %v5256_v37  ;;  %v15362_v54 = vpop.permute.xlu1 %2641 }
 0x685   :  { %v5261_v56 = vsel %vm5253_vm11, %v5244_v35, %v5260_v34  ;;  %v15354_v21 = vsub.s32 %v5175_v2, %v5178_v60  ;;  %v5265_v23 = vsel %vm5253_vm11, %v5247_v27, %v5264_v16  ;;  %18452 = vst [vmem:[#allocation203_spill] sm:$0xff] %v15362_v54  ;;  %v5096_v5 = vsel %vm5013_vm5, %v5095_v40, %v15262_v15  ;;  %v15374_v17 = vpop.permute.xlu0 %2595  ;;  %v18454_v40 = vld [vmem:[#allocation96_spill] sm:$0xff] }
 0x686   :  { %v5262_v13 = vsel %vm5252_vm15, %v5259_v19, %v5261_v56  ;;  %v5266_v35 = vsel %vm5252_vm15, %v5263_v62, %v5265_v23  ;;  %v18453_v60 = vxor.u32 2147483648, %v15225_v11  ;;  %3137 = vrot.lane.b32.xlu1 %v18442_v46, %s10444_s2  ;;  %vm18455_vm4 = vcmask 121856   ;;  %v18456_v23 = vld [vmem:[#allocation99_spill] sm:$0xff] }
 0x687   :  { %v15370_v29 = vmul.u32.u64.low %v15300_v31, %v5262_v13  ;;  %v15371_v28 = vmul.u32.u64.high %v15300_v31, %v5262_v13, %v15370_v29  ;;  %v5181_v19 = vsub.s32 0, %v15354_v21  ;;  %v4215_v62 = vsel %vm18455_vm4, %v15290_v8, %v18454_v40  ;;  %3091 = vrot.lane.b32.xlu0 %v18456_v23, %s18124_s9  ;;  %v18457_v56 = vld [vmem:[#allocation239_spill] sm:$0xff] }
 0x688   :  { %v15378_v27 = vmul.u32.u64.low %v15300_v31, %v5266_v35  ;;  %v15379_v2 = vmul.u32.u64.high %v15300_v31, %v5266_v35, %v15378_v27  ;;  %v5008_v15 = vsel %vm5006_vm6, %v18453_v60, %v15235_v9  ;;  %v5258_v37 = vsel %vm5252_vm15, %v5255_v30, %v5257_v39  ;;  %v15410_v39 = vpop.permute.xlu1 %2501  ;;  %v18471_v30 = vld [vmem:[#allocation197_spill] sm:$0xff] }
 0x689   :  { %vm4999_vm11 = vweird.f32 %v14640_v36  ;;  %v5009_v34 = vsel %vm5002_vm7, %v15310_v18, %v5008_v15  ;;  %vm18458_vm6 = vcmask 146432   ;;  %v9072_v46 = vmin.u32 %v5181_v19, %v15354_v21  ;;  %v15424_v60 = vpop.permute.xlu0 %2455  ;;  %v18465_v15 = vld [vmem:[#allocation252_spill] sm:$0xff] }
 0x68a   :  { %v4231_v16 = vsel %vm18458_vm6, %v4215_v62, %v18457_v56  ;;  %v5010_v8 = vsel %vm4999_vm11, nan, %v5009_v34  ;;  %v18459_v22 = vand.u32 2147483647, %v18449_v6  ;;  %vm18463_vm7 = vcmask 171008   ;;  %2605 = vrot.lane.b32.xlu1 %v15031_v0, %s18127_s29  ;;  %v18467_v56 = vld [vmem:[#allocation132_spill] sm:$0xff] }
 0x68b   :  { %v4247_v18 = vsel %vm18463_vm7, %v4231_v16, %v18462_v49  ;;  %v5277_v13 = vadd.s32 1, %v15371_v28  ;;  %9584 = vmatprep.mubr.msk.f32.mxu0 %vm7818_vm12, %v5010_v8  ;;  %v18464_v35 = vsub.s32 4, %v15065_v10  ;;  %vm18466_vm15 = vcmask 195584   ;;  %2559 = vrot.lane.b32.xlu0 %v15192_v51, %s18107_s6 }
 0x68c   :  { %vm15406_vm13 = vcmp.le.f32.partialorder %v18459_v22, 0.7853982  ;;  %v4263_v40 = vsel %vm18466_vm15, %v4247_v18, %v18465_v15  ;;  %v5183_v62 = vclz %v9072_v46  ;;  %v5274_v34 = vmul.u32 %v15300_v31, %v5258_v37  ;;  %v15443_v37 = vpop.permute.xlu1 %2689  ;;  %v15448_v22 = vld [vmem:[%s17758_s23 + $0x50] sm:$0xff] }
 0x68d   :  { %v5098_v19 = vsel %vm5013_vm5, %v18464_v35, %v15065_v10  ;;  %v5099_v27 = vsel %vm15406_vm13, %v18449_v6, %v5096_v5  ;;  %vm5276_vm4 = vc.u32 %v15379_v2, %v15370_v29  ;;  %v4279_v10 = vsel %vm17752_vm8, %v4263_v40, %v18467_v56  ;;  %18468 = vst [vmem:[#allocation214_spill] sm:$0xff] %v15443_v37  ;;  %v18474_v40 = vld [vmem:[#allocation87_spill] sm:$0xff]  ;;  %v18475_v56 = vld [vmem:[#allocation260_spill] sm:$0xff] }
 0x68e   :  { %v5278_v16 = vsel %vm5276_vm4, %v5277_v13, %v15371_v28  ;;  %10242 = vcosq.f32 %v5099_v27  ;;  %v6660_v5 = vand.u32 3, %v15138_v47  ;;  %v9073_v46 = vadd.s32 4294967294, %v5183_v62  ;;  %v18469_v47 = vld [vmem:[#allocation36_spill] sm:$0xff]  ;;  %v18472_v13 = vld [vmem:[#allocation125_spill] sm:$0xff]  ;;  %2793 = vrot.lane.b32.xlu1 %v14724_v32, %s10428_s28  ;;  %v18477_v32 = vld [vmem:[#allocation211_spill] sm:$0xff] }
 0x68f   :  { %v5279_v8 = vadd.s32 %v5278_v16, %v5274_v34  ;;  %v15441_v31 = vsel %vm15406_vm13, 0, %v5098_v19  ;;  %10244 = vsinq.f32 %v5099_v27  ;;  %v15453_v28 = vsel %vm17753_vm0, %v15448_v22, %v18439_v52  ;;  %v15465_v19 = vpop.permute.xlu0 %2643  ;;  %v18473_v27 = vld [vmem:[#allocation201_spill] sm:$0xff]  ;;  %2747 = vrot.lane.b32.xlu0 %v14771_v4, %s18110_s22 }
 0x690   :  { %v15458_v49 = vsel %vm17753_vm0, %v14771_v4, %v18469_v47  ;;  %v4152_v18 = vsel %vm17753_vm0, %v18456_v23, %v18471_v30  ;;  %v4295_v35 = vsel %vm17751_vm9, %v4279_v10, %v18472_v13  ;;  %vm9074_vm5 = vcmp.lt.s32.totalorder %v9073_v46, 0 }
 0x691   :  { %18470 = vst [vmem:[#allocation238_spill] sm:$0xff] %v15458_v49  ;;  %v4168_v15 = vsel %vm3185_vm1, %v4152_v18, %v18473_v27  ;;  %v4311_v62 = vsel %vm17750_vm10, %v4295_v35, %v18474_v40  ;;  %v5280_v34 = vadd.s32 536870912, %v5279_v8  ;;  %vm18476_vm6 = vcmask 293888   ;;  %v15482_v27 = vpop.permute.xlu1 %2549 }
 0x692   :  { %v4328_v16 = vsel %vm18476_vm6, %v4311_v62, %v18475_v56  ;;  %v5186_v30 = vsel %vm9074_vm5, 0, %v9073_v46  ;;  %v5104_v45 = vadd.s32 3, %v15441_v31  ;;  %vm6662_vm13 = vcmp.eq.s32.totalorder %v6660_v5, 0  ;;  %v18478_v62 = vld [vmem:[#allocation145_spill] sm:$0xff]  ;;  %2997 = vrot.lane.b32.xlu1 %v18439_v52, %s10442_s26 }
 0x693   :  { %v5171_v10 = vadd.s32 %v15246_v59, %v15266_v41  ;;  %v5187_v18 = vsub.s32 32, %v5186_v30  ;;  %v5191_v13 = vsub.s32 4294967266, %v5186_v30  ;;  %v15480_v35 = vshrl.u32 %v5280_v34, 30  ;;  %v15489_v37 = vpop.permute.xlu0 %2503  ;;  %2951 = vrot.lane.b32.xlu0 %v18445_v53, %s18134_s21 }
 0x694   :  { %v4184_v40 = vsel %vm3202_vm2, %v4168_v15, %v18477_v32  ;;  %vm18479_vm7 = vcmask 318464   ;;  %v5188_v56 = vshll.u32 %v15354_v21, %v5186_v30  ;;  %v18480_v4 = vxor.u32 2147483648, %v15235_v9  ;;  %v18481_v15 = vld [vmem:[#allocation97_spill] sm:$0xff] }
 0x695   :  { %v4345_v46 = vsel %vm18479_vm7, %v4328_v16, %v18478_v62  ;;  %v5189_v41 = vshrl.u32 %v5171_v10, %v5187_v18  ;;  %v5192_v54 = vadd.s32 127, %v5191_v13  ;;  %v5282_v34 = vshll.u32 %v15480_v35, 30  ;;  %v18482_v16 = vld [vmem:[#allocation137_spill] sm:$0xff]  ;;  %v15508_v44 = vpop.permute.xlu1 %2737 }
 0x696   :  { %v6664_v59 = vsel %vm6662_vm13, %v15225_v11, %v18480_v4  ;;  %vm6665_vm15 = vcmp.eq.s32.totalorder %v6660_v5, 2  ;;  %v4200_v32 = vsel %vm3219_vm3, %v4184_v40, %v18481_v15  ;;  %vm18483_vm4 = vcmask 343040   ;;  %18485 = vst [vmem:[#allocation240_spill] sm:$0xff] %v15508_v44  ;;  %v15513_v40 = vld [vmem:[%s17758_s23 + $0x60] sm:$0xff] }
 0x697   :  { %v4362_v21 = vsel %vm18483_vm4, %v4345_v46, %v18482_v16  ;;  %v5105_v30 = vand.u32 3, %v5104_v45  ;;  %v18484_v10 = vxor.u32 2147483648, %v15225_v11  ;;  %v5190_v13 = vor.u32 %v5189_v41, %v5188_v56  ;;  %v18486_v45 = vld [vmem:[#allocation37_spill] sm:$0xff]  ;;  %v18487_v11 = vld [vmem:[#allocation76_spill] sm:$0xff]  ;;  %v15524_v56 = vpop.permute.xlu0 %2691  ;;  %3139 = vrot.lane.b32.xlu0 %v18456_v23, %s10444_s2 }
 0x698   :  { %v5193_v62 = vshll.u32 %v5192_v54, 23  ;;  %v15506_v4 = vsub.s32 %v5279_v8, %v5282_v34  ;;  %vm6661_vm5 = vcmp.lt.s32.totalorder %v6660_v5, 2  ;;  %v10243_v48 = vpop.eup %10242  ;;  %v15518_v46 = vsel %vm17753_vm0, %v15513_v40, %v18486_v45  ;;  %v18489_v54 = vld [vmem:[#allocation174_spill] sm:$0xff]  ;;  %v18491_v34 = vld [vmem:[#allocation243_spill] sm:$0xff] }
 0x699   :  { %v6667_v18 = vsel %vm6665_vm15, %v18484_v10, %v15235_v9  ;;  %vm18488_vm6 = vcmask 121856   ;;  %vm18490_vm13 = vcmask 367616   ;;  %v10245_v41 = vpop.eup %10244  ;;  %vm18492_vm7 = vcmask 146432  }
 0x69a   :  { %v4216_v9 = vsel %vm18488_vm6, %v4200_v32, %v18487_v11  ;;  %v4379_v8 = vsel %vm18490_vm13, %v4362_v21, %v18489_v54  ;;  %v6668_v5 = vsel %vm6661_vm5, %v6664_v59, %v6667_v18  ;;  %v5194_v16 = vor.u32 4788187, %v5193_v62  ;;  %v15534_v62 = vpop.permute.xlu1 %2597 }
 0x69b   :  { %v4232_v15 = vsel %vm18492_vm7, %v4216_v9, %v18491_v34  ;;  %v5285_v10 = vsub.s32 0, %v15506_v4  ;;  %v5111_v44 = vxor.u32 2147483648, %v10243_v48  ;;  %4419 = vrot.lane.b32.xlu1 %v4379_v8, %s10445_s30  ;;  %vm5107_vm15 = vcmp.eq.s32.totalorder %v5105_v30, 0  ;;  %v18493_v9 = vld [vmem:[#allocation253_spill] sm:$0xff]  ;;  %v15538_v34 = vpop.permute.xlu0 %2551  ;;  %2607 = vrot.lane.b32.xlu0 %v15192_v51, %s18127_s29 }
 0x69c   :  { %v5108_v50 = vxor.u32 2147483648, %v10245_v41  ;;  %vm5110_vm4 = vcmp.eq.s32.totalorder %v5105_v30, 2  ;;  %v5201_v32 = vsub.s32 4, %v15336_v38  ;;  %vm2348_vm6 = vcmask 31744  }
 0x69d   :  { %v5195_v59 = vand.u32 2147483647, %v5194_v16  ;;  %v5197_v21 = vcvt.s32.f32 %v5190_v13  ;;  %v9076_v18 = vmin.u32 %v5285_v10, %v15506_v4  ;;  %v5112_v11 = vsel %vm5110_vm4, %v5111_v44, %v10245_v41  ;;  %v18495_v13 = vld [vmem:[#allocation131_spill] sm:$0xff] }
 0x69e   :  { %vm18494_vm5 = vcmask 171008   ;;  %vm5106_vm13 = vcmp.lt.s32.totalorder %v5105_v30, 2  ;;  %v5109_v8 = vsel %vm5107_vm15, %v10243_v48, %v5108_v50  ;;  %v6763_v49 = vand.u32 3, %v15441_v31 }
 0x69f   :  { %v4248_v54 = vsel %vm18494_vm5, %v4232_v15, %v18493_v9  ;;  %v5198_v23 = vmul.f32 %v5197_v21, %v5195_v59  ;;  %v5287_v3 = vclz %v9076_v18  ;;  %vm5103_vm7 = vweird.f32 %v18449_v6  ;;  %2653 = vrot.lane.b32.xlu1 %v15031_v0, %s10431_s0  ;;  %v18497_v15 = vld [vmem:[#allocation126_spill] sm:$0xff]  ;;  %v15565_v36 = vpop.permute.xlu0 %2739 }
 0x6a0   :  { %v5113_v16 = vsel %vm5106_vm13, %v5109_v8, %v5112_v11  ;;  %vm18496_vm4 = vcmask 195584   ;;  %vm5117_vm14 = vcmp.lt.s32.totalorder %v15052_v42, 0  ;;  %v15553_v31 = vsel %vm4999_vm11, nan, %v6668_v5  ;;  %v15558_v11 = vpop.permute.xlu1 %2785 }
 0x6a1   :  { %v4264_v10 = vsel %vm18496_vm4, %v4248_v54, %v18495_v13  ;;  %v5114_v30 = vsel %vm5103_vm7, nan, %v5113_v16  ;;  %v5199_v21 = vxor.u32 2147483648, %v5198_v23  ;;  %v9077_v18 = vadd.s32 4294967294, %v5287_v3  ;;  %18498 = vst [vmem:[#allocation246_spill] sm:$0xff] %v15558_v11  ;;  %v18499_v54 = vld [vmem:[#allocation122_spill] sm:$0xff]  ;;  %v18521_v11 = vld [vmem:[#allocation141_spill] sm:$0xff] }
 0x6a2   :  { %v4280_v59 = vsel %vm17752_vm8, %v4264_v10, %v18497_v15  ;;  %9585 = vmatmul.mubr.msk.f32.gmra.mrb[20].mxu0 %vm7818_vm12, %v5114_v30  ;;  %v5202_v9 = vsel %vm5117_vm14, %v5201_v32, %v15336_v38  ;;  %v5275_v16 = vadd.s32 %v15370_v29, %v15379_v2  ;;  %v18500_v5 = vand.u32 2147483647, %v15052_v42  ;;  %v15574_v32 = vld [vmem:[%s17758_s23 + $0x68] sm:$0xff] }
 0x6a3   :  { %v4296_v8 = vsel %vm17751_vm9, %v4280_v59, %v18499_v54  ;;  %vm6765_vm15 = vcmp.eq.s32.totalorder %v6763_v49, 0  ;;  %v5200_v13 = vsel %vm5117_vm14, %v5199_v21, %v5198_v23  ;;  %vm9078_vm5 = vcmp.lt.s32.totalorder %v9077_v18, 0  ;;  %2841 = vrot.lane.b32.xlu1 %v15513_v40, %s10425_s20  ;;  %2795 = vrot.lane.b32.xlu0 %v15574_v32, %s10428_s28  ;;  %v15583_v59 = vpop.permute.xlu0 %2457 }
 0x6a4   :  { %vm5116_vm11 = vcmp.le.f32.partialorder %v18500_v5, 0.7853982  ;;  %v6767_v3 = vsel %vm6765_vm15, %v10243_v48, %v5108_v50  ;;  %vm6768_vm13 = vcmp.eq.s32.totalorder %v6763_v49, 2  ;;  %v5290_v38 = vsel %vm9078_vm5, 0, %v9077_v18  ;;  %v15579_v15 = vpop.permute.xlu1 %2599  ;;  %v18501_v50 = vld [vmem:[#allocation261_spill] sm:$0xff] }
 0x6a5   :  { %v5203_v29 = vsel %vm5116_vm11, %v15052_v42, %v5200_v13  ;;  %v5204_v2 = vsel %vm5116_vm11, 0, %v5202_v9  ;;  %v6770_v10 = vsel %vm6768_vm13, %v5111_v44, %v10245_v41  ;;  %v5291_v23 = vsub.s32 32, %v5290_v38  ;;  %v18503_v9 = vld [vmem:[#allocation106_spill] sm:$0xff]  ;;  %v18504_v13 = vld [vmem:[#allocation148_spill] sm:$0xff] }
 0x6a6   :  { %v5295_v30 = vsub.s32 4294967266, %v5290_v38  ;;  %10246 = vcosq.f32 %v5203_v29  ;;  %vm6764_vm14 = vcmp.lt.s32.totalorder %v6763_v49, 2  ;;  %vm2365_vm4 = vcmask 56320   ;;  %v18502_v49 = vld [vmem:[#allocation95_spill] sm:$0xff] }
 0x6a7   :  { %v4312_v48 = vsel %vm17750_vm10, %v4296_v8, %v18501_v50  ;;  %10248 = vsinq.f32 %v5203_v29  ;;  %v6771_v21 = vsel %vm6764_vm14, %v6767_v3, %v6770_v10  ;;  %v5292_v18 = vshll.u32 %v15506_v4, %v5290_v38  ;;  %3045 = vrot.lane.b32.xlu1 %v18439_v52, %s10426_s19  ;;  %2999 = vrot.lane.b32.xlu0 %v18445_v53, %s10442_s26  ;;  %v18506_v52 = vld [vmem:[#allocation113_spill] sm:$0xff]  ;;  %v18507_v3 = vld [vmem:[#allocation223_spill] sm:$0xff]  ;;  %v18510_v50 = vld [vmem:[#allocation128_spill] sm:$0xff] }
 0x6a8   :  { %v5293_v54 = vshrl.u32 %v5275_v16, %v5291_v23  ;;  %v5296_v5 = vadd.s32 127, %v5295_v30  ;;  %v15590_v44 = vsel %vm5103_vm7, nan, %v6771_v21  ;;  %v2350_v41 = vsel %vm2348_vm6, %v15040_v57, %v18502_v49  ;;  %v15607_v10 = vpop.permute.xlu1 %2787  ;;  %v18509_v23 = vld [vmem:[#allocation72_spill] sm:$0xff]  ;;  %v18514_v49 = vld [vmem:[#allocation135_spill] sm:$0xff] }
 0x6a9   :  { %v2349_v8 = vsel %vm2348_vm6, %v15047_v33, %v18503_v9  ;;  %vm18505_vm11 = vcmask 293888   ;;  %v5208_v16 = vadd.s32 3, %v5204_v2  ;;  %v2352_v6 = vsel %vm2348_vm6, %v15061_v24, %v18506_v52  ;;  %v10407_v33 = vld [vmem:[%s17758_s23 + $0x48] sm:$0xff]  ;;  %v18511_v24 = vld [vmem:[#allocation41_spill] sm:$0xff]  ;;  %v18516_v52 = vld [vmem:[#allocation196_spill] sm:$0xff] }
 0x6aa   :  { %v4329_v4 = vsel %vm18505_vm11, %v4312_v48, %v18504_v13  ;;  %vm18508_vm7 = vcmask 318464   ;;  %v5294_v29 = vor.u32 %v5293_v54, %v5292_v18  ;;  %v5297_v57 = vshll.u32 %v5296_v5, 23  ;;  %v18512_v18 = vld [vmem:[#allocation168_spill] sm:$0xff]  ;;  %v15626_v5 = vpop.permute.xlu0 %2645  ;;  %v18515_v13 = vld [vmem:[#allocation10_spill] sm:$0xff] }
 0x6ab   :  { %v4346_v38 = vsel %vm18508_vm7, %v4329_v4, %v18507_v3  ;;  %v15614_v30 = vsel %vm17753_vm0, %v10407_v33, %v18509_v23  ;;  %v2351_v48 = vsel %vm2348_vm6, %v15086_v61, %v18510_v50  ;;  %v15622_v21 = vsel %vm17753_vm0, %v15031_v0, %v18511_v24  ;;  %2655 = vrot.lane.b32.xlu1 %v15192_v51, %s10431_s0  ;;  %v18518_v33 = vld [vmem:[#allocation14_spill] sm:$0xff] }
 0x6ac   :  { %vm18513_vm15 = vcmask 343040   ;;  %v2354_v9 = vsel %vm2348_vm6, %v15102_v63, %v18514_v49  ;;  %v2367_v4 = vsel %vm2365_vm4, %v2350_v41, %v18515_v13  ;;  %vm18517_vm5 = vcmask 367616   ;;  %v18520_v49 = vld [vmem:[#allocation3_spill] sm:$0xff] }
 0x6ad   :  { %v4363_v54 = vsel %vm18513_vm15, %v4346_v38, %v18512_v18  ;;  %v5298_v3 = vor.u32 4788187, %v5297_v57  ;;  %v2369_v23 = vsel %vm2365_vm4, %v2352_v6, %v18518_v33  ;;  %v18519_v38 = vld [vmem:[#allocation2_spill] sm:$0xff]  ;;  %v5209_v18 = vand.u32 3, %v5208_v16  ;;  %v15645_v57 = vpop.permute.xlu1 %2459  ;;  %v18522_v33 = vld [vmem:[#allocation147_spill] sm:$0xff] }
 0x6ae   :  { %v4380_v61 = vsel %vm18517_vm5, %v4363_v54, %v18516_v52  ;;  %v2366_v50 = vsel %vm2365_vm4, %v2349_v8, %v18519_v38  ;;  %v5305_v63 = vsub.s32 4, %v15480_v35  ;;  %v2368_v41 = vsel %vm2365_vm4, %v2351_v48, %v18520_v49  ;;  %v18524_v38 = vld [vmem:[#allocation16_spill] sm:$0xff] }
 0x6af   :  { %4421 = vrot.lane.b32.xlu0 %v4380_v61, %s10445_s30  ;;  %v5299_v13 = vand.u32 2147483647, %v5298_v3  ;;  %v5301_v54 = vcvt.s32.f32 %v5294_v29  ;;  %v6866_v52 = vand.u32 3, %v5204_v2  ;;  %v2353_v6 = vsel %vm2348_vm6, %v15113_v12, %v18521_v11  ;;  %v18523_v61 = vld [vmem:[#allocation152_spill] sm:$0xff]  ;;  %v15660_v29 = vpop.permute.xlu0 %2833  ;;  %v18526_v2 = vld [vmem:[#allocation153_spill] sm:$0xff]  ;;  %2843 = vrot.lane.b32.xlu1 %v15574_v32, %s10425_s20 }
 0x6b0   :  { %v2356_v8 = vsel %vm2348_vm6, %v15126_v7, %v18522_v33  ;;  %v2355_v16 = vsel %vm2348_vm6, %v15143_v58, %v18523_v61  ;;  %v15658_v48 = vsel %vm2365_vm4, %v2354_v9, %v18524_v38  ;;  %18525 = vst [vmem:[#allocation255_spill] sm:$0xff] %v15660_v29  ;;  %v10247_v3 = vpop.eup %10246  ;;  %v2358_v49 = vsel %vm2348_vm6, %v15152_v14, %v18526_v2  ;;  %v18537_v9 = vld [vmem:[#allocation18_spill] sm:$0xff] }
 0x6b1   :  { %vm2382_vm13 = vcmask 80896   ;;  %vm5221_vm14 = vcmp.lt.s32.totalorder %v15119_v26, 0  ;;  %v5302_v12 = vmul.f32 %v5301_v54, %v5299_v13  ;;  %v10249_v7 = vpop.eup %10248  ;;  %vm5210_vm11 = vcmp.lt.s32.totalorder %v5209_v18, 2  ;;  %v15679_v54 = vpop.permute.xlu1 %2647 }
 0x6b2   :  { %v5215_v58 = vxor.u32 2147483648, %v10247_v3  ;;  %v18527_v11 = vand.u32 2147483647, %v15119_v26  ;;  %v5306_v14 = vsel %vm5221_vm14, %v5305_v63, %v15480_v35  ;;  %v5212_v33 = vxor.u32 2147483648, %v10249_v7 }
 0x6b3   :  { %2701 = vrot.lane.b32.xlu0 %v15031_v0, %s10432_s17  ;;  %v5303_v13 = vxor.u32 2147483648, %v5302_v12  ;;  %vm5214_vm15 = vcmp.eq.s32.totalorder %v5209_v18, 2  ;;  %vm6871_vm5 = vcmp.eq.s32.totalorder %v6866_v52, 2  ;;  %vm5211_vm10 = vcmp.eq.s32.totalorder %v5209_v18, 0  ;;  %v15681_v38 = vpop.permute.xlu0 %2505  ;;  %3047 = vrot.lane.b32.xlu1 %v18445_v53, %s10426_s19  ;;  %v18531_v18 = vld [vmem:[#allocation218_spill] sm:$0xff] }
 0x6b4   :  { %vm15672_vm7 = vcmp.le.f32.partialorder %v18527_v11, 0.7853982  ;;  %v5216_v61 = vsel %vm5214_vm15, %v5215_v58, %v10249_v7  ;;  %vm6868_vm9 = vcmp.eq.s32.totalorder %v6866_v52, 0  ;;  %v6873_v2 = vsel %vm6871_vm5, %v5215_v58, %v10249_v7 }
 0x6b5   :  { %v5304_v11 = vsel %vm5221_vm14, %v5303_v13, %v5302_v12  ;;  %v5213_v29 = vsel %vm5211_vm10, %v10247_v3, %v5212_v33  ;;  %vm6867_vm8 = vcmp.lt.s32.totalorder %v6866_v52, 2  ;;  %v6870_v35 = vsel %vm6868_vm9, %v10247_v3, %v5212_v33  ;;  %v18530_v12 = vld [vmem:[#allocation217_spill] sm:$0xff]  ;;  %v2836_v52 = vpop.permute.xlu1 %2835  ;;  %v18532_v3 = vld [vmem:[#allocation219_spill] sm:$0xff] }
 0x6b6   :  { %vm17756_vm0 = vweird.f32 %v15052_v42  ;;  %v5217_v63 = vsel %vm5210_vm11, %v5213_v29, %v5216_v61  ;;  %v5307_v7 = vsel %vm15672_vm7, %v15119_v26, %v5304_v11  ;;  %v15694_v58 = vsel %vm6867_vm8, %v6870_v35, %v6873_v2  ;;  %v18534_v35 = vld [vmem:[#allocation155_spill] sm:$0xff]  ;;  %v18546_v42 = vld [vmem:[#allocation24_spill] sm:$0xff] }
 0x6b7   :  { %2905 = vrot.lane.b32.xlu0 %v18486_v45, %s10425_s20  ;;  %vm2399_vm14 = vcmask 105472   ;;  %v2384_v13 = vsel %vm2382_vm13, %v2367_v4, %v18530_v12  ;;  %v5218_v53 = vsel %vm17756_vm0, nan, %v5217_v63  ;;  %10250 = vcosq.f32 %v5307_v7  ;;  %v2694_v61 = vpop.permute.xlu0 %2693  ;;  %v18533_v4 = vld [vmem:[#allocation154_spill] sm:$0xff]  ;;  %2703 = vrot.lane.b32.xlu1 %v15192_v51, %s10432_s17 }
 0x6b8   :  { %v2386_v29 = vsel %vm2382_vm13, %v2369_v23, %v18531_v18  ;;  %v2383_v33 = vsel %vm2382_vm13, %v2366_v50, %v18532_v3  ;;  %9587 = vmatprep.mubr.msk.f32.mxu0 %vm7818_vm12, %v5218_v53  ;;  %v15707_v2 = vsel %vm15672_vm7, 0, %v5306_v14  ;;  %10252 = vsinq.f32 %v5307_v7  ;;  %v18535_v23 = vld [vmem:[#allocation220_spill] sm:$0xff]  ;;  %v18536_v50 = vld [vmem:[#allocation6_spill] sm:$0xff]  ;;  %v18538_v7 = vld [vmem:[#allocation9_spill] sm:$0xff] }
 0x6b9   :  { %v2357_v11 = vsel %vm2348_vm6, %v15157_v20, %v18533_v4  ;;  %v2360_v63 = vsel %vm2348_vm6, %v15281_v1, %v18534_v35  ;;  %v2385_v12 = vsel %vm2382_vm13, %v2368_v41, %v18535_v23  ;;  %v2370_v53 = vsel %vm2365_vm4, %v2353_v6, %v18536_v50  ;;  %v18539_v18 = vld [vmem:[#allocation20_spill] sm:$0xff]  ;;  %v18541_v3 = vld [vmem:[#allocation34_spill] sm:$0xff]  ;;  %v18543_v23 = vld [vmem:[#allocation21_spill] sm:$0xff]  ;;  %v15739_v50 = vpop.permute.xlu1 %2507 }
 0x6ba   :  { %vm2416_vm8 = vcmask 130048   ;;  %v2373_v14 = vsel %vm2365_vm4, %v2356_v8, %v18537_v9  ;;  %v15725_v20 = vsel %vm2365_vm4, %v2355_v16, %v18538_v7  ;;  %v15729_v1 = vsel %vm2365_vm4, %v2358_v49, %v18539_v18  ;;  %v18540_v41 = vld [vmem:[#allocation112_spill] sm:$0xff]  ;;  %v18542_v4 = vld [vmem:[#allocation38_spill] sm:$0xff]  ;;  %v18544_v9 = vld [vmem:[#allocation25_spill] sm:$0xff] }
 0x6bb   :  { %3093 = vrot.lane.b32.xlu0 %v18540_v41, %s18124_s9  ;;  %v2401_v6 = vsel %vm2399_vm14, %v2384_v13, %v18541_v3  ;;  %v2403_v35 = vsel %vm2399_vm14, %v2386_v29, %v18542_v4  ;;  %v2400_v8 = vsel %vm2399_vm14, %v2383_v33, %v18543_v23  ;;  %v5312_v16 = vadd.s32 3, %v15707_v2  ;;  %v18545_v7 = vld [vmem:[#allocation12_spill] sm:$0xff]  ;;  %v15755_v33 = vpop.permute.xlu0 %2897  ;;  %v18549_v23 = vld [vmem:[#allocation221_spill] sm:$0xff]  ;;  %2907 = vrot.lane.b32.xlu1 %v18469_v47, %s10425_s20 }
 0x6bc   :  { %v2402_v49 = vsel %vm2399_vm14, %v2385_v12, %v18544_v9  ;;  %v15746_v18 = vsel %vm2365_vm4, %v2357_v11, %v18545_v7  ;;  %v15750_v13 = vsel %vm2365_vm4, %v2360_v63, %v18546_v42  ;;  %v3195_v29 = vsel %vm3185_vm1, %v15614_v30, %v15286_v43  ;;  %v18547_v3 = vld [vmem:[#allocation156_spill] sm:$0xff]  ;;  %v18548_v12 = vld [vmem:[#allocation158_spill] sm:$0xff] }
 0x6bd   :  { %v15760_v4 = vsel %vm2348_vm6, %v15453_v28, %v18547_v3  ;;  %v15765_v11 = vsel %vm2348_vm6, %v15518_v46, %v18548_v12  ;;  %v2388_v42 = vsel %vm2382_vm13, %v15658_v48, %v18549_v23  ;;  %v3212_v63 = vsel %vm3202_vm2, %v3195_v29, %v15318_v25  ;;  %v18550_v43 = vld [vmem:[#allocation52_spill] sm:$0xff]  ;;  %v18552_v48 = vld [vmem:[#allocation54_spill] sm:$0xff]  ;;  %v18555_v3 = vld [vmem:[#allocation51_spill] sm:$0xff] }
 0x6be   :  { %v15776_v30 = vsel %vm2416_vm8, %v2401_v6, %v18550_v43  ;;  %v3229_v28 = vsel %vm3219_vm3, %v3212_v63, %v15374_v17  ;;  %v18551_v9 = vld [vmem:[#allocation48_spill] sm:$0xff]  ;;  %v15788_v25 = vsel %vm2416_vm8, %v2403_v35, %v18552_v48  ;;  %vm18553_vm9 = vcmask 23552   ;;  %v15795_v17 = vpop.permute.xlu1 %2695  ;;  %v18556_v12 = vld [vmem:[#allocation42_spill] sm:$0xff]  ;;  %v18557_v35 = vld [vmem:[#allocation229_spill] sm:$0xff] }
 0x6bf   :  { %v15782_v46 = vsel %vm2416_vm8, %v2400_v8, %v18551_v9  ;;  %2749 = vrot.lane.b32.xlu0 %v15031_v0, %s18110_s22  ;;  %v3179_v7 = vsel %vm18553_vm9, %v15448_v22, %v15339_v55  ;;  %vm18554_vm10 = vcmask 121856   ;;  %v5313_v29 = vand.u32 3, %v5312_v16  ;;  %v18560_v43 = vld [vmem:[#allocation100_spill] sm:$0xff]  ;;  %vm18561_vm7 = vmmov %vm18553_vm9  ;;  %v18564_v9 = vld [vmem:[#allocation78_spill] sm:$0xff] }
 0x6c0   :  { %v3246_v6 = vsel %vm18554_vm10, %v3229_v28, %v15465_v19  ;;  %v15799_v8 = vsel %vm2416_vm8, %v2402_v49, %v18555_v3  ;;  %v15803_v0 = vsel %vm2399_vm14, %v2388_v42, %v18556_v12  ;;  %v15807_v23 = vsel %vm2382_vm13, %v2373_v14, %v18557_v35  ;;  %v15813_v19 = vpop.permute.xlu0 %2553  ;;  %v18559_v49 = vld [vmem:[#allocation230_spill] sm:$0xff]  ;;  %v18563_v28 = vld [vmem:[#allocation107_spill] sm:$0xff]  ;;  %vm18566_vm9 = vmmov %vm18554_vm10 }
 0x6c1   :  { %v3196_v55 = vsel %vm3185_vm1, %v3179_v7, %v15410_v39  ;;  %vm18558_vm11 = vcmask 146432   ;;  %v15815_v16 = vpop.eup %10250  ;;  %v2387_v63 = vsel %vm2382_vm13, %v2370_v53, %v18559_v49  ;;  %v4153_v42 = vsel %vm18561_vm7, %v18540_v41, %v18560_v43  ;;  %3095 = vrot.lane.b32.xlu1 %v18563_v28, %s18124_s9 }
 0x6c2   :  { %v3263_v22 = vsel %vm18558_vm11, %v3246_v6, %v15524_v56  ;;  %v3213_v14 = vsel %vm3202_vm2, %v3196_v55, %v15482_v27  ;;  %vm18562_vm15 = vcmask 171008   ;;  %v15828_v56 = vpop.eup %10252  ;;  %v4169_v48 = vsel %vm3185_vm1, %v4153_v42, %v18564_v9  ;;  %v2900_v12 = vpop.permute.xlu1 %2899 }
 0x6c3   :  { %v3280_v39 = vsel %vm18562_vm15, %v3263_v22, %v15565_v36  ;;  %v3230_v53 = vsel %vm3219_vm3, %v3213_v14, %v15534_v62  ;;  %vm18565_vm5 = vcmask 195584   ;;  %v5319_v6 = vxor.u32 2147483648, %v15815_v16  ;;  %2953 = vrot.lane.b32.xlu0 %v18486_v45, %s18134_s21  ;;  %v18570_v22 = vld [vmem:[#allocation244_spill] sm:$0xff]  ;;  %v18574_v14 = vld [vmem:[#allocation250_spill] sm:$0xff] }
 0x6c4   :  { %v3297_v7 = vsel %vm18565_vm5, %v3280_v39, %v15607_v10  ;;  %v3247_v27 = vsel %vm18566_vm9, %v3230_v53, %v15626_v5  ;;  %vm18567_vm10 = vcmask 220160   ;;  %v5316_v3 = vxor.u32 2147483648, %v15828_v56  ;;  %v2742_v55 = vpop.permute.xlu0 %2741 }
 0x6c5   :  { %v3314_v36 = vsel %vm18567_vm10, %v3297_v7, %v2836_v52  ;;  %vm5318_vm11 = vcmp.eq.s32.totalorder %v5313_v29, 2  ;;  %vm18568_vm7 = vcmask 146432   ;;  %vm5315_vm15 = vcmp.eq.s32.totalorder %v5313_v29, 0  ;;  %2751 = vrot.lane.b32.xlu1 %v15192_v51, %s18110_s22 }
 0x6c6   :  { %v3264_v35 = vsel %vm18568_vm7, %v3247_v27, %v2694_v61  ;;  %v5320_v62 = vsel %vm5318_vm11, %v5319_v6, %v15828_v56  ;;  %vm18569_vm5 = vcmask 244736   ;;  %v4185_v5 = vsel %vm3202_vm2, %v4169_v48, %v18570_v22  ;;  %v10408_v61 = vld [vmem:[%s17758_s23 + $0x58] sm:$0xff]  ;;  %v2556_v53 = vpop.permute.xlu1 %2555 }
 0x6c7   :  { %v15848_v10 = vsel %vm18569_vm5, %v3314_v36, %v2900_v12  ;;  %vm5314_vm9 = vcmp.lt.s32.totalorder %v5313_v29, 2  ;;  %v5317_v52 = vsel %vm5315_vm15, %v15815_v16, %v5316_v3  ;;  %vm18571_vm10 = vcmask 171008   ;;  %3141 = vrot.lane.b32.xlu0 %v18540_v41, %s10444_s2  ;;  %v18575_v41 = vld [vmem:[#allocation29_spill] sm:$0xff] }
 0x6c8   :  { %v15856_v49 = vsel %vm18571_vm10, %v3264_v35, %v2742_v55  ;;  %vm18572_vm11 = vcmask 23552   ;;  %vm17755_vm5 = vweird.f32 %v15119_v26  ;;  %v5321_v42 = vsel %vm5314_vm9, %v5317_v52, %v5320_v62  ;;  %v18576_v27 = vld [vmem:[#allocation133_spill] sm:$0xff]  ;;  %v15895_v12 = vpop.permute.xlu0 %2945  ;;  %v18578_v35 = vld [vmem:[#allocation234_spill] sm:$0xff]  ;;  %v18579_v55 = vld [vmem:[#allocation68_spill] sm:$0xff] }
 0x6c9   :  { %v3180_v43 = vsel %vm18572_vm11, %v10408_v61, %v15424_v60  ;;  %vm18573_vm7 = vmmov %vm18572_vm11  ;;  %v4201_v39 = vsel %vm3219_vm3, %v4185_v5, %v18574_v14  ;;  %v5322_v60 = vsel %vm17755_vm5, nan, %v5321_v42  ;;  %v2404_v7 = vsel %vm2399_vm14, %v2387_v63, %v18575_v41  ;;  %2955 = vrot.lane.b32.xlu1 %v18469_v47, %s18134_s21  ;;  %v18584_v61 = vld [vmem:[#allocation103_spill] sm:$0xff]  ;;  %v8209_v14 = vld [vmem:[%s17593_s10 + $0x20] sm:$0xff] }
 0x6ca   :  { %v3182_v29 = vsel %vm18573_vm7, %v15574_v32, %v15645_v57  ;;  %v3197_v9 = vsel %vm3185_vm1, %v3180_v43, %v15489_v37  ;;  %v8207_v32 = vld [vmem:[%s17593_s10 + $0x10] sm:$0xff]  ;;  %v8208_v57 = vld [vmem:[%s17593_s10 + $0x18] sm:$0xff]  ;;  %vm18577_vm15 = vcmask 121856   ;;  %9588 = vmatmul.mubr.msk.f32.gmra.mrb[22].mxu0 %vm7818_vm12, %v5322_v60  ;;  %v2389_v62 = vsel %vm2382_vm13, %v15725_v20, %v18578_v35  ;;  %v18590_v60 = vld [vmem:[#allocation143_spill] sm:$0xff] }
 0x6cb   :  { %v3199_v48 = vsel %vm3185_vm1, %v3182_v29, %v15739_v50  ;;  %v4217_v37 = vsel %vm18577_vm15, %v4201_v39, %v18576_v27  ;;  %v3214_v50 = vsel %vm3202_vm2, %v3197_v9, %v15538_v34  ;;  %vm18580_vm9 = vcmask 146432   ;;  %v18582_v34 = vld [vmem:[#allocation65_spill] sm:$0xff]  ;;  %v18586_v29 = vld [vmem:[#allocation91_spill] sm:$0xff]  ;;  %v18589_v9 = vld [vmem:[#allocation242_spill] sm:$0xff] }
 0x6cc   :  { %v15893_v36 = vsel %vm3202_vm2, %v3199_v48, %v2556_v53  ;;  %v4233_v63 = vsel %vm18580_vm9, %v4217_v37, %v18579_v55  ;;  %v3231_v22 = vsel %vm3219_vm3, %v3214_v50, %v15579_v15  ;;  %vm18581_vm10 = vcmask 261120   ;;  %v15918_v15 = vld [vmem:[%s17758_s23 + $0x70] sm:$0xff]  ;;  %vm18585_vm9 = vmmov %vm18573_vm7  ;;  %v8210_v39 = vld [vmem:[%s17593_s10 + $0x28] sm:$0xff] }
 0x6cd   :  { %9610 = vmatprep.mubr.msk.f32.mxu0 %vm18581_vm10, %v15782_v46  ;;  %vm18583_vm11 = vcmask 171008   ;;  %v3181_v52 = vsel %vm18573_vm7, %v15513_v40, %v15583_v59  ;;  %v3248_v20 = vsel %vm18577_vm15, %v3231_v22, %v15679_v54  ;;  %2797 = vrot.lane.b32.xlu0 %v15918_v15, %s10428_s28  ;;  %v9856_v46 = vpack.c.bf16 %v8208_v57, %v8207_v32  ;;  %v2744_v54 = vpop.permute.xlu1 %2743  ;;  %v2602_v32 = vpop.permute.xlu0 %2601  ;;  %v18594_v57 = vld [vmem:[#allocation251_spill] sm:$0xff]  ;;  %v18595_v27 = vld [vmem:[#allocation232_spill] sm:$0xff]  ;;  %v18598_v50 = vld [vmem:[#allocation258_spill] sm:$0xff] }
 0x6ce   :  { %v4249_v5 = vsel %vm18583_vm11, %v4233_v63, %v18582_v34  ;;  %v4154_v43 = vsel %vm18585_vm9, %v18563_v28, %v18584_v61  ;;  %vm18587_vm10 = vcmask 195584   ;;  %v3198_v40 = vsel %vm3185_vm1, %v3181_v52, %v15681_v38  ;;  %v18599_v35 = vld [vmem:[#allocation127_spill] sm:$0xff]  ;;  %v18600_v55 = vld [vmem:[#allocation170_spill] sm:$0xff]  ;;  %3143 = vrot.lane.b32.xlu1 %v18563_v28, %s10444_s2  ;;  %v8211_v28 = vld [vmem:[%s17593_s10 + $0x30] sm:$0xff] }
 0x6cf   :  { %v4265_v42 = vsel %vm18587_vm10, %v4249_v5, %v18586_v29  ;;  %vm18588_vm11 = vcmask 146432   ;;  %v4170_v48 = vsel %vm3185_vm1, %v4154_v43, %v18589_v9  ;;  %vm18591_vm7 = vcmask 220160   ;;  %v18602_v34 = vld [vmem:[#allocation31_spill] sm:$0xff]  ;;  %v18607_v43 = vld [vmem:[#allocation53_spill] sm:$0xff] }
 0x6d0   :  { %v3265_v59 = vsel %vm18588_vm11, %v3248_v20, %v15795_v17  ;;  %v4281_v53 = vsel %vm18591_vm7, %v4265_v42, %v18590_v60  ;;  %vm18592_vm15 = vcmask 261120   ;;  %v3215_v38 = vsel %vm3202_vm2, %v3198_v40, %v15813_v19  ;;  %v18605_v20 = vld [vmem:[#allocation192_spill] sm:$0xff]  ;;  %v18608_v40 = vld [vmem:[#allocation235_spill] sm:$0xff] }
 0x6d1   :  { %9611 = vmatmul.mubr.msk.f32.vlgmr.msra.gmra.mrb[16].mxu0 %vm18592_vm15, %v15776_v30  ;;  %vm18593_vm9 = vcmask 171008   ;;  %v4186_v41 = vsel %vm3202_vm2, %v4170_v48, %v18594_v57  ;;  %vm18596_vm10 = vcmask 244736   ;;  %vm18597_vm11 = vmmov %vm18592_vm15  ;;  %v15956_v30 = vsel %vm3219_vm3, %v3215_v38, %v2602_v32  ;;  %3001 = vrot.lane.b32.xlu0 %v18486_v45, %s10442_s26  ;;  %v2948_v42 = vpop.permute.xlu1 %2947  ;;  %v2790_v48 = vpop.permute.xlu0 %2789  ;;  %v18615_v60 = vld [vmem:[#allocation259_spill] sm:$0xff]  ;;  %v18617_v38 = vld [vmem:[#allocation165_spill] sm:$0xff] }
 0x6d2   :  { %v15946_v17 = vsel %vm18593_vm9, %v3265_v59, %v2744_v54  ;;  %v4297_v37 = vsel %vm18596_vm10, %v4281_v53, %v18595_v27  ;;  %9613 = vmatprep.mubr.msk.f32.mxu0 %vm18597_vm11, %v15799_v8  ;;  %9855 = vmatpush3.bf16.msra.mxu0 %v18598_v50  ;;  %v4202_v19 = vsel %vm3219_vm3, %v4186_v41, %v18599_v35  ;;  %vm18601_vm7 = vcmask 269312   ;;  %v18603_v8 = vld [vmem:[#allocation123_spill] sm:$0xff]  ;;  %v18609_v54 = vld [vmem:[#allocation118_spill] sm:$0xff]  ;;  %v18623_v41 = vld [vmem:[#allocation204_spill] sm:$0xff] }
 0x6d3   :  { %v4313_v63 = vsel %vm18601_vm7, %v4297_v37, %v18600_v55  ;;  %9857 = vmatprep.subr.bf16.mxu0 %v9856_v46  ;;  %v9860_v22 = vpack.c.bf16 %v8210_v39, %v8209_v14  ;;  %v2406_v5 = vsel %vm2399_vm14, %v2389_v62, %v18602_v34  ;;  %vm18604_vm15 = vcmask 121856   ;;  %v8212_v62 = vld [vmem:[%s17593_s10 + $0x38] sm:$0xff]  ;;  %v18621_v57 = vld [vmem:[#allocation146_spill] sm:$0xff]  ;;  %2799 = vrot.lane.b32.xlu1 %v15192_v51, %s10428_s28 }
 0x6d4   :  { %v4218_v52 = vsel %vm18604_vm15, %v4202_v19, %v18603_v8  ;;  %vm18606_vm9 = vcmask 293888   ;;  %v2421_v29 = vsel %vm2416_vm8, %v2404_v7, %v18607_v43  ;;  %v2391_v59 = vsel %vm2382_vm13, %v15746_v18, %v18608_v40  ;;  %v18611_v7 = vld [vmem:[#allocation94_spill] sm:$0xff]  ;;  %v18625_v37 = vld [vmem:[#allocation157_spill] sm:$0xff]  ;;  %v18628_v19 = vld [vmem:[#allocation136_spill] sm:$0xff] }
 0x6d5   :  { %v4330_v61 = vsel %vm18606_vm9, %v4313_v63, %v18605_v20  ;;  %vm18610_vm10 = vcmask 146432   ;;  %vm18612_vm11 = vcmask 318464   ;;  %vm18613_vm7 = vcmask 261120   ;;  %v18626_v50 = vld [vmem:[#allocation238_spill] sm:$0xff]  ;;  %v18630_v63 = vld [vmem:[#allocation55_spill] sm:$0xff]  ;;  %v16020_v51 = vpop.permute.xlu1 %2461  ;;  %v18633_v43 = vld [vmem:[#allocation140_spill] sm:$0xff] }
 0x6d6   :  { %v4234_v14 = vsel %vm18610_vm10, %v4218_v52, %v18609_v54  ;;  %v4347_v39 = vsel %vm18612_vm11, %v4330_v61, %v18611_v7  ;;  %9614 = vmatmul.mubr.msk.f32.gmra.mrb[18].mxu0 %vm18613_vm7, %v15788_v25  ;;  %vm18614_vm15 = vcmask 252928   ;;  %vm18616_vm9 = vcmask 171008   ;;  %vm18619_vm0 = vmmov %vm18613_vm7  ;;  %v8213_v8 = vld [vmem:[%s17593_s10 + $0x40] sm:$0xff]  ;;  %v8214_v52 = vld [vmem:[%s17593_s10 + $0x48] sm:$0xff] }
 0x6d7   :  { %v15991_v9 = vsel %vm18614_vm15, %v15848_v10, %v2948_v42  ;;  %v4250_v53 = vsel %vm18616_vm9, %v4234_v14, %v18615_v60  ;;  %vm18618_vm5 = vcmask 343040   ;;  %9616 = vmatprep.mubr.msk.f32.mxu0 %vm18619_vm0, %v2421_v29  ;;  %9859 = vmatpush3.bf16.msra.mxu0 %v9856_v46  ;;  %vm18620_vm10 = vcmask 195584   ;;  %v18627_v46 = vld [vmem:[#allocation15_spill] sm:$0xff]  ;;  %v18632_v61 = vld [vmem:[#allocation110_spill] sm:$0xff]  ;;  %v18636_v42 = vld [vmem:[#allocation56_spill] sm:$0xff] }
 0x6d8   :  { %v4364_v18 = vsel %vm18618_vm5, %v4347_v39, %v18617_v38  ;;  %v16000_v32 = vsel %vm18620_vm10, %v15856_v49, %v2790_v48  ;;  %vm18622_vm11 = vmmov %vm18620_vm10  ;;  %vm18624_vm7 = vcmask 367616   ;;  %9861 = vmatprep.subr.bf16.mxu0 %v9860_v22  ;;  %v9864_v27 = vpack.c.bf16 %v8212_v62, %v8211_v28  ;;  %v16039_v62 = vpop.permute.xlu0 %2993  ;;  %v18637_v40 = vld [vmem:[#allocation35_spill] sm:$0xff]  ;;  %v18638_v14 = vld [vmem:[#allocation17_spill] sm:$0xff]  ;;  %3003 = vrot.lane.b32.xlu1 %v18469_v47, %s10442_s26 }
 0x6d9   :  { %v4266_v25 = vsel %vm18622_vm11, %v4250_v53, %v18621_v57  ;;  %v4381_v10 = vsel %vm18624_vm7, %v4364_v18, %v18623_v41  ;;  %v2362_v35 = vsel %vm2348_vm6, %v18626_v50, %v18625_v37  ;;  %v2376_v49 = vsel %vm2365_vm4, %v15760_v4, %v18627_v46  ;;  %v18631_v4 = vld [vmem:[#allocation44_spill] sm:$0xff]  ;;  %v18643_v60 = vld [vmem:[#allocation101_spill] sm:$0xff]  ;;  %v18647_v57 = vld [vmem:[#allocation67_spill] sm:$0xff] }
 0x6da   :  { %vm18629_vm0 = vcmask 220160   ;;  %v2422_v34 = vsel %vm2416_vm8, %v15803_v0, %v18630_v63  ;;  %4423 = vrot.lane.b32.xlu0 %v4381_v10, %s10445_s30  ;;  %v2407_v20 = vsel %vm2399_vm14, %v15807_v23, %v18631_v4  ;;  %v2392_v0 = vsel %vm2382_vm13, %v15729_v1, %v18632_v61  ;;  %v18639_v7 = vld [vmem:[#allocation224_spill] sm:$0xff]  ;;  %v18646_v38 = vld [vmem:[#allocation45_spill] sm:$0xff]  ;;  %v2650_v10 = vpop.permute.xlu1 %2649  ;;  %v18650_v37 = vld [vmem:[#allocation74_spill] sm:$0xff] }
 0x6db   :  { %v4282_v55 = vsel %vm18629_vm0, %v4266_v25, %v18628_v19  ;;  %vm18634_vm5 = vcmask 244736   ;;  %vm18635_vm15 = vcmask 261120   ;;  %v2423_v28 = vsel %vm2416_vm8, %v2406_v5, %v18636_v42  ;;  %9863 = vmatpush3.bf16.msra.mxu0 %v9860_v22  ;;  %v18642_v39 = vld [vmem:[#allocation236_spill] sm:$0xff]  ;;  %v18649_v25 = vld [vmem:[#allocation57_spill] sm:$0xff]  ;;  %v18651_v46 = vld [vmem:[#allocation194_spill] sm:$0xff] }
 0x6dc   :  { %v4298_v29 = vsel %vm18634_vm5, %v4282_v55, %v18633_v43  ;;  %9617 = vmatmul.mubr.msk.f32.gmra.mrb[20].mxu0 %vm18635_vm15, %v2422_v34  ;;  %v2408_v54 = vsel %vm2399_vm14, %v2391_v59, %v18637_v40  ;;  %v2378_v23 = vsel %vm2365_vm4, %v15765_v11, %v18638_v14  ;;  %vm18640_vm9 = vcmask 269312   ;;  %vm18641_vm10 = vmmov %vm18635_vm15  ;;  %9865 = vmatprep.subr.bf16.mxu0 %v9864_v27  ;;  %v18645_v53 = vld [vmem:[#allocation160_spill] sm:$0xff]  ;;  %v2604_v63 = vpop.permute.xlu0 %2603  ;;  %v18656_v34 = vld [vmem:[#allocation39_spill] sm:$0xff] }
 0x6dd   :  { %v4314_v1 = vsel %vm18640_vm9, %v4298_v29, %v18639_v7  ;;  %9619 = vmatprep.mubr.msk.f32.mxu0 %vm18641_vm10, %v2423_v28  ;;  %v2393_v48 = vsel %vm2382_vm13, %v2376_v49, %v18642_v39  ;;  %vm18644_vm11 = vcmask 293888   ;;  %v9868_v59 = vpack.c.bf16 %v8214_v52, %v8213_v8  ;;  %vm18653_vm5 = vmmov %vm18641_vm10  ;;  %v18654_v49 = vld [vmem:[#allocation58_spill] sm:$0xff]  ;;  %v18657_v52 = vld [vmem:[#allocation184_spill] sm:$0xff] }
 0x6de   :  { %v4331_v5 = vsel %vm18644_vm11, %v4314_v1, %v18643_v60  ;;  %v2363_v11 = vsel %vm2348_vm6, %v15622_v21, %v18645_v53  ;;  %v2409_v18 = vsel %vm2399_vm14, %v2392_v0, %v18646_v38  ;;  %vm18648_vm7 = vcmask 318464   ;;  %2845 = vrot.lane.b32.xlu0 %v15918_v15, %s10425_s20  ;;  %vm18659_vm10 = vmmov %vm18653_vm5  ;;  %v18662_v0 = vld [vmem:[#allocation81_spill] sm:$0xff]  ;;  %v18665_v28 = vld [vmem:[#allocation59_spill] sm:$0xff] }
 0x6df   :  { %v4348_v22 = vsel %vm18648_vm7, %v4331_v5, %v18647_v57  ;;  %v2424_v41 = vsel %vm2416_vm8, %v2407_v20, %v18649_v25  ;;  %v2394_v50 = vsel %vm2382_vm13, %v15750_v13, %v18650_v37  ;;  %vm18652_vm0 = vcmask 343040   ;;  %9867 = vmatpush3.bf16.msra.mxu0 %v9864_v27  ;;  %v16090_v20 = vld [vmem:[%s17758_s23 + $0x78] sm:$0xff]  ;;  %v18663_v27 = vld [vmem:[#allocation159_spill] sm:$0xff]  ;;  %v8215_v14 = vld [vmem:[%s17593_s10 + $0x50] sm:$0xff] }
 0x6e0   :  { %v4365_v21 = vsel %vm18652_vm0, %v4348_v22, %v18651_v46  ;;  %9620 = vmatmul.mubr.msk.f32.gmra.mrb[22].mxu0 %vm18653_vm5, %v2424_v41  ;;  %v2425_v19 = vsel %vm2416_vm8, %v2408_v54, %v18654_v49  ;;  %vm18655_vm15 = vcmask 121856   ;;  %v2410_v8 = vsel %vm2399_vm14, %v2393_v48, %v18656_v34  ;;  %9869 = vmatprep.subr.bf16.mxu0 %v9868_v59  ;;  %v2838_v54 = vpop.permute.xlu1 %2837  ;;  %v18667_v1 = vld [vmem:[#allocation19_spill] sm:$0xff]  ;;  %vm18673_vm0 = vmmov %vm18653_vm5  ;;  %v18675_v57 = vld [vmem:[#allocation237_spill] sm:$0xff] }
 0x6e1   :  { %v16076_v55 = vsel %vm18655_vm15, %v15956_v30, %v2650_v10  ;;  %vm18658_vm9 = vcmask 367616   ;;  %9622 = vmatprep.mubr.msk.f32.mxu0 %vm18659_vm10, %v2425_v19  ;;  %v16085_v13 = vsel %vm3219_vm3, %v15893_v36, %v2604_v63  ;;  %v18660_v30 = vld [vmem:[#allocation40_spill] sm:$0xff]  ;;  %vm18661_vm11 = vcmask 23552   ;;  %v18664_v36 = vld [vmem:[#allocation27_spill] sm:$0xff]  ;;  %v18677_v10 = vld [vmem:[#allocation49_spill] sm:$0xff] }
 0x6e2   :  { %v4382_v4 = vsel %vm18658_vm9, %v4365_v21, %v18657_v52  ;;  %v2347_v61 = vsel %vm18661_vm11, %v16090_v20, %v18660_v30  ;;  %v2395_v43 = vsel %vm2382_vm13, %v2378_v23, %v18662_v0  ;;  %v2379_v42 = vsel %vm2365_vm4, %v2362_v35, %v18664_v36  ;;  %3049 = vrot.lane.b32.xlu0 %v18486_v45, %s10426_s19  ;;  %v18666_v23 = vld [vmem:[#allocation47_spill] sm:$0xff]  ;;  %v18669_v35 = vld [vmem:[#allocation61_spill] sm:$0xff]  ;;  %v2792_v45 = vpop.permute.xlu0 %2791  ;;  %v18678_v37 = vld [vmem:[#allocation30_spill] sm:$0xff] }
 0x6e3   :  { %4425 = vrot.lane.b32.xlu1 %v4382_v4, %s10445_s30  ;;  %v2364_v29 = vsel %vm2348_vm6, %v2347_v61, %v18663_v27  ;;  %v2426_v40 = vsel %vm2416_vm8, %v2409_v18, %v18665_v28  ;;  %v2411_v7 = vsel %vm2399_vm14, %v2394_v50, %v18666_v23  ;;  %v2380_v39 = vsel %vm2365_vm4, %v2363_v11, %v18667_v1  ;;  %vm18668_vm6 = vmmov %vm18653_vm5  ;;  %v18671_v5 = vld [vmem:[#allocation79_spill] sm:$0xff]  ;;  %v18682_v63 = vld [vmem:[#allocation46_spill] sm:$0xff] }
 0x6e4   :  { %9623 = vmatmul.mubr.msk.f32.gmra.mrb[24].mxu0 %vm18668_vm6, %v2426_v40  ;;  %v2427_v48 = vsel %vm2416_vm8, %v2410_v8, %v18669_v35  ;;  %vm18670_vm7 = vcmask 220160   ;;  %v2396_v53 = vsel %vm2382_vm13, %v2379_v42, %v18671_v5  ;;  %v18672_v38 = vld [vmem:[#allocation43_spill] sm:$0xff]  ;;  %vm18674_vm5 = vcmask 195584   ;;  %v16133_v41 = vpop.permute.xlu1 %3041  ;;  %vm18679_vm15 = vmmov %vm18673_vm0  ;;  %v18685_v52 = vld [vmem:[#allocation129_spill] sm:$0xff] }
 0x6e5   :  { %v3315_v60 = vsel %vm18670_vm7, %v16000_v32, %v2838_v54  ;;  %v2412_v18 = vsel %vm2399_vm14, %v2395_v43, %v18672_v38  ;;  %9625 = vmatprep.mubr.msk.f32.mxu0 %vm18673_vm0, %v2427_v48  ;;  %9871 = vmatpush3.bf16.msra.mxu0 %v9868_v59  ;;  %v3299_v11 = vsel %vm18674_vm5, %v15946_v17, %v2792_v45  ;;  %v18676_v32 = vld [vmem:[#allocation60_spill] sm:$0xff]  ;;  %v18680_v50 = vld [vmem:[#allocation63_spill] sm:$0xff]  ;;  %vm18683_vm9 = vmmov %vm18673_vm0  ;;  %vm18700_vm6 = vcmask 146432  }
 0x6e6   :  { %v2397_v22 = vsel %vm2382_vm13, %v2380_v39, %v18675_v57  ;;  %9654 = vmatprep.subr.mxu0 %v8215_v14  ;;  %v2428_v25 = vsel %vm2416_vm8, %v2411_v7, %v18676_v32  ;;  %2847 = vrot.lane.b32.xlu0 %v16090_v20, %s10425_s20  ;;  %v2413_v59 = vsel %vm2399_vm14, %v2396_v53, %v18677_v10  ;;  %v16142_v21 = vpop.permute.xlu0 %2995  ;;  %v18681_v49 = vld [vmem:[#allocation83_spill] sm:$0xff]  ;;  %v18688_v0 = vld [vmem:[#allocation62_spill] sm:$0xff]  ;;  %v18690_v42 = vld [vmem:[#allocation84_spill] sm:$0xff]  ;;  %vm18704_vm5 = vcmask 171008  }
 0x6e7   :  { %2909 = vrot.lane.b32.xlu1 %v18511_v24, %s10425_s20  ;;  %v2381_v17 = vsel %vm2365_vm4, %v2364_v29, %v18678_v37  ;;  %v2429_v46 = vsel %vm2416_vm8, %v2412_v18, %v18680_v50  ;;  %v2414_v34 = vsel %vm2399_vm14, %v2397_v22, %v18682_v63  ;;  %v18684_v8 = vld [vmem:[#allocation119_spill] sm:$0xff]  ;;  %vm18686_vm4 = vmmov %vm18661_vm11  ;;  %v2430_v43 = vsel %vm2416_vm8, %v2413_v59, %v18688_v0  ;;  %v18689_v29 = vld [vmem:[#allocation50_spill] sm:$0xff] }
 0x6e8   :  { %9626 = vmatmul.mubr.msk.f32.gmra.mrb[26].mxu0 %vm18679_vm15, %v2428_v25  ;;  %v2398_v19 = vsel %vm2382_vm13, %v2381_v17, %v18681_v49  ;;  %v4155_v4 = vsel %vm18686_vm4, %v18684_v8, %v18685_v52  ;;  %vm18687_vm10 = vmmov %vm18686_vm4  ;;  %v2510_v27 = vpop.permute.xlu1 %2509  ;;  %v18692_v40 = vld [vmem:[#allocation66_spill] sm:$0xff]  ;;  %v18698_v35 = vld [vmem:[#allocation64_spill] sm:$0xff]  ;;  %vm18708_vm15 = vcmask 195584  }
 0x6e9   :  { %9628 = vmatprep.mubr.msk.f32.mxu0 %vm18683_vm9, %v2429_v46  ;;  %9655 = vmatpush3.msra.mxu0 %v8215_v14  ;;  %v3183_v61 = vsel %vm18687_vm10, %v15918_v15, %v16020_v51  ;;  %v2415_v36 = vsel %vm2399_vm14, %v2398_v19, %v18689_v29  ;;  %v4171_v28 = vsel %vm3185_vm1, %v4155_v4, %v18690_v42  ;;  %vm18691_vm13 = vmmov %vm18673_vm0  ;;  %v18693_v14 = vld [vmem:[#allocation120_spill] sm:$0xff]  ;;  %v18696_v1 = vld [vmem:[#allocation206_spill] sm:$0xff]  ;;  %vm18697_vm14 = vcmask 121856  }
 0x6ea   :  { %3051 = vrot.lane.b32.xlu0 %v18469_v47, %s10426_s19  ;;  %v2431_v54 = vsel %vm2416_vm8, %v2414_v34, %v18692_v40  ;;  %v3200_v15 = vsel %vm3185_vm1, %v3183_v61, %v2510_v27  ;;  %v2464_v51 = vpop.permute.xlu0 %2463  ;;  %v4187_v23 = vsel %vm3202_vm2, %v4171_v28, %v18693_v14  ;;  %vm18694_vm11 = vmmov %vm18673_vm0  ;;  %v18695_v47 = vld [vmem:[#allocation88_spill] sm:$0xff]  ;;  %v2432_v48 = vsel %vm2416_vm8, %v2415_v36, %v18698_v35  ;;  %v18699_v5 = vld [vmem:[#allocation177_spill] sm:$0xff] }
 0x6eb   :  { %3097 = vrot.lane.b32.xlu1 %v18684_v8, %s18124_s9  ;;  %v4203_v7 = vsel %vm3219_vm3, %v4187_v23, %v18695_v47  ;;  %vm18701_vm7 = vmmov %vm18673_vm0  ;;  %v18703_v57 = vld [vmem:[#allocation164_spill] sm:$0xff]  ;;  %v18705_v32 = vld [vmem:[#allocation163_spill] sm:$0xff]  ;;  %vm18716_vm10 = vcmask 244736   ;;  %v6969_v4 = vand.u32 3, %v15707_v2 }
 0x6ec   :  { %9629 = vmatmul.mubr.msk.f32.gmra.mrb[28].mxu0 %vm18691_vm13, %v2430_v43  ;;  %v4219_v39 = vsel %vm18697_vm14, %v4203_v7, %v18696_v1  ;;  %v2698_v45 = vpop.permute.xlu1 %2697  ;;  %vm18702_vm0 = vmmov %vm18700_vm6  ;;  %v18707_v10 = vld [vmem:[#allocation191_spill] sm:$0xff]  ;;  %v18709_v37 = vld [vmem:[#allocation86_spill] sm:$0xff] }
 0x6ed   :  { %9631 = vmatprep.mubr.msk.f32.mxu0 %vm18694_vm11, %v2431_v54  ;;  %v4235_v53 = vsel %vm18700_vm6, %v4219_v39, %v18699_v5  ;;  %v16187_v38 = vsel %vm18702_vm0, %v16076_v55, %v2698_v45  ;;  %vm18706_vm8 = vmmov %vm18697_vm14  ;;  %v18710_v55 = vld [vmem:[#allocation115_spill] sm:$0xff]  ;;  %v18712_v50 = vld [vmem:[#allocation241_spill] sm:$0xff]  ;;  %vm18721_vm11 = vcmask 269312   ;;  %vm18726_vm6 = vcmask 293888  }
 0x6ee   :  { %2911 = vrot.lane.b32.xlu0 %v18660_v30, %s10425_s20  ;;  %v2652_v18 = vpop.permute.xlu0 %2651  ;;  %v4251_v22 = vsel %vm18704_vm5, %v4235_v53, %v18703_v57  ;;  %vm18711_vm9 = vmmov %vm18686_vm4  ;;  %vm18713_vm4 = vcmask 220160   ;;  %v18714_v19 = vld [vmem:[#allocation116_spill] sm:$0xff]  ;;  %v18715_v63 = vld [vmem:[#allocation151_spill] sm:$0xff]  ;;  %vm18730_vm0 = vcmask 318464   ;;  %vm18732_vm5 = vcmask 146432  }
 0x6ef   :  { %2957 = vrot.lane.b32.xlu1 %v18511_v24, %s18134_s21  ;;  %v16195_v25 = vsel %vm18706_vm8, %v16085_v13, %v2652_v18  ;;  %v4267_v59 = vsel %vm18708_vm15, %v4251_v22, %v18707_v10  ;;  %v4156_v17 = vsel %vm18711_vm9, %v18710_v55, %v18709_v37  ;;  %v18717_v52 = vld [vmem:[#allocation225_spill] sm:$0xff]  ;;  %vm18718_vm13 = vmmov %vm18716_vm10  ;;  %v18719_v0 = vld [vmem:[#allocation92_spill] sm:$0xff]  ;;  %vm6971_vm15 = vcmp.eq.s32.totalorder %v6969_v4, 0 }
 0x6f0   :  { %9632 = vmatmul.mubr.msk.f32.gmra.mrb[30].mxu0 %vm18701_vm7, %v2432_v48  ;;  %v4283_v46 = vsel %vm18713_vm4, %v4267_v59, %v18712_v50  ;;  %v2902_v49 = vpop.permute.xlu1 %2901  ;;  %v4172_v13 = vsel %vm3185_vm1, %v4156_v17, %v18714_v19  ;;  %v18720_v27 = vld [vmem:[#allocation199_spill] sm:$0xff]  ;;  %vm18723_vm14 = vmmov %vm18713_vm4  ;;  %v18724_v28 = vld [vmem:[#allocation142_spill] sm:$0xff]  ;;  %vm6974_vm9 = vcmp.eq.s32.totalorder %v6969_v4, 2  ;;  %vm18737_vm4 = vcmask 171008  }
 0x6f1   :  { %9656 = vmatprep.mubr.msk.f32.mxu0 %vm7818_vm12, %v18705_v32  ;;  %v4299_v34 = vsel %vm18716_vm10, %v4283_v46, %v18715_v63  ;;  %v4188_v43 = vsel %vm3202_vm2, %v4172_v13, %v18719_v0  ;;  %v18722_v36 = vld [vmem:[#allocation171_spill] sm:$0xff]  ;;  %v18727_v2 = vld [vmem:[#allocation181_spill] sm:$0xff]  ;;  %vm18728_vm7 = vmmov %vm18706_vm8  ;;  %vm18734_vm8 = vcmask 343040   ;;  %vm18739_vm10 = vcmask 367616  }
 0x6f2   :  { %3099 = vrot.lane.b32.xlu0 %v18710_v55, %s18124_s9  ;;  %v2840_v61 = vpop.permute.xlu0 %2839  ;;  %v4315_v29 = vsel %vm18721_vm11, %v4299_v34, %v18720_v27  ;;  %v4204_v40 = vsel %vm3219_vm3, %v4188_v43, %v18724_v28  ;;  %v18729_v23 = vld [vmem:[#allocation249_spill] sm:$0xff]  ;;  %v18731_v7 = vld [vmem:[#allocation138_spill] sm:$0xff]  ;;  %v6973_v22 = vsel %vm6971_vm15, %v15815_v16, %v5316_v3  ;;  %v6976_v32 = vsel %vm6974_vm9, %v5319_v6, %v15828_v56  ;;  %v18740_v10 = vld [vmem:[#allocation228_spill] sm:$0xff] }
 0x6f3   :  { %3145 = vrot.lane.b32.xlu1 %v18684_v8, %s10444_s2  ;;  %v16215_v8 = vsel %vm18718_vm13, %v3315_v60, %v2902_v49  ;;  %v16225_v42 = vsel %vm18723_vm14, %v3299_v11, %v2840_v61  ;;  %v18725_v60 = vld [vmem:[#allocation183_spill] sm:$0xff]  ;;  %v4220_v14 = vsel %vm18728_vm7, %v4204_v40, %v18727_v2  ;;  %v18733_v39 = vld [vmem:[#allocation166_spill] sm:$0xff]  ;;  %v18735_v48 = vld [vmem:[#allocation105_spill] sm:$0xff]  ;;  %vm18741_vm13 = vcmask 195584  }
 0x6f4   :  { %9657 = vmatmul.mubr.msk.f32.vlgmr.msra.gmra.mrb[16].mxu0 %vm7818_vm12, %v18717_v52  ;;  %v4332_v54 = vsel %vm18726_vm6, %v4315_v29, %v18725_v60  ;;  %v16239_v11 = vpop.permute.xlu1 %3089  ;;  %v4236_v1 = vsel %vm18732_vm5, %v4220_v14, %v18731_v7  ;;  %v18736_v5 = vld [vmem:[#allocation222_spill] sm:$0xff]  ;;  %v18738_v18 = vld [vmem:[#allocation117_spill] sm:$0xff]  ;;  %vm18743_vm11 = vmmov %vm18723_vm14  ;;  %vm6970_vm14 = vcmp.lt.s32.totalorder %v6969_v4, 2  ;;  %vm18744_vm6 = vcmask 23552  }
 0x6f5   :  { %9659 = vmatprep.mubr.msk.f32.mxu0 %vm7818_vm12, %v18722_v36  ;;  %v4349_v47 = vsel %vm18730_vm0, %v4332_v54, %v18729_v23  ;;  %v4252_v53 = vsel %vm18737_vm4, %v4236_v1, %v18736_v5  ;;  %v18742_v37 = vld [vmem:[#allocation161_spill] sm:$0xff]  ;;  %v3184_v3 = vsel %vm18744_vm6, %v16090_v20, %v2464_v51  ;;  %v18745_v16 = vld [vmem:[#allocation172_spill] sm:$0xff]  ;;  %v6977_v6 = vsel %vm6970_vm14, %v6973_v22, %v6976_v32  ;;  %v18749_v20 = vld [vmem:[#allocation98_spill] sm:$0xff] }
 0x6f6   :  { %2959 = vrot.lane.b32.xlu0 %v18660_v30, %s18134_s21  ;;  %v4366_v35 = vsel %vm18734_vm8, %v4349_v47, %v18733_v39  ;;  %v16247_v45 = vpop.permute.xlu0 %3043  ;;  %v4268_v59 = vsel %vm18741_vm13, %v4252_v53, %v18740_v10  ;;  %vm18746_vm7 = vweird.f32 %v18745_v16  ;;  %v18747_v49 = vld [vmem:[#allocation208_spill] sm:$0xff]  ;;  %vm18748_vm0 = vcmask 244736   ;;  %v18752_v51 = vld [vmem:[#allocation121_spill] sm:$0xff]  ;;  %vm18753_vm8 = vmmov %vm18744_vm6 }
 0x6f7   :  { %3005 = vrot.lane.b32.xlu1 %v18511_v24, %s10442_s26  ;;  %v4383_v57 = vsel %vm18739_vm10, %v4366_v35, %v18738_v18  ;;  %v4284_v17 = vsel %vm18743_vm11, %v4268_v59, %v18742_v37  ;;  %v6875_v56 = vsel %vm18746_vm7, nan, %v15694_v58  ;;  %vm18750_vm5 = vcmask 269312   ;;  %v18751_v58 = vld [vmem:[#allocation173_spill] sm:$0xff]  ;;  %v18754_v13 = vld [vmem:[#allocation150_spill] sm:$0xff]  ;;  %v18757_v4 = vld [vmem:[#allocation144_spill] sm:$0xff] }
 0x6f8   :  { %9660 = vmatmul.mubr.msk.f32.gmra.mrb[18].mxu0 %vm7818_vm12, %v18735_v48  ;;  %v4300_v19 = vsel %vm18748_vm0, %v4284_v17, %v18747_v49  ;;  %vm18755_vm15 = vcmask 293888   ;;  %vm18756_vm9 = vweird.f32 %v15119_v26  ;;  %v18758_v61 = vld [vmem:[#allocation124_spill] sm:$0xff]  ;;  %vm18759_vm4 = vmmov %vm18744_vm6  ;;  %v18760_v43 = vld [vmem:[#allocation139_spill] sm:$0xff]  ;;  %vm18762_vm10 = vcmask 318464  }
 0x6f9   :  { %9662 = vmatprep.mubr.msk.f32.mxu0 %vm7818_vm12, %v15553_v31  ;;  %v2558_v31 = vpop.permute.xlu1 %2557  ;;  %v6978_v34 = vsel %vm18756_vm9, nan, %v6977_v6  ;;  %v4157_v0 = vsel %vm18759_vm4, %v18758_v61, %v18757_v4  ;;  %v18761_v27 = vld [vmem:[#allocation207_spill] sm:$0xff]  ;;  %vm18763_vm13 = vcmask 171008   ;;  %v18765_v60 = vld [vmem:[#allocation182_spill] sm:$0xff]  ;;  %vm18767_vm11 = vcmask 343040   ;;  %v18774_v53 = vld [vmem:[#allocation149_spill] sm:$0xff] }
 0x6fa   :  { %3147 = vrot.lane.b32.xlu0 %v18710_v55, %s10444_s2  ;;  %v16276_v50 = vsel %vm3202_vm2, %v3200_v15, %v2558_v31  ;;  %v2512_v46 = vpop.permute.xlu0 %2511  ;;  %v4158_v15 = vsel %vm18753_vm8, %v18752_v51, %v18751_v58  ;;  %v18764_v28 = vld [vmem:[#allocation167_spill] sm:$0xff]  ;;  %vm18768_vm14 = vcmask 146432   ;;  %v18770_v1 = vld [vmem:[#allocation226_spill] sm:$0xff]  ;;  %vm18772_vm6 = vcmask 367616   ;;  %v18778_v32 = vld [vmem:[#allocation193_spill] sm:$0xff] }
 0x6fb   :  { %4427 = vrot.lane.b32.xlu1 %v4383_v57, %s10445_s30  ;;  %v16282_v55 = vsel %vm3185_vm1, %v3184_v3, %v2512_v46  ;;  %v4173_v40 = vsel %vm3185_vm1, %v4157_v0, %v18764_v28  ;;  %v18766_v2 = vld [vmem:[#allocation111_spill] sm:$0xff]  ;;  %vm18775_vm7 = vcmask 121856   ;;  %v18776_v57 = vld [vmem:[#allocation200_spill] sm:$0xff]  ;;  %vm18780_vm8 = vcmask 252928   ;;  %vm18784_vm9 = vmmov %vm18763_vm13 }
 0x6fc   :  { %9663 = vmatmul.mubr.msk.f32.gmra.mrb[20].mxu0 %vm7818_vm12, %v15590_v44  ;;  %v4316_v44 = vsel %vm18750_vm5, %v4300_v19, %v18749_v20  ;;  %v18769_v47 = vld [vmem:[#allocation227_spill] sm:$0xff]  ;;  %vm18777_vm0 = vmmov %vm18775_vm7  ;;  %vm18785_vm4 = vcmask 244736   ;;  %v18788_v46 = vld [vmem:[#allocation82_spill] sm:$0xff] }
 0x6fd   :  { %9665 = vmatprep.mubr.msk.f32.mxu0 %vm7818_vm12, %v6875_v56  ;;  %v4333_v63 = vsel %vm18755_vm15, %v4316_v44, %v18754_v13  ;;  %v2746_v52 = vpop.permute.xlu1 %2745  ;;  %v4189_v7 = vsel %vm3202_vm2, %v4173_v40, %v18769_v47  ;;  %v18773_v48 = vld [vmem:[#allocation71_spill] sm:$0xff]  ;;  %vm18779_vm5 = vmmov %vm18768_vm14  ;;  %v18792_v20 = vld [vmem:[#allocation188_spill] sm:$0xff] }
 0x6fe   :  { %3007 = vrot.lane.b32.xlu0 %v18660_v30, %s10442_s26  ;;  %v4350_v29 = vsel %vm18762_vm10, %v4333_v63, %v18761_v27  ;;  %v3283_v26 = vsel %vm18763_vm13, %v16187_v38, %v2746_v52  ;;  %v2700_v36 = vpop.permute.xlu0 %2699  ;;  %v18771_v38 = vld [vmem:[#allocation187_spill] sm:$0xff]  ;;  %v4205_v5 = vsel %vm3219_vm3, %v4189_v7, %v18773_v48  ;;  %vm18782_vm15 = vmmov %vm18779_vm5  ;;  %vm18789_vm13 = vcmask 195584   ;;  %v18796_v13 = vld [vmem:[#allocation169_spill] sm:$0xff] }
 0x6ff   :  { %3053 = vrot.lane.b32.xlu1 %v18511_v24, %s10426_s19  ;;  %v4174_v24 = vsel %vm3185_vm1, %v4158_v15, %v18760_v43  ;;  %v4367_v14 = vsel %vm18767_vm11, %v4350_v29, %v18766_v2  ;;  %v3267_v23 = vsel %vm18768_vm14, %v16195_v25, %v2700_v36  ;;  %v4221_v22 = vsel %vm18777_vm0, %v4205_v5, %v18776_v57  ;;  %v18783_v31 = vld [vmem:[#allocation215_spill] sm:$0xff]  ;;  %vm18787_vm10 = vmmov %vm18784_vm9  ;;  %v10411_v52 = vld [vmem:[%s17758_s23 + $0x40] sm:$0xff] }
 0x700   :  { %9666 = vmatmul.mubr.msk.f32.gmra.mrb[22].mxu0 %vm7818_vm12, %v6978_v34  ;;  %v4190_v54 = vsel %vm3202_vm2, %v4174_v24, %v18765_v60  ;;  %v4384_v35 = vsel %vm18772_vm6, %v4367_v14, %v18771_v38  ;;  %v18786_v56 = vld [vmem:[#allocation175_spill] sm:$0xff]  ;;  %vm18791_vm11 = vmmov %vm18789_vm13  ;;  %vm18793_vm14 = vcmask 220160   ;;  %v18798_v4 = vld [vmem:[#allocation77_spill] sm:$0xff]  ;;  %vm18799_vm0 = vcmask 23552  }
 0x701   :  { %v4206_v39 = vsel %vm3219_vm3, %v4190_v54, %v18770_v1  ;;  %v2950_v25 = vpop.permute.xlu1 %2949  ;;  %vm18795_vm6 = vmmov %vm18793_vm14  ;;  %v3177_v0 = vsel %vm18799_vm0, %v10411_v52, %v18798_v4  ;;  %v18800_v43 = vld [vmem:[#allocation162_spill] sm:$0xff]  ;;  %v18802_v27 = vld [vmem:[#allocation185_spill] sm:$0xff]  ;;  %vm18828_vm0 = vcmask 146432  }
 0x702   :  { %v4222_v18 = vsel %vm18775_vm7, %v4206_v39, %v18774_v53  ;;  %4429 = vrot.lane.b32.xlu0 %v4384_v35, %s10445_s30  ;;  %v3349_v59 = vsel %vm18780_vm8, %v16215_v8, %v2950_v25  ;;  %v2904_v37 = vpop.permute.xlu0 %2903  ;;  %v18790_v8 = vld [vmem:[#allocation179_spill] sm:$0xff]  ;;  %vm18797_vm7 = vmmov %vm18785_vm4  ;;  %vm18803_vm8 = vcmask 269312   ;;  %v18804_v36 = vld [vmem:[#allocation176_spill] sm:$0xff] }
 0x703   :  { %3055 = vrot.lane.b32.xlu1 %v18660_v30, %s10426_s19  ;;  %v4238_v10 = vsel %vm18779_vm5, %v4222_v18, %v18778_v32  ;;  %v18781_v30 = vld [vmem:[#allocation257_spill] sm:$0xff]  ;;  %v3333_v16 = vsel %vm18785_vm4, %v16225_v42, %v2904_v37  ;;  %v18794_v42 = vld [vmem:[#allocation186_spill] sm:$0xff]  ;;  %vm18801_vm5 = vmmov %vm18785_vm4 }
 0x704   :  { %v4237_v17 = vsel %vm18782_vm15, %v4221_v22, %v18781_v30  ;;  %v4254_v3 = vsel %vm18784_vm9, %v4238_v10, %v18783_v31  ;;  %vm18805_vm15 = vmmov %vm18803_vm8  ;;  %v18806_v40 = vld [vmem:[#allocation108_spill] sm:$0xff]  ;;  %vm18807_vm9 = vcmask 293888   ;;  %v18808_v54 = vld [vmem:[#allocation210_spill] sm:$0xff] }
 0x705   :  { %v4253_v6 = vsel %vm18787_vm10, %v4237_v17, %v18786_v56  ;;  %v4270_v49 = vsel %vm18789_vm13, %v4254_v3, %v18788_v46  ;;  %v3138_v58 = vpop.permute.xlu1 %3137  ;;  %v3194_v2 = vsel %vm3185_vm1, %v3177_v0, %v18808_v54  ;;  %v18809_v14 = vld [vmem:[#allocation180_spill] sm:$0xff]  ;;  %vm18810_vm4 = vmmov %vm18807_vm9  ;;  %v18811_v7 = vld [vmem:[#allocation189_spill] sm:$0xff]  ;;  %vm18812_vm10 = vcmask 318464  }
 0x706   :  { %v4269_v19 = vsel %vm18791_vm11, %v4253_v6, %v18790_v8  ;;  %v4286_v44 = vsel %vm18793_vm14, %v4270_v49, %v18792_v20  ;;  %3101 = vrot.lane.b32.xlu0 %v18758_v61, %s18124_s9  ;;  %v16356_v34 = vpop.permute.xlu0 %3091  ;;  %v18813_v39 = vld [vmem:[#allocation209_spill] sm:$0xff]  ;;  %v18814_v48 = vld [vmem:[#allocation190_spill] sm:$0xff]  ;;  %vm18815_vm13 = vmmov %vm18812_vm10  ;;  %vm18817_vm1 = vcmask 343040   ;;  %vm18822_vm14 = vcmask 367616  }
 0x707   :  { %3103 = vrot.lane.b32.xlu1 %v18752_v51, %s18124_s9  ;;  %v4285_v15 = vsel %vm18795_vm6, %v4269_v19, %v18794_v42  ;;  %v4302_v63 = vsel %vm18797_vm7, %v4286_v44, %v18796_v13  ;;  %v3211_v38 = vsel %vm3202_vm2, %v3194_v2, %v18813_v39  ;;  %v18816_v53 = vld [vmem:[#allocation231_spill] sm:$0xff]  ;;  %v18819_v32 = vld [vmem:[#allocation233_spill] sm:$0xff]  ;;  %vm18820_vm11 = vmmov %vm18817_vm1  ;;  %vm18824_vm6 = vcmask 121856  }
 0x708   :  { %v4301_v24 = vsel %vm18801_vm5, %v4285_v15, %v18800_v43  ;;  %v4318_v29 = vsel %vm18803_vm8, %v4302_v63, %v18802_v27  ;;  %v18821_v37 = vld [vmem:[#allocation109_spill] sm:$0xff]  ;;  %v18823_v30 = vld [vmem:[#allocation203_spill] sm:$0xff]  ;;  %v18825_v3 = vld [vmem:[#allocation114_spill] sm:$0xff]  ;;  %vm18830_vm5 = vcmask 171008   ;;  %vm18832_vm8 = vcmask 195584  }
 0x709   :  { %v4317_v28 = vsel %vm18805_vm15, %v4301_v24, %v18804_v36  ;;  %v4335_v60 = vsel %vm18807_vm9, %v4318_v29, %v18806_v40  ;;  %v2606_v35 = vpop.permute.xlu1 %2605  ;;  %vm18826_vm7 = vmmov %vm18822_vm14  ;;  %v18827_v6 = vld [vmem:[#allocation214_spill] sm:$0xff]  ;;  %v18834_v42 = vld [vmem:[#allocation255_spill] sm:$0xff] }
 0x70a   :  { %v4334_v47 = vsel %vm18810_vm4, %v4317_v28, %v18809_v14  ;;  %v4352_v1 = vsel %vm18812_vm10, %v4335_v60, %v18811_v7  ;;  %3149 = vrot.lane.b32.xlu0 %v18758_v61, %s10444_s2  ;;  %v3234_v57 = vsel %vm3219_vm3, %v16276_v50, %v2606_v35  ;;  %v2560_v22 = vpop.permute.xlu0 %2559  ;;  %v18829_v50 = vld [vmem:[#allocation240_spill] sm:$0xff]  ;;  %v18831_v19 = vld [vmem:[#allocation246_spill] sm:$0xff]  ;;  %vm18833_vm15 = vmmov %vm18832_vm8  ;;  %vm18837_vm4 = vcmask 244736  }
 0x70b   :  { %3151 = vrot.lane.b32.xlu1 %v18752_v51, %s10444_s2  ;;  %v4351_v5 = vsel %vm18815_vm13, %v4334_v47, %v18814_v48  ;;  %v4369_v18 = vsel %vm18817_vm1, %v4352_v1, %v18816_v53  ;;  %v18818_v51 = vld [vmem:[#allocation73_spill] sm:$0xff]  ;;  %v3218_v31 = vsel %vm3202_vm2, %v16282_v55, %v2560_v22  ;;  %vm18835_vm2 = vcmask 220160   ;;  %vm18836_vm9 = vmmov %vm18830_vm5 }
 0x70c   :  { %v3228_v25 = vsel %vm3219_vm3, %v3211_v38, %v18818_v51  ;;  %v4368_v10 = vsel %vm18820_vm11, %v4351_v5, %v18819_v32  ;;  %v4386_v61 = vsel %vm18822_vm14, %v4369_v18, %v18821_v37  ;;  %vm18838_vm10 = vcmask 252928  }
 0x70d   :  { %v3245_v17 = vsel %vm18824_vm6, %v3228_v25, %v18823_v30  ;;  %v4385_v56 = vsel %vm18826_vm7, %v4368_v10, %v18825_v3  ;;  %v2794_v8 = vpop.permute.xlu1 %2793  ;;  %vm18839_vm13 = vcmask 261120   ;;  %vm18841_vm11 = vcmask 269312   ;;  %vm18842_vm14 = vmmov %vm18838_vm10 }
 0x70e   :  { %v3262_v46 = vsel %vm18828_vm0, %v3245_v17, %v18827_v6  ;;  %4431 = vrot.lane.b32.xlu0 %v4385_v56, %s10445_s30  ;;  %v3300_v44 = vsel %vm18833_vm15, %v3283_v26, %v2794_v8  ;;  %v2748_v55 = vpop.permute.xlu0 %2747  ;;  %vm18840_vm1 = vmmov %vm18839_vm13  ;;  %vm18843_vm6 = vcmask 277504   ;;  %vm18844_vm7 = vcmask 302080  }
 0x70f   :  { %4433 = vrot.lane.b32.xlu1 %v4386_v61, %s10445_s30  ;;  %v3279_v49 = vsel %vm18830_vm5, %v3262_v46, %v18829_v50  ;;  %v3284_v13 = vsel %vm18836_vm9, %v3267_v23, %v2748_v55  ;;  %vm18845_vm0 = vcmask 326656   ;;  %vm18846_vm5 = vcmask 121856   ;;  %vm18848_vm9 = vmmov %vm18840_vm1 }
 0x710   :  { %v3296_v20 = vsel %vm18832_vm8, %v3279_v49, %v18831_v19  ;;  %vm18847_vm8 = vmmov %vm18835_vm2  ;;  %v3365_v48 = vsel %vm18848_vm9, %v15991_v9, %v16142_v21  ;;  %v18853_v9 = vmov 683565275   ;;  %v18854_v30 = vmov 2475754826  }
 0x711   :  { %v3313_v15 = vsel %vm18835_vm2, %v3296_v20, %v18834_v42  ;;  %v2998_v4 = vpop.permute.xlu1 %2997  ;;  %v18856_v3 = vmov 2102212464   ;;  %v18857_v49 = vmov 920167782   ;;  %v18858_v20 = vmov 1326507024  }
 0x712   :  { %v3330_v63 = vsel %vm18837_vm4, %v3313_v15, %v15755_v33  ;;  %v16420_v43 = vsel %vm18840_vm1, %v3349_v59, %v2998_v4  ;;  %v2952_v26 = vpop.permute.xlu0 %2951  ;;  %vm18850_vm4 = vmmov %vm18840_vm1  ;;  %vm18864_vm9 = vcmask 171008  }
 0x713   :  { %v3347_v52 = vsel %vm18838_vm10, %v3330_v63, %v15895_v12  ;;  %v3350_v27 = vsel %vm18842_vm14, %v3333_v16, %v2952_v26  ;;  %vm18851_vm10 = vmmov %vm18843_vm6 }
 0x714   :  { %v3364_v0 = vsel %vm18839_vm13, %v3347_v52, %v16039_v62  ;;  %v16432_v62 = vld [vmem:[%s17591_s7] ss:$0 sm:$0xff]  ;;  %vm18852_vm13 = vmmov %vm18844_vm7 }
 0x715   :  { %v3381_v24 = vsel %vm18841_vm11, %v3364_v0, %v16133_v41  ;;  %v4420_v29 = vpop.permute.xlu1 %4419  ;;  %vm18859_vm14 = vmmov %vm18846_vm5 }
 0x716   :  { %v3398_v23 = vsel %vm18843_vm6, %v3381_v24, %v16239_v11  ;;  %v3140_v36 = vpop.permute.xlu0 %3139  ;;  %vm18860_vm6 = vmmov %vm18845_vm0 }
 0x717   :  { %v3415_v33 = vsel %vm18844_vm7, %v3398_v23, %v3138_v58  ;;  %vm18861_vm7 = vmmov %vm18847_vm8 }
 0x718   :  { %v4460_v12 = vsel %vm18845_vm0, %v3415_v33, %v4420_v29 }
 0x719   :  { %v16435_v59 = vmul.f32 %v16432_v62, %v4460_v12  ;;  %v2654_v28 = vpop.permute.xlu1 %2653 }
 0x71a   :  { %v3251_v11 = vsel %vm18846_vm5, %v3234_v57, %v2654_v28  ;;  %v2608_v58 = vpop.permute.xlu0 %2607 }
 0x71b   :  { %v5323_v41 = vand.u32 2147483647, %v16435_v59  ;;  %v5326_v16 = vand.u32 2139095040, %v16435_v59  ;;  %v3235_v60 = vsel %vm3219_vm3, %v3218_v31, %v2608_v58  ;;  %vm18849_vm3 = vmmov %vm18841_vm11  ;;  %v18855_v31 = vmov 2131351028  }
 0x71c   :  { %v3382_v18 = vsel %vm18849_vm3, %v3365_v48, %v16247_v45 }
 0x71d   :  { %v5327_v40 = vshrl.u32 %v5326_v16, 23  ;;  %v5330_v2 = vand.u32 8388607, %v5323_v41  ;;  %v2842_v14 = vpop.permute.xlu1 %2841  ;;  %v3399_v57 = vsel %vm18851_vm10, %v3382_v18, %v16356_v34 }
 0x71e   :  { %v16444_v47 = vsel %vm18847_vm8, %v3300_v44, %v2842_v14  ;;  %v2796_v7 = vpop.permute.xlu0 %2795  ;;  %v3416_v37 = vsel %vm18852_vm13, %v3399_v57, %v3140_v36  ;;  %vm18862_vm8 = vcmask 146432  }
 0x71f   :  { %v9079_v54 = vadd.s32 4294967169, %v5327_v40  ;;  %v3301_v39 = vsel %vm18833_vm15, %v3284_v13, %v2796_v7  ;;  %v5331_v38 = vor.u32 8388608, %v5330_v2  ;;  %vm18863_vm15 = vmmov %vm18862_vm8 }
 0x721   :  { %v5333_v1 = vadd.s32 1, %v9079_v54  ;;  %v16447_v35 = vpop.permute.xlu1 %3045  ;;  %v16459_v10 = vshll.u32 %v5331_v38, 8 }
 0x722   :  { %v3000_v53 = vpop.permute.xlu0 %2999 }
 0x723   :  { %vm5334_vm2 = vcmp.gt.s32.totalorder %v5333_v1, 0  ;;  %v16455_v25 = vsel %vm18850_vm4, %v3350_v27, %v3000_v53 }
 0x724   :  { %v5335_v5 = vsel %vm5334_vm2, %v5333_v1, 0 }
 0x725   :  { %v5337_v51 = vand.u32 31, %v5335_v5  ;;  %v5336_v22 = vshrl.u32 %v5335_v5, 5  ;;  %v2656_v61 = vpop.permute.xlu1 %2655 }
 0x726   :  { %v4422_v6 = vpop.permute.xlu0 %4421  ;;  %v3252_v13 = vsel %vm18859_vm14, %v3235_v60, %v2656_v61  ;;  %vm18865_vm14 = vcmask 269312  }
 0x727   :  { %v5338_v32 = vsub.s32 32, %v5337_v51  ;;  %v5340_v21 = vshll.u32 %v18853_v9, %v5337_v51  ;;  %v5343_v17 = vshll.u32 %v18854_v30, %v5337_v51  ;;  %v5346_v45 = vshll.u32 %v18855_v31, %v5337_v51 }
 0x728   :  { %v5349_v56 = vshll.u32 %v18856_v3, %v5337_v51  ;;  %v5352_v8 = vshll.u32 %v18857_v49, %v5337_v51  ;;  %vm5355_vm1 = vcmp.lt.s32.totalorder %v5336_v22, 1  ;;  %vm5358_vm11 = vcmp.lt.s32.totalorder %v5336_v22, 4 }
 0x729   :  { %v5341_v46 = vshrl.u32 %v18854_v30, %v5338_v32  ;;  %v5344_v34 = vshrl.u32 %v18855_v31, %v5338_v32  ;;  %v5347_v50 = vshrl.u32 %v18856_v3, %v5338_v32  ;;  %v5350_v19 = vshrl.u32 %v18857_v49, %v5338_v32  ;;  %v2844_v63 = vpop.permute.xlu1 %2843 }
 0x72a   :  { %v5353_v44 = vshrl.u32 %v18858_v20, %v5338_v32  ;;  %v4461_v0 = vsel %vm18860_vm6, %v3416_v37, %v4422_v6  ;;  %v16475_v26 = vsel %vm18861_vm7, %v3301_v39, %v2844_v63  ;;  %v2702_v24 = vpop.permute.xlu0 %2701  ;;  %v5339_v27 = vshrl.u32 %v18853_v9, %v5338_v32 }
 0x72b   :  { %v5342_v55 = vor.u32 %v5341_v46, %v5340_v21  ;;  %v5345_v42 = vor.u32 %v5344_v34, %v5343_v17  ;;  %v5348_v15 = vor.u32 %v5347_v50, %v5346_v45  ;;  %v5351_v52 = vor.u32 %v5350_v19, %v5349_v56 }
 0x72c   :  { %v5354_v4 = vor.u32 %v5353_v44, %v5352_v8  ;;  %vm5357_vm0 = vcmp.lt.s32.totalorder %v5336_v22, 3  ;;  %v16484_v16 = vmul.f32 %v16432_v62, %v4461_v0  ;;  %vm5356_vm5 = vcmp.lt.s32.totalorder %v5336_v22, 2 }
 0x72d   :  { %v5360_v23 = vsel %vm5358_vm11, %v5348_v15, 2102212464  ;;  %v5363_v33 = vsel %vm5355_vm1, %v5342_v55, %v5345_v42  ;;  %v5367_v29 = vsel %vm5355_vm1, %v5345_v42, %v5348_v15  ;;  %v5364_v12 = vsel %vm5358_vm11, %v5351_v52, 920167782  ;;  %v16487_v60 = vpop.permute.xlu1 %3047 }
 0x72e   :  { %v5368_v36 = vsel %vm5358_vm11, %v5354_v4, 1326507024  ;;  %v5365_v28 = vsel %vm5357_vm0, %v5348_v15, %v5364_v12  ;;  %v3268_v40 = vsel %vm18862_vm8, %v3251_v11, %v2702_v24  ;;  %v5359_v54 = vsel %vm5355_vm1, %v5339_v27, %v5342_v55  ;;  %v16490_v1 = vpop.permute.xlu0 %2905 }
 0x72f   :  { %v5369_v58 = vsel %vm5357_vm0, %v5351_v52, %v5368_v36  ;;  %v5361_v2 = vsel %vm5357_vm0, %v5345_v42, %v5360_v23  ;;  %v5366_v14 = vsel %vm5356_vm5, %v5363_v33, %v5365_v28  ;;  %v5430_v11 = vand.u32 2139095040, %v16484_v16 }
 0x730   :  { %v5370_v7 = vsel %vm5356_vm5, %v5367_v29, %v5369_v58  ;;  %v16497_v48 = vmul.u32.u64.low %v16459_v10, %v5366_v14  ;;  %v16498_v5 = vmul.u32.u64.high %v16459_v10, %v5366_v14, %v16497_v48  ;;  %v5362_v53 = vsel %vm5356_vm5, %v5359_v54, %v5361_v2 }
 0x731   :  { %v16493_v39 = vmul.u32.u64.low %v16459_v10, %v5370_v7  ;;  %v16494_v38 = vmul.u32.u64.high %v16459_v10, %v5370_v7, %v16493_v39  ;;  %v5427_v18 = vand.u32 2147483647, %v16484_v16  ;;  %v2704_v51 = vpop.permute.xlu1 %2703  ;;  %v5431_v57 = vshrl.u32 %v5430_v11, 23 }
 0x732   :  { %v16504_v22 = vsel %vm18863_vm15, %v3252_v13, %v2704_v51  ;;  %v16506_v32 = vpop.permute.xlu0 %3093  ;;  %v5381_v37 = vadd.s32 1, %v16498_v5  ;;  %v5378_v61 = vmul.u32 %v16459_v10, %v5362_v53  ;;  %vm18866_vm6 = vcmask 277504   ;;  %vm18869_vm15 = vmmov %vm18865_vm14 }
 0x733   :  { %vm5380_vm2 = vc.u32 %v16494_v38, %v16497_v48  ;;  %v9083_v21 = vadd.s32 4294967169, %v5431_v57  ;;  %v5434_v45 = vand.u32 8388607, %v5427_v18  ;;  %vm18867_vm0 = vcmask 302080  }
 0x734   :  { %v5382_v17 = vsel %vm5380_vm2, %v5381_v37, %v16498_v5  ;;  %vm18868_vm5 = vcmask 326656   ;;  %vm5325_vm8 = vcmp.lt.s32.totalorder %v16435_v59, 0  ;;  %vm16592_vm2 = vcmp.le.f32.partialorder %v5323_v41, 0.7853982 }
 0x735   :  { %v16515_v56 = vpop.permute.xlu1 %2907  ;;  %v5383_v6 = vadd.s32 %v5382_v17, %v5378_v61  ;;  %v5437_v46 = vadd.s32 1, %v9083_v21  ;;  %v5435_v19 = vor.u32 8388608, %v5434_v45 }
 0x736   :  { %v2750_v34 = vpop.permute.xlu0 %2749 }
 0x737   :  { %v16518_v50 = vsel %vm18864_vm9, %v3268_v40, %v2750_v34  ;;  %v5384_v8 = vadd.s32 536870912, %v5383_v6  ;;  %vm5438_vm3 = vcmp.gt.s32.totalorder %v5437_v46, 0  ;;  %v16530_v27 = vshll.u32 %v5435_v19, 8 }
 0x738   :  { %v5439_v44 = vsel %vm5438_vm3, %v5437_v46, 0  ;;  %vm18872_vm9 = vcmask 244736   ;;  %vm18873_vm3 = vmmov %vm18866_vm6 }
 0x739   :  { %v16520_v55 = vpop.permute.xlu1 %3095  ;;  %v16522_v10 = vshrl.u32 %v5384_v8, 30  ;;  %v5441_v42 = vand.u32 31, %v5439_v44  ;;  %v5440_v63 = vshrl.u32 %v5439_v44, 5 }
 0x73a   :  { %v16524_v15 = vpop.permute.xlu0 %2953 }
 0x73b   :  { %v5386_v13 = vshll.u32 %v16522_v10, 30  ;;  %v5442_v52 = vsub.s32 32, %v5441_v42  ;;  %v5444_v4 = vshll.u32 %v18853_v9, %v5441_v42  ;;  %v5447_v0 = vshll.u32 %v18854_v30, %v5441_v42 }
 0x73c   :  { %v5450_v24 = vshll.u32 %v18855_v31, %v5441_v42  ;;  %v5453_v36 = vshll.u32 %v18856_v3, %v5441_v42  ;;  %v5456_v54 = vshll.u32 %v18857_v49, %v5441_v42  ;;  %vm5459_vm4 = vcmp.lt.s32.totalorder %v5440_v63, 1 }
 0x73d   :  { %v16532_v23 = vpop.permute.xlu1 %2751  ;;  %v16534_v33 = vsub.s32 %v5383_v6, %v5386_v13  ;;  %v5445_v29 = vshrl.u32 %v18854_v30, %v5442_v52  ;;  %v5448_v12 = vshrl.u32 %v18855_v31, %v5442_v52  ;;  %v5451_v58 = vshrl.u32 %v18856_v3, %v5442_v52 }
 0x73e   :  { %v3142_v28 = vpop.permute.xlu0 %3141  ;;  %v5454_v40 = vshrl.u32 %v18857_v49, %v5442_v52  ;;  %v5457_v2 = vshrl.u32 %v18858_v20, %v5442_v52  ;;  %v5443_v5 = vshrl.u32 %v18853_v9, %v5442_v52  ;;  %vm5461_vm10 = vcmp.lt.s32.totalorder %v5440_v63, 3 }
 0x73f   :  { %v5389_v14 = vsub.s32 0, %v16534_v33  ;;  %v5446_v7 = vor.u32 %v5445_v29, %v5444_v4  ;;  %v5449_v39 = vor.u32 %v5448_v12, %v5447_v0  ;;  %v5452_v11 = vor.u32 %v5451_v58, %v5450_v24 }
 0x740   :  { %v5455_v53 = vor.u32 %v5454_v40, %v5453_v36  ;;  %v5458_v51 = vor.u32 %v5457_v2, %v5456_v54  ;;  %vm5462_vm13 = vcmp.lt.s32.totalorder %v5440_v63, 4  ;;  %vm5460_vm1 = vcmp.lt.s32.totalorder %v5440_v63, 2 }
 0x741   :  { %v16545_v57 = vpop.permute.xlu1 %2955  ;;  %v9080_v37 = vmin.u32 %v5389_v14, %v16534_v33  ;;  %v5467_v61 = vsel %vm5459_vm4, %v5446_v7, %v5449_v39  ;;  %v5464_v17 = vsel %vm5462_vm13, %v5452_v11, 2102212464  ;;  %v5471_v6 = vsel %vm5459_vm4, %v5449_v39, %v5452_v11 }
 0x742   :  { %v16549_v21 = vpop.permute.xlu0 %2797  ;;  %v5468_v45 = vsel %vm5462_vm13, %v5455_v53, 920167782  ;;  %v5472_v46 = vsel %vm5462_vm13, %v5458_v51, 1326507024  ;;  %v5463_v44 = vsel %vm5459_vm4, %v5443_v5, %v5446_v7  ;;  %v5465_v4 = vsel %vm5461_vm10, %v5449_v39, %v5464_v17  ;;  %vm18874_vm4 = vmmov %vm18872_vm9 }
 0x743   :  { %v5391_v34 = vclz %v9080_v37  ;;  %v5469_v8 = vsel %vm5461_vm10, %v5452_v11, %v5468_v45  ;;  %v5473_v19 = vsel %vm5461_vm10, %v5455_v53, %v5472_v46  ;;  %v3383_v54 = vsel %vm18865_vm14, %v16420_v43, %v16447_v35  ;;  %vm18875_vm10 = vmmov %vm18867_vm0 }
 0x744   :  { %v5470_v42 = vsel %vm5460_vm1, %v5467_v61, %v5469_v8  ;;  %v5474_v13 = vsel %vm5460_vm1, %v5471_v6, %v5473_v19  ;;  %v5466_v2 = vsel %vm5460_vm1, %v5463_v44, %v5465_v4  ;;  %v3400_v7 = vsel %vm18866_vm6, %v3383_v54, %v16506_v32 }
 0x745   :  { %v9081_v52 = vadd.s32 4294967294, %v5391_v34  ;;  %v16559_v0 = vmul.u32.u64.low %v16530_v27, %v5474_v13  ;;  %v16560_v24 = vmul.u32.u64.high %v16530_v27, %v5474_v13, %v16559_v0  ;;  %v3144_v29 = vpop.permute.xlu1 %3143  ;;  %v3417_v11 = vsel %vm18867_vm0, %v3400_v7, %v3142_v28 }
 0x746   :  { %v16563_v12 = vmul.u32.u64.low %v16530_v27, %v5470_v42  ;;  %v16564_v36 = vmul.u32.u64.high %v16530_v27, %v5470_v42, %v16563_v12  ;;  %v3002_v58 = vpop.permute.xlu0 %3001  ;;  %v5482_v61 = vmul.u32 %v16530_v27, %v5466_v2  ;;  %v5379_v63 = vadd.s32 %v16497_v48, %v16494_v38 }
 0x747   :  { %vm9082_vm11 = vcmp.lt.s32.totalorder %v9081_v52, 0  ;;  %v5409_v6 = vsub.s32 4, %v16522_v10  ;;  %v3384_v27 = vsel %vm18869_vm15, %v16455_v25, %v16487_v60  ;;  %v3334_v44 = vsel %vm18872_vm9, %v16444_v47, %v16490_v1 }
 0x748   :  { %v5394_v40 = vsel %vm9082_vm11, 0, %v9081_v52  ;;  %vm5484_vm7 = vc.u32 %v16560_v24, %v16563_v12  ;;  %v5485_v5 = vadd.s32 1, %v16564_v36  ;;  %v3401_v25 = vsel %vm18873_vm3, %v3384_v27, %v16520_v55  ;;  %vm18878_vm11 = vmmov %vm18868_vm5 }
 0x749   :  { %v5399_v14 = vsub.s32 4294967266, %v5394_v40  ;;  %v2800_v39 = vpop.permute.xlu1 %2799  ;;  %v5395_v51 = vsub.s32 32, %v5394_v40  ;;  %v5396_v60 = vshll.u32 %v16534_v33, %v5394_v40  ;;  %v3335_v42 = vsel %vm18874_vm4, %v16475_v26, %v16515_v56 }
 0x74a   :  { %v5486_v35 = vsel %vm5484_vm7, %v5485_v5, %v16564_v36  ;;  %v3418_v41 = vsel %vm18875_vm10, %v3401_v25, %v3144_v29  ;;  %v5410_v47 = vsel %vm5325_vm8, %v5409_v6, %v16522_v10  ;;  %vm18876_vm13 = vcmask 252928  }
 0x74b   :  { %v5400_v37 = vadd.s32 127, %v5399_v14  ;;  %v5487_v45 = vadd.s32 %v5486_v35, %v5482_v61  ;;  %v5397_v38 = vshrl.u32 %v5379_v63, %v5395_v51  ;;  %v3351_v1 = vsel %vm18876_vm13, %v3334_v44, %v16524_v15  ;;  %vm18879_vm14 = vmmov %vm18876_vm13 }
 0x74c   :  { %v4424_v53 = vpop.permute.xlu0 %4423  ;;  %vm18877_vm1 = vcmask 171008   ;;  %v3352_v54 = vsel %vm18879_vm14, %v3335_v42, %v16545_v57  ;;  %vm18880_vm6 = vcmask 195584   ;;  %vm18881_vm7 = vcmask 261120  }
 0x74d   :  { %v4462_v43 = vsel %vm18868_vm5, %v3417_v11, %v4424_v53  ;;  %v5401_v17 = vshll.u32 %v5400_v37, 23  ;;  %v3004_v28 = vpop.permute.xlu1 %3003  ;;  %v5488_v48 = vadd.s32 536870912, %v5487_v45  ;;  %v3286_v26 = vsel %vm18877_vm1, %v16504_v22, %v16532_v23  ;;  %vm18882_vm0 = vmmov %vm18880_vm6 }
 0x74e   :  { %v16580_v32 = vmul.f32 %v16432_v62, %v4462_v43  ;;  %v5398_v29 = vor.u32 %v5397_v38, %v5396_v60  ;;  %v3302_v15 = vsel %vm18880_vm6, %v16518_v50, %v16549_v21  ;;  %v16631_v22 = vsel %vm18881_vm7, %v3351_v1, %v3002_v58  ;;  %vm18883_vm15 = vmmov %vm18881_vm7 }
 0x74f   :  { %v5402_v52 = vor.u32 4788187, %v5401_v17  ;;  %v16606_v4 = vshrl.u32 %v5488_v48, 30  ;;  %v5412_v2 = vsel %vm16592_vm2, 0, %v5410_v47  ;;  %v16636_v7 = vadd.s32 %v16563_v12, %v16560_v24 }
 0x750   :  { %v5531_v46 = vand.u32 2147483647, %v16580_v32  ;;  %v5534_v34 = vand.u32 2139095040, %v16580_v32  ;;  %v2846_v8 = vpop.permute.xlu0 %2845  ;;  %v16643_v53 = vsel %vm18882_vm0, %v3286_v26, %v2800_v39  ;;  %v5405_v51 = vcvt.s32.f32 %v5398_v29 }
 0x751   :  { %v5490_v40 = vshll.u32 %v16606_v4, 30  ;;  %v5403_v14 = vand.u32 2147483647, %v5402_v52  ;;  %v16650_v12 = vadd.s32 3, %v5412_v2  ;;  %v16653_v43 = vsel %vm18883_vm15, %v3352_v54, %v3004_v28 }
 0x752   :  { %v5535_v13 = vshrl.u32 %v5534_v34, 23  ;;  %v5538_v0 = vand.u32 8388607, %v5531_v46  ;;  %vm18884_vm9 = vcmask 220160   ;;  %v16658_v35 = vand.u32 3, %v5412_v2 }
 0x753   :  { %v16638_v5 = vsub.s32 %v5487_v45, %v5490_v40  ;;  %v16656_v39 = vsel %vm18884_vm9, %v3302_v15, %v2846_v8  ;;  %v16660_v63 = vmul.f32 %v5405_v51, %v5403_v14  ;;  %v5513_v45 = vsub.s32 4, %v16606_v4 }
 0x754   :  { %v9087_v56 = vadd.s32 4294967169, %v5535_v13  ;;  %v16619_v33 = vpop.permute.xlu0 %3049  ;;  %v5539_v57 = vor.u32 8388608, %v5538_v0  ;;  %vm5429_vm4 = vcmp.lt.s32.totalorder %v16484_v16, 0  ;;  %vm18885_vm6 = vcmask 269312  }
 0x755   :  { %v4426_v36 = vpop.permute.xlu1 %4425  ;;  %v5493_v37 = vsub.s32 0, %v16638_v5  ;;  %vm18886_vm0 = vcmask 244736   ;;  %vm18888_vm15 = vcmask 277504  }
 0x756   :  { %v4463_v55 = vsel %vm18878_vm11, %v3418_v41, %v4426_v36  ;;  %v5541_v23 = vadd.s32 1, %v9087_v56  ;;  %v16664_v6 = vshll.u32 %v5539_v57, 8 }
 0x757   :  { %v16625_v10 = vmul.f32 %v16432_v62, %v4463_v55  ;;  %v9084_v17 = vmin.u32 %v5493_v37, %v16638_v5 }
 0x758   :  { %vm5542_vm5 = vcmp.gt.s32.totalorder %v5541_v23, 0  ;;  %v16647_v58 = vpop.permute.xlu0 %2847 }
 0x759   :  { %v16640_v11 = vpop.permute.xlu1 %2909  ;;  %v5635_v50 = vand.u32 2147483647, %v16625_v10  ;;  %v5638_v21 = vand.u32 2139095040, %v16625_v10  ;;  %v5543_v24 = vsel %vm5542_vm5, %v5541_v23, 0  ;;  %v5495_v44 = vclz %v9084_v17  ;;  %vm18887_vm5 = vmmov %vm18884_vm9 }
 0x75a   :  { %v5545_v61 = vand.u32 31, %v5543_v24  ;;  %v16668_v34 = vshrl.u32 %v5543_v24, 5  ;;  %vm18890_vm9 = vcmask 326656  }
 0x75b   :  { %v5639_v28 = vshrl.u32 %v5638_v21, 23  ;;  %v16672_v8 = vand.u32 8388607, %v5635_v50  ;;  %v9085_v36 = vadd.s32 4294967294, %v5495_v44 }
 0x75c   :  { %v5546_v38 = vsub.s32 32, %v5545_v61  ;;  %v16674_v48 = vpop.permute.xlu0 %3051  ;;  %v5548_v25 = vshll.u32 %v18853_v9, %v5545_v61  ;;  %v5551_v60 = vshll.u32 %v18854_v30, %v5545_v61  ;;  %v5554_v42 = vshll.u32 %v18855_v31, %v5545_v61 }
 0x75d   :  { %v16666_v27 = vpop.permute.xlu1 %3097  ;;  %v5557_v0 = vshll.u32 %v18856_v3, %v5545_v61  ;;  %v5560_v1 = vshll.u32 %v18857_v49, %v5545_v61  ;;  %vm5563_vm3 = vcmp.lt.s32.totalorder %v16668_v34, 1  ;;  %vm9086_vm10 = vcmp.lt.s32.totalorder %v9085_v36, 0 }
 0x75e   :  { %v5549_v41 = vshrl.u32 %v18854_v30, %v5546_v38  ;;  %v5552_v13 = vshrl.u32 %v18855_v31, %v5546_v38  ;;  %v5555_v52 = vshrl.u32 %v18856_v3, %v5546_v38  ;;  %v5558_v47 = vshrl.u32 %v18857_v49, %v5546_v38 }
 0x75f   :  { %v5561_v26 = vshrl.u32 %v18858_v20, %v5546_v38  ;;  %v5547_v15 = vshrl.u32 %v18853_v9, %v5546_v38  ;;  %v5498_v14 = vsel %vm9086_vm10, 0, %v9085_v36  ;;  %vm5564_vm13 = vcmp.lt.s32.totalorder %v16668_v34, 2 }
 0x760   :  { %v5550_v55 = vor.u32 %v5549_v41, %v5548_v25  ;;  %v5553_v29 = vor.u32 %v5552_v13, %v5551_v60  ;;  %v5556_v40 = vor.u32 %v5555_v52, %v5554_v42  ;;  %v16689_v54 = vpop.permute.xlu0 %2911  ;;  %v5559_v23 = vor.u32 %v5558_v47, %v5557_v0 }
 0x761   :  { %v16686_v56 = vpop.permute.xlu1 %2957  ;;  %v5562_v2 = vor.u32 %v5561_v26, %v5560_v1  ;;  %vm5565_vm1 = vcmp.lt.s32.totalorder %v16668_v34, 3  ;;  %vm5566_vm11 = vcmp.lt.s32.totalorder %v16668_v34, 4  ;;  %v5499_v57 = vsub.s32 32, %v5498_v14 }
 0x762   :  { %v5503_v21 = vsub.s32 4294967266, %v5498_v14  ;;  %v5567_v51 = vsel %vm5563_vm3, %v5547_v15, %v5550_v55  ;;  %v5571_v37 = vsel %vm5563_vm3, %v5550_v55, %v5553_v29  ;;  %v5568_v61 = vsel %vm5566_vm11, %v5556_v40, 2102212464 }
 0x763   :  { %v5572_v17 = vsel %vm5566_vm11, %v5559_v23, 920167782  ;;  %v5575_v38 = vsel %vm5563_vm3, %v5553_v29, %v5556_v40  ;;  %v5576_v44 = vsel %vm5566_vm11, %v5562_v2, 1326507024  ;;  %v5501_v60 = vshrl.u32 %v16636_v7, %v5499_v57 }
 0x764   :  { %v16702_v25 = vpop.permute.xlu0 %3099  ;;  %v5504_v42 = vadd.s32 127, %v5503_v21  ;;  %v5573_v41 = vsel %vm5565_vm1, %v5556_v40, %v5572_v17  ;;  %v5577_v13 = vsel %vm5565_vm1, %v5559_v23, %v5576_v44  ;;  %v5500_v52 = vshll.u32 %v16638_v5, %v5498_v14 }
 0x765   :  { %v3146_v24 = vpop.permute.xlu1 %3145  ;;  %v5574_v0 = vsel %vm5564_vm13, %v5571_v37, %v5573_v41  ;;  %v5578_v36 = vsel %vm5564_vm13, %v5575_v38, %v5577_v13  ;;  %v9091_v47 = vadd.s32 4294967169, %v5639_v28  ;;  %v5569_v7 = vsel %vm5565_vm1, %v5553_v29, %v5568_v61 }
 0x766   :  { %v5505_v1 = vshll.u32 %v5504_v42, 23  ;;  %v16717_v26 = vmul.u32.u64.low %v16664_v6, %v5578_v36  ;;  %v16718_v55 = vmul.u32.u64.high %v16664_v6, %v5578_v36, %v16717_v26  ;;  %v5407_v40 = vxor.u32 2147483648, %v16660_v63 }
 0x767   :  { %v16722_v15 = vmul.u32.u64.low %v16664_v6, %v5574_v0  ;;  %v16723_v5 = vmul.u32.u64.high %v16664_v6, %v5574_v0, %v16722_v15  ;;  %v5645_v23 = vadd.s32 1, %v9091_v47  ;;  %v5502_v14 = vor.u32 %v5501_v60, %v5500_v52 }
 0x768   :  { %v5506_v28 = vor.u32 4788187, %v5505_v1  ;;  %v5643_v57 = vor.u32 8388608, %v16672_v8  ;;  %v16730_v29 = vand.u32 3, %v16650_v12  ;;  %v16737_v21 = vsel %vm5429_vm4, %v5513_v45, %v16606_v4  ;;  %v16744_v17 = vpop.permute.xlu0 %2959 }
 0x769   :  { %v16726_v2 = vpop.permute.xlu1 %3005  ;;  %v5570_v37 = vsel %vm5564_vm13, %v5567_v51, %v5569_v7  ;;  %vm5646_vm14 = vcmp.gt.s32.totalorder %v5645_v23, 0  ;;  %v3385_v61 = vsel %vm18885_vm6, %v16631_v22, %v16619_v33  ;;  %vm5588_vm7 = vc.u32 %v16718_v55, %v16722_v15 }
 0x76a   :  { %v5507_v8 = vand.u32 2147483647, %v5506_v28  ;;  %v5647_v12 = vsel %vm5646_vm14, %v5645_v23, 0  ;;  %v16751_v4 = vsel %vm18886_vm0, %v16656_v39, %v16640_v11  ;;  %v16756_v45 = vsel %vm5325_vm8, %v5407_v40, %v16660_v63 }
 0x76b   :  { %v5589_v34 = vadd.s32 1, %v16723_v5  ;;  %v5649_v33 = vand.u32 31, %v5647_v12  ;;  %v16762_v22 = vsel %vm18887_vm5, %v16643_v53, %v16647_v58  ;;  %v5509_v51 = vcvt.s32.f32 %v5502_v14  ;;  %vm18898_vm5 = vmmov %vm18890_vm9 }
 0x76c   :  { %v5586_v38 = vmul.u32 %v16664_v6, %v5570_v37  ;;  %v16765_v44 = vshll.u32 %v5643_v57, 8  ;;  %v3402_v11 = vsel %vm18888_vm15, %v3385_v61, %v16666_v27  ;;  %v5648_v63 = vshrl.u32 %v5647_v12, 5  ;;  %v3148_v47 = vpop.permute.xlu0 %3147 }
 0x76d   :  { %v5590_v39 = vsel %vm5588_vm7, %v5589_v34, %v16723_v5  ;;  %v5650_v60 = vsub.s32 32, %v5649_v33  ;;  %vm18889_vm8 = vcmask 302080   ;;  %v4428_v41 = vpop.permute.xlu1 %4427  ;;  %v5510_v13 = vmul.f32 %v5509_v51, %v5507_v8  ;;  %vm18896_vm7 = vmmov %vm18888_vm15 }
 0x76e   :  { %v3419_v42 = vsel %vm18889_vm8, %v3402_v11, %v3146_v24  ;;  %v5591_v52 = vadd.s32 %v5590_v39, %v5586_v38  ;;  %v5652_v53 = vshll.u32 %v18853_v9, %v5649_v33  ;;  %v5655_v58 = vshll.u32 %v18854_v30, %v5649_v33 }
 0x76f   :  { %v5653_v6 = vshrl.u32 %v18854_v30, %v5650_v60  ;;  %v5656_v0 = vshrl.u32 %v18855_v31, %v5650_v60  ;;  %v5658_v36 = vshll.u32 %v18855_v31, %v5649_v33  ;;  %v5659_v27 = vshrl.u32 %v18856_v3, %v5650_v60 }
 0x770   :  { %v5592_v1 = vadd.s32 536870912, %v5591_v52  ;;  %v5661_v7 = vshll.u32 %v18856_v3, %v5649_v33  ;;  %v5662_v24 = vshrl.u32 %v18857_v49, %v5650_v60  ;;  %v4464_v26 = vsel %vm18890_vm9, %v3419_v42, %v4428_v41  ;;  %v16792_v41 = vpop.permute.xlu0 %3007 }
 0x771   :  { %v5651_v40 = vshrl.u32 %v18853_v9, %v5650_v60  ;;  %v5654_v5 = vor.u32 %v5653_v6, %v5652_v53  ;;  %v5657_v23 = vor.u32 %v5656_v0, %v5655_v58  ;;  %v5660_v14 = vor.u32 %v5659_v27, %v5658_v36 }
 0x772   :  { %vm16783_vm3 = vcmp.le.f32.partialorder %v5427_v18, 0.7853982  ;;  %v16787_v57 = vshrl.u32 %v5592_v1, 30  ;;  %v5663_v37 = vor.u32 %v5662_v24, %v5661_v7  ;;  %v5664_v61 = vshll.u32 %v18857_v49, %v5649_v33 }
 0x773   :  { %v5665_v8 = vshrl.u32 %v18858_v20, %v5650_v60  ;;  %v5511_v12 = vxor.u32 2147483648, %v5510_v13  ;;  %vm5667_vm10 = vcmp.lt.s32.totalorder %v5648_v63, 1  ;;  %vm5668_vm13 = vcmp.lt.s32.totalorder %v5648_v63, 2 }
 0x774   :  { %vm5669_vm1 = vcmp.lt.s32.totalorder %v5648_v63, 3  ;;  %v5594_v34 = vshll.u32 %v16787_v57, 30  ;;  %vm5670_vm11 = vcmp.lt.s32.totalorder %v5648_v63, 4  ;;  %v5671_v38 = vsel %vm5667_vm10, %v5651_v40, %v5654_v5 }
 0x775   :  { %v5666_v51 = vor.u32 %v5665_v8, %v5664_v61  ;;  %v5672_v18 = vsel %vm5670_vm11, %v5660_v14, 2102212464  ;;  %v5675_v11 = vsel %vm5667_vm10, %v5654_v5, %v5657_v23  ;;  %v5676_v39 = vsel %vm5670_vm11, %v5663_v37, 920167782 }
 0x776   :  { %v5679_v42 = vsel %vm5667_vm10, %v5657_v23, %v5660_v14  ;;  %v16794_v53 = vsub.s32 %v5591_v52, %v5594_v34  ;;  %v5673_v33 = vsel %vm5669_vm1, %v5657_v23, %v5672_v18  ;;  %v5677_v60 = vsel %vm5669_vm1, %v5660_v14, %v5676_v39 }
 0x777   :  { %v5680_v58 = vsel %vm5670_vm11, %v5666_v51, 1326507024  ;;  %v5512_v6 = vsel %vm5429_vm4, %v5511_v12, %v5510_v13  ;;  %v5678_v0 = vsel %vm5668_vm13, %v5675_v11, %v5677_v60  ;;  %v16803_v27 = vmul.f32 %v16432_v62, %v4464_v26  ;;  %vm18893_vm4 = vmmov %vm18885_vm6 }
 0x778   :  { %v5681_v36 = vsel %vm5669_vm1, %v5663_v37, %v5680_v58  ;;  %v5597_v1 = vsub.s32 0, %v16794_v53  ;;  %v16808_v7 = vmul.u32.u64.low %v16765_v44, %v5678_v0  ;;  %v16809_v24 = vmul.u32.u64.high %v16765_v44, %v5678_v0, %v16808_v7  ;;  %vm18895_vm6 = vmmov %vm18886_vm0 }
 0x779   :  { %v5682_v52 = vsel %vm5668_vm13, %v5679_v42, %v5681_v36  ;;  %v5674_v40 = vsel %vm5668_vm13, %v5671_v38, %v5673_v33  ;;  %v5739_v23 = vand.u32 2147483647, %v16803_v27  ;;  %v3386_v26 = vsel %vm18893_vm4, %v16653_v43, %v16674_v48  ;;  %v4430_v48 = vpop.permute.xlu0 %4429  ;;  %v3054_v38 = vpop.permute.xlu1 %3053  ;;  %vm18897_vm0 = vmmov %vm18889_vm8 }
 0x77a   :  { %v16813_v5 = vmul.u32.u64.low %v16765_v44, %v5682_v52  ;;  %v16814_v13 = vmul.u32.u64.high %v16765_v44, %v5682_v52, %v16813_v5  ;;  %v9088_v14 = vmin.u32 %v5597_v1, %v16794_v53  ;;  %v5742_v37 = vand.u32 2139095040, %v16803_v27  ;;  %vm18901_vm13 = vmmov %vm18893_vm4 }
 0x77b   :  { %v5411_v63 = vsel %vm16592_vm2, %v16435_v59, %v16756_v45  ;;  %v5515_v61 = vsel %vm16783_vm3, %v16484_v16, %v5512_v6  ;;  %vm18894_vm14 = vcmask 252928   ;;  %v3337_v12 = vsel %vm18895_vm6, %v16762_v22, %v16689_v54  ;;  %vm18903_vm11 = vmmov %vm18893_vm4 }
 0x77c   :  { %v3353_v8 = vsel %vm18894_vm14, %v16751_v4, %v16686_v56  ;;  %v3403_v43 = vsel %vm18896_vm7, %v3386_v26, %v16702_v25  ;;  %v5599_v34 = vclz %v9088_v14  ;;  %v5690_v19 = vmul.u32 %v16765_v44, %v5674_v40  ;;  %vm18900_vm9 = vmmov %vm18894_vm14 }
 0x77d   :  { %v5693_v45 = vadd.s32 1, %v16809_v24  ;;  %v5743_v51 = vshrl.u32 %v5742_v37, 23  ;;  %vm5692_vm2 = vc.u32 %v16814_v13, %v16808_v7  ;;  %v5746_v56 = vand.u32 8388607, %v5739_v23 }
 0x77e   :  { %10254 = vcosq.f32 %v5411_v63  ;;  %v3420_v4 = vsel %vm18897_vm0, %v3403_v43, %v3148_v47  ;;  %v9089_v54 = vadd.s32 4294967294, %v5599_v34  ;;  %v5587_v44 = vadd.s32 %v16722_v15, %v16718_v55  ;;  %v3056_v55 = vpop.permute.xlu1 %3055 }
 0x77f   :  { %v5694_v22 = vsel %vm5692_vm2, %v5693_v45, %v16809_v24  ;;  %v9095_v25 = vadd.s32 4294967169, %v5743_v51  ;;  %v4465_v18 = vsel %vm18898_vm5, %v3420_v4, %v4430_v48  ;;  %vm18899_vm15 = vcmask 261120  }
 0x780   :  { %v5695_v11 = vadd.s32 %v5694_v22, %v5690_v19  ;;  %v3370_v39 = vsel %vm18899_vm15, %v3353_v8, %v16726_v2  ;;  %v16850_v42 = vmul.f32 %v16432_v62, %v4465_v18  ;;  %10256 = vcosq.f32 %v5515_v61  ;;  %vm18902_vm1 = vmmov %vm18899_vm15 }
 0x781   :  { %vm9090_vm8 = vcmp.lt.s32.totalorder %v9089_v54, 0  ;;  %v3354_v47 = vsel %vm18900_vm9, %v3337_v12, %v16744_v17  ;;  %v5749_v33 = vadd.s32 1, %v9095_v25  ;;  %10258 = vsinq.f32 %v5515_v61 }
 0x782   :  { %v5602_v60 = vsel %vm9090_vm8, 0, %v9089_v54  ;;  %v5696_v58 = vadd.s32 536870912, %v5695_v11  ;;  %v5747_v6 = vor.u32 8388608, %v5746_v56  ;;  %v5843_v15 = vand.u32 2147483647, %v16850_v42 }
 0x783   :  { %v5603_v0 = vsub.s32 32, %v5602_v60  ;;  %v5607_v36 = vsub.s32 4294967266, %v5602_v60  ;;  %vm5750_vm10 = vcmp.gt.s32.totalorder %v5749_v33, 0  ;;  %10260 = vsinq.f32 %v5411_v63 }
 0x784   :  { %v16855_v2 = vshrl.u32 %v5696_v58, 30  ;;  %v5751_v62 = vsel %vm5750_vm10, %v5749_v33, 0  ;;  %v16858_v1 = vsel %vm18901_vm13, %v3370_v39, %v3054_v38  ;;  %v16861_v17 = vadd.s32 %v16808_v7, %v16814_v13 }
 0x785   :  { %v5608_v52 = vadd.s32 127, %v5607_v36  ;;  %v5753_v24 = vand.u32 31, %v5751_v62  ;;  %v3371_v40 = vsel %vm18902_vm1, %v3354_v47, %v16792_v41  ;;  %v5604_v5 = vshll.u32 %v16794_v53, %v5602_v60 }
 0x786   :  { %v5698_v14 = vshll.u32 %v16855_v2, 30  ;;  %v16867_v26 = vshll.u32 %v5747_v6, 8  ;;  %v16870_v37 = vsel %vm18903_vm11, %v3371_v40, %v3056_v55  ;;  %v5605_v63 = vshrl.u32 %v5587_v44, %v5603_v0 }
 0x787   :  { %v5754_v61 = vsub.s32 32, %v5753_v24  ;;  %v5846_v8 = vand.u32 2139095040, %v16850_v42  ;;  %v16875_v7 = vand.u32 8388607, %v5843_v15  ;;  %v5609_v41 = vshll.u32 %v5608_v52, 23 }
 0x788   :  { %v16877_v13 = vpop.eup %10254  ;;  %v16879_v12 = vsub.s32 %v5695_v11, %v5698_v14  ;;  %v5752_v53 = vshrl.u32 %v5751_v62, 5  ;;  %v5756_v43 = vshll.u32 %v18853_v9, %v5753_v24  ;;  %v5759_v34 = vshll.u32 %v18854_v30, %v5753_v24 }
 0x789   :  { %v5757_v48 = vshrl.u32 %v18854_v30, %v5754_v61  ;;  %v5762_v19 = vshll.u32 %v18855_v31, %v5753_v24  ;;  %v5765_v45 = vshll.u32 %v18856_v3, %v5753_v24  ;;  %v5760_v38 = vshrl.u32 %v18855_v31, %v5754_v61 }
 0x78a   :  { %v5701_v51 = vsub.s32 0, %v16879_v12  ;;  %v5763_v56 = vshrl.u32 %v18856_v3, %v5754_v61  ;;  %v5766_v4 = vshrl.u32 %v18857_v49, %v5754_v61  ;;  %v16890_v54 = vpop.eup %10256  ;;  %v5768_v25 = vshll.u32 %v18857_v49, %v5753_v24 }
 0x78b   :  { %v5758_v22 = vor.u32 %v5757_v48, %v5756_v43  ;;  %v5769_v18 = vshrl.u32 %v18858_v20, %v5754_v61  ;;  %vm5422_vm4 = vcmp.eq.s32.totalorder %v16730_v29, 2  ;;  %v5423_v44 = vxor.u32 2147483648, %v16877_v13  ;;  %v16896_v11 = vpop.eup %10258 }
 0x78c   :  { %v9092_v39 = vmin.u32 %v5701_v51, %v16879_v12  ;;  %v5761_v47 = vor.u32 %v5760_v38, %v5759_v34  ;;  %v5764_v33 = vor.u32 %v5763_v56, %v5762_v19  ;;  %v5767_v60 = vor.u32 %v5766_v4, %v5765_v45 }
 0x78d   :  { %vm5419_vm14 = vcmp.eq.s32.totalorder %v16730_v29, 0  ;;  %vm7074_vm6 = vcmp.eq.s32.totalorder %v16658_v35, 0  ;;  %v5606_v58 = vor.u32 %v5605_v63, %v5604_v5  ;;  %v5610_v6 = vor.u32 4788187, %v5609_v41  ;;  %v10261_v55 = vpop.eup %10260 }
 0x78e   :  { %v5770_v0 = vor.u32 %v5769_v18, %v5768_v25  ;;  %vm5418_vm7 = vcmp.lt.s32.totalorder %v16730_v29, 2  ;;  %v5847_v36 = vshrl.u32 %v5846_v8, 23  ;;  %v5703_v62 = vclz %v9092_v39  ;;  %v3104_v25 = vpop.permute.xlu1 %3103  ;;  %v3102_v29 = vpop.permute.xlu0 %3101 }
 0x78f   :  { %v5755_v52 = vshrl.u32 %v18853_v9, %v5754_v61  ;;  %vm5771_vm2 = vcmp.lt.s32.totalorder %v5752_v53, 1  ;;  %vm5774_vm0 = vcmp.lt.s32.totalorder %v5752_v53, 4  ;;  %vm5415_vm5 = vweird.f32 %v16435_v59 }
 0x790   :  { %vm7077_vm15 = vcmp.eq.s32.totalorder %v16658_v35, 2  ;;  %vm5773_vm8 = vcmp.lt.s32.totalorder %v5752_v53, 3  ;;  %v5776_v24 = vsel %vm5774_vm0, %v5764_v33, 2102212464  ;;  %v5779_v40 = vsel %vm5771_vm2, %v5758_v22, %v5761_v47 }
 0x791   :  { %v5780_v14 = vsel %vm5774_vm0, %v5767_v60, 920167782  ;;  %vm7073_vm9 = vcmp.lt.s32.totalorder %v16658_v35, 2  ;;  %v9093_v5 = vadd.s32 4294967294, %v5703_v62  ;;  %vm5772_vm10 = vcmp.lt.s32.totalorder %v5752_v53, 2 }
 0x792   :  { %v5781_v63 = vsel %vm5773_vm8, %v5764_v33, %v5780_v14  ;;  %v5783_v8 = vsel %vm5771_vm2, %v5761_v47, %v5764_v33  ;;  %v5775_v41 = vsel %vm5771_vm2, %v5755_v52, %v5758_v22  ;;  %v5777_v43 = vsel %vm5773_vm8, %v5761_v47, %v5776_v24 }
 0x793   :  { %v5782_v61 = vsel %vm5772_vm10, %v5779_v40, %v5781_v63  ;;  %v5784_v48 = vsel %vm5774_vm0, %v5770_v0, 1326507024  ;;  %vm9094_vm13 = vcmp.lt.s32.totalorder %v9093_v5, 0  ;;  %v5611_v51 = vand.u32 2147483647, %v5610_v6 }
 0x794   :  { %v5785_v34 = vsel %vm5773_vm8, %v5767_v60, %v5784_v48  ;;  %v16908_v19 = vmul.u32.u64.low %v16867_v26, %v5782_v61  ;;  %v16909_v45 = vmul.u32.u64.high %v16867_v26, %v5782_v61, %v16908_v19  ;;  %v5706_v38 = vsel %vm9094_vm13, 0, %v9093_v5 }
 0x795   :  { %v5786_v56 = vsel %vm5772_vm10, %v5783_v8, %v5785_v34  ;;  %v5420_v4 = vxor.u32 2147483648, %v10261_v55  ;;  %v5707_v18 = vsub.s32 32, %v5706_v38  ;;  %v5711_v39 = vsub.s32 4294967266, %v5706_v38 }
 0x796   :  { %v5778_v22 = vsel %vm5772_vm10, %v5775_v41, %v5777_v43  ;;  %v5424_v47 = vsel %vm5422_vm4, %v5423_v44, %v10261_v55  ;;  %v16917_v33 = vmul.u32.u64.low %v16867_v26, %v5786_v56  ;;  %v16918_v60 = vmul.u32.u64.high %v16867_v26, %v5786_v56, %v16917_v33 }
 0x797   :  { %v5421_v6 = vsel %vm5419_vm14, %v16877_v13, %v5420_v4  ;;  %v7076_v0 = vsel %vm7074_vm6, %v16877_v13, %v5420_v4  ;;  %v5613_v62 = vcvt.s32.f32 %v5606_v58  ;;  %v5712_v52 = vadd.s32 127, %v5711_v39 }
 0x798   :  { %v5797_v53 = vadd.s32 1, %v16909_v45  ;;  %v5425_v24 = vsel %vm5418_vm7, %v5421_v6, %v5424_v47  ;;  %v7079_v14 = vsel %vm7077_vm15, %v5423_v44, %v10261_v55  ;;  %v9099_v5 = vadd.s32 4294967169, %v5847_v36 }
 0x799   :  { %v5426_v40 = vsel %vm5415_vm5, nan, %v5425_v24  ;;  %v5851_v63 = vor.u32 8388608, %v16875_v7  ;;  %v16934_v8 = vmul.f32 %v5613_v62, %v5611_v51  ;;  %v5794_v13 = vmul.u32 %v16867_v26, %v5778_v22  ;;  %v3152_v26 = vpop.permute.xlu1 %3151 }
 0x79a   :  { %9590 = vmatprep.mubr.msk.f32.mxu1 %vm7818_vm12, %v5426_v40  ;;  %v7080_v58 = vsel %vm7073_vm9, %v7076_v0, %v7079_v14  ;;  %v5516_v41 = vsel %vm16783_vm3, 0, %v16737_v21  ;;  %v5709_v43 = vshrl.u32 %v16861_v17, %v5707_v18  ;;  %vm5796_vm1 = vc.u32 %v16918_v60, %v16908_v19 }
 0x79b   :  { %v7081_v7 = vsel %vm5415_vm5, nan, %v7080_v58  ;;  %v5853_v44 = vadd.s32 1, %v9099_v5  ;;  %v5713_v36 = vshll.u32 %v5712_v52, 23  ;;  %v5798_v55 = vsel %vm5796_vm1, %v5797_v53, %v16909_v45 }
 0x79c   :  { %9668 = vmatprep.mubr.msk.f32.mxu0 %vm7818_vm12, %v7081_v7  ;;  %vm18904_vm11 = vcmask 277504   ;;  %v5520_v28 = vadd.s32 3, %v5516_v41  ;;  %v5708_v21 = vshll.u32 %v16879_v12, %v5706_v38  ;;  %v5799_v17 = vadd.s32 %v5798_v55, %v5794_v13 }
 0x79d   :  { %v3405_v35 = vsel %vm18904_vm11, %v16870_v37, %v3104_v25  ;;  %vm5854_vm3 = vcmp.gt.s32.totalorder %v5853_v44, 0  ;;  %vm18905_vm4 = vmmov %vm18904_vm11  ;;  %v5615_v59 = vxor.u32 2147483648, %v16934_v8  ;;  %vm18906_vm14 = vcmask 302080  }
 0x79e   :  { %v16955_v61 = vsel %vm18905_vm4, %v16858_v1, %v3102_v29  ;;  %v5855_v48 = vsel %vm5854_vm3, %v5853_v44, 0  ;;  %v16959_v34 = vsel %vm18906_vm14, %v3405_v35, %v3152_v26  ;;  %v16961_v45 = vand.u32 3, %v5520_v28 }
 0x79f   :  { %v16963_v51 = vor.u32 %v5709_v43, %v5708_v21  ;;  %v5800_v37 = vadd.s32 536870912, %v5799_v17  ;;  %v5857_v56 = vand.u32 31, %v5855_v48  ;;  %v16965_v4 = vshll.u32 %v5851_v63, 8 }
 0x7a0   :  { %v16967_v12 = vor.u32 4788187, %v5713_v36  ;;  %v5524_v38 = vxor.u32 2147483648, %v16896_v11  ;;  %v5527_v1 = vxor.u32 2147483648, %v16890_v54  ;;  %v16971_v25 = vand.u32 3, %v5516_v41 }
 0x7a1   :  { %v16973_v18 = vshrl.u32 %v5800_v37, 30  ;;  %v5856_v39 = vshrl.u32 %v5855_v48, 5  ;;  %v5858_v22 = vsub.s32 32, %v5857_v56  ;;  %vm5523_vm6 = vcmp.eq.s32.totalorder %v16961_v45, 0 }
 0x7a2   :  { %v5860_v47 = vshll.u32 %v18853_v9, %v5857_v56  ;;  %v5863_v33 = vshll.u32 %v18854_v30, %v5857_v56  ;;  %v5866_v6 = vshll.u32 %v18855_v31, %v5857_v56  ;;  %v5869_v0 = vshll.u32 %v18856_v3, %v5857_v56 }
 0x7a3   :  { %v5802_v62 = vshll.u32 %v16973_v18, 30  ;;  %v5861_v52 = vshrl.u32 %v18854_v30, %v5858_v22  ;;  %v5864_v53 = vshrl.u32 %v18855_v31, %v5858_v22  ;;  %v5872_v24 = vshll.u32 %v18857_v49, %v5857_v56 }
 0x7a4   :  { %v5859_v40 = vshrl.u32 %v18853_v9, %v5858_v22  ;;  %v5867_v14 = vshrl.u32 %v18856_v3, %v5858_v22  ;;  %v5870_v5 = vshrl.u32 %v18857_v49, %v5858_v22  ;;  %v5873_v63 = vshrl.u32 %v18858_v20, %v5858_v22 }
 0x7a5   :  { %vm5522_vm7 = vcmp.lt.s32.totalorder %v16961_v45, 2  ;;  %v16989_v13 = vsub.s32 %v5799_v17, %v5802_v62  ;;  %v5862_v58 = vor.u32 %v5861_v52, %v5860_v47  ;;  %v5865_v29 = vor.u32 %v5864_v53, %v5863_v33  ;;  %v3150_v33 = vpop.permute.xlu0 %3149  ;;  %v4434_v53 = vpop.permute.xlu1 %4433 }
 0x7a6   :  { %vm5875_vm2 = vcmp.lt.s32.totalorder %v5856_v39, 1  ;;  %vm5519_vm0 = vweird.f32 %v16484_v16  ;;  %v5868_v41 = vor.u32 %v5867_v14, %v5866_v6  ;;  %v5871_v43 = vor.u32 %v5870_v5, %v5869_v0 }
 0x7a7   :  { %v5874_v7 = vor.u32 %v5873_v63, %v5872_v24  ;;  %vm5876_vm5 = vcmp.lt.s32.totalorder %v5856_v39, 2  ;;  %v5805_v44 = vsub.s32 0, %v16989_v13  ;;  %vm5877_vm15 = vcmp.lt.s32.totalorder %v5856_v39, 3 }
 0x7a8   :  { %vm5878_vm8 = vcmp.lt.s32.totalorder %v5856_v39, 4  ;;  %v5879_v26 = vsel %vm5875_vm2, %v5859_v40, %v5862_v58  ;;  %v5883_v55 = vsel %vm5875_vm2, %v5862_v58, %v5865_v29  ;;  %v5887_v28 = vsel %vm5875_vm2, %v5865_v29, %v5868_v41 }
 0x7a9   :  { %v5880_v36 = vsel %vm5878_vm8, %v5868_v41, 2102212464  ;;  %v5884_v35 = vsel %vm5878_vm8, %v5871_v43, 920167782  ;;  %v9096_v21 = vmin.u32 %v5805_v44, %v16989_v13  ;;  %v5888_v37 = vsel %vm5878_vm8, %v5874_v7, 1326507024 }
 0x7aa   :  { %v5881_v17 = vsel %vm5877_vm15, %v5865_v29, %v5880_v36  ;;  %v5885_v48 = vsel %vm5877_vm15, %v5868_v41, %v5884_v35  ;;  %v5889_v22 = vsel %vm5877_vm15, %v5871_v43, %v5888_v37  ;;  %v5525_v47 = vsel %vm5523_vm6, %v16890_v54, %v5524_v38  ;;  %v10413_v7 = vld [vmem:[%s17591_s7] ss:$0 sm:$0xff]  ;;  %v4432_v36 = vpop.permute.xlu0 %4431 }
 0x7ab   :  { %v5886_v56 = vsel %vm5876_vm5, %v5883_v55, %v5885_v48  ;;  %vm5526_vm9 = vcmp.eq.s32.totalorder %v16961_v45, 2  ;;  %v5807_v6 = vclz %v9096_v21  ;;  %v5890_v0 = vsel %vm5876_vm5, %v5887_v28, %v5889_v22 }
 0x7ac   :  { %v17001_v62 = vmul.u32.u64.low %v16965_v4, %v5886_v56  ;;  %v17002_v52 = vmul.u32.u64.high %v16965_v4, %v5886_v56, %v17001_v62  ;;  %v5882_v24 = vsel %vm5876_vm5, %v5879_v26, %v5881_v17  ;;  %v5528_v5 = vsel %vm5526_vm9, %v5527_v1, %v16896_v11 }
 0x7ad   :  { %v17007_v40 = vmul.u32.u64.low %v16965_v4, %v5890_v0  ;;  %v17008_v14 = vmul.u32.u64.high %v16965_v4, %v5890_v0, %v17007_v40  ;;  %v9097_v63 = vadd.s32 4294967294, %v5807_v6  ;;  %v5529_v58 = vsel %vm5522_vm7, %v5525_v47, %v5528_v5 }
 0x7ae   :  { %vm7176_vm10 = vcmp.lt.s32.totalorder %v16971_v25, 2  ;;  %vm7177_vm13 = vcmp.eq.s32.totalorder %v16971_v25, 0  ;;  %v5530_v39 = vsel %vm5519_vm0, nan, %v5529_v58  ;;  %vm7180_vm1 = vcmp.eq.s32.totalorder %v16971_v25, 2 }
 0x7af   :  { %v7179_v29 = vsel %vm7177_vm13, %v16890_v54, %v5524_v38  ;;  %vm18907_vm11 = vcmask 326656   ;;  %vm9098_vm3 = vcmp.lt.s32.totalorder %v9097_v63, 0  ;;  %v5901_v43 = vadd.s32 1, %v17002_v52  ;;  %9591 = vmatmul.mubr.msk.f32.vlgmr.msra.gmra.mrb[16].mxu1 %vm7818_vm12, %v5530_v39 }
 0x7b0   :  { %v4467_v41 = vsel %vm18907_vm11, %v16959_v34, %v4434_v53  ;;  %v7182_v45 = vsel %vm7180_vm1, %v5527_v1, %v16896_v11  ;;  %v5810_v38 = vsel %vm9098_vm3, 0, %v9097_v63  ;;  %v5898_v26 = vmul.u32 %v16965_v4, %v5882_v24  ;;  %vm18908_vm6 = vmmov %vm18907_vm11 }
 0x7b1   :  { %v17031_v44 = vmul.f32 %v10413_v7, %v4467_v41  ;;  %vm5900_vm4 = vc.u32 %v17008_v14, %v17001_v62  ;;  %v7183_v34 = vsel %vm7176_vm10, %v7179_v29, %v7182_v45  ;;  %v5795_v54 = vadd.s32 %v16908_v19, %v16918_v60 }
 0x7b2   :  { %v5811_v11 = vsub.s32 32, %v5810_v38  ;;  %v5815_v1 = vsub.s32 4294967266, %v5810_v38  ;;  %v5902_v55 = vsel %vm5900_vm4, %v5901_v43, %v17002_v52  ;;  %v7184_v28 = vsel %vm5519_vm0, nan, %v7183_v34 }
 0x7b3   :  { %v5903_v35 = vadd.s32 %v5902_v55, %v5898_v26  ;;  %v3421_v4 = vsel %vm18906_vm14, %v16955_v61, %v3150_v33  ;;  %v6051_v21 = vand.u32 2147483647, %v17031_v44  ;;  %v5715_v25 = vand.u32 2147483647, %v16967_v12  ;;  %9669 = vmatmul.mubr.msk.f32.gmra.mrb[24].mxu0 %vm7818_vm12, %v7184_v28 }
 0x7b4   :  { %v5816_v17 = vadd.s32 127, %v5815_v1  ;;  %v6054_v19 = vand.u32 2139095040, %v17031_v44  ;;  %v4466_v60 = vsel %vm18908_vm6, %v3421_v4, %v4432_v36  ;;  %vm5533_vm7 = vcmp.lt.s32.totalorder %v16580_v32, 0 }
 0x7b5   :  { %v5813_v48 = vshrl.u32 %v5795_v54, %v5811_v11  ;;  %v5904_v37 = vadd.s32 536870912, %v5903_v35  ;;  %v17051_v16 = vmul.f32 %v10413_v7, %v4466_v60  ;;  %v5717_v56 = vcvt.s32.f32 %v16963_v51 }
 0x7b6   :  { %v6055_v61 = vshrl.u32 %v6054_v19, 23  ;;  %v6058_v22 = vand.u32 8388607, %v6051_v21  ;;  %v5617_v12 = vsub.s32 4, %v16787_v57  ;;  %v5812_v47 = vshll.u32 %v16989_v13, %v5810_v38 }
 0x7b7   :  { %v5817_v33 = vshll.u32 %v5816_v17, 23  ;;  %v17058_v6 = vshrl.u32 %v5904_v37, 30  ;;  %v5947_v0 = vand.u32 2147483647, %v17051_v16  ;;  %v5616_v52 = vsel %vm5533_vm7, %v5615_v59, %v16934_v8 }
 0x7b8   :  { %v17066_v51 = vmul.f32 %v5717_v56, %v5715_v25  ;;  %v9107_v53 = vadd.s32 4294967169, %v6055_v61  ;;  %v5950_v24 = vand.u32 2139095040, %v17051_v16  ;;  %v17069_v40 = vor.u32 %v5813_v48, %v5812_v47 }
 0x7b9   :  { %v5906_v13 = vshll.u32 %v17058_v6, 30  ;;  %vm5532_vm2 = vcmp.le.f32.partialorder %v5531_v46, 0.7853982  ;;  %v6059_v5 = vor.u32 8388608, %v6058_v22  ;;  %v5618_v39 = vsel %vm5533_vm7, %v5617_v12, %v16787_v57 }
 0x7ba   :  { %v6061_v63 = vadd.s32 1, %v9107_v53  ;;  %v5951_v58 = vshrl.u32 %v5950_v24, 23  ;;  %v17077_v8 = vor.u32 4788187, %v5817_v33  ;;  %v17083_v29 = vand.u32 8388607, %v5947_v0 }
 0x7bb   :  { %v17079_v59 = vsub.s32 %v5903_v35, %v5906_v13  ;;  %v5619_v41 = vsel %vm5532_vm2, %v16580_v32, %v5616_v52  ;;  %v5719_v43 = vxor.u32 2147483648, %v17066_v51  ;;  %v5899_v45 = vadd.s32 %v17001_v62, %v17008_v14 }
 0x7bc   :  { %vm6062_vm0 = vcmp.gt.s32.totalorder %v6061_v63, 0  ;;  %v9103_v46 = vadd.s32 4294967169, %v5951_v58  ;;  %v17090_v38 = vsel %vm5532_vm2, 0, %v5618_v39  ;;  %v5821_v26 = vcvt.s32.f32 %v17069_v40 }
 0x7bd   :  { %v5909_v7 = vsub.s32 0, %v17079_v59  ;;  %v6063_v57 = vsel %vm6062_vm0, %v6061_v63, 0  ;;  %v17093_v36 = vshll.u32 %v6059_v5, 8  ;;  %10262 = vcosq.f32 %v5619_v41 }
 0x7be   :  { %v6065_v34 = vand.u32 31, %v6063_v57  ;;  %v5819_v54 = vand.u32 2147483647, %v17077_v8  ;;  %v5955_v1 = vor.u32 8388608, %v17083_v29  ;;  %10264 = vsinq.f32 %v5619_v41 }
 0x7bf   :  { %v9100_v11 = vmin.u32 %v5909_v7, %v17079_v59  ;;  %v6064_v55 = vshrl.u32 %v6063_v57, 5  ;;  %v5957_v14 = vadd.s32 1, %v9103_v46  ;;  %v17099_v35 = vadd.s32 3, %v17090_v38 }
 0x7c0   :  { %v6066_v62 = vsub.s32 32, %v6065_v34  ;;  %v6068_v4 = vshll.u32 %v18853_v9, %v6065_v34  ;;  %v6071_v25 = vshll.u32 %v18854_v30, %v6065_v34  ;;  %v6074_v17 = vshll.u32 %v18855_v31, %v6065_v34 }
 0x7c1   :  { %v5911_v28 = vclz %v9100_v11  ;;  %v6077_v37 = vshll.u32 %v18856_v3, %v6065_v34  ;;  %v6080_v22 = vshll.u32 %v18857_v49, %v6065_v34  ;;  %vm5637_vm5 = vcmp.lt.s32.totalorder %v16625_v10, 0 }
 0x7c2   :  { %v6069_v19 = vshrl.u32 %v18854_v30, %v6066_v62  ;;  %v6072_v60 = vshrl.u32 %v18855_v31, %v6066_v62  ;;  %v6075_v48 = vshrl.u32 %v18856_v3, %v6066_v62  ;;  %v6078_v61 = vshrl.u32 %v18857_v49, %v6066_v62 }
 0x7c3   :  { %v9101_v56 = vadd.s32 4294967294, %v5911_v28  ;;  %v6081_v12 = vshrl.u32 %v18858_v20, %v6066_v62  ;;  %v6067_v47 = vshrl.u32 %v18853_v9, %v6066_v62  ;;  %vm6083_vm8 = vcmp.lt.s32.totalorder %v6064_v55, 1 }
 0x7c4   :  { %v6070_v33 = vor.u32 %v6069_v19, %v6068_v4  ;;  %v6073_v52 = vor.u32 %v6072_v60, %v6071_v25  ;;  %v6076_v53 = vor.u32 %v6075_v48, %v6074_v17  ;;  %v6079_v24 = vor.u32 %v6078_v61, %v6077_v37 }
 0x7c5   :  { %vm9102_vm15 = vcmp.lt.s32.totalorder %v9101_v56, 0  ;;  %v6082_v13 = vor.u32 %v6081_v12, %v6080_v22  ;;  %vm6085_vm9 = vcmp.lt.s32.totalorder %v6064_v55, 3  ;;  %vm6086_vm10 = vcmp.lt.s32.totalorder %v6064_v55, 4 }
 0x7c6   :  { %v5914_v5 = vsel %vm9102_vm15, 0, %v9101_v56  ;;  %v6087_v63 = vsel %vm6083_vm8, %v6067_v47, %v6070_v33  ;;  %v6088_v8 = vsel %vm6086_vm10, %v6076_v53, 2102212464  ;;  %v6091_v41 = vsel %vm6083_vm8, %v6070_v33, %v6073_v52 }
 0x7c7   :  { %v5915_v58 = vsub.s32 32, %v5914_v5  ;;  %v5919_v39 = vsub.s32 4294967266, %v5914_v5  ;;  %v17113_v46 = vpop.eup %10262  ;;  %v6089_v7 = vsel %vm6085_vm9, %v6073_v52, %v6088_v8  ;;  %v6092_v57 = vsel %vm6086_vm10, %v6079_v24, 920167782  ;;  %v17120_v17 = vpop.f32.mrb[16].mxu0 }
 0x7c8   :  { %v6095_v34 = vsel %vm6083_vm8, %v6073_v52, %v6076_v53  ;;  %v6096_v11 = vsel %vm6086_vm10, %v6082_v13, 1326507024  ;;  %v17116_v62 = vpop.eup %10264  ;;  %v5916_v28 = vshll.u32 %v17079_v59, %v5914_v5  ;;  %vm6084_vm13 = vcmp.lt.s32.totalorder %v6064_v55, 2  ;;  %v17123_v37 = vpop.f32.mrb[17].mxu0 }
 0x7c9   :  { %v5920_v4 = vadd.s32 127, %v5919_v39  ;;  %v6093_v25 = vsel %vm6085_vm9, %v6076_v53, %v6092_v57  ;;  %v5917_v19 = vshrl.u32 %v5899_v45, %v5915_v58  ;;  %v6097_v48 = vsel %vm6085_vm9, %v6079_v24, %v6096_v11 }
 0x7ca   :  { %v6094_v60 = vsel %vm6084_vm13, %v6091_v41, %v6093_v25  ;;  %vm5958_vm1 = vcmp.gt.s32.totalorder %v5957_v14, 0  ;;  %v6090_v61 = vsel %vm6084_vm13, %v6087_v63, %v6089_v7  ;;  %v6098_v22 = vsel %vm6084_vm13, %v6095_v34, %v6097_v48 }
 0x7cb   :  { %v5921_v56 = vshll.u32 %v5920_v4, 23  ;;  %v5959_v12 = vsel %vm5958_vm1, %v5957_v14, 0  ;;  %v17126_v47 = vmul.u32.u64.low %v17093_v36, %v6098_v22  ;;  %v17127_v59 = vmul.u32.u64.high %v17093_v36, %v6098_v22, %v17126_v47  ;;  %v17145_v53 = vpop.f32.mrb[18].mxu0 }
 0x7cc   :  { %v17130_v33 = vmul.u32.u64.low %v17093_v36, %v6094_v60  ;;  %v17131_v52 = vmul.u32.u64.high %v17093_v36, %v6094_v60, %v17130_v33  ;;  %v17139_v45 = vsel %vm5637_vm5, %v5719_v43, %v17066_v51  ;;  %v17143_v55 = vmul.f32 %v5821_v26, %v5819_v54  ;;  %v17157_v51 = vpop.f32.mrb[19].mxu0 }
 0x7cd   :  { %v5961_v14 = vand.u32 31, %v5959_v12  ;;  %v17147_v24 = vor.u32 %v5917_v19, %v5916_v28  ;;  %v6106_v13 = vmul.u32 %v17093_v36, %v6090_v61  ;;  %v17152_v5 = vshll.u32 %v5955_v1, 8 }
 0x7ce   :  { %v17155_v63 = vand.u32 3, %v17090_v38  ;;  %v17159_v43 = vor.u32 4788187, %v5921_v56  ;;  %v5960_v40 = vshrl.u32 %v5959_v12, 5  ;;  %v17162_v54 = vand.u32 3, %v17099_v35 }
 0x7cf   :  { %v5962_v26 = vsub.s32 32, %v5961_v14  ;;  %vm6108_vm11 = vc.u32 %v17127_v59, %v17130_v33  ;;  %v6109_v36 = vadd.s32 1, %v17131_v52  ;;  %v5964_v29 = vshll.u32 %v18853_v9, %v5961_v14  ;;  %v17173_v41 = vpop.f32.mrb[20].mxu0 }
 0x7d0   :  { %v5628_v1 = vxor.u32 2147483648, %v17116_v62  ;;  %v5967_v58 = vshll.u32 %v18854_v30, %v5961_v14  ;;  %v5970_v8 = vshll.u32 %v18855_v31, %v5961_v14  ;;  %v5973_v57 = vshll.u32 %v18856_v3, %v5961_v14  ;;  %v17179_v11 = vpop.f32.mrb[21].mxu0 }
 0x7d1   :  { %v5965_v38 = vshrl.u32 %v18854_v30, %v5962_v26  ;;  %v5968_v39 = vshrl.u32 %v18855_v31, %v5962_v26  ;;  %v6110_v35 = vsel %vm6108_vm11, %v6109_v36, %v17131_v52  ;;  %v5971_v7 = vshrl.u32 %v18856_v3, %v5962_v26 }
 0x7d2   :  { %v5974_v34 = vshrl.u32 %v18857_v49, %v5962_v26  ;;  %v6111_v28 = vadd.s32 %v6110_v35, %v6106_v13  ;;  %v5963_v4 = vshrl.u32 %v18853_v9, %v5962_v26  ;;  %v5976_v31 = vshll.u32 %v18857_v49, %v5961_v14 }
 0x7d3   :  { %v5966_v30 = vor.u32 %v5965_v38, %v5964_v29  ;;  %v5969_v25 = vor.u32 %v5968_v39, %v5967_v58  ;;  %v5972_v19 = vor.u32 %v5971_v7, %v5970_v8  ;;  %v5977_v48 = vshrl.u32 %v18858_v20, %v5962_v26  ;;  %v17185_v61 = vpop.f32.mrb[22].mxu0 }
 0x7d4   :  { %v5975_v60 = vor.u32 %v5974_v34, %v5973_v57  ;;  %v6112_v56 = vadd.s32 536870912, %v6111_v28  ;;  %vm5979_vm3 = vcmp.lt.s32.totalorder %v5960_v40, 1  ;;  %vm5980_vm4 = vcmp.lt.s32.totalorder %v5960_v40, 2  ;;  %v17189_v12 = vpop.f32.mrb[23].mxu0 }
 0x7d5   :  { %v5631_v3 = vxor.u32 2147483648, %v17113_v46  ;;  %v5978_v22 = vor.u32 %v5977_v48, %v5976_v31  ;;  %vm5981_vm14 = vcmp.lt.s32.totalorder %v5960_v40, 3  ;;  %vm5982_vm6 = vcmp.lt.s32.totalorder %v5960_v40, 4 }
 0x7d6   :  { %v5983_v9 = vsel %vm5979_vm3, %v5963_v4, %v5966_v30  ;;  %vm5623_vm7 = vweird.f32 %v16580_v32  ;;  %v17191_v47 = vshrl.u32 %v6112_v56, 30  ;;  %v5984_v49 = vsel %vm5982_vm6, %v5972_v19, 2102212464 }
 0x7d7   :  { %v5987_v20 = vsel %vm5979_vm3, %v5966_v30, %v5969_v25  ;;  %v5988_v52 = vsel %vm5982_vm6, %v5975_v60, 920167782  ;;  %vm7279_vm2 = vcmp.lt.s32.totalorder %v17155_v63, 2  ;;  %vm17197_vm0 = vcmp.le.f32.partialorder %v5635_v50, 0.7853982 }
 0x7d8   :  { %v5985_v13 = vsel %vm5981_vm14, %v5969_v25, %v5984_v49  ;;  %v5989_v26 = vsel %vm5981_vm14, %v5972_v19, %v5988_v52  ;;  %v5991_v36 = vsel %vm5979_vm3, %v5969_v25, %v5972_v19  ;;  %v5992_v29 = vsel %vm5982_vm6, %v5978_v22, 1326507024 }
 0x7d9   :  { %v5923_v38 = vand.u32 2147483647, %v17159_v43  ;;  %v6114_v58 = vshll.u32 %v17191_v47, 30  ;;  %v5990_v39 = vsel %vm5980_vm4, %v5987_v20, %v5989_v26  ;;  %v5993_v8 = vsel %vm5981_vm14, %v5975_v60, %v5992_v29 }
 0x7da   :  { %v5986_v50 = vsel %vm5980_vm4, %v5983_v9, %v5985_v13  ;;  %v5994_v35 = vsel %vm5980_vm4, %v5991_v36, %v5993_v8  ;;  %v17211_v7 = vmul.u32.u64.low %v17152_v5, %v5990_v39  ;;  %v17212_v57 = vmul.u32.u64.high %v17152_v5, %v5990_v39, %v17211_v7 }
 0x7db   :  { %v17215_v34 = vsub.s32 %v6111_v28, %v6114_v58  ;;  %v17218_v4 = vmul.u32.u64.low %v17152_v5, %v5994_v35  ;;  %v17219_v43 = vmul.u32.u64.high %v17152_v5, %v5994_v35, %v17218_v4  ;;  %vm5626_vm15 = vcmp.lt.s32.totalorder %v17162_v54, 2 }
 0x7dc   :  { %vm5627_vm8 = vcmp.eq.s32.totalorder %v17162_v54, 0  ;;  %vm5630_vm9 = vcmp.eq.s32.totalorder %v17162_v54, 2  ;;  %vm7280_vm10 = vcmp.eq.s32.totalorder %v17155_v63, 0  ;;  %vm7283_vm13 = vcmp.eq.s32.totalorder %v17155_v63, 2 }
 0x7dd   :  { %v6117_v40 = vsub.s32 0, %v17215_v34  ;;  %v5629_v30 = vsel %vm5627_vm8, %v17113_v46, %v5628_v1  ;;  %v5632_v28 = vsel %vm5630_vm9, %v5631_v3, %v17116_v62  ;;  %v7282_v25 = vsel %vm7280_vm10, %v17113_v46, %v5628_v1 }
 0x7de   :  { %v6005_v19 = vadd.s32 1, %v17212_v57  ;;  %v5633_v60 = vsel %vm5626_vm15, %v5629_v30, %v5632_v28  ;;  %v7285_v31 = vsel %vm7283_vm13, %v5631_v3, %v17116_v62  ;;  %v5721_v48 = vsub.s32 4, %v16855_v2 }
 0x7df   :  { %v9108_v54 = vmin.u32 %v6117_v40, %v17215_v34  ;;  %v6002_v56 = vmul.u32 %v17152_v5, %v5986_v50  ;;  %vm6004_vm1 = vc.u32 %v17219_v43, %v17211_v7  ;;  %v5634_v22 = vsel %vm5623_vm7, nan, %v5633_v60 }
 0x7e0   :  { %v6006_v9 = vsel %vm6004_vm1, %v6005_v19, %v17212_v57  ;;  %9593 = vmatprep.mubr.msk.f32.mxu1 %vm7818_vm12, %v5634_v22  ;;  %v7286_v46 = vsel %vm7279_vm2, %v7282_v25, %v7285_v31  ;;  %v5722_v62 = vsel %vm5637_vm5, %v5721_v48, %v16855_v2  ;;  %v5723_v5 = vsel %vm17197_vm0, %v16625_v10, %v17139_v45 }
 0x7e1   :  { %v6119_v1 = vclz %v9108_v54  ;;  %v6007_v3 = vadd.s32 %v6006_v9, %v6002_v56  ;;  %v7287_v49 = vsel %vm5623_vm7, nan, %v7286_v46  ;;  %v5823_v20 = vxor.u32 2147483648, %v17143_v55 }
 0x7e2   :  { %v5925_v52 = vcvt.s32.f32 %v17147_v24  ;;  %9671 = vmatprep.mubr.msk.f32.mxu0 %vm7818_vm12, %v7287_v49  ;;  %10266 = vcosq.f32 %v5723_v5  ;;  %v5724_v2 = vsel %vm17197_vm0, 0, %v5722_v62  ;;  %vm5741_vm5 = vcmp.lt.s32.totalorder %v16803_v27, 0 }
 0x7e3   :  { %v9109_v63 = vadd.s32 4294967294, %v6119_v1  ;;  %v6008_v13 = vadd.s32 536870912, %v6007_v3  ;;  %10268 = vsinq.f32 %v5723_v5  ;;  %v5824_v32 = vsel %vm5741_vm5, %v5823_v20, %v17143_v55 }
 0x7e4   :  { %v5926_v26 = vmul.f32 %v5925_v52, %v5923_v38  ;;  %v5728_v36 = vadd.s32 3, %v5724_v2  ;;  %v7381_v29 = vand.u32 3, %v5724_v2  ;;  %v6107_v38 = vadd.s32 %v17130_v33, %v17127_v59 }
 0x7e5   :  { %vm9110_vm11 = vcmp.lt.s32.totalorder %v9109_v63, 0  ;;  %v17258_v45 = vshrl.u32 %v6008_v13, 30  ;;  %vm5740_vm3 = vcmp.le.f32.partialorder %v5739_v23, 0.7853982  ;;  %v5825_v50 = vsub.s32 4, %v16973_v18 }
 0x7e6   :  { %v6122_v24 = vsel %vm9110_vm11, 0, %v9109_v63  ;;  %v5927_v14 = vxor.u32 2147483648, %v5926_v26  ;;  %vm5845_vm4 = vcmp.lt.s32.totalorder %v16850_v42, 0  ;;  %vm5727_vm14 = vweird.f32 %v16625_v10 }
 0x7e7   :  { %v6123_v58 = vsub.s32 32, %v6122_v24  ;;  %v6127_v39 = vsub.s32 4294967266, %v6122_v24  ;;  %v6010_v8 = vshll.u32 %v17258_v45, 30  ;;  %v5827_v57 = vsel %vm5740_vm3, %v16803_v27, %v5824_v32 }
 0x7e8   :  { %v5729_v4 = vand.u32 3, %v5728_v36  ;;  %vm7382_vm6 = vcmp.lt.s32.totalorder %v7381_v29, 2  ;;  %v5826_v59 = vsel %vm5741_vm5, %v5825_v50, %v16973_v18  ;;  %10270 = vcosq.f32 %v5827_v57 }
 0x7e9   :  { %v6128_v35 = vadd.s32 127, %v6127_v39  ;;  %v17270_v55 = vsub.s32 %v6007_v3, %v6010_v8  ;;  %v6125_v33 = vshrl.u32 %v6107_v38, %v6123_v58  ;;  %v5828_v30 = vsel %vm5740_vm3, 0, %v5826_v59 }
 0x7ea   :  { %vm7383_vm7 = vcmp.eq.s32.totalorder %v7381_v29, 0  ;;  %vm7386_vm2 = vcmp.eq.s32.totalorder %v7381_v29, 2  ;;  %10272 = vsinq.f32 %v5827_v57  ;;  %v5832_v25 = vadd.s32 3, %v5828_v30 }
 0x7eb   :  { %v6129_v23 = vshll.u32 %v6128_v35, 23  ;;  %v6013_v40 = vsub.s32 0, %v17270_v55  ;;  %v6124_v60 = vshll.u32 %v17215_v34, %v6122_v24  ;;  %vm5730_vm0 = vcmp.lt.s32.totalorder %v5729_v4, 2 }
 0x7ec   :  { %v10267_v28 = vpop.eup %10266  ;;  %vm5731_vm15 = vcmp.eq.s32.totalorder %v5729_v4, 0  ;;  %vm5734_vm8 = vcmp.eq.s32.totalorder %v5729_v4, 2  ;;  %v5833_v1 = vand.u32 3, %v5832_v25  ;;  %v7484_v3 = vand.u32 3, %v5828_v30  ;;  %v8465_v30 = vld [vmem:[%s17594_s12 + $0x8] sm:$0xff] }
 0x7ed   :  { %v10269_v19 = vpop.eup %10268  ;;  %v6130_v31 = vor.u32 4788187, %v6129_v23  ;;  %v9104_v48 = vmin.u32 %v6013_v40, %v17270_v55  ;;  %v5735_v54 = vxor.u32 2147483648, %v10267_v28  ;;  %v6126_v56 = vor.u32 %v6125_v33, %v6124_v60  ;;  %v8464_v40 = vld [vmem:[%s17594_s12] sm:$0xff]  ;;  %v8466_v60 = vld [vmem:[%s17594_s12 + $0x10] sm:$0xff] }
 0x7ee   :  { %v5732_v18 = vxor.u32 2147483648, %v10269_v19  ;;  %v5928_v63 = vsel %vm5845_vm4, %v5927_v14, %v5926_v26  ;;  %v6003_v24 = vadd.s32 %v17211_v7, %v17219_v43  ;;  %vm5831_vm10 = vweird.f32 %v16803_v27  ;;  %v8469_v27 = vld [vmem:[%s17594_s12 + $0x28] sm:$0xff] }
 0x7ef   :  { %v6015_v22 = vclz %v9104_v48  ;;  %v5736_v9 = vsel %vm5734_vm8, %v5735_v54, %v10269_v19  ;;  %v7388_v46 = vsel %vm7386_vm2, %v5735_v54, %v10269_v19  ;;  %v6131_v49 = vand.u32 2147483647, %v6130_v31  ;;  %v8467_v31 = vld [vmem:[%s17594_s12 + $0x18] sm:$0xff] }
 0x7f0   :  { %v5733_v62 = vsel %vm5731_vm15, %v10267_v28, %v5732_v18  ;;  %v7385_v5 = vsel %vm7383_vm7, %v10267_v28, %v5732_v18  ;;  %v6133_v32 = vcvt.s32.f32 %v6126_v56  ;;  %vm5834_vm13 = vcmp.lt.s32.totalorder %v5833_v1, 2 }
 0x7f1   :  { %v9105_v20 = vadd.s32 4294967294, %v6015_v22  ;;  %v5737_v34 = vsel %vm5730_vm0, %v5733_v62, %v5736_v9  ;;  %v7389_v52 = vsel %vm7382_vm6, %v7385_v5, %v7388_v46  ;;  %vm5835_vm1 = vcmp.eq.s32.totalorder %v5833_v1, 0  ;;  %v8468_v5 = vld [vmem:[%s17594_s12 + $0x20] sm:$0xff] }
 0x7f2   :  { %v5738_v13 = vsel %vm5727_vm14, nan, %v5737_v34  ;;  %v7390_v2 = vsel %vm5727_vm14, nan, %v7389_v52  ;;  %v10271_v36 = vpop.eup %10270  ;;  %vm7485_vm5 = vcmp.lt.s32.totalorder %v7484_v3, 2  ;;  %v6134_v26 = vmul.f32 %v6133_v32, %v6131_v49  ;;  %v8470_v32 = vld [vmem:[%s17594_s12 + $0x30] sm:$0xff] }
 0x7f3   :  { %vm9106_vm9 = vcmp.lt.s32.totalorder %v9105_v20, 0  ;;  %9594 = vmatmul.mubr.msk.f32.gmra.mrb[18].mxu1 %vm7818_vm12, %v5738_v13  ;;  %9672 = vmatmul.mubr.msk.f32.gmra.mrb[26].mxu0 %vm7818_vm12, %v7390_v2  ;;  %vm5838_vm11 = vcmp.eq.s32.totalorder %v5833_v1, 2  ;;  %v5839_v7 = vxor.u32 2147483648, %v10271_v36  ;;  %vm7489_vm3 = vcmp.eq.s32.totalorder %v7484_v3, 2 }
 0x7f4   :  { %v6018_v29 = vsel %vm9106_vm9, 0, %v9105_v20  ;;  %v10273_v39 = vpop.eup %10272  ;;  %vm17296_vm14 = vcmp.le.f32.partialorder %v5843_v15, 0.7853982  ;;  %v5929_v35 = vsub.s32 4, %v17058_v6  ;;  %vm7486_vm6 = vcmp.eq.s32.totalorder %v7484_v3, 0 }
 0x7f5   :  { %v6019_v58 = vsub.s32 32, %v6018_v29  ;;  %v6023_v10 = vsub.s32 4294967266, %v6018_v29  ;;  %v6020_v8 = vshll.u32 %v17270_v55, %v6018_v29  ;;  %v5836_v50 = vxor.u32 2147483648, %v10273_v39 }
 0x7f6   :  { %v5840_v57 = vsel %vm5838_vm11, %v5839_v7, %v10273_v39  ;;  %v7491_v4 = vsel %vm7489_vm3, %v5839_v7, %v10273_v39  ;;  %v5931_v55 = vsel %vm17296_vm14, %v16850_v42, %v5928_v63  ;;  %v5930_v19 = vsel %vm5845_vm4, %v5929_v35, %v17058_v6 }
 0x7f7   :  { %v6021_v14 = vshrl.u32 %v6003_v24, %v6019_v58  ;;  %v6024_v38 = vadd.s32 127, %v6023_v10  ;;  %v5837_v23 = vsel %vm5835_vm1, %v10271_v36, %v5836_v50  ;;  %v7488_v15 = vsel %vm7486_vm6, %v10271_v36, %v5836_v50  ;;  %v8471_v24 = vld [vmem:[%s17594_s12 + $0x38] sm:$0xff] }
 0x7f8   :  { %v5841_v28 = vsel %vm5834_vm13, %v5837_v23, %v5840_v57  ;;  %v7492_v25 = vsel %vm7485_vm5, %v7488_v15, %v7491_v4  ;;  %10274 = vcosq.f32 %v5931_v55  ;;  %v6135_v48 = vxor.u32 2147483648, %v6134_v26  ;;  %v17370_v57 = vld [vmem:[%s17595_s11] ss:$0 sm:$0xff] }
 0x7f9   :  { %v6022_v59 = vor.u32 %v6021_v14, %v6020_v8  ;;  %v6025_v33 = vshll.u32 %v6024_v38, 23  ;;  %v5842_v18 = vsel %vm5831_vm10, nan, %v5841_v28  ;;  %v7493_v56 = vsel %vm5831_vm10, nan, %v7492_v25 }
 0x7fa   :  { %9596 = vmatprep.mubr.msk.f32.mxu1 %vm7818_vm12, %v5842_v18  ;;  %9674 = vmatprep.mubr.msk.f32.mxu0 %vm7818_vm12, %v7493_v56  ;;  %v5932_v6 = vsel %vm17296_vm14, 0, %v5930_v19  ;;  %10276 = vsinq.f32 %v5931_v55  ;;  %v9872_v22 = vpack.c.bf16 %v8465_v30, %v8464_v40  ;;  %v9876_v62 = vpack.c.bf16 %v8467_v31, %v8466_v60 }
 0x7fb   :  { %v6026_v54 = vor.u32 4788187, %v6025_v33  ;;  %v6029_v46 = vcvt.s32.f32 %v6022_v59  ;;  %vm6053_vm4 = vcmp.lt.s32.totalorder %v17031_v44, 0  ;;  %v5936_v1 = vadd.s32 3, %v5932_v6 }
 0x7fc   :  { %9873 = vmatprep.subr.bf16.mxu1 %v9872_v22  ;;  %v6033_v3 = vsub.s32 4, %v17258_v45  ;;  %v6136_v49 = vsel %vm6053_vm4, %v6135_v48, %v6134_v26  ;;  %vm5949_vm7 = vcmp.lt.s32.totalorder %v17051_v16, 0  ;;  %v9880_v34 = vpack.c.bf16 %v8469_v27, %v8468_v5 }
 0x7fd   :  { %v6027_v9 = vand.u32 2147483647, %v6026_v54  ;;  %9875 = vmatpush3.bf16.msra.mxu1 %v9872_v22  ;;  %v7587_v13 = vand.u32 3, %v5932_v6  ;;  %vm17344_vm2 = vcmp.le.f32.partialorder %v6051_v21, 0.7853982  ;;  %v5937_v36 = vand.u32 3, %v5936_v1 }
 0x7fe   :  { %9877 = vmatprep.subr.bf16.mxu1 %v9876_v62  ;;  %v6034_v52 = vsel %vm5949_vm7, %v6033_v3, %v17258_v45  ;;  %vm5948_vm0 = vcmp.le.f32.partialorder %v5947_v0, 0.7853982  ;;  %v6137_v45 = vsub.s32 4, %v17191_v47  ;;  %v6139_v21 = vsel %vm17344_vm2, %v17031_v44, %v6136_v49 }
 0x7ff   :  { %v6030_v20 = vmul.f32 %v6029_v46, %v6027_v9  ;;  %v6036_v26 = vsel %vm5948_vm0, 0, %v6034_v52  ;;  %10278 = vcosq.f32 %v6139_v21  ;;  %v9884_v0 = vpack.c.bf16 %v8471_v24, %v8470_v32 }
 0x800   :  { %v6138_v39 = vsel %vm6053_vm4, %v6137_v45, %v17191_v47  ;;  %10280 = vsinq.f32 %v6139_v21  ;;  %vm7592_vm15 = vcmp.eq.s32.totalorder %v7587_v13, 2  ;;  %vm5942_vm8 = vcmp.eq.s32.totalorder %v5937_v36, 2 }
 0x801   :  { %v6031_v63 = vxor.u32 2147483648, %v6030_v20  ;;  %9879 = vmatpush3.bf16.msra.mxu1 %v9876_v62  ;;  %v6040_v43 = vadd.s32 3, %v6036_v26  ;;  %v6140_v14 = vsel %vm17344_vm2, 0, %v6138_v39  ;;  %vm5935_vm9 = vweird.f32 %v16850_v42 }
 0x802   :  { %v10275_v58 = vpop.eup %10274  ;;  %9881 = vmatprep.subr.bf16.mxu1 %v9880_v34  ;;  %vm5939_vm10 = vcmp.eq.s32.totalorder %v5937_v36, 0  ;;  %vm7588_vm13 = vcmp.lt.s32.totalorder %v7587_v13, 2  ;;  %vm7589_vm1 = vcmp.eq.s32.totalorder %v7587_v13, 0  ;;  %v6144_v47 = vadd.s32 3, %v6140_v14 }
 0x803   :  { %v6032_v29 = vsel %vm5949_vm7, %v6031_v63, %v6030_v20  ;;  %v5943_v8 = vxor.u32 2147483648, %v10275_v58  ;;  %vm5938_vm5 = vcmp.lt.s32.totalorder %v5937_v36, 2  ;;  %v7690_v59 = vand.u32 3, %v6036_v26 }
 0x804   :  { %v6035_v10 = vsel %vm5948_vm0, %v17051_v16, %v6032_v29  ;;  %v10277_v7 = vpop.eup %10276  ;;  %v6041_v15 = vand.u32 3, %v6040_v43  ;;  %v7793_v40 = vand.u32 3, %v6140_v14  ;;  %v6145_v25 = vand.u32 3, %v6144_v47  ;;  %v8694_v43 = vld [vmem:[%s17596_s14 + $0x28] sm:$0xff] }
 0x805   :  { %10282 = vcosq.f32 %v6035_v10  ;;  %v5940_v38 = vxor.u32 2147483648, %v10277_v7  ;;  %v5944_v50 = vsel %vm5942_vm8, %v5943_v8, %v10277_v7  ;;  %v7594_v35 = vsel %vm7592_vm15, %v5943_v8, %v10277_v7  ;;  %9883 = vmatpush3.bf16.msra.mxu1 %v9880_v34  ;;  %v8693_v7 = vld [vmem:[%s17596_s14 + $0x20] sm:$0xff] }
 0x806   :  { %10284 = vsinq.f32 %v6035_v10  ;;  %9885 = vmatprep.subr.bf16.mxu1 %v9884_v0  ;;  %v8432_v19 = vadd.f32 %v17370_v57, %v17123_v37  ;;  %vm6039_vm11 = vweird.f32 %v17051_v16  ;;  %vm7692_vm3 = vcmp.eq.s32.totalorder %v7690_v59, 0 }
 0x807   :  { %v5941_v4 = vsel %vm5939_vm10, %v10275_v58, %v5940_v38  ;;  %v7591_v55 = vsel %vm7589_vm1, %v10275_v58, %v5940_v38  ;;  %vm7695_vm14 = vcmp.eq.s32.totalorder %v7690_v59, 2  ;;  %vm6143_vm6 = vweird.f32 %v17031_v44  ;;  %v8695_v38 = vld [vmem:[%s17596_s14 + $0x30] sm:$0xff] }
 0x808   :  { %v5945_v33 = vsel %vm5938_vm5, %v5941_v4, %v5944_v50  ;;  %v7595_v23 = vsel %vm7588_vm13, %v7591_v55, %v7594_v35  ;;  %vm6043_vm4 = vcmp.eq.s32.totalorder %v6041_v15, 0  ;;  %vm6046_vm7 = vcmp.eq.s32.totalorder %v6041_v15, 2  ;;  %v8696_v50 = vld [vmem:[%s17596_s14 + $0x38] sm:$0xff] }
 0x809   :  { %v5946_v30 = vsel %vm5935_vm9, nan, %v5945_v33  ;;  %v7596_v28 = vsel %vm5935_vm9, nan, %v7595_v23  ;;  %9887 = vmatpush3.bf16.msra.mxu1 %v9884_v0  ;;  %v10279_v60 = vpop.eup %10278  ;;  %vm7794_vm2 = vcmp.lt.s32.totalorder %v7793_v40, 2  ;;  %vm6150_vm0 = vcmp.eq.s32.totalorder %v6145_v25, 2  ;;  %v8692_v0 = vld [vmem:[%s17596_s14 + $0x18] sm:$0xff] }
 0x80a   :  { %9597 = vmatmul.mubr.msk.f32.gmra.mrb[20].mxu1 %vm7818_vm12, %v5946_v30  ;;  %9675 = vmatmul.mubr.msk.f32.gmra.mrb[28].mxu0 %vm7818_vm12, %v7596_v28  ;;  %v10281_v31 = vpop.eup %10280  ;;  %v6151_v42 = vxor.u32 2147483648, %v10279_v60  ;;  %vm7795_vm15 = vcmp.eq.s32.totalorder %v7793_v40, 0  ;;  %vm7798_vm8 = vcmp.eq.s32.totalorder %v7793_v40, 2  ;;  %vm6147_vm9 = vcmp.eq.s32.totalorder %v6145_v25, 0 }
 0x80b   :  { %v6148_v54 = vxor.u32 2147483648, %v10281_v31  ;;  %vm6146_vm10 = vcmp.lt.s32.totalorder %v6145_v25, 2  ;;  %vm6042_vm13 = vcmp.lt.s32.totalorder %v6041_v15, 2  ;;  %vm7691_vm1 = vcmp.lt.s32.totalorder %v7690_v59, 2 }
 0x80c   :  { %v6152_v56 = vsel %vm6150_vm0, %v6151_v42, %v10281_v31  ;;  %v7800_v6 = vsel %vm7798_vm8, %v6151_v42, %v10281_v31  ;;  %v8433_v13 = vadd.f32 %v17120_v17, %v17370_v57  ;;  %vm8479_vm5 = vcmask 523264  }
 0x80d   :  { %v6149_v9 = vsel %vm6147_vm9, %v10279_v60, %v6148_v54  ;;  %v7797_v46 = vsel %vm7795_vm15, %v10279_v60, %v6148_v54  ;;  %v8448_v24 = vmax.f32 %v8432_v19, 0.0  ;;  %v8434_v36 = vadd.f32 %v17370_v57, %v17157_v51 }
 0x80e   :  { %v6153_v27 = vsel %vm6146_vm10, %v6149_v9, %v6152_v56  ;;  %v7801_v1 = vsel %vm7794_vm2, %v7797_v46, %v7800_v6  ;;  %v8449_v44 = vmax.f32 %v8433_v13, 0.0  ;;  %v8435_v16 = vadd.f32 %v17145_v53, %v17370_v57 }
 0x80f   :  { %v10283_v48 = vpop.eup %10282  ;;  %v6154_v52 = vsel %vm6143_vm6, nan, %v6153_v27  ;;  %v7802_v63 = vsel %vm6143_vm6, nan, %v7801_v1  ;;  %v8450_v17 = vmax.f32 %v8434_v36, 0.0  ;;  %v8436_v45 = vadd.f32 %v17370_v57, %v17179_v11 }
 0x810   :  { %v10285_v37 = vpop.eup %10284  ;;  %v6047_v18 = vxor.u32 2147483648, %v10283_v48  ;;  %v8451_v51 = vmax.f32 %v8435_v16, 0.0  ;;  %v8437_v21 = vadd.f32 %v17173_v41, %v17370_v57  ;;  %v8438_v26 = vadd.f32 %v17370_v57, %v17189_v12  ;;  %v8689_v41 = vld [vmem:[%s17596_s14] sm:$0xff]  ;;  %v8690_v12 = vld [vmem:[%s17596_s14 + $0x8] sm:$0xff] }
 0x811   :  { %v6044_v22 = vxor.u32 2147483648, %v10285_v37  ;;  %v8452_v29 = vmax.f32 %v8436_v45, 0.0  ;;  %v8439_v11 = vadd.f32 %v17185_v61, %v17370_v57  ;;  %v9888_v39 = vpack.c.bf16 %v8690_v12, %v8689_v41  ;;  %v8691_v61 = vld [vmem:[%s17596_s14 + $0x10] sm:$0xff] }
 0x812   :  { %v6048_v62 = vsel %vm6046_vm7, %v6047_v18, %v10285_v37  ;;  %v7697_v5 = vsel %vm7695_vm14, %v6047_v18, %v10285_v37  ;;  %v8453_v53 = vmax.f32 %v8437_v21, 0.0  ;;  %v8454_v58 = vmax.f32 %v8438_v26, 0.0 }
 0x813   :  { %v6045_v3 = vsel %vm6043_vm4, %v10283_v48, %v6044_v22  ;;  %v7694_v49 = vsel %vm7692_vm3, %v10283_v48, %v6044_v22  ;;  %v8455_v10 = vmax.f32 %v8439_v11, 0.0  ;;  %9889 = vmatprep.subr.bf16.mxu1 %v9888_v39  ;;  %v9892_v8 = vpack.c.bf16 %v8692_v0, %v8691_v61 }
 0x814   :  { %v6049_v20 = vsel %vm6042_vm13, %v6045_v3, %v6048_v62  ;;  %v7698_v34 = vsel %vm7691_vm1, %v7694_v49, %v7697_v5  ;;  %v9896_v14 = vpack.c.bf16 %v8694_v43, %v8693_v7  ;;  %v9900_v35 = vpack.c.bf16 %v8696_v50, %v8695_v38 }
 0x815   :  { %v6050_v2 = vsel %vm6039_vm11, nan, %v6049_v20  ;;  %v7699_v32 = vsel %vm6039_vm11, nan, %v7698_v34 }
 0x816   :  { %9599 = vmatprep.mubr.msk.f32.mxu1 %vm7818_vm12, %v6050_v2  ;;  %9677 = vmatprep.mubr.msk.f32.mxu0 %vm7818_vm12, %v7699_v32 }
 0x817   :  { %9600 = vmatmul.mubr.msk.f32.gmra.mrb[22].mxu1 %vm7818_vm12, %v6154_v52  ;;  %9678 = vmatmul.mubr.msk.f32.gmra.mrb[30].mxu0 %vm7818_vm12, %v7802_v63  ;;  %vm18915_vm12 = vcmask 23552  }
 0x818   :  { %9696 = vmatprep.mubr.msk.f32.mxu1 %vm8479_vm5, %v8448_v24  ;;  %v17461_v24 = vld [vmem:[%s17597_s13] ss:$0 sm:$0xff]  ;;  %vm18916_vm11 = vmmov %vm18915_vm12 }
 0x819   :  { %vm18917_vm3 = vmmov %vm18916_vm11 }
 0x81a   :  { %vm18918_vm14 = vmmov %vm18917_vm3 }
 0x81b   :  { %9697 = vmatmul.mubr.msk.f32.vlgmr.msra.gmra.mrb[24].mxu1 %vm8479_vm5, %v8449_v44  ;;  %vm18919_vm6 = vmmov %vm18917_vm3 }
 0x81c   :  { %9699 = vmatprep.mubr.msk.f32.mxu1 %vm8479_vm5, %v8450_v17  ;;  %9891 = vmatpush3.bf16.msra.mxu1 %v9888_v39  ;;  %vm18920_vm4 = vmmov %vm18917_vm3 }
 0x81d   :  { %9893 = vmatprep.subr.bf16.mxu1 %v9892_v8  ;;  %vm18921_vm7 = vmmov %vm18917_vm3 }
 0x81e   :  { %vm18922_vm2 = vmmov %vm18917_vm3 }
 0x81f   :  { %9700 = vmatmul.mubr.msk.f32.gmra.mrb[26].mxu1 %vm8479_vm5, %v8451_v51  ;;  %vm18923_vm0 = vmmov %vm18922_vm2 }
 0x820   :  { %9702 = vmatprep.mubr.msk.f32.mxu1 %vm8479_vm5, %v8452_v29  ;;  %9895 = vmatpush3.bf16.msra.mxu1 %v9892_v8  ;;  %vm18924_vm15 = vmmov %vm18923_vm0 }
 0x821   :  { %9897 = vmatprep.subr.bf16.mxu1 %v9896_v14  ;;  %vm18925_vm8 = vmmov %vm18923_vm0 }
 0x822   :  { %vm18926_vm9 = vmmov %vm18923_vm0 }
 0x823   :  { %9703 = vmatmul.mubr.msk.f32.gmra.mrb[28].mxu1 %vm8479_vm5, %v8453_v53  ;;  %vm18927_vm10 = vmmov %vm18923_vm0 }
 0x824   :  { %9705 = vmatprep.mubr.msk.f32.mxu1 %vm8479_vm5, %v8454_v58  ;;  %9899 = vmatpush3.bf16.msra.mxu1 %v9896_v14  ;;  %vm18928_vm13 = vmmov %vm18923_vm0 }
 0x825   :  { %9901 = vmatprep.subr.bf16.mxu1 %v9900_v35  ;;  %vm18929_vm1 = vmmov %vm18923_vm0 }
 0x827   :  { %9706 = vmatmul.mubr.msk.f32.gmra.mrb[30].mxu1 %vm8479_vm5, %v8455_v10 }
 0x828   :  { %9903 = vmatpush3.bf16.msra.mxu1 %v9900_v35 }
 0x882   :  { %v9592_v47 = vpop.f32.mrb[16].mxu1 }
 0x883   :  { %v7973_v4 = vpop.f32.mrb[17].mxu1 }
 0x886   :  { %v9670_v55 = vpop.f32.mrb[24].mxu0 }
 0x887   :  { %v9916_v59 = vadd.f32 %v9670_v55, %v9592_v47  ;;  %v8370_v33 = vpop.f32.mrb[25].mxu0 }
 0x888   :  { %v9917_v23 = vadd.f32 %v8370_v33, %v7973_v4 }
 0x889   :  { %v8441_v15 = vadd.f32 %v9916_v59, %v17370_v57 }
 0x88a   :  { %v8440_v40 = vadd.f32 %v9917_v23, %v17370_v57 }
 0x88b   :  { %v8457_v28 = vmax.f32 %v8441_v15, 0.0 }
 0x88c   :  { %v8456_v30 = vmax.f32 %v8440_v40, 0.0 }
 0x88e   :  { %9708 = vmatprep.mubr.msk.f32.mxu1 %vm8479_vm5, %v8456_v30 }
 0x88f   :  { %9709 = vmatmul.mubr.msk.f32.gmra.mrb[32].mxu1 %vm8479_vm5, %v8457_v28 }
 0x8c6   :  { %v9595_v25 = vpop.f32.mrb[18].mxu1  ;;  %v9673_v19 = vpop.f32.mrb[26].mxu0 }
 0x8c7   :  { %v9918_v60 = vadd.f32 %v9673_v19, %v9595_v25  ;;  %v7983_v31 = vpop.f32.mrb[19].mxu1  ;;  %v8380_v42 = vpop.f32.mrb[27].mxu0 }
 0x8c8   :  { %v9919_v48 = vadd.f32 %v8380_v42, %v7983_v31 }
 0x8c9   :  { %v8443_v54 = vadd.f32 %v9918_v60, %v17370_v57 }
 0x8ca   :  { %v8442_v37 = vadd.f32 %v9919_v48, %v17370_v57 }
 0x8cb   :  { %v8459_v56 = vmax.f32 %v8443_v54, 0.0 }
 0x8cc   :  { %v8458_v18 = vmax.f32 %v8442_v37, 0.0 }
 0x8ce   :  { %9711 = vmatprep.mubr.msk.f32.mxu1 %vm8479_vm5, %v8458_v18 }
 0x8cf   :  { %9712 = vmatmul.mubr.msk.f32.gmra.mrb[34].mxu1 %vm8479_vm5, %v8459_v56 }
 0x8dd   :  { %v9598_v6 = vpop.f32.mrb[20].mxu1  ;;  %v9676_v22 = vpop.f32.mrb[28].mxu0 }
 0x8de   :  { %v9920_v9 = vadd.f32 %v9676_v22, %v9598_v6  ;;  %v7993_v46 = vpop.f32.mrb[21].mxu1  ;;  %v8390_v62 = vpop.f32.mrb[29].mxu0 }
 0x8df   :  { %v9921_v5 = vadd.f32 %v8390_v62, %v7993_v46  ;;  %v17499_v46 = vld [vmem:[%s17598_s15] ss:$0 sm:$0xff] }
 0x8e0   :  { %v8445_v27 = vadd.f32 %v9920_v9, %v17370_v57 }
 0x8e1   :  { %v8444_v1 = vadd.f32 %v9921_v5, %v17370_v57 }
 0x8e2   :  { %v8461_v49 = vmax.f32 %v8445_v27, 0.0 }
 0x8e3   :  { %v8460_v3 = vmax.f32 %v8444_v1, 0.0 }
 0x8e5   :  { %9714 = vmatprep.mubr.msk.f32.mxu1 %vm8479_vm5, %v8460_v3 }
 0x8e6   :  { %9715 = vmatmul.mubr.msk.f32.gmra.mrb[36].mxu1 %vm8479_vm5, %v8461_v49 }
 0x8ea   :  { %v9601_v20 = vpop.f32.mrb[22].mxu1  ;;  %v9679_v34 = vpop.f32.mrb[30].mxu0 }
 0x8eb   :  { %v9922_v52 = vadd.f32 %v9679_v34, %v9601_v20  ;;  %v8003_v63 = vpop.f32.mrb[23].mxu1  ;;  %v8400_v13 = vpop.f32.mrb[31].mxu0 }
 0x8ec   :  { %v9923_v2 = vadd.f32 %v8400_v13, %v8003_v63 }
 0x8ed   :  { %v8447_v32 = vadd.f32 %v9922_v52, %v17370_v57 }
 0x8ee   :  { %v8446_v36 = vadd.f32 %v9923_v2, %v17370_v57  ;;  %v9698_v44 = vpop.f32.mrb[24].mxu1 }
 0x8ef   :  { %v8594_v16 = vpop.f32.mrb[25].mxu1  ;;  %v8463_v51 = vmax.f32 %v8447_v32, 0.0  ;;  %v8600_v21 = vadd.f32 %v9698_v44, %v17461_v24 }
 0x8f0   :  { %v8462_v17 = vmax.f32 %v8446_v36, 0.0  ;;  %v8595_v45 = vadd.f32 %v17461_v24, %v8594_v16 }
 0x8f1   :  { %v8674_v57 = vmax.f32 %v8600_v21, 0.0 }
 0x8f2   :  { %v8673_v29 = vmax.f32 %v8595_v45, 0.0  ;;  %v9701_v26 = vpop.f32.mrb[26].mxu1  ;;  %9717 = vmatprep.mubr.msk.f32.mxu1 %vm8479_vm5, %v8462_v17 }
 0x8f3   :  { %v8604_v53 = vpop.f32.mrb[27].mxu1  ;;  %9718 = vmatmul.mubr.msk.f32.gmra.mrb[38].mxu1 %vm8479_vm5, %v8463_v51  ;;  %v8610_v58 = vadd.f32 %v9701_v26, %v17461_v24 }
 0x8f4   :  { %v8605_v11 = vadd.f32 %v17461_v24, %v8604_v53  ;;  %9736 = vmatprep.mubr.msk.f32.mxu1 %vm8479_vm5, %v8673_v29 }
 0x8f5   :  { %v8676_v61 = vmax.f32 %v8610_v58, 0.0 }
 0x8f6   :  { %v8675_v10 = vmax.f32 %v8605_v11, 0.0  ;;  %v9704_v41 = vpop.f32.mrb[28].mxu1 }
 0x8f7   :  { %v8614_v12 = vpop.f32.mrb[29].mxu1  ;;  %9737 = vmatmul.mubr.msk.f32.vlgmr.msra.gmra.mrb[40].mxu1 %vm8479_vm5, %v8674_v57  ;;  %v8620_v0 = vadd.f32 %v9704_v41, %v17461_v24 }
 0x8f8   :  { %v8615_v39 = vadd.f32 %v17461_v24, %v8614_v12  ;;  %9739 = vmatprep.mubr.msk.f32.mxu1 %vm8479_vm5, %v8675_v10 }
 0x8f9   :  { %v8678_v38 = vmax.f32 %v8620_v0, 0.0 }
 0x8fa   :  { %v8677_v8 = vmax.f32 %v8615_v39, 0.0  ;;  %v9707_v7 = vpop.f32.mrb[30].mxu1 }
 0x8fb   :  { %v8624_v43 = vpop.f32.mrb[31].mxu1  ;;  %9740 = vmatmul.mubr.msk.f32.gmra.mrb[42].mxu1 %vm8479_vm5, %v8676_v61  ;;  %v8630_v50 = vadd.f32 %v9707_v7, %v17461_v24 }
 0x8fc   :  { %v8625_v14 = vadd.f32 %v17461_v24, %v8624_v43  ;;  %9742 = vmatprep.mubr.msk.f32.mxu1 %vm8479_vm5, %v8677_v8 }
 0x8fd   :  { %v8680_v47 = vmax.f32 %v8630_v50, 0.0 }
 0x8fe   :  { %v8679_v35 = vmax.f32 %v8625_v14, 0.0 }
 0x8ff   :  { %9743 = vmatmul.mubr.msk.f32.gmra.mrb[44].mxu1 %vm8479_vm5, %v8678_v38 }
 0x900   :  { %9745 = vmatprep.mubr.msk.f32.mxu1 %vm8479_vm5, %v8679_v35 }
 0x903   :  { %9746 = vmatmul.mubr.msk.f32.gmra.mrb[46].mxu1 %vm8479_vm5, %v8680_v47 }
 0x962   :  { %v9710_v4 = vpop.f32.mrb[32].mxu1 }
 0x963   :  { %v8640_v55 = vadd.f32 %v9710_v4, %v17461_v24  ;;  %v8634_v59 = vpop.f32.mrb[33].mxu1 }
 0x964   :  { %v8635_v33 = vadd.f32 %v17461_v24, %v8634_v59 }
 0x965   :  { %v8682_v15 = vmax.f32 %v8640_v55, 0.0 }
 0x966   :  { %v8681_v23 = vmax.f32 %v8635_v33, 0.0 }
 0x968   :  { %9748 = vmatprep.mubr.msk.f32.mxu1 %vm8479_vm5, %v8681_v23 }
 0x969   :  { %9749 = vmatmul.mubr.msk.f32.gmra.mrb[48].mxu1 %vm8479_vm5, %v8682_v15 }
 0x9a2   :  { %v9713_v40 = vpop.f32.mrb[34].mxu1 }
 0x9a3   :  { %v8650_v30 = vadd.f32 %v9713_v40, %v17461_v24  ;;  %v8644_v28 = vpop.f32.mrb[35].mxu1 }
 0x9a4   :  { %v8645_v25 = vadd.f32 %v17461_v24, %v8644_v28 }
 0x9a5   :  { %v8684_v60 = vmax.f32 %v8650_v30, 0.0 }
 0x9a6   :  { %v8683_v19 = vmax.f32 %v8645_v25, 0.0 }
 0x9a8   :  { %9751 = vmatprep.mubr.msk.f32.mxu1 %vm8479_vm5, %v8683_v19 }
 0x9a9   :  { %9752 = vmatmul.mubr.msk.f32.gmra.mrb[50].mxu1 %vm8479_vm5, %v8684_v60 }
 0x9b9   :  { %v9716_v31 = vpop.f32.mrb[36].mxu1 }
 0x9ba   :  { %v8660_v42 = vadd.f32 %v9716_v31, %v17461_v24  ;;  %v8654_v48 = vpop.f32.mrb[37].mxu1 }
 0x9bb   :  { %v8655_v54 = vadd.f32 %v17461_v24, %v8654_v48 }
 0x9bc   :  { %v8686_v18 = vmax.f32 %v8660_v42, 0.0 }
 0x9bd   :  { %v8685_v37 = vmax.f32 %v8655_v54, 0.0 }
 0x9bf   :  { %9754 = vmatprep.mubr.msk.f32.mxu1 %vm8479_vm5, %v8685_v37 }
 0x9c0   :  { %9755 = vmatmul.mubr.msk.f32.gmra.mrb[52].mxu1 %vm8479_vm5, %v8686_v18 }
 0x9c6   :  { %v9719_v56 = vpop.f32.mrb[38].mxu1 }
 0x9c7   :  { %v8670_v6 = vadd.f32 %v9719_v56, %v17461_v24  ;;  %v8664_v22 = vpop.f32.mrb[39].mxu1 }
 0x9c8   :  { %v8665_v9 = vadd.f32 %v17461_v24, %v8664_v22 }
 0x9c9   :  { %v8688_v27 = vmax.f32 %v8670_v6, 0.0 }
 0x9ca   :  { %v8687_v62 = vmax.f32 %v8665_v9, 0.0  ;;  %v9738_v5 = vpop.f32.mrb[40].mxu1 }
 0x9cb   :  { %v8824_v1 = vadd.f32 %v9738_v5, %v17499_v46  ;;  %v8818_v3 = vpop.f32.mrb[41].mxu1 }
 0x9cc   :  { %v8819_v49 = vadd.f32 %v17499_v46, %v8818_v3  ;;  %9757 = vmatprep.mubr.msk.f32.mxu1 %vm8479_vm5, %v8687_v62 }
 0x9cd   :  { %v8898_v20 = vsub.f32 0.0, %v8824_v1  ;;  %9758 = vmatmul.mubr.msk.f32.gmra.mrb[54].mxu1 %vm8479_vm5, %v8688_v27  ;;  %vm18930_vm5 = vmmov %vm18923_vm0 }
 0x9ce   :  { %v8897_v34 = vsub.f32 0.0, %v8819_v49  ;;  %v9741_v52 = vpop.f32.mrb[42].mxu1 }
 0x9cf   :  { %v8915_v63 = vmul.f32 1.442695, %v8898_v20  ;;  %v8834_v13 = vadd.f32 %v9741_v52, %v17499_v46  ;;  %v8828_v2 = vpop.f32.mrb[43].mxu1 }
 0x9d0   :  { %v8913_v32 = vmul.f32 1.442695, %v8897_v34  ;;  %v8829_v24 = vadd.f32 %v17499_v46, %v8828_v2 }
 0x9d1   :  { %10286 = vpow2.f32 %v8915_v63  ;;  %v8900_v36 = vsub.f32 0.0, %v8834_v13 }
 0x9d2   :  { %10288 = vpow2.f32 %v8913_v32  ;;  %v8899_v44 = vsub.f32 0.0, %v8829_v24  ;;  %v9744_v16 = vpop.f32.mrb[44].mxu1 }
 0x9d3   :  { %v8919_v17 = vmul.f32 1.442695, %v8900_v36  ;;  %v8844_v45 = vadd.f32 %v9744_v16, %v17499_v46  ;;  %v8838_v51 = vpop.f32.mrb[45].mxu1 }
 0x9d4   :  { %v8917_v21 = vmul.f32 1.442695, %v8899_v44  ;;  %v8839_v29 = vadd.f32 %v17499_v46, %v8838_v51 }
 0x9d5   :  { %10290 = vpow2.f32 %v8919_v17  ;;  %v8902_v26 = vsub.f32 0.0, %v8844_v45 }
 0x9d6   :  { %10292 = vpow2.f32 %v8917_v21  ;;  %v8901_v53 = vsub.f32 0.0, %v8839_v29  ;;  %v9747_v11 = vpop.f32.mrb[46].mxu1 }
 0x9d7   :  { %v8923_v57 = vmul.f32 1.442695, %v8902_v26  ;;  %v8854_v58 = vadd.f32 %v9747_v11, %v17499_v46  ;;  %v8848_v10 = vpop.f32.mrb[47].mxu1 }
 0x9d8   :  { %v8921_v41 = vmul.f32 1.442695, %v8901_v53  ;;  %v8849_v12 = vadd.f32 %v17499_v46, %v8848_v10 }
 0x9d9   :  { %10294 = vpow2.f32 %v8923_v57  ;;  %v8904_v39 = vsub.f32 0.0, %v8854_v58 }
 0x9da   :  { %10296 = vpow2.f32 %v8921_v41  ;;  %v8903_v61 = vsub.f32 0.0, %v8849_v12 }
 0x9db   :  { %v10287_v0 = vpop.eup %10286  ;;  %v8927_v8 = vmul.f32 1.442695, %v8904_v39 }
 0x9dc   :  { %v10289_v7 = vpop.eup %10288  ;;  %v8946_v43 = vadd.f32 1.0, %v10287_v0  ;;  %v8925_v14 = vmul.f32 1.442695, %v8903_v61 }
 0x9dd   :  { %v8945_v38 = vadd.f32 1.0, %v10289_v7  ;;  %10298 = vpow2.f32 %v8927_v8 }
 0x9de   :  { %10300 = vrcp.f32 %v8946_v43 }
 0x9df   :  { %v10291_v50 = vpop.eup %10290  ;;  %10302 = vrcp.f32 %v8945_v38 }
 0x9e0   :  { %v10293_v35 = vpop.eup %10292  ;;  %v8948_v47 = vadd.f32 1.0, %v10291_v50  ;;  %10304 = vpow2.f32 %v8925_v14 }
 0x9e1   :  { %v8947_v4 = vadd.f32 1.0, %v10293_v35 }
 0x9e2   :  { %10306 = vrcp.f32 %v8948_v47 }
 0x9e3   :  { %v10295_v55 = vpop.eup %10294  ;;  %10308 = vrcp.f32 %v8947_v4 }
 0x9e4   :  { %v10297_v59 = vpop.eup %10296  ;;  %v8950_v33 = vadd.f32 1.0, %v10295_v55 }
 0x9e5   :  { %v8949_v23 = vadd.f32 1.0, %v10297_v59 }
 0x9e6   :  { %10310 = vrcp.f32 %v8950_v33 }
 0x9e7   :  { %v10299_v15 = vpop.eup %10298  ;;  %10312 = vrcp.f32 %v8949_v23 }
 0x9e8   :  { %v10301_v40 = vpop.eup %10300  ;;  %v8952_v30 = vadd.f32 1.0, %v10299_v15 }
 0x9e9   :  { %v10303_v28 = vpop.eup %10302  ;;  %8994 = vst.msk [vmem:[%s17599_s16 + $0x8] sm:$0xff] %vm18915_vm12, %v10301_v40 }
 0x9ea   :  { %v10305_v25 = vpop.eup %10304  ;;  %8993 = vst.msk [vmem:[%s17599_s16] sm:$0xff] %vm18916_vm11, %v10303_v28  ;;  %10314 = vrcp.f32 %v8952_v30 }
 0x9eb   :  { %v8951_v19 = vadd.f32 1.0, %v10305_v25 }
 0x9ec   :  { %v10307_v60 = vpop.eup %10306 }
 0x9ed   :  { %v10309_v31 = vpop.eup %10308  ;;  %8996 = vst.msk [vmem:[%s17599_s16 + $0x18] sm:$0xff] %vm18917_vm3, %v10307_v60  ;;  %10316 = vrcp.f32 %v8951_v19 }
 0x9ee   :  { %8995 = vst.msk [vmem:[%s17599_s16 + $0x10] sm:$0xff] %vm18918_vm14, %v10309_v31 }
 0x9f0   :  { %v10311_v42 = vpop.eup %10310 }
 0x9f1   :  { %v10313_v48 = vpop.eup %10312  ;;  %8998 = vst.msk [vmem:[%s17599_s16 + $0x28] sm:$0xff] %vm18919_vm6, %v10311_v42 }
 0x9f2   :  { %8997 = vst.msk [vmem:[%s17599_s16 + $0x20] sm:$0xff] %vm18920_vm4, %v10313_v48 }
 0x9f4   :  { %v10315_v54 = vpop.eup %10314 }
 0x9f5   :  { %9000 = vst.msk [vmem:[%s17599_s16 + $0x38] sm:$0xff] %vm18921_vm7, %v10315_v54 }
 0x9f7   :  { %v10317_v37 = vpop.eup %10316 }
 0x9f8   :  { %8999 = vst.msk [vmem:[%s17599_s16 + $0x30] sm:$0xff] %vm18922_vm2, %v10317_v37 }
 0xa3c   :  { %v9750_v18 = vpop.f32.mrb[48].mxu1 }
 0xa3d   :  { %v8864_v56 = vadd.f32 %v9750_v18, %v17499_v46  ;;  %v8858_v6 = vpop.f32.mrb[49].mxu1 }
 0xa3e   :  { %v8859_v22 = vadd.f32 %v17499_v46, %v8858_v6 }
 0xa3f   :  { %v8906_v9 = vsub.f32 0.0, %v8864_v56 }
 0xa40   :  { %v8905_v62 = vsub.f32 0.0, %v8859_v22 }
 0xa41   :  { %v8931_v5 = vmul.f32 1.442695, %v8906_v9 }
 0xa42   :  { %v8929_v27 = vmul.f32 1.442695, %v8905_v62 }
 0xa43   :  { %10318 = vpow2.f32 %v8931_v5 }
 0xa44   :  { %10320 = vpow2.f32 %v8929_v27 }
 0xa4d   :  { %v10319_v1 = vpop.eup %10318 }
 0xa4e   :  { %v10321_v3 = vpop.eup %10320  ;;  %v8954_v49 = vadd.f32 1.0, %v10319_v1 }
 0xa4f   :  { %v8953_v20 = vadd.f32 1.0, %v10321_v3 }
 0xa50   :  { %10322 = vrcp.f32 %v8954_v49 }
 0xa51   :  { %10324 = vrcp.f32 %v8953_v20 }
 0xa5a   :  { %v10323_v34 = vpop.eup %10322 }
 0xa5b   :  { %v10325_v52 = vpop.eup %10324  ;;  %9002 = vst.msk [vmem:[%s17599_s16 + $0x48] sm:$0xff] %vm18923_vm0, %v10323_v34 }
 0xa5c   :  { %9001 = vst.msk [vmem:[%s17599_s16 + $0x40] sm:$0xff] %vm18924_vm15, %v10325_v52 }
 0xa7c   :  { %v9753_v63 = vpop.f32.mrb[50].mxu1 }
 0xa7d   :  { %v8874_v13 = vadd.f32 %v9753_v63, %v17499_v46  ;;  %v8868_v2 = vpop.f32.mrb[51].mxu1 }
 0xa7e   :  { %v8869_v32 = vadd.f32 %v17499_v46, %v8868_v2 }
 0xa7f   :  { %v8908_v24 = vsub.f32 0.0, %v8874_v13 }
 0xa80   :  { %v8907_v36 = vsub.f32 0.0, %v8869_v32 }
 0xa81   :  { %v8935_v44 = vmul.f32 1.442695, %v8908_v24 }
 0xa82   :  { %v8933_v16 = vmul.f32 1.442695, %v8907_v36 }
 0xa83   :  { %10326 = vpow2.f32 %v8935_v44 }
 0xa84   :  { %10328 = vpow2.f32 %v8933_v16 }
 0xa8d   :  { %v10327_v17 = vpop.eup %10326 }
 0xa8e   :  { %v10329_v45 = vpop.eup %10328  ;;  %v8956_v51 = vadd.f32 1.0, %v10327_v17 }
 0xa8f   :  { %v8955_v21 = vadd.f32 1.0, %v10329_v45 }
 0xa90   :  { %10330 = vrcp.f32 %v8956_v51 }
 0xa91   :  { %10332 = vrcp.f32 %v8955_v21 }
 0xa93   :  { %v9756_v29 = vpop.f32.mrb[52].mxu1 }
 0xa94   :  { %v8884_v26 = vadd.f32 %v9756_v29, %v17499_v46  ;;  %v8878_v53 = vpop.f32.mrb[53].mxu1 }
 0xa95   :  { %v8879_v11 = vadd.f32 %v17499_v46, %v8878_v53 }
 0xa96   :  { %v8910_v57 = vsub.f32 0.0, %v8884_v26 }
 0xa97   :  { %v8909_v58 = vsub.f32 0.0, %v8879_v11 }
 0xa98   :  { %v8939_v41 = vmul.f32 1.442695, %v8910_v57 }
 0xa99   :  { %v8937_v39 = vmul.f32 1.442695, %v8909_v58 }
 0xa9a   :  { %v10331_v10 = vpop.eup %10330  ;;  %10334 = vpow2.f32 %v8939_v41 }
 0xa9b   :  { %v10333_v12 = vpop.eup %10332  ;;  %9004 = vst.msk [vmem:[%s17599_s16 + $0x58] sm:$0xff] %vm18925_vm8, %v10331_v10  ;;  %10336 = vpow2.f32 %v8937_v39 }
 0xa9c   :  { %9003 = vst.msk [vmem:[%s17599_s16 + $0x50] sm:$0xff] %vm18926_vm9, %v10333_v12 }
 0xaa0   :  { %v9759_v61 = vpop.f32.mrb[54].mxu1 }
 0xaa1   :  { %v8894_v0 = vadd.f32 %v9759_v61, %v17499_v46  ;;  %v8888_v8 = vpop.f32.mrb[55].mxu1 }
 0xaa2   :  { %v8889_v7 = vadd.f32 %v17499_v46, %v8888_v8 }
 0xaa3   :  { %v8912_v43 = vsub.f32 0.0, %v8894_v0 }
 0xaa4   :  { %v8911_v14 = vsub.f32 0.0, %v8889_v7  ;;  %v10335_v50 = vpop.eup %10334 }
 0xaa5   :  { %v8943_v38 = vmul.f32 1.442695, %v8912_v43  ;;  %v10337_v47 = vpop.eup %10336  ;;  %v8958_v4 = vadd.f32 1.0, %v10335_v50 }
 0xaa6   :  { %v8941_v35 = vmul.f32 1.442695, %v8911_v14  ;;  %v8957_v55 = vadd.f32 1.0, %v10337_v47 }
 0xaa7   :  { %10338 = vpow2.f32 %v8943_v38 }
 0xaa8   :  { %10340 = vpow2.f32 %v8941_v35 }
 0xaa9   :  { %10342 = vrcp.f32 %v8958_v4 }
 0xaaa   :  { %10344 = vrcp.f32 %v8957_v55 }
 0xab1   :  { %v10339_v59 = vpop.eup %10338 }
 0xab2   :  { %v10341_v33 = vpop.eup %10340  ;;  %v8960_v23 = vadd.f32 1.0, %v10339_v59 }
 0xab3   :  { %v10343_v15 = vpop.eup %10342  ;;  %v8959_v40 = vadd.f32 1.0, %v10341_v33 }
 0xab4   :  { %v10345_v30 = vpop.eup %10344  ;;  %9006 = vst.msk [vmem:[%s17599_s16 + $0x68] sm:$0xff] %vm18927_vm10, %v10343_v15  ;;  %10346 = vrcp.f32 %v8960_v23 }
 0xab5   :  { %9005 = vst.msk [vmem:[%s17599_s16 + $0x60] sm:$0xff] %vm18928_vm13, %v10345_v30  ;;  %10348 = vrcp.f32 %v8959_v40 }
 0xabe   :  { %v10347_v46 = vpop.eup %10346 }
 0xabf   :  { %v10349_v28 = vpop.eup %10348  ;;  %9008 = vst.msk [vmem:[%s17599_s16 + $0x78] sm:$0xff] %vm18929_vm1, %v10347_v46 }
 0xac0   :  { %9007 = vst.msk [vmem:[%s17599_s16 + $0x70] sm:$0xff] %vm18930_vm5, %v10349_v28 }

</bundles_post_ra>
